<compile_context>
chip_gen: v7x
topology: tpu7x:2x2x1
jax: 0.10.0
libtpu: 0.0.40
codegen_flags: <defaults>
</compile_context>

<pallas_src>
import functools

import numpy as np
import jax
import jax.numpy as jnp
from jax.experimental import pallas as pl
from jax.experimental.pallas import tpu as pltpu

_RMS_EPS = float(np.finfo(np.float32).eps)   # torch nn.RMSNorm(eps=None) on float32


# ----------------------------- in-kernel helpers (traced inside Pallas bodies) -----------------------------

def _rms(x, w, eps=_RMS_EPS):
    ms = jnp.mean(x * x, axis=-1, keepdims=True)
    return x * jax.lax.rsqrt(ms + eps) * w


def _swiglu(x, w1, b1, w2, b2):
    a = jnp.dot(x, w1, preferred_element_type=jnp.float32) + b1
    g = jnp.dot(x, w2, preferred_element_type=jnp.float32) + b2
    return a * jax.nn.sigmoid(a) * g


def _mha_heads(qp, kp, vp, wo, bo, n_head):
    """Multi-head attention on already-projected 2-D q/k/v (scale folded into Q proj).

    qp: (Lq, E), kp/vp: (Lk, E).  Heads are static lane slices of the E dim; each head's
    output is folded straight into the output projection by slicing Wo rows, so no lane
    concatenation is needed.
    """
    E = qp.shape[-1]
    dh = E // n_head
    out = None
    for h in range(n_head):
        sl = slice(h * dh, (h + 1) * dh)
        s = jax.lax.dot_general(qp[:, sl], kp[:, sl], (((1,), (1,)), ((), ())),
                                preferred_element_type=jnp.float32)            # (Lq, Lk)
        s = s - jnp.max(s, axis=-1, keepdims=True)
        p = jnp.exp(s)
        p = p * pl.reciprocal(jnp.sum(p, axis=-1, keepdims=True), approx=True)
        oh = jnp.dot(p, vp[:, sl], preferred_element_type=jnp.float32)          # (Lq, dh)
        c = jnp.dot(oh, wo[sl, :], preferred_element_type=jnp.float32)          # (Lq, E)
        out = c if out is None else out + c
    return out + bo


# ----------------------------- Pallas kernels -----------------------------

def _linear_kernel(x_ref, w_ref, b_ref, o_ref):
    o_ref[...] = (jnp.dot(x_ref[...], w_ref[...], preferred_element_type=jnp.float32)
                  + b_ref[...])


def _mlp_stem_kernel(x_ref, w1_ref, b1_ref, w2_ref, b2_ref, wo_ref, bo_ref, o_ref):
    """Fused stem: Linear(SwiGLU(x))."""
    h = _swiglu(x_ref[...], w1_ref[...], b1_ref[...], w2_ref[...], b2_ref[...])
    o_ref[...] = jnp.dot(h, wo_ref[...], preferred_element_type=jnp.float32) + bo_ref[...]


def _queries_kernel(x0_ref, x2d_ref,
                    q1w1_ref, q1b1_ref, q1w2_ref, q1b2_ref,
                    q2w1_ref, q2b1_ref, q2w2_ref, q2b2_ref,
                    q1_ref, q2_ref):
    """query_1 (SwiGLU on x_sl[:,0]) and query_2 (SwiGLU on all of x_sl) in one launch."""
    q1_ref[...] = _swiglu(x0_ref[...], q1w1_ref[...], q1b1_ref[...],
                          q1w2_ref[...], q1b2_ref[...])
    q2_ref[...] = _swiglu(x2d_ref[...], q2w1_ref[...], q2b1_ref[...],
                          q2w2_ref[...], q2b2_ref[...])


def _t3d_cross_kernel(x_ref, q_ref,
                      wq_ref, bq_ref, wk_ref, bk_ref, wv_ref, bv_ref, wo_ref, bo_ref,
                      nrm_ref, o_ref, *, n_head):
    """Transformer3D first half: out[b,s] = RMSNorm(x[b,s] + MHA(q[b], x[b,s], x[b,s])).

    Blocks (grid over batch b): x_ref (1, S, P, E), q_ref (1, P, E), o_ref (1, S, P, E).
    The query is projected once and reused across S (torch's repeat_interleave, for free).
    """
    wq, bq = wq_ref[...], bq_ref[...]
    wk, bk = wk_ref[...], bk_ref[...]
    wv, bv = wv_ref[...], bv_ref[...]
    wo, bo = wo_ref[...], bo_ref[...]
    nrm = nrm_ref[...]
    qp = jnp.dot(q_ref[0], wq, preferred_element_type=jnp.float32) + bq        # (P, E)
    for s in range(x_ref.shape[1]):
        x = x_ref[0, s]                                                         # (P, E)
        kp = jnp.dot(x, wk, preferred_element_type=jnp.float32) + bk
        vp = jnp.dot(x, wv, preferred_element_type=jnp.float32) + bv
        attn = _mha_heads(qp, kp, vp, wo, bo, n_head)
        o_ref[0, s] = _rms(x + attn, nrm)


def _tlayer_kernel(q_ref, kv_ref,
                   wq_ref, bq_ref, wk_ref, bk_ref, wv_ref, bv_ref, wo_ref, bo_ref,
                   n1_ref, fw1_ref, fb1_ref, fw2_ref, fb2_ref, fwo_ref, fbo_ref, n2_ref,
                   o_ref, *, n_head):
    """Fused TransformerLayerPost (post-norm, SwiGLU FFN).

    Blocks (grid over batch b): q_ref (1, Lq, E) query/residual shared across the repeat
    axis R, kv_ref (1, R, Lk, E), o_ref (1, R, Lq, E).
        y  = RMSNorm(q + MHA(q, kv[r], kv[r]))
        out[r] = RMSNorm(y + ff_out(SwiGLU(y)))
    """
    wq, bq = wq_ref[...], bq_ref[...]
    wk, bk = wk_ref[...], bk_ref[...]
    wv, bv = wv_ref[...], bv_ref[...]
    wo, bo = wo_ref[...], bo_ref[...]
    n1, n2 = n1_ref[...], n2_ref[...]
    fw1, fb1 = fw1_ref[...], fb1_ref[...]
    fw2, fb2 = fw2_ref[...], fb2_ref[...]
    fwo, fbo = fwo_ref[...], fbo_ref[...]
    q = q_ref[0]                                                                # (Lq, E)
    qp = jnp.dot(q, wq, preferred_element_type=jnp.float32) + bq                # once per b
    for r in range(kv_ref.shape[1]):
        x = kv_ref[0, r]                                                        # (Lk, E)
        kp = jnp.dot(x, wk, preferred_element_type=jnp.float32) + bk
        vp = jnp.dot(x, wv, preferred_element_type=jnp.float32) + bv
        attn = _mha_heads(qp, kp, vp, wo, bo, n_head)                           # (Lq, E)
        y = _rms(q + attn, n1)
        ff = _swiglu(y, fw1, fb1, fw2, fb2)
        ff = jnp.dot(ff, fwo, preferred_element_type=jnp.float32) + fbo
        o_ref[0, r] = _rms(y + ff, n2)


# ----------------------------- pallas_call wrappers -----------------------------

def _wspec(a):
    """Full-array BlockSpec for 2-D weights/biases (resident across the batch grid)."""
    return pl.BlockSpec(a.shape, lambda b: (0, 0))


def pallas_linear(x2d, w, b):
    M, N = x2d.shape[0], w.shape[1]
    return pl.pallas_call(
        _linear_kernel,
        out_shape=jax.ShapeDtypeStruct((M, N), jnp.float32),
    )(x2d, w, b)


def pallas_mlp_stem(x2d, p_sw, p_out):
    M = x2d.shape[0]
    N = p_out["w"].shape[1]
    return pl.pallas_call(
        _mlp_stem_kernel,
        out_shape=jax.ShapeDtypeStruct((M, N), jnp.float32),
    )(x2d, p_sw["w1"]["w"], p_sw["w1"]["b"], p_sw["w2"]["w"], p_sw["w2"]["b"],
      p_out["w"], p_out["b"])


def pallas_queries(x_sl, p_q1, p_q2):
    B, L, E = x_sl.shape
    d1 = p_q1["w1"]["w"].shape[1]
    d2 = p_q2["w1"]["w"].shape[1]
    x0 = x_sl[:, 0]                      # (B, E)
    x2d = x_sl.reshape(B * L, E)
    q1, q2 = pl.pallas_call(
        _queries_kernel,
        out_shape=(jax.ShapeDtypeStruct((B, d1), jnp.float32),
                   jax.ShapeDtypeStruct((B * L, d2), jnp.float32)),
    )(x0, x2d,
      p_q1["w1"]["w"], p_q1["w1"]["b"], p_q1["w2"]["w"], p_q1["w2"]["b"],
      p_q2["w1"]["w"], p_q2["w1"]["b"], p_q2["w2"]["w"], p_q2["w2"]["b"])
    return q1, q2.reshape(B, L, d2)


def pallas_t3d_cross(x_obs, q_1, at, rms_w, n_head):
    B, S, P, E = x_obs.shape
    wargs = (at["wq"], at["bq"], at["wk"], at["bk"], at["wv"], at["bv"],
             at["wo"], at["bo"], rms_w)
    flops = int(2 * B * P * E * E
                + B * S * (4 * P * E * E + 4 * P * P * E + 2 * P * E * E))
    transc = int(B * S * (n_head * P * P + n_head * P + P))
    bytes_acc = int(4 * (2 * x_obs.size + q_1.size + sum(int(a.size) for a in wargs)))
    return pl.pallas_call(
        functools.partial(_t3d_cross_kernel, n_head=n_head),
        out_shape=jax.ShapeDtypeStruct((B, S, P, E), jnp.float32),
        grid=(B,),
        in_specs=[pl.BlockSpec((1, S, P, E), lambda b: (b, 0, 0, 0)),
                  pl.BlockSpec((1, P, E), lambda b: (b, 0, 0))]
                 + [_wspec(a) for a in wargs],
        out_specs=pl.BlockSpec((1, S, P, E), lambda b: (b, 0, 0, 0)),
        compiler_params=pltpu.CompilerParams(dimension_semantics=("parallel",)),
        cost_estimate=pl.CostEstimate(flops=flops, transcendentals=transc,
                                      bytes_accessed=bytes_acc),
    )(x_obs, q_1, *wargs)


def pallas_tlayer(q, kv4, p, n_head):
    """q: (B, Lq, E) query/residual; kv4: (B, R, Lk, E) keys/values -> (B, R, Lq, E)."""
    B, Lq, E = q.shape
    _, R, Lk, _ = kv4.shape
    at = p["atten"]
    d_ff = p["ff_out"]["w"].shape[0]
    wargs = (at["wq"], at["bq"], at["wk"], at["bk"], at["wv"], at["bv"],
             at["wo"], at["bo"], p["norm1"],
             p["ff_swiglu"]["w1"]["w"], p["ff_swiglu"]["w1"]["b"],
             p["ff_swiglu"]["w2"]["w"], p["ff_swiglu"]["w2"]["b"],
             p["ff_out"]["w"], p["ff_out"]["b"], p["norm2"])
    flops = int(2 * B * Lq * E * E
                + B * R * (4 * Lk * E * E + 4 * Lq * Lk * E + 2 * Lq * E * E
                           + 6 * Lq * E * d_ff))
    transc = int(B * R * (n_head * Lq * Lk + n_head * Lq + Lq * d_ff + 2 * Lq))
    bytes_acc = int(4 * (q.size + kv4.size + B * R * Lq * E
                         + sum(int(a.size) for a in wargs)))
    return pl.pallas_call(
        functools.partial(_tlayer_kernel, n_head=n_head),
        out_shape=jax.ShapeDtypeStruct((B, R, Lq, E), jnp.float32),
        grid=(B,),
        in_specs=[pl.BlockSpec((1, Lq, E), lambda b: (b, 0, 0)),
                  pl.BlockSpec((1, R, Lk, E), lambda b: (b, 0, 0, 0))]
                 + [_wspec(a) for a in wargs],
        out_specs=pl.BlockSpec((1, R, Lq, E), lambda b: (b, 0, 0, 0)),
        compiler_params=pltpu.CompilerParams(dimension_semantics=("parallel",)),
        cost_estimate=pl.CostEstimate(flops=flops, transcendentals=transc,
                                      bytes_accessed=bytes_acc),
    )(q, kv4, *wargs)


# ----------------------------- model (thin JAX glue around the fused kernels) -----------------------------

def tlayer_self(p, x, n_head):
    """TransformerLayerPost self-attention: q = k = v = x."""
    return pallas_tlayer(x, x[:, None], p, n_head)[:, 0]


def transformer3d_forward(p, x_in, q_1, q_2, n_head):
    y = pallas_t3d_cross(x_in, q_1, p["atten"], p["rms"], n_head)     # (B, S, P, E)
    y = jnp.transpose(y, (0, 2, 1, 3))                                # (B, P, S, E)  (tiny)
    z = pallas_tlayer(q_2, y, p["transformer"], n_head)               # (B, P, Lq2, E)
    return jnp.transpose(z, (0, 2, 1, 3))                             # (B, Lq2, P, E)


def block_forward(p, x_sl, x_obs, n_head, n_patch, d_model):
    B = x_sl.shape[0]
    q1_flat, q_2 = pallas_queries(x_sl, p["query_1"], p["query_2"])
    q_1 = q1_flat.reshape(B, n_patch, d_model)
    x_obs = transformer3d_forward(p["t_obs"], x_obs, q_1, q_2, n_head)
    x_sl = x_sl + x_obs[:, :, 0]
    x_sl = tlayer_self(p["t_sl_1"], x_sl, n_head)
    x_sl = tlayer_self(p["t_sl_2"], x_sl, n_head)
    return x_sl, x_obs


def backbone_forward(params, embed_obs, embed_sl, cfg):
    # TODO(synk): key_padding_mask branch not implemented (mask=None in this run).
    B = embed_obs.shape[0]
    d_model, d_patch, n_head = cfg["d_model"], cfg["d_patch"], cfg["n_head"]
    n_patch = cfg["d_obs"] // d_patch + 1

    # stem: Linear(SwiGLU(embed_sl)) fused into one kernel, then prepend marker_sl
    Bs, Ls, d_sl = embed_sl.shape
    x_sl = pallas_mlp_stem(embed_sl.reshape(Bs * Ls, d_sl),
                           params["mlp_swiglu"], params["mlp_out"]).reshape(Bs, Ls, d_model)
    x_sl = jnp.concatenate(
        [jnp.broadcast_to(params["marker_sl"], (B, 1, d_model)), x_sl], axis=1)

    # patching: Conv1d(in_ch, d_model, kernel=stride=d_patch) lowered to a patch matmul
    _, No, C, L = embed_obs.shape
    n_p = L // d_patch
    xp = embed_obs.reshape(B * No, C, n_p, d_patch).transpose(0, 2, 1, 3)
    xp = xp.reshape(B * No * n_p, C * d_patch)
    x_obs = pallas_linear(xp, params["patch_w"], params["patch_b"]).reshape(B, No, n_p, d_model)

    # marker rows/cols (tiny one-off tensors; kept as XLA concats deliberately)
    x_obs = jnp.concatenate(
        [jnp.broadcast_to(params["marker_obs"], (B, No, 1, d_model)), x_obs], axis=2)
    x_obs = jnp.concatenate(
        [jnp.broadcast_to(params["marker_obs"], (B, 1, n_p + 1, d_model)), x_obs], axis=1)

    for bp in params["blocks"]:
        x_sl, x_obs = block_forward(bp, x_sl, x_obs, n_head, n_patch, d_model)
    return x_sl


# ----------------------------- deterministic parameter init -----------------------------

def init_linear(key, d_in, d_out):
    k1, k2 = jax.random.split(key)
    return {"w": jax.random.normal(k1, (d_in, d_out), jnp.float32) * (1.0 / np.sqrt(d_in)),
            "b": jax.random.normal(k2, (1, d_out), jnp.float32) * 0.01}


def init_swiglu(key, d_in, d_out):
    k1, k2 = jax.random.split(key)
    return {"w1": init_linear(k1, d_in, d_out), "w2": init_linear(k2, d_in, d_out)}


def init_mha(key, d_model, n_head):
    ks = jax.random.split(key, 4)
    q = init_linear(ks[0], d_model, d_model)
    k = init_linear(ks[1], d_model, d_model)
    v = init_linear(ks[2], d_model, d_model)
    o = init_linear(ks[3], d_model, d_model)
    scale = 1.0 / float(np.sqrt(d_model // n_head))
    # fold 1/sqrt(Dh) into W_q AND b_q (torch scales q before the score matmul)
    return {"wq": q["w"] * scale, "bq": q["b"] * scale,
            "wk": k["w"], "bk": k["b"], "wv": v["w"], "bv": v["b"],
            "wo": o["w"], "bo": o["b"]}


def init_tlayer(key, d_model, d_ff, n_head):
    ks = jax.random.split(key, 3)
    return {"atten": init_mha(ks[0], d_model, n_head),
            "norm1": jnp.ones((1, d_model), jnp.float32),
            "ff_swiglu": init_swiglu(ks[1], d_model, d_ff),
            "ff_out": init_linear(ks[2], d_ff, d_model),
            "norm2": jnp.ones((1, d_model), jnp.float32)}


def init_t3d(key, d_model, d_ff, n_head):
    ks = jax.random.split(key, 2)
    return {"atten": init_mha(ks[0], d_model, n_head),
            "rms": jnp.ones((1, d_model), jnp.float32),
            "transformer": init_tlayer(ks[1], d_model, d_ff, n_head)}


def init_block(key, d_model, d_ff, n_head, n_patch):
    ks = jax.random.split(key, 5)
    return {"t_sl_1": init_tlayer(ks[0], d_model, d_ff, n_head),
            "t_sl_2": init_tlayer(ks[1], d_model, d_ff, n_head),
            "t_obs": init_t3d(ks[2], d_model, d_ff, n_head),
            "query_1": init_swiglu(ks[3], d_model, n_patch * d_model),
            "query_2": init_swiglu(ks[4], d_model, d_model)}


def init_backbone(key, cfg):
    d_model, d_ff, d_sl = cfg["d_model"], cfg["d_ff"], cfg["d_sl"]
    in_ch, d_patch, n_head = cfg["in_channels"], cfg["d_patch"], cfg["n_head"]
    n_patch = cfg["d_obs"] // d_patch + 1
    ks = jax.random.split(key, 5 + cfg["n_block"])
    # Conv1d(in_ch, d_model, kernel=stride=d_patch) stored as a (in_ch*d_patch, d_model) matmul
    patch = init_linear(ks[2], in_ch * d_patch, d_model)
    return {
        "mlp_swiglu": init_swiglu(ks[0], d_sl, d_ff),
        "mlp_out": init_linear(ks[1], d_ff, d_model),
        "patch_w": patch["w"], "patch_b": patch["b"],
        "marker_sl": jax.random.normal(ks[3], (1, 1, d_model), jnp.float32),
        "marker_obs": jax.random.normal(ks[4], (1, 1, 1, d_model), jnp.float32),
        "blocks": [init_block(ks[5 + i], d_model, d_ff, n_head, n_patch)
                   for i in range(cfg["n_block"])],
    }


# ----------------------------- main -----------------------------

if __name__ == "__main__":
    cfg = dict(d_model=32, n_head=4, d_ff=64, ff_type="swiglu", n_block=2,
               d_sl=16, in_channels=3, d_obs=16, d_patch=4)

    key = jax.random.PRNGKey(0)
    kp, ko, ks = jax.random.split(key, 3)
    params = init_backbone(kp, cfg)

    batch, n_obs, seq_sl = 2, 5, 5
    embed_obs = jax.random.normal(ko, (batch, n_obs, cfg["in_channels"], cfg["d_obs"]), jnp.float32)
    embed_sl = jax.random.normal(ks, (batch, seq_sl, cfg["d_sl"]), jnp.float32)

    fwd = jax.jit(lambda eo, es: backbone_forward(params, eo, es, cfg))
    out = jax.block_until_ready(fwd(embed_obs, embed_sl))

    assert out.shape == (batch, seq_sl + 1, cfg["d_model"]), out.shape
    assert bool(jnp.all(jnp.isfinite(out)))
    print("KERNEL_OK")
</pallas_src>

<mosaic_0001>
module attributes {stable_mosaic.version = 11 : i64} {
  func.func @_mlp_stem_kernel(%arg0: memref<10x16xf32, #tpu.memory_space<vmem>>, %arg1: memref<16x64xf32, #tpu.memory_space<vmem>>, %arg2: memref<1x64xf32, #tpu.memory_space<vmem>>, %arg3: memref<16x64xf32, #tpu.memory_space<vmem>>, %arg4: memref<1x64xf32, #tpu.memory_space<vmem>>, %arg5: memref<64x32xf32, #tpu.memory_space<vmem>>, %arg6: memref<1x32xf32, #tpu.memory_space<vmem>>, %arg7: memref<10x32xf32, #tpu.memory_space<vmem>>) attributes {dimension_semantics = [], scalar_prefetch = 0 : i64, scratch_operands = 0 : i64, tpu.core_type = #tpu.core_type<tc>} {
    %c0 = arith.constant 0 : index
    %c0_0 = arith.constant 0 : index
    %0 = vector.load %arg0[%c0, %c0_0] : memref<10x16xf32, #tpu.memory_space<vmem>>, vector<10x16xf32>
    %c0_1 = arith.constant 0 : index
    %c0_2 = arith.constant 0 : index
    %1 = vector.load %arg1[%c0_1, %c0_2] : memref<16x64xf32, #tpu.memory_space<vmem>>, vector<16x64xf32>
    %c0_3 = arith.constant 0 : index
    %c0_4 = arith.constant 0 : index
    %2 = vector.load %arg2[%c0_3, %c0_4] : memref<1x64xf32, #tpu.memory_space<vmem>>, vector<1x64xf32>
    %c0_5 = arith.constant 0 : index
    %c0_6 = arith.constant 0 : index
    %3 = vector.load %arg3[%c0_5, %c0_6] : memref<16x64xf32, #tpu.memory_space<vmem>>, vector<16x64xf32>
    %c0_7 = arith.constant 0 : index
    %c0_8 = arith.constant 0 : index
    %4 = vector.load %arg4[%c0_7, %c0_8] : memref<1x64xf32, #tpu.memory_space<vmem>>, vector<1x64xf32>
    %cst = arith.constant dense<0.000000e+00> : vector<10x64xf32>
    %5 = tpu.matmul %0, %1, %cst {dimension_numbers = #tpu.dot_dimension_numbers<[1], [0], [0], [1], [0, 0, 1, 1], [], []>} : vector<10x16xf32>, vector<16x64xf32>, vector<10x64xf32> -> vector<10x64xf32>
    %6 = vector.broadcast %2 : vector<1x64xf32> to vector<10x64xf32>
    %7 = arith.addf %5, %6 : vector<10x64xf32>
    %cst_9 = arith.constant dense<0.000000e+00> : vector<10x64xf32>
    %8 = tpu.matmul %0, %3, %cst_9 {dimension_numbers = #tpu.dot_dimension_numbers<[1], [0], [0], [1], [0, 0, 1, 1], [], []>} : vector<10x16xf32>, vector<16x64xf32>, vector<10x64xf32> -> vector<10x64xf32>
    %9 = vector.broadcast %4 : vector<1x64xf32> to vector<10x64xf32>
    %10 = arith.addf %8, %9 : vector<10x64xf32>
    %11 = arith.negf %7 : vector<10x64xf32>
    %12 = math.exp %11 : vector<10x64xf32>
    %cst_10 = arith.constant 1.000000e+00 : f32
    %13 = vector.broadcast %cst_10 : f32 to vector<10x64xf32>
    %14 = arith.addf %13, %12 : vector<10x64xf32>
    %15 = arith.divf %13, %14 : vector<10x64xf32>
    %16 = arith.mulf %7, %15 : vector<10x64xf32>
    %17 = arith.mulf %16, %10 : vector<10x64xf32>
    %c0_11 = arith.constant 0 : index
    %c0_12 = arith.constant 0 : index
    %18 = vector.load %arg5[%c0_11, %c0_12] : memref<64x32xf32, #tpu.memory_space<vmem>>, vector<64x32xf32>
    %cst_13 = arith.constant dense<0.000000e+00> : vector<10x32xf32>
    %19 = tpu.matmul %17, %18, %cst_13 {dimension_numbers = #tpu.dot_dimension_numbers<[1], [0], [0], [1], [0, 0, 1, 1], [], []>} : vector<10x64xf32>, vector<64x32xf32>, vector<10x32xf32> -> vector<10x32xf32>
    %c0_14 = arith.constant 0 : index
    %c0_15 = arith.constant 0 : index
    %20 = vector.load %arg6[%c0_14, %c0_15] : memref<1x32xf32, #tpu.memory_space<vmem>>, vector<1x32xf32>
    %21 = vector.broadcast %20 : vector<1x32xf32> to vector<10x32xf32>
    %22 = arith.addf %19, %21 : vector<10x32xf32>
    %c0_16 = arith.constant 0 : index
    %c0_17 = arith.constant 0 : index
    %23 = vector.load %arg7[%c0_16, %c0_17] : memref<10x32xf32, #tpu.memory_space<vmem>>, vector<10x32xf32>
    tpu.vector_store %arg7[%c0_16, %c0_17], %22 {strides = array<i32>} : memref<10x32xf32, #tpu.memory_space<vmem>>, vector<10x32xf32>,
    return
  }
}

module attributes {stable_mosaic.version = 11 : i64} {
  func.func @_queries_kernel(%arg0: memref<2x32xf32, #tpu.memory_space<vmem>>, %arg1: memref<12x32xf32, #tpu.memory_space<vmem>>, %arg2: memref<32x160xf32, #tpu.memory_space<vmem>>, %arg3: memref<1x160xf32, #tpu.memory_space<vmem>>, %arg4: memref<32x160xf32, #tpu.memory_space<vmem>>, %arg5: memref<1x160xf32, #tpu.memory_space<vmem>>, %arg6: memref<32x32xf32, #tpu.memory_space<vmem>>, %arg7: memref<1x32xf32, #tpu.memory_space<vmem>>, %arg8: memref<32x32xf32, #tpu.memory_space<vmem>>, %arg9: memref<1x32xf32, #tpu.memory_space<vmem>>, %arg10: memref<2x160xf32, #tpu.memory_space<vmem>>, %arg11: memref<12x32xf32, #tpu.memory_space<vmem>>) attributes {dimension_semantics = [], scalar_prefetch = 0 : i64, scratch_operands = 0 : i64, tpu.core_type = #tpu.core_type<tc>} {
    %c0 = arith.constant 0 : index
    %c0_0 = arith.constant 0 : index
    %0 = vector.load %arg0[%c0, %c0_0] : memref<2x32xf32, #tpu.memory_space<vmem>>, vector<2x32xf32>
    %c0_1 = arith.constant 0 : index
    %c0_2 = arith.constant 0 : index
    %1 = vector.load %arg2[%c0_1, %c0_2] : memref<32x160xf32, #tpu.memory_space<vmem>>, vector<32x160xf32>
    %c0_3 = arith.constant 0 : index
    %c0_4 = arith.constant 0 : index
    %2 = vector.load %arg3[%c0_3, %c0_4] : memref<1x160xf32, #tpu.memory_space<vmem>>, vector<1x160xf32>
    %c0_5 = arith.constant 0 : index
    %c0_6 = arith.constant 0 : index
    %3 = vector.load %arg4[%c0_5, %c0_6] : memref<32x160xf32, #tpu.memory_space<vmem>>, vector<32x160xf32>
    %c0_7 = arith.constant 0 : index
    %c0_8 = arith.constant 0 : index
    %4 = vector.load %arg5[%c0_7, %c0_8] : memref<1x160xf32, #tpu.memory_space<vmem>>, vector<1x160xf32>
    %cst = arith.constant dense<0.000000e+00> : vector<2x160xf32>
    %5 = tpu.matmul %0, %1, %cst {dimension_numbers = #tpu.dot_dimension_numbers<[1], [0], [0], [1], [0, 0, 1, 1], [], []>} : vector<2x32xf32>, vector<32x160xf32>, vector<2x160xf32> -> vector<2x160xf32>
    %6 = vector.broadcast %2 : vector<1x160xf32> to vector<2x160xf32>
    %7 = arith.addf %5, %6 : vector<2x160xf32>
    %cst_9 = arith.constant dense<0.000000e+00> : vector<2x160xf32>
    %8 = tpu.matmul %0, %3, %cst_9 {dimension_numbers = #tpu.dot_dimension_numbers<[1], [0], [0], [1], [0, 0, 1, 1], [], []>} : vector<2x32xf32>, vector<32x160xf32>, vector<2x160xf32> -> vector<2x160xf32>
    %9 = vector.broadcast %4 : vector<1x160xf32> to vector<2x160xf32>
    %10 = arith.addf %8, %9 : vector<2x160xf32>
    %11 = arith.negf %7 : vector<2x160xf32>
    %12 = math.exp %11 : vector<2x160xf32>
    %cst_10 = arith.constant 1.000000e+00 : f32
    %13 = vector.broadcast %cst_10 : f32 to vector<2x160xf32>
    %14 = arith.addf %13, %12 : vector<2x160xf32>
    %15 = arith.divf %13, %14 : vector<2x160xf32>
    %16 = arith.mulf %7, %15 : vector<2x160xf32>
    %17 = arith.mulf %16, %10 : vector<2x160xf32>
    %c0_11 = arith.constant 0 : index
    %c0_12 = arith.constant 0 : index
    %18 = vector.load %arg10[%c0_11, %c0_12] : memref<2x160xf32, #tpu.memory_space<vmem>>, vector<2x160xf32>
    tpu.vector_store %arg10[%c0_11, %c0_12], %17 {strides = array<i32>} : memref<2x160xf32, #tpu.memory_space<vmem>>, vector<2x160xf32>,
    %c0_13 = arith.constant 0 : index
    %c0_14 = arith.constant 0 : index
    %19 = vector.load %arg1[%c0_13, %c0_14] : memref<12x32xf32, #tpu.memory_space<vmem>>, vector<12x32xf32>
    %c0_15 = arith.constant 0 : index
    %c0_16 = arith.constant 0 : index
    %20 = vector.load %arg6[%c0_15, %c0_16] : memref<32x32xf32, #tpu.memory_space<vmem>>, vector<32x32xf32>
    %c0_17 = arith.constant 0 : index
    %c0_18 = arith.constant 0 : index
    %21 = vector.load %arg7[%c0_17, %c0_18] : memref<1x32xf32, #tpu.memory_space<vmem>>, vector<1x32xf32>
    %c0_19 = arith.constant 0 : index
    %c0_20 = arith.constant 0 : index
    %22 = vector.load %arg8[%c0_19, %c0_20] : memref<32x32xf32, #tpu.memory_space<vmem>>, vector<32x32xf32>
    %c0_21 = arith.constant 0 : index
    %c0_22 = arith.constant 0 : index
    %23 = vector.load %arg9[%c0_21, %c0_22] : memref<1x32xf32, #tpu.memory_space<vmem>>, vector<1x32xf32>
    %cst_23 = arith.constant dense<0.000000e+00> : vector<12x32xf32>
    %24 = tpu.matmul %19, %20, %cst_23 {dimension_numbers = #tpu.dot_dimension_numbers<[1], [0], [0], [1], [0, 0, 1, 1], [], []>} : vector<12x32xf32>, vector<32x32xf32>, vector<12x32xf32> -> vector<12x32xf32>
    %25 = vector.broadcast %21 : vector<1x32xf32> to vector<12x32xf32>
    %26 = arith.addf %24, %25 : vector<12x32xf32>
    %cst_24 = arith.constant dense<0.000000e+00> : vector<12x32xf32>
    %27 = tpu.matmul %19, %22, %cst_24 {dimension_numbers = #tpu.dot_dimension_numbers<[1], [0], [0], [1], [0, 0, 1, 1], [], []>} : vector<12x32xf32>, vector<32x32xf32>, vector<12x32xf32> -> vector<12x32xf32>
    %28 = vector.broadcast %23 : vector<1x32xf32> to vector<12x32xf32>
    %29 = arith.addf %27, %28 : vector<12x32xf32>
    %30 = arith.negf %26 : vector<12x32xf32>
    %31 = math.exp %30 : vector<12x32xf32>
    %cst_25 = arith.constant 1.000000e+00 : f32
    %32 = vector.broadcast %cst_25 : f32 to vector<12x32xf32>
    %33 = arith.addf %32, %31 : vector<12x32xf32>
    %34 = arith.divf %32, %33 : vector<12x32xf32>
    %35 = arith.mulf %26, %34 : vector<12x32xf32>
    %36 = arith.mulf %35, %29 : vector<12x32xf32>
    %c0_26 = arith.constant 0 : index
    %c0_27 = arith.constant 0 : index
    %37 = vector.load %arg11[%c0_26, %c0_27] : memref<12x32xf32, #tpu.memory_space<vmem>>, vector<12x32xf32>
    tpu.vector_store %arg11[%c0_26, %c0_27], %36 {strides = array<i32>} : memref<12x32xf32, #tpu.memory_space<vmem>>, vector<12x32xf32>,
    return
  }
}

module attributes {stable_mosaic.version = 11 : i64} {
  func.func @_linear_kernel(%arg0: memref<40x12xf32, #tpu.memory_space<vmem>>, %arg1: memref<12x32xf32, #tpu.memory_space<vmem>>, %arg2: memref<1x32xf32, #tpu.memory_space<vmem>>, %arg3: memref<40x32xf32, #tpu.memory_space<vmem>>) attributes {dimension_semantics = [], scalar_prefetch = 0 : i64, scratch_operands = 0 : i64, tpu.core_type = #tpu.core_type<tc>} {
    %c0 = arith.constant 0 : index
    %c0_0 = arith.constant 0 : index
    %0 = vector.load %arg0[%c0, %c0_0] : memref<40x12xf32, #tpu.memory_space<vmem>>, vector<40x12xf32>
    %c0_1 = arith.constant 0 : index
    %c0_2 = arith.constant 0 : index
    %1 = vector.load %arg1[%c0_1, %c0_2] : memref<12x32xf32, #tpu.memory_space<vmem>>, vector<12x32xf32>
    %cst = arith.constant dense<0.000000e+00> : vector<40x32xf32>
    %2 = tpu.matmul %0, %1, %cst {dimension_numbers = #tpu.dot_dimension_numbers<[1], [0], [0], [1], [0, 0, 1, 1], [], []>} : vector<40x12xf32>, vector<12x32xf32>, vector<40x32xf32> -> vector<40x32xf32>
    %c0_3 = arith.constant 0 : index
    %c0_4 = arith.constant 0 : index
    %3 = vector.load %arg2[%c0_3, %c0_4] : memref<1x32xf32, #tpu.memory_space<vmem>>, vector<1x32xf32>
    %4 = vector.broadcast %3 : vector<1x32xf32> to vector<40x32xf32>
    %5 = arith.addf %2, %4 : vector<40x32xf32>
    %c0_5 = arith.constant 0 : index
    %c0_6 = arith.constant 0 : index
    %6 = vector.load %arg3[%c0_5, %c0_6] : memref<40x32xf32, #tpu.memory_space<vmem>>, vector<40x32xf32>
    tpu.vector_store %arg3[%c0_5, %c0_6], %5 {strides = array<i32>} : memref<40x32xf32, #tpu.memory_space<vmem>>, vector<40x32xf32>,
    return
  }
}

module attributes {stable_mosaic.version = 11 : i64} {
  func.func @_tlayer_kernel(%arg0: i32, %arg1: memref<1x6x32xf32, #tpu.memory_space<vmem>>, %arg2: memref<1x5x6x32xf32, #tpu.memory_space<vmem>>, %arg3: memref<32x32xf32, #tpu.memory_space<vmem>>, %arg4: memref<1x32xf32, #tpu.memory_space<vmem>>, %arg5: memref<32x32xf32, #tpu.memory_space<vmem>>, %arg6: memref<1x32xf32, #tpu.memory_space<vmem>>, %arg7: memref<32x32xf32, #tpu.memory_space<vmem>>, %arg8: memref<1x32xf32, #tpu.memory_space<vmem>>, %arg9: memref<32x32xf32, #tpu.memory_space<vmem>>, %arg10: memref<1x32xf32, #tpu.memory_space<vmem>>, %arg11: memref<1x32xf32, #tpu.memory_space<vmem>>, %arg12: memref<32x64xf32, #tpu.memory_space<vmem>>, %arg13: memref<1x64xf32, #tpu.memory_space<vmem>>, %arg14: memref<32x64xf32, #tpu.memory_space<vmem>>, %arg15: memref<1x64xf32, #tpu.memory_space<vmem>>, %arg16: memref<64x32xf32, #tpu.memory_space<vmem>>, %arg17: memref<1x32xf32, #tpu.memory_space<vmem>>, %arg18: memref<1x32xf32, #tpu.memory_space<vmem>>, %arg19: memref<1x5x6x32xf32, #tpu.memory_space<vmem>>) attributes {dimension_semantics = [#tpu.dimension_semantics<parallel>], iteration_bounds = array<i64: 2>, scalar_prefetch = 0 : i64, scratch_operands = 0 : i64, tpu.core_type = #tpu.core_type<tc>, window_params = [{transform_indices = @transform_0, window_bounds = array<i64: 1, 6, 32>}, {transform_indices = @transform_1, window_bounds = array<i64: 1, 5, 6, 32>}, {pipeline_mode = #tpu.pipeline_mode<synchronous>, transform_indices = @transform_2, window_bounds = array<i64: 32, 32>}, {pipeline_mode = #tpu.pipeline_mode<synchronous>, transform_indices = @transform_3, window_bounds = array<i64: 1, 32>}, {pipeline_mode = #tpu.pipeline_mode<synchronous>, transform_indices = @transform_4, window_bounds = array<i64: 32, 32>}, {pipeline_mode = #tpu.pipeline_mode<synchronous>, transform_indices = @transform_5, window_bounds = array<i64: 1, 32>}, {pipeline_mode = #tpu.pipeline_mode<synchronous>, transform_indices = @transform_6, window_bounds = array<i64: 32, 32>}, {pipeline_mode = #tpu.pipeline_mode<synchronous>, transform_indices = @transform_7, window_bounds = array<i64: 1, 32>}, {pipeline_mode = #tpu.pipeline_mode<synchronous>, transform_indices = @transform_8, window_bounds = array<i64: 32, 32>}, {pipeline_mode = #tpu.pipeline_mode<synchronous>, transform_indices = @transform_9, window_bounds = array<i64: 1, 32>}, {pipeline_mode = #tpu.pipeline_mode<synchronous>, transform_indices = @transform_10, window_bounds = array<i64: 1, 32>}, {pipeline_mode = #tpu.pipeline_mode<synchronous>, transform_indices = @transform_11, window_bounds = array<i64: 32, 64>}, {pipeline_mode = #tpu.pipeline_mode<synchronous>, transform_indices = @transform_12, window_bounds = array<i64: 1, 64>}, {pipeline_mode = #tpu.pipeline_mode<synchronous>, transform_indices = @transform_13, window_bounds = array<i64: 32, 64>}, {pipeline_mode = #tpu.pipeline_mode<synchronous>, transform_indices = @transform_14, window_bounds = array<i64: 1, 64>}, {pipeline_mode = #tpu.pipeline_mode<synchronous>, transform_indices = @transform_15, window_bounds = array<i64: 64, 32>}, {pipeline_mode = #tpu.pipeline_mode<synchronous>, transform_indices = @transform_16, window_bounds = array<i64: 1, 32>}, {pipeline_mode = #tpu.pipeline_mode<synchronous>, transform_indices = @transform_17, window_bounds = array<i64: 1, 32>}, {transform_indices = @transform_18, window_bounds = array<i64: 1, 5, 6, 32>}]} {
    %c0 = arith.constant 0 : index
    %c0_0 = arith.constant 0 : index
    %0 = vector.load %arg3[%c0, %c0_0] : memref<32x32xf32, #tpu.memory_space<vmem>>, vector<32x32xf32>
    %c0_1 = arith.constant 0 : index
    %c0_2 = arith.constant 0 : index
    %1 = vector.load %arg4[%c0_1, %c0_2] : memref<1x32xf32, #tpu.memory_space<vmem>>, vector<1x32xf32>
    %c0_3 = arith.constant 0 : index
    %c0_4 = arith.constant 0 : index
    %2 = vector.load %arg5[%c0_3, %c0_4] : memref<32x32xf32, #tpu.memory_space<vmem>>, vector<32x32xf32>
    %c0_5 = arith.constant 0 : index
    %c0_6 = arith.constant 0 : index
    %3 = vector.load %arg6[%c0_5, %c0_6] : memref<1x32xf32, #tpu.memory_space<vmem>>, vector<1x32xf32>
    %c0_7 = arith.constant 0 : index
    %c0_8 = arith.constant 0 : index
    %4 = vector.load %arg7[%c0_7, %c0_8] : memref<32x32xf32, #tpu.memory_space<vmem>>, vector<32x32xf32>
    %c0_9 = arith.constant 0 : index
    %c0_10 = arith.constant 0 : index
    %5 = vector.load %arg8[%c0_9, %c0_10] : memref<1x32xf32, #tpu.memory_space<vmem>>, vector<1x32xf32>
    %c0_11 = arith.constant 0 : index
    %c0_12 = arith.constant 0 : index
    %6 = vector.load %arg9[%c0_11, %c0_12] : memref<32x32xf32, #tpu.memory_space<vmem>>, vector<32x32xf32>
    %c0_13 = arith.constant 0 : index
    %c0_14 = arith.constant 0 : index
    %7 = vector.load %arg10[%c0_13, %c0_14] : memref<1x32xf32, #tpu.memory_space<vmem>>, vector<1x32xf32>
    %c0_15 = arith.constant 0 : index
    %c0_16 = arith.constant 0 : index
    %8 = vector.load %arg11[%c0_15, %c0_16] : memref<1x32xf32, #tpu.memory_space<vmem>>, vector<1x32xf32>
    %c0_17 = arith.constant 0 : index
    %c0_18 = arith.constant 0 : index
    %9 = vector.load %arg18[%c0_17, %c0_18] : memref<1x32xf32, #tpu.memory_space<vmem>>, vector<1x32xf32>
    %c0_19 = arith.constant 0 : index
    %c0_20 = arith.constant 0 : index
    %10 = vector.load %arg12[%c0_19, %c0_20] : memref<32x64xf32, #tpu.memory_space<vmem>>, vector<32x64xf32>
    %c0_21 = arith.constant 0 : index
    %c0_22 = arith.constant 0 : index
    %11 = vector.load %arg13[%c0_21, %c0_22] : memref<1x64xf32, #tpu.memory_space<vmem>>, vector<1x64xf32>
    %c0_23 = arith.constant 0 : index
    %c0_24 = arith.constant 0 : index
    %12 = vector.load %arg14[%c0_23, %c0_24] : memref<32x64xf32, #tpu.memory_space<vmem>>, vector<32x64xf32>
    %c0_25 = arith.constant 0 : index
    %c0_26 = arith.constant 0 : index
    %13 = vector.load %arg15[%c0_25, %c0_26] : memref<1x64xf32, #tpu.memory_space<vmem>>, vector<1x64xf32>
    %c0_27 = arith.constant 0 : index
    %c0_28 = arith.constant 0 : index
    %14 = vector.load %arg16[%c0_27, %c0_28] : memref<64x32xf32, #tpu.memory_space<vmem>>, vector<64x32xf32>
    %c0_29 = arith.constant 0 : index
    %c0_30 = arith.constant 0 : index
    %15 = vector.load %arg17[%c0_29, %c0_30] : memref<1x32xf32, #tpu.memory_space<vmem>>, vector<1x32xf32>
    %c0_31 = arith.constant 0 : index
    %c0_32 = arith.constant 0 : index
    %c0_33 = arith.constant 0 : index
    %16 = vector.load %arg1[%c0_31, %c0_32, %c0_33] : memref<1x6x32xf32, #tpu.memory_space<vmem>>, vector<1x6x32xf32>
    %17 = vector.shape_cast %16 : vector<1x6x32xf32> to vector<6x32xf32>
    %cst = arith.constant dense<0.000000e+00> : vector<6x32xf32>
    %18 = tpu.matmul %17, %0, %cst {dimension_numbers = #tpu.dot_dimension_numbers<[1], [0], [0], [1], [0, 0, 1, 1], [], []>} : vector<6x32xf32>, vector<32x32xf32>, vector<6x32xf32> -> vector<6x32xf32>
    %19 = vector.broadcast %1 : vector<1x32xf32> to vector<6x32xf32>
    %20 = arith.addf %18, %19 : vector<6x32xf32>
    %c0_34 = arith.constant 0 : index
    %c0_35 = arith.constant 0 : index
    %c0_36 = arith.constant 0 : index
    %c0_37 = arith.constant 0 : index
    %21 = vector.load %arg2[%c0_34, %c0_35, %c0_36, %c0_37] : memref<1x5x6x32xf32, #tpu.memory_space<vmem>>, vector<1x1x6x32xf32>
    %22 = vector.shape_cast %21 : vector<1x1x6x32xf32> to vector<6x32xf32>
    %cst_38 = arith.constant dense<0.000000e+00> : vector<6x32xf32>
    %23 = tpu.matmul %22, %2, %cst_38 {dimension_numbers = #tpu.dot_dimension_numbers<[1], [0], [0], [1], [0, 0, 1, 1], [], []>} : vector<6x32xf32>, vector<32x32xf32>, vector<6x32xf32> -> vector<6x32xf32>
    %24 = vector.broadcast %3 : vector<1x32xf32> to vector<6x32xf32>
    %25 = arith.addf %23, %24 : vector<6x32xf32>
    %cst_39 = arith.constant dense<0.000000e+00> : vector<6x32xf32>
    %26 = tpu.matmul %22, %4, %cst_39 {dimension_numbers = #tpu.dot_dimension_numbers<[1], [0], [0], [1], [0, 0, 1, 1], [], []>} : vector<6x32xf32>, vector<32x32xf32>, vector<6x32xf32> -> vector<6x32xf32>
    %27 = vector.broadcast %5 : vector<1x32xf32> to vector<6x32xf32>
    %28 = arith.addf %26, %27 : vector<6x32xf32>
    %29 = vector.extract_strided_slice %20 {offsets = [0, 0], sizes = [6, 8], strides = [1, 1]} : vector<6x32xf32> to vector<6x8xf32>
    %30 = vector.extract_strided_slice %25 {offsets = [0, 0], sizes = [6, 8], strides = [1, 1]} : vector<6x32xf32> to vector<6x8xf32>
    %cst_40 = arith.constant dense<0.000000e+00> : vector<6x6xf32>
    %31 = tpu.matmul %29, %30, %cst_40 {dimension_numbers = #tpu.dot_dimension_numbers<[1], [1], [0], [0], [0, 0, 1, 0], [], []>} : vector<6x8xf32>, vector<6x8xf32>, vector<6x6xf32> -> vector<6x6xf32>
    %cst_41 = arith.constant dense<0xFF800000> : vector<6xf32>
    %32 = vector.multi_reduction <maximumf>, %31, %cst_41 [1] : vector<6x6xf32> to vector<6xf32>
    %33 = vector.shape_cast %32 : vector<6xf32> to vector<6x1xf32>
    %34 = vector.broadcast %33 : vector<6x1xf32> to vector<6x6xf32>
    %35 = arith.subf %31, %34 : vector<6x6xf32>
    %36 = math.exp %35 : vector<6x6xf32>
    %cst_42 = arith.constant dense<0.000000e+00> : vector<6xf32>
    %37 = vector.multi_reduction <add>, %36, %cst_42 [1] : vector<6x6xf32> to vector<6xf32>
    %38 = vector.shape_cast %37 : vector<6xf32> to vector<6x1xf32>
    %39 = tpu.reciprocal %38 {approx = true} : vector<6x1xf32> -> vector<6x1xf32>
    %40 = vector.broadcast %39 : vector<6x1xf32> to vector<6x6xf32>
    %41 = arith.mulf %36, %40 : vector<6x6xf32>
    %42 = vector.extract_strided_slice %28 {offsets = [0, 0], sizes = [6, 8], strides = [1, 1]} : vector<6x32xf32> to vector<6x8xf32>
    %cst_43 = arith.constant dense<0.000000e+00> : vector<6x8xf32>
    %43 = tpu.matmul %41, %42, %cst_43 {dimension_numbers = #tpu.dot_dimension_numbers<[1], [0], [0], [1], [0, 0, 1, 1], [], []>} : vector<6x6xf32>, vector<6x8xf32>, vector<6x8xf32> -> vector<6x8xf32>
    %44 = vector.extract_strided_slice %6 {offsets = [0, 0], sizes = [8, 32], strides = [1, 1]} : vector<32x32xf32> to vector<8x32xf32>
    %cst_44 = arith.constant dense<0.000000e+00> : vector<6x32xf32>
    %45 = tpu.matmul %43, %44, %cst_44 {dimension_numbers = #tpu.dot_dimension_numbers<[1], [0], [0], [1], [0, 0, 1, 1], [], []>} : vector<6x8xf32>, vector<8x32xf32>, vector<6x32xf32> -> vector<6x32xf32>
    %46 = vector.extract_strided_slice %20 {offsets = [0, 8], sizes = [6, 8], strides = [1, 1]} : vector<6x32xf32> to vector<6x8xf32>
    %47 = vector.extract_strided_slice %25 {offsets = [0, 8], sizes = [6, 8], strides = [1, 1]} : vector<6x32xf32> to vector<6x8xf32>
    %cst_45 = arith.constant dense<0.000000e+00> : vector<6x6xf32>
    %48 = tpu.matmul %46, %47, %cst_45 {dimension_numbers = #tpu.dot_dimension_numbers<[1], [1], [0], [0], [0, 0, 1, 0], [], []>} : vector<6x8xf32>, vector<6x8xf32>, vector<6x6xf32> -> vector<6x6xf32>
    %cst_46 = arith.constant dense<0xFF800000> : vector<6xf32>
    %49 = vector.multi_reduction <maximumf>, %48, %cst_46 [1] : vector<6x6xf32> to vector<6xf32>
    %50 = vector.shape_cast %49 : vector<6xf32> to vector<6x1xf32>
    %51 = vector.broadcast %50 : vector<6x1xf32> to vector<6x6xf32>
    %52 = arith.subf %48, %51 : vector<6x6xf32>
    %53 = math.exp %52 : vector<6x6xf32>
    %cst_47 = arith.constant dense<0.000000e+00> : vector<6xf32>
    %54 = vector.multi_reduction <add>, %53, %cst_47 [1] : vector<6x6xf32> to vector<6xf32>
    %55 = vector.shape_cast %54 : vector<6xf32> to vector<6x1xf32>
    %56 = tpu.reciprocal %55 {approx = true} : vector<6x1xf32> -> vector<6x1xf32>
    %57 = vector.broadcast %56 : vector<6x1xf32> to vector<6x6xf32>
    %58 = arith.mulf %53, %57 : vector<6x6xf32>
    %59 = vector.extract_strided_slice %28 {offsets = [0, 8], sizes = [6, 8], strides = [1, 1]} : vector<6x32xf32> to vector<6x8xf32>
    %cst_48 = arith.constant dense<0.000000e+00> : vector<6x8xf32>
    %60 = tpu.matmul %58, %59, %cst_48 {dimension_numbers = #tpu.dot_dimension_numbers<[1], [0], [0], [1], [0, 0, 1, 1], [], []>} : vector<6x6xf32>, vector<6x8xf32>, vector<6x8xf32> -> vector<6x8xf32>
    %61 = vector.extract_strided_slice %6 {offsets = [8, 0], sizes = [8, 32], strides = [1, 1]} : vector<32x32xf32> to vector<8x32xf32>
    %cst_49 = arith.constant dense<0.000000e+00> : vector<6x32xf32>
    %62 = tpu.matmul %60, %61, %cst_49 {dimension_numbers = #tpu.dot_dimension_numbers<[1], [0], [0], [1], [0, 0, 1, 1], [], []>} : vector<6x8xf32>, vector<8x32xf32>, vector<6x32xf32> -> vector<6x32xf32>
    %63 = arith.addf %45, %62 : vector<6x32xf32>
    %64 = vector.extract_strided_slice %20 {offsets = [0, 16], sizes = [6, 8], strides = [1, 1]} : vector<6x32xf32> to vector<6x8xf32>
    %65 = vector.extract_strided_slice %25 {offsets = [0, 16], sizes = [6, 8], strides = [1, 1]} : vector<6x32xf32> to vector<6x8xf32>
    %cst_50 = arith.constant dense<0.000000e+00> : vector<6x6xf32>
    %66 = tpu.matmul %64, %65, %cst_50 {dimension_numbers = #tpu.dot_dimension_numbers<[1], [1], [0], [0], [0, 0, 1, 0], [], []>} : vector<6x8xf32>, vector<6x8xf32>, vector<6x6xf32> -> vector<6x6xf32>
    %cst_51 = arith.constant dense<0xFF800000> : vector<6xf32>
    %67 = vector.multi_reduction <maximumf>, %66, %cst_51 [1] : vector<6x6xf32> to vector<6xf32>
    %68 = vector.shape_cast %67 : vector<6xf32> to vector<6x1xf32>
    %69 = vector.broadcast %68 : vector<6x1xf32> to vector<6x6xf32>
    %70 = arith.subf %66, %69 : vector<6x6xf32>
    %71 = math.exp %70 : vector<6x6xf32>
    %cst_52 = arith.constant dense<0.000000e+00> : vector<6xf32>
    %72 = vector.multi_reduction <add>, %71, %cst_52 [1] : vector<6x6xf32> to vector<6xf32>
    %73 = vector.shape_cast %72 : vector<6xf32> to vector<6x1xf32>
    %74 = tpu.reciprocal %73 {approx = true} : vector<6x1xf32> -> vector<6x1xf32>
    %75 = vector.broadcast %74 : vector<6x1xf32> to vector<6x6xf32>
    %76 = arith.mulf %71, %75 : vector<6x6xf32>
    %77 = vector.extract_strided_slice %28 {offsets = [0, 16], sizes = [6, 8], strides = [1, 1]} : vector<6x32xf32> to vector<6x8xf32>
    %cst_53 = arith.constant dense<0.000000e+00> : vector<6x8xf32>
    %78 = tpu.matmul %76, %77, %cst_53 {dimension_numbers = #tpu.dot_dimension_numbers<[1], [0], [0], [1], [0, 0, 1, 1], [], []>} : vector<6x6xf32>, vector<6x8xf32>, vector<6x8xf32> -> vector<6x8xf32>
    %79 = vector.extract_strided_slice %6 {offsets = [16, 0], sizes = [8, 32], strides = [1, 1]} : vector<32x32xf32> to vector<8x32xf32>
    %cst_54 = arith.constant dense<0.000000e+00> : vector<6x32xf32>
    %80 = tpu.matmul %78, %79, %cst_54 {dimension_numbers = #tpu.dot_dimension_numbers<[1], [0], [0], [1], [0, 0, 1, 1], [], []>} : vector<6x8xf32>, vector<8x32xf32>, vector<6x32xf32> -> vector<6x32xf32>
    %81 = arith.addf %63, %80 : vector<6x32xf32>
    %82 = vector.extract_strided_slice %20 {offsets = [0, 24], sizes = [6, 8], strides = [1, 1]} : vector<6x32xf32> to vector<6x8xf32>
    %83 = vector.extract_strided_slice %25 {offsets = [0, 24], sizes = [6, 8], strides = [1, 1]} : vector<6x32xf32> to vector<6x8xf32>
    %cst_55 = arith.constant dense<0.000000e+00> : vector<6x6xf32>
    %84 = tpu.matmul %82, %83, %cst_55 {dimension_numbers = #tpu.dot_dimension_numbers<[1], [1], [0], [0], [0, 0, 1, 0], [], []>} : vector<6x8xf32>, vector<6x8xf32>, vector<6x6xf32> -> vector<6x6xf32>
    %cst_56 = arith.constant dense<0xFF800000> : vector<6xf32>
    %85 = vector.multi_reduction <maximumf>, %84, %cst_56 [1] : vector<6x6xf32> to vector<6xf32>
    %86 = vector.shape_cast %85 : vector<6xf32> to vector<6x1xf32>
    %87 = vector.broadcast %86 : vector<6x1xf32> to vector<6x6xf32>
    %88 = arith.subf %84, %87 : vector<6x6xf32>
    %89 = math.exp %88 : vector<6x6xf32>
    %cst_57 = arith.constant dense<0.000000e+00> : vector<6xf32>
    %90 = vector.multi_reduction <add>, %89, %cst_57 [1] : vector<6x6xf32> to vector<6xf32>
    %91 = vector.shape_cast %90 : vector<6xf32> to vector<6x1xf32>
    %92 = tpu.reciprocal %91 {approx = true} : vector<6x1xf32> -> vector<6x1xf32>
    %93 = vector.broadcast %92 : vector<6x1xf32> to vector<6x6xf32>
    %94 = arith.mulf %89, %93 : vector<6x6xf32>
    %95 = vector.extract_strided_slice %28 {offsets = [0, 24], sizes = [6, 8], strides = [1, 1]} : vector<6x32xf32> to vector<6x8xf32>
    %cst_58 = arith.constant dense<0.000000e+00> : vector<6x8xf32>
    %96 = tpu.matmul %94, %95, %cst_58 {dimension_numbers = #tpu.dot_dimension_numbers<[1], [0], [0], [1], [0, 0, 1, 1], [], []>} : vector<6x6xf32>, vector<6x8xf32>, vector<6x8xf32> -> vector<6x8xf32>
    %97 = vector.extract_strided_slice %6 {offsets = [24, 0], sizes = [8, 32], strides = [1, 1]} : vector<32x32xf32> to vector<8x32xf32>
    %cst_59 = arith.constant dense<0.000000e+00> : vector<6x32xf32>
    %98 = tpu.matmul %96, %97, %cst_59 {dimension_numbers = #tpu.dot_dimension_numbers<[1], [0], [0], [1], [0, 0, 1, 1], [], []>} : vector<6x8xf32>, vector<8x32xf32>, vector<6x32xf32> -> vector<6x32xf32>
    %99 = arith.addf %81, %98 : vector<6x32xf32>
    %100 = vector.broadcast %7 : vector<1x32xf32> to vector<6x32xf32>
    %101 = arith.addf %99, %100 : vector<6x32xf32>
    %102 = arith.addf %17, %101 : vector<6x32xf32>
    %103 = arith.mulf %102, %102 : vector<6x32xf32>
    %cst_60 = arith.constant dense<0.000000e+00> : vector<6xf32>
    %104 = vector.multi_reduction <add>, %103, %cst_60 [1] : vector<6x32xf32> to vector<6xf32>
    %105 = vector.shape_cast %104 : vector<6xf32> to vector<6x1xf32>
    %cst_61 = arith.constant 3.200000e+01 : f32
    %106 = vector.broadcast %cst_61 : f32 to vector<6x1xf32>
    %107 = arith.divf %105, %106 : vector<6x1xf32>
    %cst_62 = arith.constant 1.1920929E-7 : f32
    %108 = vector.broadcast %cst_62 : f32 to vector<6x1xf32>
    %109 = arith.addf %107, %108 : vector<6x1xf32>
    %110 = math.rsqrt %109 : vector<6x1xf32>
    %111 = vector.broadcast %110 : vector<6x1xf32> to vector<6x32xf32>
    %112 = arith.mulf %102, %111 : vector<6x32xf32>
    %113 = vector.broadcast %8 : vector<1x32xf32> to vector<6x32xf32>
    %114 = arith.mulf %112, %113 : vector<6x32xf32>
    %cst_63 = arith.constant dense<0.000000e+00> : vector<6x64xf32>
    %115 = tpu.matmul %114, %10, %cst_63 {dimension_numbers = #tpu.dot_dimension_numbers<[1], [0], [0], [1], [0, 0, 1, 1], [], []>} : vector<6x32xf32>, vector<32x64xf32>, vector<6x64xf32> -> vector<6x64xf32>
    %116 = vector.broadcast %11 : vector<1x64xf32> to vector<6x64xf32>
    %117 = arith.addf %115, %116 : vector<6x64xf32>
    %cst_64 = arith.constant dense<0.000000e+00> : vector<6x64xf32>
    %118 = tpu.matmul %114, %12, %cst_64 {dimension_numbers = #tpu.dot_dimension_numbers<[1], [0], [0], [1], [0, 0, 1, 1], [], []>} : vector<6x32xf32>, vector<32x64xf32>, vector<6x64xf32> -> vector<6x64xf32>
    %119 = vector.broadcast %13 : vector<1x64xf32> to vector<6x64xf32>
    %120 = arith.addf %118, %119 : vector<6x64xf32>
    %121 = arith.negf %117 : vector<6x64xf32>
    %122 = math.exp %121 : vector<6x64xf32>
    %cst_65 = arith.constant 1.000000e+00 : f32
    %123 = vector.broadcast %cst_65 : f32 to vector<6x64xf32>
    %124 = arith.addf %123, %122 : vector<6x64xf32>
    %125 = arith.divf %123, %124 : vector<6x64xf32>
    %126 = arith.mulf %117, %125 : vector<6x64xf32>
    %127 = arith.mulf %126, %120 : vector<6x64xf32>
    %cst_66 = arith.constant dense<0.000000e+00> : vector<6x32xf32>
    %128 = tpu.matmul %127, %14, %cst_66 {dimension_numbers = #tpu.dot_dimension_numbers<[1], [0], [0], [1], [0, 0, 1, 1], [], []>} : vector<6x64xf32>, vector<64x32xf32>, vector<6x32xf32> -> vector<6x32xf32>
    %129 = vector.broadcast %15 : vector<1x32xf32> to vector<6x32xf32>
    %130 = arith.addf %128, %129 : vector<6x32xf32>
    %131 = arith.addf %114, %130 : vector<6x32xf32>
    %132 = arith.mulf %131, %131 : vector<6x32xf32>
    %cst_67 = arith.constant dense<0.000000e+00> : vector<6xf32>
    %133 = vector.multi_reduction <add>, %132, %cst_67 [1] : vector<6x32xf32> to vector<6xf32>
    %134 = vector.shape_cast %133 : vector<6xf32> to vector<6x1xf32>
    %cst_68 = arith.constant 3.200000e+01 : f32
    %135 = vector.broadcast %cst_68 : f32 to vector<6x1xf32>
    %136 = arith.divf %134, %135 : vector<6x1xf32>
    %cst_69 = arith.constant 1.1920929E-7 : f32
    %137 = vector.broadcast %cst_69 : f32 to vector<6x1xf32>
    %138 = arith.addf %136, %137 : vector<6x1xf32>
    %139 = math.rsqrt %138 : vector<6x1xf32>
    %140 = vector.broadcast %139 : vector<6x1xf32> to vector<6x32xf32>
    %141 = arith.mulf %131, %140 : vector<6x32xf32>
    %142 = vector.broadcast %9 : vector<1x32xf32> to vector<6x32xf32>
    %143 = arith.mulf %141, %142 : vector<6x32xf32>
    %c0_70 = arith.constant 0 : index
    %c0_71 = arith.constant 0 : index
    %c0_72 = arith.constant 0 : index
    %c0_73 = arith.constant 0 : index
    %144 = vector.load %arg19[%c0_70, %c0_71, %c0_72, %c0_73] : memref<1x5x6x32xf32, #tpu.memory_space<vmem>>, vector<1x1x6x32xf32>
    %145 = vector.shape_cast %144 : vector<1x1x6x32xf32> to vector<6x32xf32>
    %146 = vector.shape_cast %143 : vector<6x32xf32> to vector<1x1x6x32xf32>
    tpu.vector_store %arg19[%c0_70, %c0_71, %c0_72, %c0_73], %146 {strides = array<i32>} : memref<1x5x6x32xf32, #tpu.memory_space<vmem>>, vector<1x1x6x32xf32>,
    %c0_74 = arith.constant 0 : index
    %c1 = arith.constant 1 : index
    %c0_75 = arith.constant 0 : index
    %c0_76 = arith.constant 0 : index
    %147 = vector.load %arg2[%c0_74, %c1, %c0_75, %c0_76] : memref<1x5x6x32xf32, #tpu.memory_space<vmem>>, vector<1x1x6x32xf32>
    %148 = vector.shape_cast %147 : vector<1x1x6x32xf32> to vector<6x32xf32>
    %cst_77 = arith.constant dense<0.000000e+00> : vector<6x32xf32>
    %149 = tpu.matmul %148, %2, %cst_77 {dimension_numbers = #tpu.dot_dimension_numbers<[1], [0], [0], [1], [0, 0, 1, 1], [], []>} : vector<6x32xf32>, vector<32x32xf32>, vector<6x32xf32> -> vector<6x32xf32>
    %150 = vector.broadcast %3 : vector<1x32xf32> to vector<6x32xf32>
    %151 = arith.addf %149, %150 : vector<6x32xf32>
    %cst_78 = arith.constant dense<0.000000e+00> : vector<6x32xf32>
    %152 = tpu.matmul %148, %4, %cst_78 {dimension_numbers = #tpu.dot_dimension_numbers<[1], [0], [0], [1], [0, 0, 1, 1], [], []>} : vector<6x32xf32>, vector<32x32xf32>, vector<6x32xf32> -> vector<6x32xf32>
    %153 = vector.broadcast %5 : vector<1x32xf32> to vector<6x32xf32>
    %154 = arith.addf %152, %153 : vector<6x32xf32>
    %155 = vector.extract_strided_slice %20 {offsets = [0, 0], sizes = [6, 8], strides = [1, 1]} : vector<6x32xf32> to vector<6x8xf32>
    %156 = vector.extract_strided_slice %151 {offsets = [0, 0], sizes = [6, 8], strides = [1, 1]} : vector<6x32xf32> to vector<6x8xf32>
    %cst_79 = arith.constant dense<0.000000e+00> : vector<6x6xf32>
    %157 = tpu.matmul %155, %156, %cst_79 {dimension_numbers = #tpu.dot_dimension_numbers<[1], [1], [0], [0], [0, 0, 1, 0], [], []>} : vector<6x8xf32>, vector<6x8xf32>, vector<6x6xf32> -> vector<6x6xf32>
    %cst_80 = arith.constant dense<0xFF800000> : vector<6xf32>
    %158 = vector.multi_reduction <maximumf>, %157, %cst_80 [1] : vector<6x6xf32> to vector<6xf32>
    %159 = vector.shape_cast %158 : vector<6xf32> to vector<6x1xf32>
    %160 = vector.broadcast %159 : vector<6x1xf32> to vector<6x6xf32>
    %161 = arith.subf %157, %160 : vector<6x6xf32>
    %162 = math.exp %161 : vector<6x6xf32>
    %cst_81 = arith.constant dense<0.000000e+00> : vector<6xf32>
    %163 = vector.multi_reduction <add>, %162, %cst_81 [1] : vector<6x6xf32> to vector<6xf32>
    %164 = vector.shape_cast %163 : vector<6xf32> to vector<6x1xf32>
    %165 = tpu.reciprocal %164 {approx = true} : vector<6x1xf32> -> vector<6x1xf32>
    %166 = vector.broadcast %165 : vector<6x1xf32> to vector<6x6xf32>
    %167 = arith.mulf %162, %166 : vector<6x6xf32>
    %168 = vector.extract_strided_slice %154 {offsets = [0, 0], sizes = [6, 8], strides = [1, 1]} : vector<6x32xf32> to vector<6x8xf32>
    %cst_82 = arith.constant dense<0.000000e+00> : vector<6x8xf32>
    %169 = tpu.matmul %167, %168, %cst_82 {dimension_numbers = #tpu.dot_dimension_numbers<[1], [0], [0], [1], [0, 0, 1, 1], [], []>} : vector<6x6xf32>, vector<6x8xf32>, vector<6x8xf32> -> vector<6x8xf32>
    %170 = vector.extract_strided_slice %6 {offsets = [0, 0], sizes = [8, 32], strides = [1, 1]} : vector<32x32xf32> to vector<8x32xf32>
    %cst_83 = arith.constant dense<0.000000e+00> : vector<6x32xf32>
    %171 = tpu.matmul %169, %170, %cst_83 {dimension_numbers = #tpu.dot_dimension_numbers<[1], [0], [0], [1], [0, 0, 1, 1], [], []>} : vector<6x8xf32>, vector<8x32xf32>, vector<6x32xf32> -> vector<6x32xf32>
    %172 = vector.extract_strided_slice %20 {offsets = [0, 8], sizes = [6, 8], strides = [1, 1]} : vector<6x32xf32> to vector<6x8xf32>
    %173 = vector.extract_strided_slice %151 {offsets = [0, 8], sizes = [6, 8], strides = [1, 1]} : vector<6x32xf32> to vector<6x8xf32>
    %cst_84 = arith.constant dense<0.000000e+00> : vector<6x6xf32>
    %174 = tpu.matmul %172, %173, %cst_84 {dimension_numbers = #tpu.dot_dimension_numbers<[1], [1], [0], [0], [0, 0, 1, 0], [], []>} : vector<6x8xf32>, vector<6x8xf32>, vector<6x6xf32> -> vector<6x6xf32>
    %cst_85 = arith.constant dense<0xFF800000> : vector<6xf32>
    %175 = vector.multi_reduction <maximumf>, %174, %cst_85 [1] : vector<6x6xf32> to vector<6xf32>
    %176 = vector.shape_cast %175 : vector<6xf32> to vector<6x1xf32>
    %177 = vector.broadcast %176 : vector<6x1xf32> to vector<6x6xf32>
    %178 = arith.subf %174, %177 : vector<6x6xf32>
    %179 = math.exp %178 : vector<6x6xf32>
    %cst_86 = arith.constant dense<0.000000e+00> : vector<6xf32>
    %180 = vector.multi_reduction <add>, %179, %cst_86 [1] : vector<6x6xf32> to vector<6xf32>
    %181 = vector.shape_cast %180 : vector<6xf32> to vector<6x1xf32>
    %182 = tpu.reciprocal %181 {approx = true} : vector<6x1xf32> -> vector<6x1xf32>
    %183 = vector.broadcast %182 : vector<6x1xf32> to vector<6x6xf32>
    %184 = arith.mulf %179, %183 : vector<6x6xf32>
    %185 = vector.extract_strided_slice %154 {offsets = [0, 8], sizes = [6, 8], strides = [1, 1]} : vector<6x32xf32> to vector<6x8xf32>
    %cst_87 = arith.constant dense<0.000000e+00> : vector<6x8xf32>
    %186 = tpu.matmul %184, %185, %cst_87 {dimension_numbers = #tpu.dot_dimension_numbers<[1], [0], [0], [1], [0, 0, 1, 1], [], []>} : vector<6x6xf32>, vector<6x8xf32>, vector<6x8xf32> -> vector<6x8xf32>
    %187 = vector.extract_strided_slice %6 {offsets = [8, 0], sizes = [8, 32], strides = [1, 1]} : vector<32x32xf32> to vector<8x32xf32>
    %cst_88 = arith.constant dense<0.000000e+00> : vector<6x32xf32>
    %188 = tpu.matmul %186, %187, %cst_88 {dimension_numbers = #tpu.dot_dimension_numbers<[1], [0], [0], [1], [0, 0, 1, 1], [], []>} : vector<6x8xf32>, vector<8x32xf32>, vector<6x32xf32> -> vector<6x32xf32>
    %189 = arith.addf %171, %188 : vector<6x32xf32>
    %190 = vector.extract_strided_slice %20 {offsets = [0, 16], sizes = [6, 8], strides = [1, 1]} : vector<6x32xf32> to vector<6x8xf32>
    %191 = vector.extract_strided_slice %151 {offsets = [0, 16], sizes = [6, 8], strides = [1, 1]} : vector<6x32xf32> to vector<6x8xf32>
    %cst_89 = arith.constant dense<0.000000e+00> : vector<6x6xf32>
    %192 = tpu.matmul %190, %191, %cst_89 {dimension_numbers = #tpu.dot_dimension_numbers<[1], [1], [0], [0], [0, 0, 1, 0], [], []>} : vector<6x8xf32>, vector<6x8xf32>, vector<6x6xf32> -> vector<6x6xf32>
    %cst_90 = arith.constant dense<0xFF800000> : vector<6xf32>
    %193 = vector.multi_reduction <maximumf>, %192, %cst_90 [1] : vector<6x6xf32> to vector<6xf32>
    %194 = vector.shape_cast %193 : vector<6xf32> to vector<6x1xf32>
    %195 = vector.broadcast %194 : vector<6x1xf32> to vector<6x6xf32>
    %196 = arith.subf %192, %195 : vector<6x6xf32>
    %197 = math.exp %196 : vector<6x6xf32>
    %cst_91 = arith.constant dense<0.000000e+00> : vector<6xf32>
    %198 = vector.multi_reduction <add>, %197, %cst_91 [1] : vector<6x6xf32> to vector<6xf32>
    %199 = vector.shape_cast %198 : vector<6xf32> to vector<6x1xf32>
    %200 = tpu.reciprocal %199 {approx = true} : vector<6x1xf32> -> vector<6x1xf32>
    %201 = vector.broadcast %200 : vector<6x1xf32> to vector<6x6xf32>
    %202 = arith.mulf %197, %201 : vector<6x6xf32>
    %203 = vector.extract_strided_slice %154 {offsets = [0, 16], sizes = [6, 8], strides = [1, 1]} : vector<6x32xf32> to vector<6x8xf32>
    %cst_92 = arith.constant dense<0.000000e+00> : vector<6x8xf32>
    %204 = tpu.matmul %202, %203, %cst_92 {dimension_numbers = #tpu.dot_dimension_numbers<[1], [0], [0], [1], [0, 0, 1, 1], [], []>} : vector<6x6xf32>, vector<6x8xf32>, vector<6x8xf32> -> vector<6x8xf32>
    %205 = vector.extract_strided_slice %6 {offsets = [16, 0], sizes = [8, 32], strides = [1, 1]} : vector<32x32xf32> to vector<8x32xf32>
    %cst_93 = arith.constant dense<0.000000e+00> : vector<6x32xf32>
    %206 = tpu.matmul %204, %205, %cst_93 {dimension_numbers = #tpu.dot_dimension_numbers<[1], [0], [0], [1], [0, 0, 1, 1], [], []>} : vector<6x8xf32>, vector<8x32xf32>, vector<6x32xf32> -> vector<6x32xf32>
    %207 = arith.addf %189, %206 : vector<6x32xf32>
    %208 = vector.extract_strided_slice %20 {offsets = [0, 24], sizes = [6, 8], strides = [1, 1]} : vector<6x32xf32> to vector<6x8xf32>
    %209 = vector.extract_strided_slice %151 {offsets = [0, 24], sizes = [6, 8], strides = [1, 1]} : vector<6x32xf32> to vector<6x8xf32>
    %cst_94 = arith.constant dense<0.000000e+00> : vector<6x6xf32>
    %210 = tpu.matmul %208, %209, %cst_94 {dimension_numbers = #tpu.dot_dimension_numbers<[1], [1], [0], [0], [0, 0, 1, 0], [], []>} : vector<6x8xf32>, vector<6x8xf32>, vector<6x6xf32> -> vector<6x6xf32>
    %cst_95 = arith.constant dense<0xFF800000> : vector<6xf32>
    %211 = vector.multi_reduction <maximumf>, %210, %cst_95 [1] : vector<6x6xf32> to vector<6xf32>
    %212 = vector.shape_cast %211 : vector<6xf32> to vector<6x1xf32>
    %213 = vector.broadcast %212 : vector<6x1xf32> to vector<6x6xf32>
    %214 = arith.subf %210, %213 : vector<6x6xf32>
    %215 = math.exp %214 : vector<6x6xf32>
    %cst_96 = arith.constant dense<0.000000e+00> : vector<6xf32>
    %216 = vector.multi_reduction <add>, %215, %cst_96 [1] : vector<6x6xf32> to vector<6xf32>
    %217 = vector.shape_cast %216 : vector<6xf32> to vector<6x1xf32>
    %218 = tpu.reciprocal %217 {approx = true} : vector<6x1xf32> -> vector<6x1xf32>
    %219 = vector.broadcast %218 : vector<6x1xf32> to vector<6x6xf32>
    %220 = arith.mulf %215, %219 : vector<6x6xf32>
    %221 = vector.extract_strided_slice %154 {offsets = [0, 24], sizes = [6, 8], strides = [1, 1]} : vector<6x32xf32> to vector<6x8xf32>
    %cst_97 = arith.constant dense<0.000000e+00> : vector<6x8xf32>
    %222 = tpu.matmul %220, %221, %cst_97 {dimension_numbers = #tpu.dot_dimension_numbers<[1], [0], [0], [1], [0, 0, 1, 1], [], []>} : vector<6x6xf32>, vector<6x8xf32>, vector<6x8xf32> -> vector<6x8xf32>
    %223 = vector.extract_strided_slice %6 {offsets = [24, 0], sizes = [8, 32], strides = [1, 1]} : vector<32x32xf32> to vector<8x32xf32>
    %cst_98 = arith.constant dense<0.000000e+00> : vector<6x32xf32>
    %224 = tpu.matmul %222, %223, %cst_98 {dimension_numbers = #tpu.dot_dimension_numbers<[1], [0], [0], [1], [0, 0, 1, 1], [], []>} : vector<6x8xf32>, vector<8x32xf32>, vector<6x32xf32> -> vector<6x32xf32>
    %225 = arith.addf %207, %224 : vector<6x32xf32>
    %226 = vector.broadcast %7 : vector<1x32xf32> to vector<6x32xf32>
    %227 = arith.addf %225, %226 : vector<6x32xf32>
    %228 = arith.addf %17, %227 : vector<6x32xf32>
    %229 = arith.mulf %228, %228 : vector<6x32xf32>
    %cst_99 = arith.constant dense<0.000000e+00> : vector<6xf32>
    %230 = vector.multi_reduction <add>, %229, %cst_99 [1] : vector<6x32xf32> to vector<6xf32>
    %231 = vector.shape_cast %230 : vector<6xf32> to vector<6x1xf32>
    %cst_100 = arith.constant 3.200000e+01 : f32
    %232 = vector.broadcast %cst_100 : f32 to vector<6x1xf32>
    %233 = arith.divf %231, %232 : vector<6x1xf32>
    %cst_101 = arith.constant 1.1920929E-7 : f32
    %234 = vector.broadcast %cst_101 : f32 to vector<6x1xf32>
    %235 = arith.addf %233, %234 : vector<6x1xf32>
    %236 = math.rsqrt %235 : vector<6x1xf32>
    %237 = vector.broadcast %236 : vector<6x1xf32> to vector<6x32xf32>
    %238 = arith.mulf %228, %237 : vector<6x32xf32>
    %239 = vector.broadcast %8 : vector<1x32xf32> to vector<6x32xf32>
    %240 = arith.mulf %238, %239 : vector<6x32xf32>
    %cst_102 = arith.constant dense<0.000000e+00> : vector<6x64xf32>
    %241 = tpu.matmul %240, %10, %cst_102 {dimension_numbers = #tpu.dot_dimension_numbers<[1], [0], [0], [1], [0, 0, 1, 1], [], []>} : vector<6x32xf32>, vector<32x64xf32>, vector<6x64xf32> -> vector<6x64xf32>
    %242 = vector.broadcast %11 : vector<1x64xf32> to vector<6x64xf32>
    %243 = arith.addf %241, %242 : vector<6x64xf32>
    %cst_103 = arith.constant dense<0.000000e+00> : vector<6x64xf32>
    %244 = tpu.matmul %240, %12, %cst_103 {dimension_numbers = #tpu.dot_dimension_numbers<[1], [0], [0], [1], [0, 0, 1, 1], [], []>} : vector<6x32xf32>, vector<32x64xf32>, vector<6x64xf32> -> vector<6x64xf32>
    %245 = vector.broadcast %13 : vector<1x64xf32> to vector<6x64xf32>
    %246 = arith.addf %244, %245 : vector<6x64xf32>
    %247 = arith.negf %243 : vector<6x64xf32>
    %248 = math.exp %247 : vector<6x64xf32>
    %cst_104 = arith.constant 1.000000e+00 : f32
    %249 = vector.broadcast %cst_104 : f32 to vector<6x64xf32>
    %250 = arith.addf %249, %248 : vector<6x64xf32>
    %251 = arith.divf %249, %250 : vector<6x64xf32>
    %252 = arith.mulf %243, %251 : vector<6x64xf32>
    %253 = arith.mulf %252, %246 : vector<6x64xf32>
    %cst_105 = arith.constant dense<0.000000e+00> : vector<6x32xf32>
    %254 = tpu.matmul %253, %14, %cst_105 {dimension_numbers = #tpu.dot_dimension_numbers<[1], [0], [0], [1], [0, 0, 1, 1], [], []>} : vector<6x64xf32>, vector<64x32xf32>, vector<6x32xf32> -> vector<6x32xf32>
    %255 = vector.broadcast %15 : vector<1x32xf32> to vector<6x32xf32>
    %256 = arith.addf %254, %255 : vector<6x32xf32>
    %257 = arith.addf %240, %256 : vector<6x32xf32>
    %258 = arith.mulf %257, %257 : vector<6x32xf32>
    %cst_106 = arith.constant dense<0.000000e+00> : vector<6xf32>
    %259 = vector.multi_reduction <add>, %258, %cst_106 [1] : vector<6x32xf32> to vector<6xf32>
    %260 = vector.shape_cast %259 : vector<6xf32> to vector<6x1xf32>
    %cst_107 = arith.constant 3.200000e+01 : f32
    %261 = vector.broadcast %cst_107 : f32 to vector<6x1xf32>
    %262 = arith.divf %260, %261 : vector<6x1xf32>
    %cst_108 = arith.constant 1.1920929E-7 : f32
    %263 = vector.broadcast %cst_108 : f32 to vector<6x1xf32>
    %264 = arith.addf %262, %263 : vector<6x1xf32>
    %265 = math.rsqrt %264 : vector<6x1xf32>
    %266 = vector.broadcast %265 : vector<6x1xf32> to vector<6x32xf32>
    %267 = arith.mulf %257, %266 : vector<6x32xf32>
    %268 = vector.broadcast %9 : vector<1x32xf32> to vector<6x32xf32>
    %269 = arith.mulf %267, %268 : vector<6x32xf32>
    %c0_109 = arith.constant 0 : index
    %c1_110 = arith.constant 1 : index
    %c0_111 = arith.constant 0 : index
    %c0_112 = arith.constant 0 : index
    %270 = vector.load %arg19[%c0_109, %c1_110, %c0_111, %c0_112] : memref<1x5x6x32xf32, #tpu.memory_space<vmem>>, vector<1x1x6x32xf32>
    %271 = vector.shape_cast %270 : vector<1x1x6x32xf32> to vector<6x32xf32>
    %272 = vector.shape_cast %269 : vector<6x32xf32> to vector<1x1x6x32xf32>
    tpu.vector_store %arg19[%c0_109, %c1_110, %c0_111, %c0_112], %272 {strides = array<i32>} : memref<1x5x6x32xf32, #tpu.memory_space<vmem>>, vector<1x1x6x32xf32>,
    %c0_113 = arith.constant 0 : index
    %c2 = arith.constant 2 : index
    %c0_114 = arith.constant 0 : index
    %c0_115 = arith.constant 0 : index
    %273 = vector.load %arg2[%c0_113, %c2, %c0_114, %c0_115] : memref<1x5x6x32xf32, #tpu.memory_space<vmem>>, vector<1x1x6x32xf32>
    %274 = vector.shape_cast %273 : vector<1x1x6x32xf32> to vector<6x32xf32>
    %cst_116 = arith.constant dense<0.000000e+00> : vector<6x32xf32>
    %275 = tpu.matmul %274, %2, %cst_116 {dimension_numbers = #tpu.dot_dimension_numbers<[1], [0], [0], [1], [0, 0, 1, 1], [], []>} : vector<6x32xf32>, vector<32x32xf32>, vector<6x32xf32> -> vector<6x32xf32>
    %276 = vector.broadcast %3 : vector<1x32xf32> to vector<6x32xf32>
    %277 = arith.addf %275, %276 : vector<6x32xf32>
    %cst_117 = arith.constant dense<0.000000e+00> : vector<6x32xf32>
    %278 = tpu.matmul %274, %4, %cst_117 {dimension_numbers = #tpu.dot_dimension_numbers<[1], [0], [0], [1], [0, 0, 1, 1], [], []>} : vector<6x32xf32>, vector<32x32xf32>, vector<6x32xf32> -> vector<6x32xf32>
    %279 = vector.broadcast %5 : vector<1x32xf32> to vector<6x32xf32>
    %280 = arith.addf %278, %279 : vector<6x32xf32>
    %281 = vector.extract_strided_slice %20 {offsets = [0, 0], sizes = [6, 8], strides = [1, 1]} : vector<6x32xf32> to vector<6x8xf32>
    %282 = vector.extract_strided_slice %277 {offsets = [0, 0], sizes = [6, 8], strides = [1, 1]} : vector<6x32xf32> to vector<6x8xf32>
    %cst_118 = arith.constant dense<0.000000e+00> : vector<6x6xf32>
    %283 = tpu.matmul %281, %282, %cst_118 {dimension_numbers = #tpu.dot_dimension_numbers<[1], [1], [0], [0], [0, 0, 1, 0], [], []>} : vector<6x8xf32>, vector<6x8xf32>, vector<6x6xf32> -> vector<6x6xf32>
    %cst_119 = arith.constant dense<0xFF800000> : vector<6xf32>
    %284 = vector.multi_reduction <maximumf>, %283, %cst_119 [1] : vector<6x6xf32> to vector<6xf32>
    %285 = vector.shape_cast %284 : vector<6xf32> to vector<6x1xf32>
    %286 = vector.broadcast %285 : vector<6x1xf32> to vector<6x6xf32>
    %287 = arith.subf %283, %286 : vector<6x6xf32>
    %288 = math.exp %287 : vector<6x6xf32>
    %cst_120 = arith.constant dense<0.000000e+00> : vector<6xf32>
    %289 = vector.multi_reduction <add>, %288, %cst_120 [1] : vector<6x6xf32> to vector<6xf32>
    %290 = vector.shape_cast %289 : vector<6xf32> to vector<6x1xf32>
    %291 = tpu.reciprocal %290 {approx = true} : vector<6x1xf32> -> vector<6x1xf32>
    %292 = vector.broadcast %291 : vector<6x1xf32> to vector<6x6xf32>
    %293 = arith.mulf %288, %292 : vector<6x6xf32>
    %294 = vector.extract_strided_slice %280 {offsets = [0, 0], sizes = [6, 8], strides = [1, 1]} : vector<6x32xf32> to vector<6x8xf32>
    %cst_121 = arith.constant dense<0.000000e+00> : vector<6x8xf32>
    %295 = tpu.matmul %293, %294, %cst_121 {dimension_numbers = #tpu.dot_dimension_numbers<[1], [0], [0], [1], [0, 0, 1, 1], [], []>} : vector<6x6xf32>, vector<6x8xf32>, vector<6x8xf32> -> vector<6x8xf32>
    %296 = vector.extract_strided_slice %6 {offsets = [0, 0], sizes = [8, 32], strides = [1, 1]} : vector<32x32xf32> to vector<8x32xf32>
    %cst_122 = arith.constant dense<0.000000e+00> : vector<6x32xf32>
    %297 = tpu.matmul %295, %296, %cst_122 {dimension_numbers = #tpu.dot_dimension_numbers<[1], [0], [0], [1], [0, 0, 1, 1], [], []>} : vector<6x8xf32>, vector<8x32xf32>, vector<6x32xf32> -> vector<6x32xf32>
    %298 = vector.extract_strided_slice %20 {offsets = [0, 8], sizes = [6, 8], strides = [1, 1]} : vector<6x32xf32> to vector<6x8xf32>
    %299 = vector.extract_strided_slice %277 {offsets = [0, 8], sizes = [6, 8], strides = [1, 1]} : vector<6x32xf32> to vector<6x8xf32>
    %cst_123 = arith.constant dense<0.000000e+00> : vector<6x6xf32>
    %300 = tpu.matmul %298, %299, %cst_123 {dimension_numbers = #tpu.dot_dimension_numbers<[1], [1], [0], [0], [0, 0, 1, 0], [], []>} : vector<6x8xf32>, vector<6x8xf32>, vector<6x6xf32> -> vector<6x6xf32>
    %cst_124 = arith.constant dense<0xFF800000> : vector<6xf32>
    %301 = vector.multi_reduction <maximumf>, %300, %cst_124 [1] : vector<6x6xf32> to vector<6xf32>
    %302 = vector.shape_cast %301 : vector<6xf32> to vector<6x1xf32>
    %303 = vector.broadcast %302 : vector<6x1xf32> to vector<6x6xf32>
    %304 = arith.subf %300, %303 : vector<6x6xf32>
    %305 = math.exp %304 : vector<6x6xf32>
    %cst_125 = arith.constant dense<0.000000e+00> : vector<6xf32>
    %306 = vector.multi_reduction <add>, %305, %cst_125 [1] : vector<6x6xf32> to vector<6xf32>
    %307 = vector.shape_cast %306 : vector<6xf32> to vector<6x1xf32>
    %308 = tpu.reciprocal %307 {approx = true} : vector<6x1xf32> -> vector<6x1xf32>
    %309 = vector.broadcast %308 : vector<6x1xf32> to vector<6x6xf32>
    %310 = arith.mulf %305, %309 : vector<6x6xf32>
    %311 = vector.extract_strided_slice %280 {offsets = [0, 8], sizes = [6, 8], strides = [1, 1]} : vector<6x32xf32> to vector<6x8xf32>
    %cst_126 = arith.constant dense<0.000000e+00> : vector<6x8xf32>
    %312 = tpu.matmul %310, %311, %cst_126 {dimension_numbers = #tpu.dot_dimension_numbers<[1], [0], [0], [1], [0, 0, 1, 1], [], []>} : vector<6x6xf32>, vector<6x8xf32>, vector<6x8xf32> -> vector<6x8xf32>
    %313 = vector.extract_strided_slice %6 {offsets = [8, 0], sizes = [8, 32], strides = [1, 1]} : vector<32x32xf32> to vector<8x32xf32>
    %cst_127 = arith.constant dense<0.000000e+00> : vector<6x32xf32>
    %314 = tpu.matmul %312, %313, %cst_127 {dimension_numbers = #tpu.dot_dimension_numbers<[1], [0], [0], [1], [0, 0, 1, 1], [], []>} : vector<6x8xf32>, vector<8x32xf32>, vector<6x32xf32> -> vector<6x32xf32>
    %315 = arith.addf %297, %314 : vector<6x32xf32>
    %316 = vector.extract_strided_slice %20 {offsets = [0, 16], sizes = [6, 8], strides = [1, 1]} : vector<6x32xf32> to vector<6x8xf32>
    %317 = vector.extract_strided_slice %277 {offsets = [0, 16], sizes = [6, 8], strides = [1, 1]} : vector<6x32xf32> to vector<6x8xf32>
    %cst_128 = arith.constant dense<0.000000e+00> : vector<6x6xf32>
    %318 = tpu.matmul %316, %317, %cst_128 {dimension_numbers = #tpu.dot_dimension_numbers<[1], [1], [0], [0], [0, 0, 1, 0], [], []>} : vector<6x8xf32>, vector<6x8xf32>, vector<6x6xf32> -> vector<6x6xf32>
    %cst_129 = arith.constant dense<0xFF800000> : vector<6xf32>
    %319 = vector.multi_reduction <maximumf>, %318, %cst_129 [1] : vector<6x6xf32> to vector<6xf32>
    %320 = vector.shape_cast %319 : vector<6xf32> to vector<6x1xf32>
    %321 = vector.broadcast %320 : vector<6x1xf32> to vector<6x6xf32>
    %322 = arith.subf %318, %321 : vector<6x6xf32>
    %323 = math.exp %322 : vector<6x6xf32>
    %cst_130 = arith.constant dense<0.000000e+00> : vector<6xf32>
    %324 = vector.multi_reduction <add>, %323, %cst_130 [1] : vector<6x6xf32> to vector<6xf32>
    %325 = vector.shape_cast %324 : vector<6xf32> to vector<6x1xf32>
    %326 = tpu.reciprocal %325 {approx = true} : vector<6x1xf32> -> vector<6x1xf32>
    %327 = vector.broadcast %326 : vector<6x1xf32> to vector<6x6xf32>
    %328 = arith.mulf %323, %327 : vector<6x6xf32>
    %329 = vector.extract_strided_slice %280 {offsets = [0, 16], sizes = [6, 8], strides = [1, 1]} : vector<6x32xf32> to vector<6x8xf32>
    %cst_131 = arith.constant dense<0.000000e+00> : vector<6x8xf32>
    %330 = tpu.matmul %328, %329, %cst_131 {dimension_numbers = #tpu.dot_dimension_numbers<[1], [0], [0], [1], [0, 0, 1, 1], [], []>} : vector<6x6xf32>, vector<6x8xf32>, vector<6x8xf32> -> vector<6x8xf32>
    %331 = vector.extract_strided_slice %6 {offsets = [16, 0], sizes = [8, 32], strides = [1, 1]} : vector<32x32xf32> to vector<8x32xf32>
    %cst_132 = arith.constant dense<0.000000e+00> : vector<6x32xf32>
    %332 = tpu.matmul %330, %331, %cst_132 {dimension_numbers = #tpu.dot_dimension_numbers<[1], [0], [0], [1], [0, 0, 1, 1], [], []>} : vector<6x8xf32>, vector<8x32xf32>, vector<6x32xf32> -> vector<6x32xf32>
    %333 = arith.addf %315, %332 : vector<6x32xf32>
    %334 = vector.extract_strided_slice %20 {offsets = [0, 24], sizes = [6, 8], strides = [1, 1]} : vector<6x32xf32> to vector<6x8xf32>
    %335 = vector.extract_strided_slice %277 {offsets = [0, 24], sizes = [6, 8], strides = [1, 1]} : vector<6x32xf32> to vector<6x8xf32>
    %cst_133 = arith.constant dense<0.000000e+00> : vector<6x6xf32>
    %336 = tpu.matmul %334, %335, %cst_133 {dimension_numbers = #tpu.dot_dimension_numbers<[1], [1], [0], [0], [0, 0, 1, 0], [], []>} : vector<6x8xf32>, vector<6x8xf32>, vector<6x6xf32> -> vector<6x6xf32>
    %cst_134 = arith.constant dense<0xFF800000> : vector<6xf32>
    %337 = vector.multi_reduction <maximumf>, %336, %cst_134 [1] : vector<6x6xf32> to vector<6xf32>
    %338 = vector.shape_cast %337 : vector<6xf32> to vector<6x1xf32>
    %339 = vector.broadcast %338 : vector<6x1xf32> to vector<6x6xf32>
    %340 = arith.subf %336, %339 : vector<6x6xf32>
    %341 = math.exp %340 : vector<6x6xf32>
    %cst_135 = arith.constant dense<0.000000e+00> : vector<6xf32>
    %342 = vector.multi_reduction <add>, %341, %cst_135 [1] : vector<6x6xf32> to vector<6xf32>
    %343 = vector.shape_cast %342 : vector<6xf32> to vector<6x1xf32>
    %344 = tpu.reciprocal %343 {approx = true} : vector<6x1xf32> -> vector<6x1xf32>
    %345 = vector.broadcast %344 : vector<6x1xf32> to vector<6x6xf32>
    %346 = arith.mulf %341, %345 : vector<6x6xf32>
    %347 = vector.extract_strided_slice %280 {offsets = [0, 24], sizes = [6, 8], strides = [1, 1]} : vector<6x32xf32> to vector<6x8xf32>
    %cst_136 = arith.constant dense<0.000000e+00> : vector<6x8xf32>
    %348 = tpu.matmul %346, %347, %cst_136 {dimension_numbers = #tpu.dot_dimension_numbers<[1], [0], [0], [1], [0, 0, 1, 1], [], []>} : vector<6x6xf32>, vector<6x8xf32>, vector<6x8xf32> -> vector<6x8xf32>
    %349 = vector.extract_strided_slice %6 {offsets = [24, 0], sizes = [8, 32], strides = [1, 1]} : vector<32x32xf32> to vector<8x32xf32>
    %cst_137 = arith.constant dense<0.000000e+00> : vector<6x32xf32>
    %350 = tpu.matmul %348, %349, %cst_137 {dimension_numbers = #tpu.dot_dimension_numbers<[1], [0], [0], [1], [0, 0, 1, 1], [], []>} : vector<6x8xf32>, vector<8x32xf32>, vector<6x32xf32> -> vector<6x32xf32>
    %351 = arith.addf %333, %350 : vector<6x32xf32>
    %352 = vector.broadcast %7 : vector<1x32xf32> to vector<6x32xf32>
    %353 = arith.addf %351, %352 : vector<6x32xf32>
    %354 = arith.addf %17, %353 : vector<6x32xf32>
    %355 = arith.mulf %354, %354 : vector<6x32xf32>
    %cst_138 = arith.constant dense<0.000000e+00> : vector<6xf32>
    %356 = vector.multi_reduction <add>, %355, %cst_138 [1] : vector<6x32xf32> to vector<6xf32>
    %357 = vector.shape_cast %356 : vector<6xf32> to vector<6x1xf32>
    %cst_139 = arith.constant 3.200000e+01 : f32
    %358 = vector.broadcast %cst_139 : f32 to vector<6x1xf32>
    %359 = arith.divf %357, %358 : vector<6x1xf32>
    %cst_140 = arith.constant 1.1920929E-7 : f32
    %360 = vector.broadcast %cst_140 : f32 to vector<6x1xf32>
    %361 = arith.addf %359, %360 : vector<6x1xf32>
    %362 = math.rsqrt %361 : vector<6x1xf32>
    %363 = vector.broadcast %362 : vector<6x1xf32> to vector<6x32xf32>
    %364 = arith.mulf %354, %363 : vector<6x32xf32>
    %365 = vector.broadcast %8 : vector<1x32xf32> to vector<6x32xf32>
    %366 = arith.mulf %364, %365 : vector<6x32xf32>
    %cst_141 = arith.constant dense<0.000000e+00> : vector<6x64xf32>
    %367 = tpu.matmul %366, %10, %cst_141 {dimension_numbers = #tpu.dot_dimension_numbers<[1], [0], [0], [1], [0, 0, 1, 1], [], []>} : vector<6x32xf32>, vector<32x64xf32>, vector<6x64xf32> -> vector<6x64xf32>
    %368 = vector.broadcast %11 : vector<1x64xf32> to vector<6x64xf32>
    %369 = arith.addf %367, %368 : vector<6x64xf32>
    %cst_142 = arith.constant dense<0.000000e+00> : vector<6x64xf32>
    %370 = tpu.matmul %366, %12, %cst_142 {dimension_numbers = #tpu.dot_dimension_numbers<[1], [0], [0], [1], [0, 0, 1, 1], [], []>} : vector<6x32xf32>, vector<32x64xf32>, vector<6x64xf32> -> vector<6x64xf32>
    %371 = vector.broadcast %13 : vector<1x64xf32> to vector<6x64xf32>
    %372 = arith.addf %370, %371 : vector<6x64xf32>
    %373 = arith.negf %369 : vector<6x64xf32>
    %374 = math.exp %373 : vector<6x64xf32>
    %cst_143 = arith.constant 1.000000e+00 : f32
    %375 = vector.broadcast %cst_143 : f32 to vector<6x64xf32>
    %376 = arith.addf %375, %374 : vector<6x64xf32>
    %377 = arith.divf %375, %376 : vector<6x64xf32>
    %378 = arith.mulf %369, %377 : vector<6x64xf32>
    %379 = arith.mulf %378, %372 : vector<6x64xf32>
    %cst_144 = arith.constant dense<0.000000e+00> : vector<6x32xf32>
    %380 = tpu.matmul %379, %14, %cst_144 {dimension_numbers = #tpu.dot_dimension_numbers<[1], [0], [0], [1], [0, 0, 1, 1], [], []>} : vector<6x64xf32>, vector<64x32xf32>, vector<6x32xf32> -> vector<6x32xf32>
    %381 = vector.broadcast %15 : vector<1x32xf32> to vector<6x32xf32>
    %382 = arith.addf %380, %381 : vector<6x32xf32>
    %383 = arith.addf %366, %382 : vector<6x32xf32>
    %384 = arith.mulf %383, %383 : vector<6x32xf32>
    %cst_145 = arith.constant dense<0.000000e+00> : vector<6xf32>
    %385 = vector.multi_reduction <add>, %384, %cst_145 [1] : vector<6x32xf32> to vector<6xf32>
    %386 = vector.shape_cast %385 : vector<6xf32> to vector<6x1xf32>
    %cst_146 = arith.constant 3.200000e+01 : f32
    %387 = vector.broadcast %cst_146 : f32 to vector<6x1xf32>
    %388 = arith.divf %386, %387 : vector<6x1xf32>
    %cst_147 = arith.constant 1.1920929E-7 : f32
    %389 = vector.broadcast %cst_147 : f32 to vector<6x1xf32>
    %390 = arith.addf %388, %389 : vector<6x1xf32>
    %391 = math.rsqrt %390 : vector<6x1xf32>
    %392 = vector.broadcast %391 : vector<6x1xf32> to vector<6x32xf32>
    %393 = arith.mulf %383, %392 : vector<6x32xf32>
    %394 = vector.broadcast %9 : vector<1x32xf32> to vector<6x32xf32>
    %395 = arith.mulf %393, %394 : vector<6x32xf32>
    %c0_148 = arith.constant 0 : index
    %c2_149 = arith.constant 2 : index
    %c0_150 = arith.constant 0 : index
    %c0_151 = arith.constant 0 : index
    %396 = vector.load %arg19[%c0_148, %c2_149, %c0_150, %c0_151] : memref<1x5x6x32xf32, #tpu.memory_space<vmem>>, vector<1x1x6x32xf32>
    %397 = vector.shape_cast %396 : vector<1x1x6x32xf32> to vector<6x32xf32>
    %398 = vector.shape_cast %395 : vector<6x32xf32> to vector<1x1x6x32xf32>
    tpu.vector_store %arg19[%c0_148, %c2_149, %c0_150, %c0_151], %398 {strides = array<i32>} : memref<1x5x6x32xf32, #tpu.memory_space<vmem>>, vector<1x1x6x32xf32>,
    %c0_152 = arith.constant 0 : index
    %c3 = arith.constant 3 : index
    %c0_153 = arith.constant 0 : index
    %c0_154 = arith.constant 0 : index
    %399 = vector.load %arg2[%c0_152, %c3, %c0_153, %c0_154] : memref<1x5x6x32xf32, #tpu.memory_space<vmem>>, vector<1x1x6x32xf32>
    %400 = vector.shape_cast %399 : vector<1x1x6x32xf32> to vector<6x32xf32>
    %cst_155 = arith.constant dense<0.000000e+00> : vector<6x32xf32>
    %401 = tpu.matmul %400, %2, %cst_155 {dimension_numbers = #tpu.dot_dimension_numbers<[1], [0], [0], [1], [0, 0, 1, 1], [], []>} : vector<6x32xf32>, vector<32x32xf32>, vector<6x32xf32> -> vector<6x32xf32>
    %402 = vector.broadcast %3 : vector<1x32xf32> to vector<6x32xf32>
    %403 = arith.addf %401, %402 : vector<6x32xf32>
    %cst_156 = arith.constant dense<0.000000e+00> : vector<6x32xf32>
    %404 = tpu.matmul %400, %4, %cst_156 {dimension_numbers = #tpu.dot_dimension_numbers<[1], [0], [0], [1], [0, 0, 1, 1], [], []>} : vector<6x32xf32>, vector<32x32xf32>, vector<6x32xf32> -> vector<6x32xf32>
    %405 = vector.broadcast %5 : vector<1x32xf32> to vector<6x32xf32>
    %406 = arith.addf %404, %405 : vector<6x32xf32>
    %407 = vector.extract_strided_slice %20 {offsets = [0, 0], sizes = [6, 8], strides = [1, 1]} : vector<6x32xf32> to vector<6x8xf32>
    %408 = vector.extract_strided_slice %403 {offsets = [0, 0], sizes = [6, 8], strides = [1, 1]} : vector<6x32xf32> to vector<6x8xf32>
    %cst_157 = arith.constant dense<0.000000e+00> : vector<6x6xf32>
    %409 = tpu.matmul %407, %408, %cst_157 {dimension_numbers = #tpu.dot_dimension_numbers<[1], [1], [0], [0], [0, 0, 1, 0], [], []>} : vector<6x8xf32>, vector<6x8xf32>, vector<6x6xf32> -> vector<6x6xf32>
    %cst_158 = arith.constant dense<0xFF800000> : vector<6xf32>
    %410 = vector.multi_reduction <maximumf>, %409, %cst_158 [1] : vector<6x6xf32> to vector<6xf32>
    %411 = vector.shape_cast %410 : vector<6xf32> to vector<6x1xf32>
    %412 = vector.broadcast %411 : vector<6x1xf32> to vector<6x6xf32>
    %413 = arith.subf %409, %412 : vector<6x6xf32>
    %414 = math.exp %413 : vector<6x6xf32>
    %cst_159 = arith.constant dense<0.000000e+00> : vector<6xf32>
    %415 = vector.multi_reduction <add>, %414, %cst_159 [1] : vector<6x6xf32> to vector<6xf32>
    %416 = vector.shape_cast %415 : vector<6xf32> to vector<6x1xf32>
    %417 = tpu.reciprocal %416 {approx = true} : vector<6x1xf32> -> vector<6x1xf32>
    %418 = vector.broadcast %417 : vector<6x1xf32> to vector<6x6xf32>
    %419 = arith.mulf %414, %418 : vector<6x6xf32>
    %420 = vector.extract_strided_slice %406 {offsets = [0, 0], sizes = [6, 8], strides = [1, 1]} : vector<6x32xf32> to vector<6x8xf32>
    %cst_160 = arith.constant dense<0.000000e+00> : vector<6x8xf32>
    %421 = tpu.matmul %419, %420, %cst_160 {dimension_numbers = #tpu.dot_dimension_numbers<[1], [0], [0], [1], [0, 0, 1, 1], [], []>} : vector<6x6xf32>, vector<6x8xf32>, vector<6x8xf32> -> vector<6x8xf32>
    %422 = vector.extract_strided_slice %6 {offsets = [0, 0], sizes = [8, 32], strides = [1, 1]} : vector<32x32xf32> to vector<8x32xf32>
    %cst_161 = arith.constant dense<0.000000e+00> : vector<6x32xf32>
    %423 = tpu.matmul %421, %422, %cst_161 {dimension_numbers = #tpu.dot_dimension_numbers<[1], [0], [0], [1], [0, 0, 1, 1], [], []>} : vector<6x8xf32>, vector<8x32xf32>, vector<6x32xf32> -> vector<6x32xf32>
    %424 = vector.extract_strided_slice %20 {offsets = [0, 8], sizes = [6, 8], strides = [1, 1]} : vector<6x32xf32> to vector<6x8xf32>
    %425 = vector.extract_strided_slice %403 {offsets = [0, 8], sizes = [6, 8], strides = [1, 1]} : vector<6x32xf32> to vector<6x8xf32>
    %cst_162 = arith.constant dense<0.000000e+00> : vector<6x6xf32>
    %426 = tpu.matmul %424, %425, %cst_162 {dimension_numbers = #tpu.dot_dimension_numbers<[1], [1], [0], [0], [0, 0, 1, 0], [], []>} : vector<6x8xf32>, vector<6x8xf32>, vector<6x6xf32> -> vector<6x6xf32>
    %cst_163 = arith.constant dense<0xFF800000> : vector<6xf32>
    %427 = vector.multi_reduction <maximumf>, %426, %cst_163 [1] : vector<6x6xf32> to vector<6xf32>
    %428 = vector.shape_cast %427 : vector<6xf32> to vector<6x1xf32>
    %429 = vector.broadcast %428 : vector<6x1xf32> to vector<6x6xf32>
    %430 = arith.subf %426, %429 : vector<6x6xf32>
    %431 = math.exp %430 : vector<6x6xf32>
    %cst_164 = arith.constant dense<0.000000e+00> : vector<6xf32>
    %432 = vector.multi_reduction <add>, %431, %cst_164 [1] : vector<6x6xf32> to vector<6xf32>
    %433 = vector.shape_cast %432 : vector<6xf32> to vector<6x1xf32>
    %434 = tpu.reciprocal %433 {approx = true} : vector<6x1xf32> -> vector<6x1xf32>
    %435 = vector.broadcast %434 : vector<6x1xf32> to vector<6x6xf32>
    %436 = arith.mulf %431, %435 : vector<6x6xf32>
    %437 = vector.extract_strided_slice %406 {offsets = [0, 8], sizes = [6, 8], strides = [1, 1]} : vector<6x32xf32> to vector<6x8xf32>
    %cst_165 = arith.constant dense<0.000000e+00> : vector<6x8xf32>
    %438 = tpu.matmul %436, %437, %cst_165 {dimension_numbers = #tpu.dot_dimension_numbers<[1], [0], [0], [1], [0, 0, 1, 1], [], []>} : vector<6x6xf32>, vector<6x8xf32>, vector<6x8xf32> -> vector<6x8xf32>
    %439 = vector.extract_strided_slice %6 {offsets = [8, 0], sizes = [8, 32], strides = [1, 1]} : vector<32x32xf32> to vector<8x32xf32>
    %cst_166 = arith.constant dense<0.000000e+00> : vector<6x32xf32>
    %440 = tpu.matmul %438, %439, %cst_166 {dimension_numbers = #tpu.dot_dimension_numbers<[1], [0], [0], [1], [0, 0, 1, 1], [], []>} : vector<6x8xf32>, vector<8x32xf32>, vector<6x32xf32> -> vector<6x32xf32>
    %441 = arith.addf %423, %440 : vector<6x32xf32>
    %442 = vector.extract_strided_slice %20 {offsets = [0, 16], sizes = [6, 8], strides = [1, 1]} : vector<6x32xf32> to vector<6x8xf32>
    %443 = vector.extract_strided_slice %403 {offsets = [0, 16], sizes = [6, 8], strides = [1, 1]} : vector<6x32xf32> to vector<6x8xf32>
    %cst_167 = arith.constant dense<0.000000e+00> : vector<6x6xf32>
    %444 = tpu.matmul %442, %443, %cst_167 {dimension_numbers = #tpu.dot_dimension_numbers<[1], [1], [0], [0], [0, 0, 1, 0], [], []>} : vector<6x8xf32>, vector<6x8xf32>, vector<6x6xf32> -> vector<6x6xf32>
    %cst_168 = arith.constant dense<0xFF800000> : vector<6xf32>
    %445 = vector.multi_reduction <maximumf>, %444, %cst_168 [1] : vector<6x6xf32> to vector<6xf32>
    %446 = vector.shape_cast %445 : vector<6xf32> to vector<6x1xf32>
    %447 = vector.broadcast %446 : vector<6x1xf32> to vector<6x6xf32>
    %448 = arith.subf %444, %447 : vector<6x6xf32>
    %449 = math.exp %448 : vector<6x6xf32>
    %cst_169 = arith.constant dense<0.000000e+00> : vector<6xf32>
    %450 = vector.multi_reduction <add>, %449, %cst_169 [1] : vector<6x6xf32> to vector<6xf32>
    %451 = vector.shape_cast %450 : vector<6xf32> to vector<6x1xf32>
    %452 = tpu.reciprocal %451 {approx = true} : vector<6x1xf32> -> vector<6x1xf32>
    %453 = vector.broadcast %452 : vector<6x1xf32> to vector<6x6xf32>
    %454 = arith.mulf %449, %453 : vector<6x6xf32>
    %455 = vector.extract_strided_slice %406 {offsets = [0, 16], sizes = [6, 8], strides = [1, 1]} : vector<6x32xf32> to vector<6x8xf32>
    %cst_170 = arith.constant dense<0.000000e+00> : vector<6x8xf32>
    %456 = tpu.matmul %454, %455, %cst_170 {dimension_numbers = #tpu.dot_dimension_numbers<[1], [0], [0], [1], [0, 0, 1, 1], [], []>} : vector<6x6xf32>, vector<6x8xf32>, vector<6x8xf32> -> vector<6x8xf32>
    %457 = vector.extract_strided_slice %6 {offsets = [16, 0], sizes = [8, 32], strides = [1, 1]} : vector<32x32xf32> to vector<8x32xf32>
    %cst_171 = arith.constant dense<0.000000e+00> : vector<6x32xf32>
    %458 = tpu.matmul %456, %457, %cst_171 {dimension_numbers = #tpu.dot_dimension_numbers<[1], [0], [0], [1], [0, 0, 1, 1], [], []>} : vector<6x8xf32>, vector<8x32xf32>, vector<6x32xf32> -> vector<6x32xf32>
    %459 = arith.addf %441, %458 : vector<6x32xf32>
    %460 = vector.extract_strided_slice %20 {offsets = [0, 24], sizes = [6, 8], strides = [1, 1]} : vector<6x32xf32> to vector<6x8xf32>
    %461 = vector.extract_strided_slice %403 {offsets = [0, 24], sizes = [6, 8], strides = [1, 1]} : vector<6x32xf32> to vector<6x8xf32>
    %cst_172 = arith.constant dense<0.000000e+00> : vector<6x6xf32>
    %462 = tpu.matmul %460, %461, %cst_172 {dimension_numbers = #tpu.dot_dimension_numbers<[1], [1], [0], [0], [0, 0, 1, 0], [], []>} : vector<6x8xf32>, vector<6x8xf32>, vector<6x6xf32> -> vector<6x6xf32>
    %cst_173 = arith.constant dense<0xFF800000> : vector<6xf32>
    %463 = vector.multi_reduction <maximumf>, %462, %cst_173 [1] : vector<6x6xf32> to vector<6xf32>
    %464 = vector.shape_cast %463 : vector<6xf32> to vector<6x1xf32>
    %465 = vector.broadcast %464 : vector<6x1xf32> to vector<6x6xf32>
    %466 = arith.subf %462, %465 : vector<6x6xf32>
    %467 = math.exp %466 : vector<6x6xf32>
    %cst_174 = arith.constant dense<0.000000e+00> : vector<6xf32>
    %468 = vector.multi_reduction <add>, %467, %cst_174 [1] : vector<6x6xf32> to vector<6xf32>
    %469 = vector.shape_cast %468 : vector<6xf32> to vector<6x1xf32>
    %470 = tpu.reciprocal %469 {approx = true} : vector<6x1xf32> -> vector<6x1xf32>
    %471 = vector.broadcast %470 : vector<6x1xf32> to vector<6x6xf32>
    %472 = arith.mulf %467, %471 : vector<6x6xf32>
    %473 = vector.extract_strided_slice %406 {offsets = [0, 24], sizes = [6, 8], strides = [1, 1]} : vector<6x32xf32> to vector<6x8xf32>
    %cst_175 = arith.constant dense<0.000000e+00> : vector<6x8xf32>
    %474 = tpu.matmul %472, %473, %cst_175 {dimension_numbers = #tpu.dot_dimension_numbers<[1], [0], [0], [1], [0, 0, 1, 1], [], []>} : vector<6x6xf32>, vector<6x8xf32>, vector<6x8xf32> -> vector<6x8xf32>
    %475 = vector.extract_strided_slice %6 {offsets = [24, 0], sizes = [8, 32], strides = [1, 1]} : vector<32x32xf32> to vector<8x32xf32>
    %cst_176 = arith.constant dense<0.000000e+00> : vector<6x32xf32>
    %476 = tpu.matmul %474, %475, %cst_176 {dimension_numbers = #tpu.dot_dimension_numbers<[1], [0], [0], [1], [0, 0, 1, 1], [], []>} : vector<6x8xf32>, vector<8x32xf32>, vector<6x32xf32> -> vector<6x32xf32>
    %477 = arith.addf %459, %476 : vector<6x32xf32>
    %478 = vector.broadcast %7 : vector<1x32xf32> to vector<6x32xf32>
    %479 = arith.addf %477, %478 : vector<6x32xf32>
    %480 = arith.addf %17, %479 : vector<6x32xf32>
    %481 = arith.mulf %480, %480 : vector<6x32xf32>
    %cst_177 = arith.constant dense<0.000000e+00> : vector<6xf32>
    %482 = vector.multi_reduction <add>, %481, %cst_177 [1] : vector<6x32xf32> to vector<6xf32>
    %483 = vector.shape_cast %482 : vector<6xf32> to vector<6x1xf32>
    %cst_178 = arith.constant 3.200000e+01 : f32
    %484 = vector.broadcast %cst_178 : f32 to vector<6x1xf32>
    %485 = arith.divf %483, %484 : vector<6x1xf32>
    %cst_179 = arith.constant 1.1920929E-7 : f32
    %486 = vector.broadcast %cst_179 : f32 to vector<6x1xf32>
    %487 = arith.addf %485, %486 : vector<6x1xf32>
    %488 = math.rsqrt %487 : vector<6x1xf32>
    %489 = vector.broadcast %488 : vector<6x1xf32> to vector<6x32xf32>
    %490 = arith.mulf %480, %489 : vector<6x32xf32>
    %491 = vector.broadcast %8 : vector<1x32xf32> to vector<6x32xf32>
    %492 = arith.mulf %490, %491 : vector<6x32xf32>
    %cst_180 = arith.constant dense<0.000000e+00> : vector<6x64xf32>
    %493 = tpu.matmul %492, %10, %cst_180 {dimension_numbers = #tpu.dot_dimension_numbers<[1], [0], [0], [1], [0, 0, 1, 1], [], []>} : vector<6x32xf32>, vector<32x64xf32>, vector<6x64xf32> -> vector<6x64xf32>
    %494 = vector.broadcast %11 : vector<1x64xf32> to vector<6x64xf32>
    %495 = arith.addf %493, %494 : vector<6x64xf32>
    %cst_181 = arith.constant dense<0.000000e+00> : vector<6x64xf32>
    %496 = tpu.matmul %492, %12, %cst_181 {dimension_numbers = #tpu.dot_dimension_numbers<[1], [0], [0], [1], [0, 0, 1, 1], [], []>} : vector<6x32xf32>, vector<32x64xf32>, vector<6x64xf32> -> vector<6x64xf32>
    %497 = vector.broadcast %13 : vector<1x64xf32> to vector<6x64xf32>
    %498 = arith.addf %496, %497 : vector<6x64xf32>
    %499 = arith.negf %495 : vector<6x64xf32>
    %500 = math.exp %499 : vector<6x64xf32>
    %cst_182 = arith.constant 1.000000e+00 : f32
    %501 = vector.broadcast %cst_182 : f32 to vector<6x64xf32>
    %502 = arith.addf %501, %500 : vector<6x64xf32>
    %503 = arith.divf %501, %502 : vector<6x64xf32>
    %504 = arith.mulf %495, %503 : vector<6x64xf32>
    %505 = arith.mulf %504, %498 : vector<6x64xf32>
    %cst_183 = arith.constant dense<0.000000e+00> : vector<6x32xf32>
    %506 = tpu.matmul %505, %14, %cst_183 {dimension_numbers = #tpu.dot_dimension_numbers<[1], [0], [0], [1], [0, 0, 1, 1], [], []>} : vector<6x64xf32>, vector<64x32xf32>, vector<6x32xf32> -> vector<6x32xf32>
    %507 = vector.broadcast %15 : vector<1x32xf32> to vector<6x32xf32>
    %508 = arith.addf %506, %507 : vector<6x32xf32>
    %509 = arith.addf %492, %508 : vector<6x32xf32>
    %510 = arith.mulf %509, %509 : vector<6x32xf32>
    %cst_184 = arith.constant dense<0.000000e+00> : vector<6xf32>
    %511 = vector.multi_reduction <add>, %510, %cst_184 [1] : vector<6x32xf32> to vector<6xf32>
    %512 = vector.shape_cast %511 : vector<6xf32> to vector<6x1xf32>
    %cst_185 = arith.constant 3.200000e+01 : f32
    %513 = vector.broadcast %cst_185 : f32 to vector<6x1xf32>
    %514 = arith.divf %512, %513 : vector<6x1xf32>
    %cst_186 = arith.constant 1.1920929E-7 : f32
    %515 = vector.broadcast %cst_186 : f32 to vector<6x1xf32>
    %516 = arith.addf %514, %515 : vector<6x1xf32>
    %517 = math.rsqrt %516 : vector<6x1xf32>
    %518 = vector.broadcast %517 : vector<6x1xf32> to vector<6x32xf32>
    %519 = arith.mulf %509, %518 : vector<6x32xf32>
    %520 = vector.broadcast %9 : vector<1x32xf32> to vector<6x32xf32>
    %521 = arith.mulf %519, %520 : vector<6x32xf32>
    %c0_187 = arith.constant 0 : index
    %c3_188 = arith.constant 3 : index
    %c0_189 = arith.constant 0 : index
    %c0_190 = arith.constant 0 : index
    %522 = vector.load %arg19[%c0_187, %c3_188, %c0_189, %c0_190] : memref<1x5x6x32xf32, #tpu.memory_space<vmem>>, vector<1x1x6x32xf32>
    %523 = vector.shape_cast %522 : vector<1x1x6x32xf32> to vector<6x32xf32>
    %524 = vector.shape_cast %521 : vector<6x32xf32> to vector<1x1x6x32xf32>
    tpu.vector_store %arg19[%c0_187, %c3_188, %c0_189, %c0_190], %524 {strides = array<i32>} : memref<1x5x6x32xf32, #tpu.memory_space<vmem>>, vector<1x1x6x32xf32>,
    %c0_191 = arith.constant 0 : index
    %c4 = arith.constant 4 : index
    %c0_192 = arith.constant 0 : index
    %c0_193 = arith.constant 0 : index
    %525 = vector.load %arg2[%c0_191, %c4, %c0_192, %c0_193] : memref<1x5x6x32xf32, #tpu.memory_space<vmem>>, vector<1x1x6x32xf32>
    %526 = vector.shape_cast %525 : vector<1x1x6x32xf32> to vector<6x32xf32>
    %cst_194 = arith.constant dense<0.000000e+00> : vector<6x32xf32>
    %527 = tpu.matmul %526, %2, %cst_194 {dimension_numbers = #tpu.dot_dimension_numbers<[1], [0], [0], [1], [0, 0, 1, 1], [], []>} : vector<6x32xf32>, vector<32x32xf32>, vector<6x32xf32> -> vector<6x32xf32>
    %528 = vector.broadcast %3 : vector<1x32xf32> to vector<6x32xf32>
    %529 = arith.addf %527, %528 : vector<6x32xf32>
    %cst_195 = arith.constant dense<0.000000e+00> : vector<6x32xf32>
    %530 = tpu.matmul %526, %4, %cst_195 {dimension_numbers = #tpu.dot_dimension_numbers<[1], [0], [0], [1], [0, 0, 1, 1], [], []>} : vector<6x32xf32>, vector<32x32xf32>, vector<6x32xf32> -> vector<6x32xf32>
    %531 = vector.broadcast %5 : vector<1x32xf32> to vector<6x32xf32>
    %532 = arith.addf %530, %531 : vector<6x32xf32>
    %533 = vector.extract_strided_slice %20 {offsets = [0, 0], sizes = [6, 8], strides = [1, 1]} : vector<6x32xf32> to vector<6x8xf32>
    %534 = vector.extract_strided_slice %529 {offsets = [0, 0], sizes = [6, 8], strides = [1, 1]} : vector<6x32xf32> to vector<6x8xf32>
    %cst_196 = arith.constant dense<0.000000e+00> : vector<6x6xf32>
    %535 = tpu.matmul %533, %534, %cst_196 {dimension_numbers = #tpu.dot_dimension_numbers<[1], [1], [0], [0], [0, 0, 1, 0], [], []>} : vector<6x8xf32>, vector<6x8xf32>, vector<6x6xf32> -> vector<6x6xf32>
    %cst_197 = arith.constant dense<0xFF800000> : vector<6xf32>
    %536 = vector.multi_reduction <maximumf>, %535, %cst_197 [1] : vector<6x6xf32> to vector<6xf32>
    %537 = vector.shape_cast %536 : vector<6xf32> to vector<6x1xf32>
    %538 = vector.broadcast %537 : vector<6x1xf32> to vector<6x6xf32>
    %539 = arith.subf %535, %538 : vector<6x6xf32>
    %540 = math.exp %539 : vector<6x6xf32>
    %cst_198 = arith.constant dense<0.000000e+00> : vector<6xf32>
    %541 = vector.multi_reduction <add>, %540, %cst_198 [1] : vector<6x6xf32> to vector<6xf32>
    %542 = vector.shape_cast %541 : vector<6xf32> to vector<6x1xf32>
    %543 = tpu.reciprocal %542 {approx = true} : vector<6x1xf32> -> vector<6x1xf32>
    %544 = vector.broadcast %543 : vector<6x1xf32> to vector<6x6xf32>
    %545 = arith.mulf %540, %544 : vector<6x6xf32>
    %546 = vector.extract_strided_slice %532 {offsets = [0, 0], sizes = [6, 8], strides = [1, 1]} : vector<6x32xf32> to vector<6x8xf32>
    %cst_199 = arith.constant dense<0.000000e+00> : vector<6x8xf32>
    %547 = tpu.matmul %545, %546, %cst_199 {dimension_numbers = #tpu.dot_dimension_numbers<[1], [0], [0], [1], [0, 0, 1, 1], [], []>} : vector<6x6xf32>, vector<6x8xf32>, vector<6x8xf32> -> vector<6x8xf32>
    %548 = vector.extract_strided_slice %6 {offsets = [0, 0], sizes = [8, 32], strides = [1, 1]} : vector<32x32xf32> to vector<8x32xf32>
    %cst_200 = arith.constant dense<0.000000e+00> : vector<6x32xf32>
    %549 = tpu.matmul %547, %548, %cst_200 {dimension_numbers = #tpu.dot_dimension_numbers<[1], [0], [0], [1], [0, 0, 1, 1], [], []>} : vector<6x8xf32>, vector<8x32xf32>, vector<6x32xf32> -> vector<6x32xf32>
    %550 = vector.extract_strided_slice %20 {offsets = [0, 8], sizes = [6, 8], strides = [1, 1]} : vector<6x32xf32> to vector<6x8xf32>
    %551 = vector.extract_strided_slice %529 {offsets = [0, 8], sizes = [6, 8], strides = [1, 1]} : vector<6x32xf32> to vector<6x8xf32>
    %cst_201 = arith.constant dense<0.000000e+00> : vector<6x6xf32>
    %552 = tpu.matmul %550, %551, %cst_201 {dimension_numbers = #tpu.dot_dimension_numbers<[1], [1], [0], [0], [0, 0, 1, 0], [], []>} : vector<6x8xf32>, vector<6x8xf32>, vector<6x6xf32> -> vector<6x6xf32>
    %cst_202 = arith.constant dense<0xFF800000> : vector<6xf32>
    %553 = vector.multi_reduction <maximumf>, %552, %cst_202 [1] : vector<6x6xf32> to vector<6xf32>
    %554 = vector.shape_cast %553 : vector<6xf32> to vector<6x1xf32>
    %555 = vector.broadcast %554 : vector<6x1xf32> to vector<6x6xf32>
    %556 = arith.subf %552, %555 : vector<6x6xf32>
    %557 = math.exp %556 : vector<6x6xf32>
    %cst_203 = arith.constant dense<0.000000e+00> : vector<6xf32>
    %558 = vector.multi_reduction <add>, %557, %cst_203 [1] : vector<6x6xf32> to vector<6xf32>
    %559 = vector.shape_cast %558 : vector<6xf32> to vector<6x1xf32>
    %560 = tpu.reciprocal %559 {approx = true} : vector<6x1xf32> -> vector<6x1xf32>
    %561 = vector.broadcast %560 : vector<6x1xf32> to vector<6x6xf32>
    %562 = arith.mulf %557, %561 : vector<6x6xf32>
    %563 = vector.extract_strided_slice %532 {offsets = [0, 8], sizes = [6, 8], strides = [1, 1]} : vector<6x32xf32> to vector<6x8xf32>
    %cst_204 = arith.constant dense<0.000000e+00> : vector<6x8xf32>
    %564 = tpu.matmul %562, %563, %cst_204 {dimension_numbers = #tpu.dot_dimension_numbers<[1], [0], [0], [1], [0, 0, 1, 1], [], []>} : vector<6x6xf32>, vector<6x8xf32>, vector<6x8xf32> -> vector<6x8xf32>
    %565 = vector.extract_strided_slice %6 {offsets = [8, 0], sizes = [8, 32], strides = [1, 1]} : vector<32x32xf32> to vector<8x32xf32>
    %cst_205 = arith.constant dense<0.000000e+00> : vector<6x32xf32>
    %566 = tpu.matmul %564, %565, %cst_205 {dimension_numbers = #tpu.dot_dimension_numbers<[1], [0], [0], [1], [0, 0, 1, 1], [], []>} : vector<6x8xf32>, vector<8x32xf32>, vector<6x32xf32> -> vector<6x32xf32>
    %567 = arith.addf %549, %566 : vector<6x32xf32>
    %568 = vector.extract_strided_slice %20 {offsets = [0, 16], sizes = [6, 8], strides = [1, 1]} : vector<6x32xf32> to vector<6x8xf32>
    %569 = vector.extract_strided_slice %529 {offsets = [0, 16], sizes = [6, 8], strides = [1, 1]} : vector<6x32xf32> to vector<6x8xf32>
    %cst_206 = arith.constant dense<0.000000e+00> : vector<6x6xf32>
    %570 = tpu.matmul %568, %569, %cst_206 {dimension_numbers = #tpu.dot_dimension_numbers<[1], [1], [0], [0], [0, 0, 1, 0], [], []>} : vector<6x8xf32>, vector<6x8xf32>, vector<6x6xf32> -> vector<6x6xf32>
    %cst_207 = arith.constant dense<0xFF800000> : vector<6xf32>
    %571 = vector.multi_reduction <maximumf>, %570, %cst_207 [1] : vector<6x6xf32> to vector<6xf32>
    %572 = vector.shape_cast %571 : vector<6xf32> to vector<6x1xf32>
    %573 = vector.broadcast %572 : vector<6x1xf32> to vector<6x6xf32>
    %574 = arith.subf %570, %573 : vector<6x6xf32>
    %575 = math.exp %574 : vector<6x6xf32>
    %cst_208 = arith.constant dense<0.000000e+00> : vector<6xf32>
    %576 = vector.multi_reduction <add>, %575, %cst_208 [1] : vector<6x6xf32> to vector<6xf32>
    %577 = vector.shape_cast %576 : vector<6xf32> to vector<6x1xf32>
    %578 = tpu.reciprocal %577 {approx = true} : vector<6x1xf32> -> vector<6x1xf32>
    %579 = vector.broadcast %578 : vector<6x1xf32> to vector<6x6xf32>
    %580 = arith.mulf %575, %579 : vector<6x6xf32>
    %581 = vector.extract_strided_slice %532 {offsets = [0, 16], sizes = [6, 8], strides = [1, 1]} : vector<6x32xf32> to vector<6x8xf32>
    %cst_209 = arith.constant dense<0.000000e+00> : vector<6x8xf32>
    %582 = tpu.matmul %580, %581, %cst_209 {dimension_numbers = #tpu.dot_dimension_numbers<[1], [0], [0], [1], [0, 0, 1, 1], [], []>} : vector<6x6xf32>, vector<6x8xf32>, vector<6x8xf32> -> vector<6x8xf32>
    %583 = vector.extract_strided_slice %6 {offsets = [16, 0], sizes = [8, 32], strides = [1, 1]} : vector<32x32xf32> to vector<8x32xf32>
    %cst_210 = arith.constant dense<0.000000e+00> : vector<6x32xf32>
    %584 = tpu.matmul %582, %583, %cst_210 {dimension_numbers = #tpu.dot_dimension_numbers<[1], [0], [0], [1], [0, 0, 1, 1], [], []>} : vector<6x8xf32>, vector<8x32xf32>, vector<6x32xf32> -> vector<6x32xf32>
    %585 = arith.addf %567, %584 : vector<6x32xf32>
    %586 = vector.extract_strided_slice %20 {offsets = [0, 24], sizes = [6, 8], strides = [1, 1]} : vector<6x32xf32> to vector<6x8xf32>
    %587 = vector.extract_strided_slice %529 {offsets = [0, 24], sizes = [6, 8], strides = [1, 1]} : vector<6x32xf32> to vector<6x8xf32>
    %cst_211 = arith.constant dense<0.000000e+00> : vector<6x6xf32>
    %588 = tpu.matmul %586, %587, %cst_211 {dimension_numbers = #tpu.dot_dimension_numbers<[1], [1], [0], [0], [0, 0, 1, 0], [], []>} : vector<6x8xf32>, vector<6x8xf32>, vector<6x6xf32> -> vector<6x6xf32>
    %cst_212 = arith.constant dense<0xFF800000> : vector<6xf32>
    %589 = vector.multi_reduction <maximumf>, %588, %cst_212 [1] : vector<6x6xf32> to vector<6xf32>
    %590 = vector.shape_cast %589 : vector<6xf32> to vector<6x1xf32>
    %591 = vector.broadcast %590 : vector<6x1xf32> to vector<6x6xf32>
    %592 = arith.subf %588, %591 : vector<6x6xf32>
    %593 = math.exp %592 : vector<6x6xf32>
    %cst_213 = arith.constant dense<0.000000e+00> : vector<6xf32>
    %594 = vector.multi_reduction <add>, %593, %cst_213 [1] : vector<6x6xf32> to vector<6xf32>
    %595 = vector.shape_cast %594 : vector<6xf32> to vector<6x1xf32>
    %596 = tpu.reciprocal %595 {approx = true} : vector<6x1xf32> -> vector<6x1xf32>
    %597 = vector.broadcast %596 : vector<6x1xf32> to vector<6x6xf32>
    %598 = arith.mulf %593, %597 : vector<6x6xf32>
    %599 = vector.extract_strided_slice %532 {offsets = [0, 24], sizes = [6, 8], strides = [1, 1]} : vector<6x32xf32> to vector<6x8xf32>
    %cst_214 = arith.constant dense<0.000000e+00> : vector<6x8xf32>
    %600 = tpu.matmul %598, %599, %cst_214 {dimension_numbers = #tpu.dot_dimension_numbers<[1], [0], [0], [1], [0, 0, 1, 1], [], []>} : vector<6x6xf32>, vector<6x8xf32>, vector<6x8xf32> -> vector<6x8xf32>
    %601 = vector.extract_strided_slice %6 {offsets = [24, 0], sizes = [8, 32], strides = [1, 1]} : vector<32x32xf32> to vector<8x32xf32>
    %cst_215 = arith.constant dense<0.000000e+00> : vector<6x32xf32>
    %602 = tpu.matmul %600, %601, %cst_215 {dimension_numbers = #tpu.dot_dimension_numbers<[1], [0], [0], [1], [0, 0, 1, 1], [], []>} : vector<6x8xf32>, vector<8x32xf32>, vector<6x32xf32> -> vector<6x32xf32>
    %603 = arith.addf %585, %602 : vector<6x32xf32>
    %604 = vector.broadcast %7 : vector<1x32xf32> to vector<6x32xf32>
    %605 = arith.addf %603, %604 : vector<6x32xf32>
    %606 = arith.addf %17, %605 : vector<6x32xf32>
    %607 = arith.mulf %606, %606 : vector<6x32xf32>
    %cst_216 = arith.constant dense<0.000000e+00> : vector<6xf32>
    %608 = vector.multi_reduction <add>, %607, %cst_216 [1] : vector<6x32xf32> to vector<6xf32>
    %609 = vector.shape_cast %608 : vector<6xf32> to vector<6x1xf32>
    %cst_217 = arith.constant 3.200000e+01 : f32
    %610 = vector.broadcast %cst_217 : f32 to vector<6x1xf32>
    %611 = arith.divf %609, %610 : vector<6x1xf32>
    %cst_218 = arith.constant 1.1920929E-7 : f32
    %612 = vector.broadcast %cst_218 : f32 to vector<6x1xf32>
    %613 = arith.addf %611, %612 : vector<6x1xf32>
    %614 = math.rsqrt %613 : vector<6x1xf32>
    %615 = vector.broadcast %614 : vector<6x1xf32> to vector<6x32xf32>
    %616 = arith.mulf %606, %615 : vector<6x32xf32>
    %617 = vector.broadcast %8 : vector<1x32xf32> to vector<6x32xf32>
    %618 = arith.mulf %616, %617 : vector<6x32xf32>
    %cst_219 = arith.constant dense<0.000000e+00> : vector<6x64xf32>
    %619 = tpu.matmul %618, %10, %cst_219 {dimension_numbers = #tpu.dot_dimension_numbers<[1], [0], [0], [1], [0, 0, 1, 1], [], []>} : vector<6x32xf32>, vector<32x64xf32>, vector<6x64xf32> -> vector<6x64xf32>
    %620 = vector.broadcast %11 : vector<1x64xf32> to vector<6x64xf32>
    %621 = arith.addf %619, %620 : vector<6x64xf32>
    %cst_220 = arith.constant dense<0.000000e+00> : vector<6x64xf32>
    %622 = tpu.matmul %618, %12, %cst_220 {dimension_numbers = #tpu.dot_dimension_numbers<[1], [0], [0], [1], [0, 0, 1, 1], [], []>} : vector<6x32xf32>, vector<32x64xf32>, vector<6x64xf32> -> vector<6x64xf32>
    %623 = vector.broadcast %13 : vector<1x64xf32> to vector<6x64xf32>
    %624 = arith.addf %622, %623 : vector<6x64xf32>
    %625 = arith.negf %621 : vector<6x64xf32>
    %626 = math.exp %625 : vector<6x64xf32>
    %cst_221 = arith.constant 1.000000e+00 : f32
    %627 = vector.broadcast %cst_221 : f32 to vector<6x64xf32>
    %628 = arith.addf %627, %626 : vector<6x64xf32>
    %629 = arith.divf %627, %628 : vector<6x64xf32>
    %630 = arith.mulf %621, %629 : vector<6x64xf32>
    %631 = arith.mulf %630, %624 : vector<6x64xf32>
    %cst_222 = arith.constant dense<0.000000e+00> : vector<6x32xf32>
    %632 = tpu.matmul %631, %14, %cst_222 {dimension_numbers = #tpu.dot_dimension_numbers<[1], [0], [0], [1], [0, 0, 1, 1], [], []>} : vector<6x64xf32>, vector<64x32xf32>, vector<6x32xf32> -> vector<6x32xf32>
    %633 = vector.broadcast %15 : vector<1x32xf32> to vector<6x32xf32>
    %634 = arith.addf %632, %633 : vector<6x32xf32>
    %635 = arith.addf %618, %634 : vector<6x32xf32>
    %636 = arith.mulf %635, %635 : vector<6x32xf32>
    %cst_223 = arith.constant dense<0.000000e+00> : vector<6xf32>
    %637 = vector.multi_reduction <add>, %636, %cst_223 [1] : vector<6x32xf32> to vector<6xf32>
    %638 = vector.shape_cast %637 : vector<6xf32> to vector<6x1xf32>
    %cst_224 = arith.constant 3.200000e+01 : f32
    %639 = vector.broadcast %cst_224 : f32 to vector<6x1xf32>
    %640 = arith.divf %638, %639 : vector<6x1xf32>
    %cst_225 = arith.constant 1.1920929E-7 : f32
    %641 = vector.broadcast %cst_225 : f32 to vector<6x1xf32>
    %642 = arith.addf %640, %641 : vector<6x1xf32>
    %643 = math.rsqrt %642 : vector<6x1xf32>
    %644 = vector.broadcast %643 : vector<6x1xf32> to vector<6x32xf32>
    %645 = arith.mulf %635, %644 : vector<6x32xf32>
    %646 = vector.broadcast %9 : vector<1x32xf32> to vector<6x32xf32>
    %647 = arith.mulf %645, %646 : vector<6x32xf32>
    %c0_226 = arith.constant 0 : index
    %c4_227 = arith.constant 4 : index
    %c0_228 = arith.constant 0 : index
    %c0_229 = arith.constant 0 : index
    %648 = vector.load %arg19[%c0_226, %c4_227, %c0_228, %c0_229] : memref<1x5x6x32xf32, #tpu.memory_space<vmem>>, vector<1x1x6x32xf32>
    %649 = vector.shape_cast %648 : vector<1x1x6x32xf32> to vector<6x32xf32>
    %650 = vector.shape_cast %647 : vector<6x32xf32> to vector<1x1x6x32xf32>
    tpu.vector_store %arg19[%c0_226, %c4_227, %c0_228, %c0_229], %650 {strides = array<i32>} : memref<1x5x6x32xf32, #tpu.memory_space<vmem>>, vector<1x1x6x32xf32>,
    return
  }
  func.func @transform_0(%arg0: i32) -> (i32, i32, i32) {
    %c0_i32 = arith.constant 0 : i32
    %c0_i32_0 = arith.constant 0 : i32
    %c0_i32_1 = arith.constant 0 : i32
    return %arg0, %c0_i32, %c0_i32_0 : i32, i32, i32
  }
  func.func @transform_1(%arg0: i32) -> (i32, i32, i32, i32) {
    %c0_i32 = arith.constant 0 : i32
    %c0_i32_0 = arith.constant 0 : i32
    %c0_i32_1 = arith.constant 0 : i32
    %c0_i32_2 = arith.constant 0 : i32
    return %arg0, %c0_i32, %c0_i32_0, %c0_i32_1 : i32, i32, i32, i32
  }
  func.func @transform_2(%arg0: i32) -> (i32, i32) {
    %c0_i32 = arith.constant 0 : i32
    %c0_i32_0 = arith.constant 0 : i32
    %c0_i32_1 = arith.constant 0 : i32
    return %c0_i32, %c0_i32_0 : i32, i32
  }
  func.func @transform_3(%arg0: i32) -> (i32, i32) {
    %c0_i32 = arith.constant 0 : i32
    %c0_i32_0 = arith.constant 0 : i32
    %c0_i32_1 = arith.constant 0 : i32
    return %c0_i32, %c0_i32_0 : i32, i32
  }
  func.func @transform_4(%arg0: i32) -> (i32, i32) {
    %c0_i32 = arith.constant 0 : i32
    %c0_i32_0 = arith.constant 0 : i32
    %c0_i32_1 = arith.constant 0 : i32
    return %c0_i32, %c0_i32_0 : i32, i32
  }
  func.func @transform_5(%arg0: i32) -> (i32, i32) {
    %c0_i32 = arith.constant 0 : i32
    %c0_i32_0 = arith.constant 0 : i32
    %c0_i32_1 = arith.constant 0 : i32
    return %c0_i32, %c0_i32_0 : i32, i32
  }
  func.func @transform_6(%arg0: i32) -> (i32, i32) {
    %c0_i32 = arith.constant 0 : i32
    %c0_i32_0 = arith.constant 0 : i32
    %c0_i32_1 = arith.constant 0 : i32
    return %c0_i32, %c0_i32_0 : i32, i32
  }
  func.func @transform_7(%arg0: i32) -> (i32, i32) {
    %c0_i32 = arith.constant 0 : i32
    %c0_i32_0 = arith.constant 0 : i32
    %c0_i32_1 = arith.constant 0 : i32
    return %c0_i32, %c0_i32_0 : i32, i32
  }
  func.func @transform_8(%arg0: i32) -> (i32, i32) {
    %c0_i32 = arith.constant 0 : i32
    %c0_i32_0 = arith.constant 0 : i32
    %c0_i32_1 = arith.constant 0 : i32
    return %c0_i32, %c0_i32_0 : i32, i32
  }
  func.func @transform_9(%arg0: i32) -> (i32, i32) {
    %c0_i32 = arith.constant 0 : i32
    %c0_i32_0 = arith.constant 0 : i32
    %c0_i32_1 = arith.constant 0 : i32
    return %c0_i32, %c0_i32_0 : i32, i32
  }
  func.func @transform_10(%arg0: i32) -> (i32, i32) {
    %c0_i32 = arith.constant 0 : i32
    %c0_i32_0 = arith.constant 0 : i32
    %c0_i32_1 = arith.constant 0 : i32
    return %c0_i32, %c0_i32_0 : i32, i32
  }
  func.func @transform_11(%arg0: i32) -> (i32, i32) {
    %c0_i32 = arith.constant 0 : i32
    %c0_i32_0 = arith.constant 0 : i32
    %c0_i32_1 = arith.constant 0 : i32
    return %c0_i32, %c0_i32_0 : i32, i32
  }
  func.func @transform_12(%arg0: i32) -> (i32, i32) {
    %c0_i32 = arith.constant 0 : i32
    %c0_i32_0 = arith.constant 0 : i32
    %c0_i32_1 = arith.constant 0 : i32
    return %c0_i32, %c0_i32_0 : i32, i32
  }
  func.func @transform_13(%arg0: i32) -> (i32, i32) {
    %c0_i32 = arith.constant 0 : i32
    %c0_i32_0 = arith.constant 0 : i32
    %c0_i32_1 = arith.constant 0 : i32
    return %c0_i32, %c0_i32_0 : i32, i32
  }
  func.func @transform_14(%arg0: i32) -> (i32, i32) {
    %c0_i32 = arith.constant 0 : i32
    %c0_i32_0 = arith.constant 0 : i32
    %c0_i32_1 = arith.constant 0 : i32
    return %c0_i32, %c0_i32_0 : i32, i32
  }
  func.func @transform_15(%arg0: i32) -> (i32, i32) {
    %c0_i32 = arith.constant 0 : i32
    %c0_i32_0 = arith.constant 0 : i32
    %c0_i32_1 = arith.constant 0 : i32
    return %c0_i32, %c0_i32_0 : i32, i32
  }
  func.func @transform_16(%arg0: i32) -> (i32, i32) {
    %c0_i32 = arith.constant 0 : i32
    %c0_i32_0 = arith.constant 0 : i32
    %c0_i32_1 = arith.constant 0 : i32
    return %c0_i32, %c0_i32_0 : i32, i32
  }
  func.func @transform_17(%arg0: i32) -> (i32, i32) {
    %c0_i32 = arith.constant 0 : i32
    %c0_i32_0 = arith.constant 0 : i32
    %c0_i32_1 = arith.constant 0 : i32
    return %c0_i32, %c0_i32_0 : i32, i32
  }
  func.func @transform_18(%arg0: i32) -> (i32, i32, i32, i32) {
    %c0_i32 = arith.constant 0 : i32
    %c0_i32_0 = arith.constant 0 : i32
    %c0_i32_1 = arith.constant 0 : i32
    %c0_i32_2 = arith.constant 0 : i32
    return %arg0, %c0_i32, %c0_i32_0, %c0_i32_1 : i32, i32, i32, i32
  }
}

module attributes {stable_mosaic.version = 11 : i64} {
  func.func @_t3d_cross_kernel(%arg0: i32, %arg1: memref<1x6x5x32xf32, #tpu.memory_space<vmem>>, %arg2: memref<1x5x32xf32, #tpu.memory_space<vmem>>, %arg3: memref<32x32xf32, #tpu.memory_space<vmem>>, %arg4: memref<1x32xf32, #tpu.memory_space<vmem>>, %arg5: memref<32x32xf32, #tpu.memory_space<vmem>>, %arg6: memref<1x32xf32, #tpu.memory_space<vmem>>, %arg7: memref<32x32xf32, #tpu.memory_space<vmem>>, %arg8: memref<1x32xf32, #tpu.memory_space<vmem>>, %arg9: memref<32x32xf32, #tpu.memory_space<vmem>>, %arg10: memref<1x32xf32, #tpu.memory_space<vmem>>, %arg11: memref<1x32xf32, #tpu.memory_space<vmem>>, %arg12: memref<1x6x5x32xf32, #tpu.memory_space<vmem>>) attributes {dimension_semantics = [#tpu.dimension_semantics<parallel>], iteration_bounds = array<i64: 2>, scalar_prefetch = 0 : i64, scratch_operands = 0 : i64, tpu.core_type = #tpu.core_type<tc>, window_params = [{transform_indices = @transform_0, window_bounds = array<i64: 1, 6, 5, 32>}, {transform_indices = @transform_1, window_bounds = array<i64: 1, 5, 32>}, {pipeline_mode = #tpu.pipeline_mode<synchronous>, transform_indices = @transform_2, window_bounds = array<i64: 32, 32>}, {pipeline_mode = #tpu.pipeline_mode<synchronous>, transform_indices = @transform_3, window_bounds = array<i64: 1, 32>}, {pipeline_mode = #tpu.pipeline_mode<synchronous>, transform_indices = @transform_4, window_bounds = array<i64: 32, 32>}, {pipeline_mode = #tpu.pipeline_mode<synchronous>, transform_indices = @transform_5, window_bounds = array<i64: 1, 32>}, {pipeline_mode = #tpu.pipeline_mode<synchronous>, transform_indices = @transform_6, window_bounds = array<i64: 32, 32>}, {pipeline_mode = #tpu.pipeline_mode<synchronous>, transform_indices = @transform_7, window_bounds = array<i64: 1, 32>}, {pipeline_mode = #tpu.pipeline_mode<synchronous>, transform_indices = @transform_8, window_bounds = array<i64: 32, 32>}, {pipeline_mode = #tpu.pipeline_mode<synchronous>, transform_indices = @transform_9, window_bounds = array<i64: 1, 32>}, {pipeline_mode = #tpu.pipeline_mode<synchronous>, transform_indices = @transform_10, window_bounds = array<i64: 1, 32>}, {transform_indices = @transform_11, window_bounds = array<i64: 1, 6, 5, 32>}]} {
    %c0 = arith.constant 0 : index
    %c0_0 = arith.constant 0 : index
    %0 = vector.load %arg3[%c0, %c0_0] : memref<32x32xf32, #tpu.memory_space<vmem>>, vector<32x32xf32>
    %c0_1 = arith.constant 0 : index
    %c0_2 = arith.constant 0 : index
    %1 = vector.load %arg4[%c0_1, %c0_2] : memref<1x32xf32, #tpu.memory_space<vmem>>, vector<1x32xf32>
    %c0_3 = arith.constant 0 : index
    %c0_4 = arith.constant 0 : index
    %2 = vector.load %arg5[%c0_3, %c0_4] : memref<32x32xf32, #tpu.memory_space<vmem>>, vector<32x32xf32>
    %c0_5 = arith.constant 0 : index
    %c0_6 = arith.constant 0 : index
    %3 = vector.load %arg6[%c0_5, %c0_6] : memref<1x32xf32, #tpu.memory_space<vmem>>, vector<1x32xf32>
    %c0_7 = arith.constant 0 : index
    %c0_8 = arith.constant 0 : index
    %4 = vector.load %arg7[%c0_7, %c0_8] : memref<32x32xf32, #tpu.memory_space<vmem>>, vector<32x32xf32>
    %c0_9 = arith.constant 0 : index
    %c0_10 = arith.constant 0 : index
    %5 = vector.load %arg8[%c0_9, %c0_10] : memref<1x32xf32, #tpu.memory_space<vmem>>, vector<1x32xf32>
    %c0_11 = arith.constant 0 : index
    %c0_12 = arith.constant 0 : index
    %6 = vector.load %arg9[%c0_11, %c0_12] : memref<32x32xf32, #tpu.memory_space<vmem>>, vector<32x32xf32>
    %c0_13 = arith.constant 0 : index
    %c0_14 = arith.constant 0 : index
    %7 = vector.load %arg10[%c0_13, %c0_14] : memref<1x32xf32, #tpu.memory_space<vmem>>, vector<1x32xf32>
    %c0_15 = arith.constant 0 : index
    %c0_16 = arith.constant 0 : index
    %8 = vector.load %arg11[%c0_15, %c0_16] : memref<1x32xf32, #tpu.memory_space<vmem>>, vector<1x32xf32>
    %c0_17 = arith.constant 0 : index
    %c0_18 = arith.constant 0 : index
    %c0_19 = arith.constant 0 : index
    %9 = vector.load %arg2[%c0_17, %c0_18, %c0_19] : memref<1x5x32xf32, #tpu.memory_space<vmem>>, vector<1x5x32xf32>
    %10 = vector.shape_cast %9 : vector<1x5x32xf32> to vector<5x32xf32>
    %cst = arith.constant dense<0.000000e+00> : vector<5x32xf32>
    %11 = tpu.matmul %10, %0, %cst {dimension_numbers = #tpu.dot_dimension_numbers<[1], [0], [0], [1], [0, 0, 1, 1], [], []>} : vector<5x32xf32>, vector<32x32xf32>, vector<5x32xf32> -> vector<5x32xf32>
    %12 = vector.broadcast %1 : vector<1x32xf32> to vector<5x32xf32>
    %13 = arith.addf %11, %12 : vector<5x32xf32>
    %c0_20 = arith.constant 0 : index
    %c0_21 = arith.constant 0 : index
    %c0_22 = arith.constant 0 : index
    %c0_23 = arith.constant 0 : index
    %14 = vector.load %arg1[%c0_20, %c0_21, %c0_22, %c0_23] : memref<1x6x5x32xf32, #tpu.memory_space<vmem>>, vector<1x1x5x32xf32>
    %15 = vector.shape_cast %14 : vector<1x1x5x32xf32> to vector<5x32xf32>
    %cst_24 = arith.constant dense<0.000000e+00> : vector<5x32xf32>
    %16 = tpu.matmul %15, %2, %cst_24 {dimension_numbers = #tpu.dot_dimension_numbers<[1], [0], [0], [1], [0, 0, 1, 1], [], []>} : vector<5x32xf32>, vector<32x32xf32>, vector<5x32xf32> -> vector<5x32xf32>
    %17 = vector.broadcast %3 : vector<1x32xf32> to vector<5x32xf32>
    %18 = arith.addf %16, %17 : vector<5x32xf32>
    %cst_25 = arith.constant dense<0.000000e+00> : vector<5x32xf32>
    %19 = tpu.matmul %15, %4, %cst_25 {dimension_numbers = #tpu.dot_dimension_numbers<[1], [0], [0], [1], [0, 0, 1, 1], [], []>} : vector<5x32xf32>, vector<32x32xf32>, vector<5x32xf32> -> vector<5x32xf32>
    %20 = vector.broadcast %5 : vector<1x32xf32> to vector<5x32xf32>
    %21 = arith.addf %19, %20 : vector<5x32xf32>
    %22 = vector.extract_strided_slice %13 {offsets = [0, 0], sizes = [5, 8], strides = [1, 1]} : vector<5x32xf32> to vector<5x8xf32>
    %23 = vector.extract_strided_slice %18 {offsets = [0, 0], sizes = [5, 8], strides = [1, 1]} : vector<5x32xf32> to vector<5x8xf32>
    %cst_26 = arith.constant dense<0.000000e+00> : vector<5x5xf32>
    %24 = tpu.matmul %22, %23, %cst_26 {dimension_numbers = #tpu.dot_dimension_numbers<[1], [1], [0], [0], [0, 0, 1, 0], [], []>} : vector<5x8xf32>, vector<5x8xf32>, vector<5x5xf32> -> vector<5x5xf32>
    %cst_27 = arith.constant dense<0xFF800000> : vector<5xf32>
    %25 = vector.multi_reduction <maximumf>, %24, %cst_27 [1] : vector<5x5xf32> to vector<5xf32>
    %26 = vector.shape_cast %25 : vector<5xf32> to vector<5x1xf32>
    %27 = vector.broadcast %26 : vector<5x1xf32> to vector<5x5xf32>
    %28 = arith.subf %24, %27 : vector<5x5xf32>
    %29 = math.exp %28 : vector<5x5xf32>
    %cst_28 = arith.constant dense<0.000000e+00> : vector<5xf32>
    %30 = vector.multi_reduction <add>, %29, %cst_28 [1] : vector<5x5xf32> to vector<5xf32>
    %31 = vector.shape_cast %30 : vector<5xf32> to vector<5x1xf32>
    %32 = tpu.reciprocal %31 {approx = true} : vector<5x1xf32> -> vector<5x1xf32>
    %33 = vector.broadcast %32 : vector<5x1xf32> to vector<5x5xf32>
    %34 = arith.mulf %29, %33 : vector<5x5xf32>
    %35 = vector.extract_strided_slice %21 {offsets = [0, 0], sizes = [5, 8], strides = [1, 1]} : vector<5x32xf32> to vector<5x8xf32>
    %cst_29 = arith.constant dense<0.000000e+00> : vector<5x8xf32>
    %36 = tpu.matmul %34, %35, %cst_29 {dimension_numbers = #tpu.dot_dimension_numbers<[1], [0], [0], [1], [0, 0, 1, 1], [], []>} : vector<5x5xf32>, vector<5x8xf32>, vector<5x8xf32> -> vector<5x8xf32>
    %37 = vector.extract_strided_slice %6 {offsets = [0, 0], sizes = [8, 32], strides = [1, 1]} : vector<32x32xf32> to vector<8x32xf32>
    %cst_30 = arith.constant dense<0.000000e+00> : vector<5x32xf32>
    %38 = tpu.matmul %36, %37, %cst_30 {dimension_numbers = #tpu.dot_dimension_numbers<[1], [0], [0], [1], [0, 0, 1, 1], [], []>} : vector<5x8xf32>, vector<8x32xf32>, vector<5x32xf32> -> vector<5x32xf32>
    %39 = vector.extract_strided_slice %13 {offsets = [0, 8], sizes = [5, 8], strides = [1, 1]} : vector<5x32xf32> to vector<5x8xf32>
    %40 = vector.extract_strided_slice %18 {offsets = [0, 8], sizes = [5, 8], strides = [1, 1]} : vector<5x32xf32> to vector<5x8xf32>
    %cst_31 = arith.constant dense<0.000000e+00> : vector<5x5xf32>
    %41 = tpu.matmul %39, %40, %cst_31 {dimension_numbers = #tpu.dot_dimension_numbers<[1], [1], [0], [0], [0, 0, 1, 0], [], []>} : vector<5x8xf32>, vector<5x8xf32>, vector<5x5xf32> -> vector<5x5xf32>
    %cst_32 = arith.constant dense<0xFF800000> : vector<5xf32>
    %42 = vector.multi_reduction <maximumf>, %41, %cst_32 [1] : vector<5x5xf32> to vector<5xf32>
    %43 = vector.shape_cast %42 : vector<5xf32> to vector<5x1xf32>
    %44 = vector.broadcast %43 : vector<5x1xf32> to vector<5x5xf32>
    %45 = arith.subf %41, %44 : vector<5x5xf32>
    %46 = math.exp %45 : vector<5x5xf32>
    %cst_33 = arith.constant dense<0.000000e+00> : vector<5xf32>
    %47 = vector.multi_reduction <add>, %46, %cst_33 [1] : vector<5x5xf32> to vector<5xf32>
    %48 = vector.shape_cast %47 : vector<5xf32> to vector<5x1xf32>
    %49 = tpu.reciprocal %48 {approx = true} : vector<5x1xf32> -> vector<5x1xf32>
    %50 = vector.broadcast %49 : vector<5x1xf32> to vector<5x5xf32>
    %51 = arith.mulf %46, %50 : vector<5x5xf32>
    %52 = vector.extract_strided_slice %21 {offsets = [0, 8], sizes = [5, 8], strides = [1, 1]} : vector<5x32xf32> to vector<5x8xf32>
    %cst_34 = arith.constant dense<0.000000e+00> : vector<5x8xf32>
    %53 = tpu.matmul %51, %52, %cst_34 {dimension_numbers = #tpu.dot_dimension_numbers<[1], [0], [0], [1], [0, 0, 1, 1], [], []>} : vector<5x5xf32>, vector<5x8xf32>, vector<5x8xf32> -> vector<5x8xf32>
    %54 = vector.extract_strided_slice %6 {offsets = [8, 0], sizes = [8, 32], strides = [1, 1]} : vector<32x32xf32> to vector<8x32xf32>
    %cst_35 = arith.constant dense<0.000000e+00> : vector<5x32xf32>
    %55 = tpu.matmul %53, %54, %cst_35 {dimension_numbers = #tpu.dot_dimension_numbers<[1], [0], [0], [1], [0, 0, 1, 1], [], []>} : vector<5x8xf32>, vector<8x32xf32>, vector<5x32xf32> -> vector<5x32xf32>
    %56 = arith.addf %38, %55 : vector<5x32xf32>
    %57 = vector.extract_strided_slice %13 {offsets = [0, 16], sizes = [5, 8], strides = [1, 1]} : vector<5x32xf32> to vector<5x8xf32>
    %58 = vector.extract_strided_slice %18 {offsets = [0, 16], sizes = [5, 8], strides = [1, 1]} : vector<5x32xf32> to vector<5x8xf32>
    %cst_36 = arith.constant dense<0.000000e+00> : vector<5x5xf32>
    %59 = tpu.matmul %57, %58, %cst_36 {dimension_numbers = #tpu.dot_dimension_numbers<[1], [1], [0], [0], [0, 0, 1, 0], [], []>} : vector<5x8xf32>, vector<5x8xf32>, vector<5x5xf32> -> vector<5x5xf32>
    %cst_37 = arith.constant dense<0xFF800000> : vector<5xf32>
    %60 = vector.multi_reduction <maximumf>, %59, %cst_37 [1] : vector<5x5xf32> to vector<5xf32>
    %61 = vector.shape_cast %60 : vector<5xf32> to vector<5x1xf32>
    %62 = vector.broadcast %61 : vector<5x1xf32> to vector<5x5xf32>
    %63 = arith.subf %59, %62 : vector<5x5xf32>
    %64 = math.exp %63 : vector<5x5xf32>
    %cst_38 = arith.constant dense<0.000000e+00> : vector<5xf32>
    %65 = vector.multi_reduction <add>, %64, %cst_38 [1] : vector<5x5xf32> to vector<5xf32>
    %66 = vector.shape_cast %65 : vector<5xf32> to vector<5x1xf32>
    %67 = tpu.reciprocal %66 {approx = true} : vector<5x1xf32> -> vector<5x1xf32>
    %68 = vector.broadcast %67 : vector<5x1xf32> to vector<5x5xf32>
    %69 = arith.mulf %64, %68 : vector<5x5xf32>
    %70 = vector.extract_strided_slice %21 {offsets = [0, 16], sizes = [5, 8], strides = [1, 1]} : vector<5x32xf32> to vector<5x8xf32>
    %cst_39 = arith.constant dense<0.000000e+00> : vector<5x8xf32>
    %71 = tpu.matmul %69, %70, %cst_39 {dimension_numbers = #tpu.dot_dimension_numbers<[1], [0], [0], [1], [0, 0, 1, 1], [], []>} : vector<5x5xf32>, vector<5x8xf32>, vector<5x8xf32> -> vector<5x8xf32>
    %72 = vector.extract_strided_slice %6 {offsets = [16, 0], sizes = [8, 32], strides = [1, 1]} : vector<32x32xf32> to vector<8x32xf32>
    %cst_40 = arith.constant dense<0.000000e+00> : vector<5x32xf32>
    %73 = tpu.matmul %71, %72, %cst_40 {dimension_numbers = #tpu.dot_dimension_numbers<[1], [0], [0], [1], [0, 0, 1, 1], [], []>} : vector<5x8xf32>, vector<8x32xf32>, vector<5x32xf32> -> vector<5x32xf32>
    %74 = arith.addf %56, %73 : vector<5x32xf32>
    %75 = vector.extract_strided_slice %13 {offsets = [0, 24], sizes = [5, 8], strides = [1, 1]} : vector<5x32xf32> to vector<5x8xf32>
    %76 = vector.extract_strided_slice %18 {offsets = [0, 24], sizes = [5, 8], strides = [1, 1]} : vector<5x32xf32> to vector<5x8xf32>
    %cst_41 = arith.constant dense<0.000000e+00> : vector<5x5xf32>
    %77 = tpu.matmul %75, %76, %cst_41 {dimension_numbers = #tpu.dot_dimension_numbers<[1], [1], [0], [0], [0, 0, 1, 0], [], []>} : vector<5x8xf32>, vector<5x8xf32>, vector<5x5xf32> -> vector<5x5xf32>
    %cst_42 = arith.constant dense<0xFF800000> : vector<5xf32>
    %78 = vector.multi_reduction <maximumf>, %77, %cst_42 [1] : vector<5x5xf32> to vector<5xf32>
    %79 = vector.shape_cast %78 : vector<5xf32> to vector<5x1xf32>
    %80 = vector.broadcast %79 : vector<5x1xf32> to vector<5x5xf32>
    %81 = arith.subf %77, %80 : vector<5x5xf32>
    %82 = math.exp %81 : vector<5x5xf32>
    %cst_43 = arith.constant dense<0.000000e+00> : vector<5xf32>
    %83 = vector.multi_reduction <add>, %82, %cst_43 [1] : vector<5x5xf32> to vector<5xf32>
    %84 = vector.shape_cast %83 : vector<5xf32> to vector<5x1xf32>
    %85 = tpu.reciprocal %84 {approx = true} : vector<5x1xf32> -> vector<5x1xf32>
    %86 = vector.broadcast %85 : vector<5x1xf32> to vector<5x5xf32>
    %87 = arith.mulf %82, %86 : vector<5x5xf32>
    %88 = vector.extract_strided_slice %21 {offsets = [0, 24], sizes = [5, 8], strides = [1, 1]} : vector<5x32xf32> to vector<5x8xf32>
    %cst_44 = arith.constant dense<0.000000e+00> : vector<5x8xf32>
    %89 = tpu.matmul %87, %88, %cst_44 {dimension_numbers = #tpu.dot_dimension_numbers<[1], [0], [0], [1], [0, 0, 1, 1], [], []>} : vector<5x5xf32>, vector<5x8xf32>, vector<5x8xf32> -> vector<5x8xf32>
    %90 = vector.extract_strided_slice %6 {offsets = [24, 0], sizes = [8, 32], strides = [1, 1]} : vector<32x32xf32> to vector<8x32xf32>
    %cst_45 = arith.constant dense<0.000000e+00> : vector<5x32xf32>
    %91 = tpu.matmul %89, %90, %cst_45 {dimension_numbers = #tpu.dot_dimension_numbers<[1], [0], [0], [1], [0, 0, 1, 1], [], []>} : vector<5x8xf32>, vector<8x32xf32>, vector<5x32xf32> -> vector<5x32xf32>
    %92 = arith.addf %74, %91 : vector<5x32xf32>
    %93 = vector.broadcast %7 : vector<1x32xf32> to vector<5x32xf32>
    %94 = arith.addf %92, %93 : vector<5x32xf32>
    %95 = arith.addf %15, %94 : vector<5x32xf32>
    %96 = arith.mulf %95, %95 : vector<5x32xf32>
    %cst_46 = arith.constant dense<0.000000e+00> : vector<5xf32>
    %97 = vector.multi_reduction <add>, %96, %cst_46 [1] : vector<5x32xf32> to vector<5xf32>
    %98 = vector.shape_cast %97 : vector<5xf32> to vector<5x1xf32>
    %cst_47 = arith.constant 3.200000e+01 : f32
    %99 = vector.broadcast %cst_47 : f32 to vector<5x1xf32>
    %100 = arith.divf %98, %99 : vector<5x1xf32>
    %cst_48 = arith.constant 1.1920929E-7 : f32
    %101 = vector.broadcast %cst_48 : f32 to vector<5x1xf32>
    %102 = arith.addf %100, %101 : vector<5x1xf32>
    %103 = math.rsqrt %102 : vector<5x1xf32>
    %104 = vector.broadcast %103 : vector<5x1xf32> to vector<5x32xf32>
    %105 = arith.mulf %95, %104 : vector<5x32xf32>
    %106 = vector.broadcast %8 : vector<1x32xf32> to vector<5x32xf32>
    %107 = arith.mulf %105, %106 : vector<5x32xf32>
    %c0_49 = arith.constant 0 : index
    %c0_50 = arith.constant 0 : index
    %c0_51 = arith.constant 0 : index
    %c0_52 = arith.constant 0 : index
    %108 = vector.load %arg12[%c0_49, %c0_50, %c0_51, %c0_52] : memref<1x6x5x32xf32, #tpu.memory_space<vmem>>, vector<1x1x5x32xf32>
    %109 = vector.shape_cast %108 : vector<1x1x5x32xf32> to vector<5x32xf32>
    %110 = vector.shape_cast %107 : vector<5x32xf32> to vector<1x1x5x32xf32>
    tpu.vector_store %arg12[%c0_49, %c0_50, %c0_51, %c0_52], %110 {strides = array<i32>} : memref<1x6x5x32xf32, #tpu.memory_space<vmem>>, vector<1x1x5x32xf32>,
    %c0_53 = arith.constant 0 : index
    %c1 = arith.constant 1 : index
    %c0_54 = arith.constant 0 : index
    %c0_55 = arith.constant 0 : index
    %111 = vector.load %arg1[%c0_53, %c1, %c0_54, %c0_55] : memref<1x6x5x32xf32, #tpu.memory_space<vmem>>, vector<1x1x5x32xf32>
    %112 = vector.shape_cast %111 : vector<1x1x5x32xf32> to vector<5x32xf32>
    %cst_56 = arith.constant dense<0.000000e+00> : vector<5x32xf32>
    %113 = tpu.matmul %112, %2, %cst_56 {dimension_numbers = #tpu.dot_dimension_numbers<[1], [0], [0], [1], [0, 0, 1, 1], [], []>} : vector<5x32xf32>, vector<32x32xf32>, vector<5x32xf32> -> vector<5x32xf32>
    %114 = vector.broadcast %3 : vector<1x32xf32> to vector<5x32xf32>
    %115 = arith.addf %113, %114 : vector<5x32xf32>
    %cst_57 = arith.constant dense<0.000000e+00> : vector<5x32xf32>
    %116 = tpu.matmul %112, %4, %cst_57 {dimension_numbers = #tpu.dot_dimension_numbers<[1], [0], [0], [1], [0, 0, 1, 1], [], []>} : vector<5x32xf32>, vector<32x32xf32>, vector<5x32xf32> -> vector<5x32xf32>
    %117 = vector.broadcast %5 : vector<1x32xf32> to vector<5x32xf32>
    %118 = arith.addf %116, %117 : vector<5x32xf32>
    %119 = vector.extract_strided_slice %13 {offsets = [0, 0], sizes = [5, 8], strides = [1, 1]} : vector<5x32xf32> to vector<5x8xf32>
    %120 = vector.extract_strided_slice %115 {offsets = [0, 0], sizes = [5, 8], strides = [1, 1]} : vector<5x32xf32> to vector<5x8xf32>
    %cst_58 = arith.constant dense<0.000000e+00> : vector<5x5xf32>
    %121 = tpu.matmul %119, %120, %cst_58 {dimension_numbers = #tpu.dot_dimension_numbers<[1], [1], [0], [0], [0, 0, 1, 0], [], []>} : vector<5x8xf32>, vector<5x8xf32>, vector<5x5xf32> -> vector<5x5xf32>
    %cst_59 = arith.constant dense<0xFF800000> : vector<5xf32>
    %122 = vector.multi_reduction <maximumf>, %121, %cst_59 [1] : vector<5x5xf32> to vector<5xf32>
    %123 = vector.shape_cast %122 : vector<5xf32> to vector<5x1xf32>
    %124 = vector.broadcast %123 : vector<5x1xf32> to vector<5x5xf32>
    %125 = arith.subf %121, %124 : vector<5x5xf32>
    %126 = math.exp %125 : vector<5x5xf32>
    %cst_60 = arith.constant dense<0.000000e+00> : vector<5xf32>
    %127 = vector.multi_reduction <add>, %126, %cst_60 [1] : vector<5x5xf32> to vector<5xf32>
    %128 = vector.shape_cast %127 : vector<5xf32> to vector<5x1xf32>
    %129 = tpu.reciprocal %128 {approx = true} : vector<5x1xf32> -> vector<5x1xf32>
    %130 = vector.broadcast %129 : vector<5x1xf32> to vector<5x5xf32>
    %131 = arith.mulf %126, %130 : vector<5x5xf32>
    %132 = vector.extract_strided_slice %118 {offsets = [0, 0], sizes = [5, 8], strides = [1, 1]} : vector<5x32xf32> to vector<5x8xf32>
    %cst_61 = arith.constant dense<0.000000e+00> : vector<5x8xf32>
    %133 = tpu.matmul %131, %132, %cst_61 {dimension_numbers = #tpu.dot_dimension_numbers<[1], [0], [0], [1], [0, 0, 1, 1], [], []>} : vector<5x5xf32>, vector<5x8xf32>, vector<5x8xf32> -> vector<5x8xf32>
    %134 = vector.extract_strided_slice %6 {offsets = [0, 0], sizes = [8, 32], strides = [1, 1]} : vector<32x32xf32> to vector<8x32xf32>
    %cst_62 = arith.constant dense<0.000000e+00> : vector<5x32xf32>
    %135 = tpu.matmul %133, %134, %cst_62 {dimension_numbers = #tpu.dot_dimension_numbers<[1], [0], [0], [1], [0, 0, 1, 1], [], []>} : vector<5x8xf32>, vector<8x32xf32>, vector<5x32xf32> -> vector<5x32xf32>
    %136 = vector.extract_strided_slice %13 {offsets = [0, 8], sizes = [5, 8], strides = [1, 1]} : vector<5x32xf32> to vector<5x8xf32>
    %137 = vector.extract_strided_slice %115 {offsets = [0, 8], sizes = [5, 8], strides = [1, 1]} : vector<5x32xf32> to vector<5x8xf32>
    %cst_63 = arith.constant dense<0.000000e+00> : vector<5x5xf32>
    %138 = tpu.matmul %136, %137, %cst_63 {dimension_numbers = #tpu.dot_dimension_numbers<[1], [1], [0], [0], [0, 0, 1, 0], [], []>} : vector<5x8xf32>, vector<5x8xf32>, vector<5x5xf32> -> vector<5x5xf32>
    %cst_64 = arith.constant dense<0xFF800000> : vector<5xf32>
    %139 = vector.multi_reduction <maximumf>, %138, %cst_64 [1] : vector<5x5xf32> to vector<5xf32>
    %140 = vector.shape_cast %139 : vector<5xf32> to vector<5x1xf32>
    %141 = vector.broadcast %140 : vector<5x1xf32> to vector<5x5xf32>
    %142 = arith.subf %138, %141 : vector<5x5xf32>
    %143 = math.exp %142 : vector<5x5xf32>
    %cst_65 = arith.constant dense<0.000000e+00> : vector<5xf32>
    %144 = vector.multi_reduction <add>, %143, %cst_65 [1] : vector<5x5xf32> to vector<5xf32>
    %145 = vector.shape_cast %144 : vector<5xf32> to vector<5x1xf32>
    %146 = tpu.reciprocal %145 {approx = true} : vector<5x1xf32> -> vector<5x1xf32>
    %147 = vector.broadcast %146 : vector<5x1xf32> to vector<5x5xf32>
    %148 = arith.mulf %143, %147 : vector<5x5xf32>
    %149 = vector.extract_strided_slice %118 {offsets = [0, 8], sizes = [5, 8], strides = [1, 1]} : vector<5x32xf32> to vector<5x8xf32>
    %cst_66 = arith.constant dense<0.000000e+00> : vector<5x8xf32>
    %150 = tpu.matmul %148, %149, %cst_66 {dimension_numbers = #tpu.dot_dimension_numbers<[1], [0], [0], [1], [0, 0, 1, 1], [], []>} : vector<5x5xf32>, vector<5x8xf32>, vector<5x8xf32> -> vector<5x8xf32>
    %151 = vector.extract_strided_slice %6 {offsets = [8, 0], sizes = [8, 32], strides = [1, 1]} : vector<32x32xf32> to vector<8x32xf32>
    %cst_67 = arith.constant dense<0.000000e+00> : vector<5x32xf32>
    %152 = tpu.matmul %150, %151, %cst_67 {dimension_numbers = #tpu.dot_dimension_numbers<[1], [0], [0], [1], [0, 0, 1, 1], [], []>} : vector<5x8xf32>, vector<8x32xf32>, vector<5x32xf32> -> vector<5x32xf32>
    %153 = arith.addf %135, %152 : vector<5x32xf32>
    %154 = vector.extract_strided_slice %13 {offsets = [0, 16], sizes = [5, 8], strides = [1, 1]} : vector<5x32xf32> to vector<5x8xf32>
    %155 = vector.extract_strided_slice %115 {offsets = [0, 16], sizes = [5, 8], strides = [1, 1]} : vector<5x32xf32> to vector<5x8xf32>
    %cst_68 = arith.constant dense<0.000000e+00> : vector<5x5xf32>
    %156 = tpu.matmul %154, %155, %cst_68 {dimension_numbers = #tpu.dot_dimension_numbers<[1], [1], [0], [0], [0, 0, 1, 0], [], []>} : vector<5x8xf32>, vector<5x8xf32>, vector<5x5xf32> -> vector<5x5xf32>
    %cst_69 = arith.constant dense<0xFF800000> : vector<5xf32>
    %157 = vector.multi_reduction <maximumf>, %156, %cst_69 [1] : vector<5x5xf32> to vector<5xf32>
    %158 = vector.shape_cast %157 : vector<5xf32> to vector<5x1xf32>
    %159 = vector.broadcast %158 : vector<5x1xf32> to vector<5x5xf32>
    %160 = arith.subf %156, %159 : vector<5x5xf32>
    %161 = math.exp %160 : vector<5x5xf32>
    %cst_70 = arith.constant dense<0.000000e+00> : vector<5xf32>
    %162 = vector.multi_reduction <add>, %161, %cst_70 [1] : vector<5x5xf32> to vector<5xf32>
    %163 = vector.shape_cast %162 : vector<5xf32> to vector<5x1xf32>
    %164 = tpu.reciprocal %163 {approx = true} : vector<5x1xf32> -> vector<5x1xf32>
    %165 = vector.broadcast %164 : vector<5x1xf32> to vector<5x5xf32>
    %166 = arith.mulf %161, %165 : vector<5x5xf32>
    %167 = vector.extract_strided_slice %118 {offsets = [0, 16], sizes = [5, 8], strides = [1, 1]} : vector<5x32xf32> to vector<5x8xf32>
    %cst_71 = arith.constant dense<0.000000e+00> : vector<5x8xf32>
    %168 = tpu.matmul %166, %167, %cst_71 {dimension_numbers = #tpu.dot_dimension_numbers<[1], [0], [0], [1], [0, 0, 1, 1], [], []>} : vector<5x5xf32>, vector<5x8xf32>, vector<5x8xf32> -> vector<5x8xf32>
    %169 = vector.extract_strided_slice %6 {offsets = [16, 0], sizes = [8, 32], strides = [1, 1]} : vector<32x32xf32> to vector<8x32xf32>
    %cst_72 = arith.constant dense<0.000000e+00> : vector<5x32xf32>
    %170 = tpu.matmul %168, %169, %cst_72 {dimension_numbers = #tpu.dot_dimension_numbers<[1], [0], [0], [1], [0, 0, 1, 1], [], []>} : vector<5x8xf32>, vector<8x32xf32>, vector<5x32xf32> -> vector<5x32xf32>
    %171 = arith.addf %153, %170 : vector<5x32xf32>
    %172 = vector.extract_strided_slice %13 {offsets = [0, 24], sizes = [5, 8], strides = [1, 1]} : vector<5x32xf32> to vector<5x8xf32>
    %173 = vector.extract_strided_slice %115 {offsets = [0, 24], sizes = [5, 8], strides = [1, 1]} : vector<5x32xf32> to vector<5x8xf32>
    %cst_73 = arith.constant dense<0.000000e+00> : vector<5x5xf32>
    %174 = tpu.matmul %172, %173, %cst_73 {dimension_numbers = #tpu.dot_dimension_numbers<[1], [1], [0], [0], [0, 0, 1, 0], [], []>} : vector<5x8xf32>, vector<5x8xf32>, vector<5x5xf32> -> vector<5x5xf32>
    %cst_74 = arith.constant dense<0xFF800000> : vector<5xf32>
    %175 = vector.multi_reduction <maximumf>, %174, %cst_74 [1] : vector<5x5xf32> to vector<5xf32>
    %176 = vector.shape_cast %175 : vector<5xf32> to vector<5x1xf32>
    %177 = vector.broadcast %176 : vector<5x1xf32> to vector<5x5xf32>
    %178 = arith.subf %174, %177 : vector<5x5xf32>
    %179 = math.exp %178 : vector<5x5xf32>
    %cst_75 = arith.constant dense<0.000000e+00> : vector<5xf32>
    %180 = vector.multi_reduction <add>, %179, %cst_75 [1] : vector<5x5xf32> to vector<5xf32>
    %181 = vector.shape_cast %180 : vector<5xf32> to vector<5x1xf32>
    %182 = tpu.reciprocal %181 {approx = true} : vector<5x1xf32> -> vector<5x1xf32>
    %183 = vector.broadcast %182 : vector<5x1xf32> to vector<5x5xf32>
    %184 = arith.mulf %179, %183 : vector<5x5xf32>
    %185 = vector.extract_strided_slice %118 {offsets = [0, 24], sizes = [5, 8], strides = [1, 1]} : vector<5x32xf32> to vector<5x8xf32>
    %cst_76 = arith.constant dense<0.000000e+00> : vector<5x8xf32>
    %186 = tpu.matmul %184, %185, %cst_76 {dimension_numbers = #tpu.dot_dimension_numbers<[1], [0], [0], [1], [0, 0, 1, 1], [], []>} : vector<5x5xf32>, vector<5x8xf32>, vector<5x8xf32> -> vector<5x8xf32>
    %187 = vector.extract_strided_slice %6 {offsets = [24, 0], sizes = [8, 32], strides = [1, 1]} : vector<32x32xf32> to vector<8x32xf32>
    %cst_77 = arith.constant dense<0.000000e+00> : vector<5x32xf32>
    %188 = tpu.matmul %186, %187, %cst_77 {dimension_numbers = #tpu.dot_dimension_numbers<[1], [0], [0], [1], [0, 0, 1, 1], [], []>} : vector<5x8xf32>, vector<8x32xf32>, vector<5x32xf32> -> vector<5x32xf32>
    %189 = arith.addf %171, %188 : vector<5x32xf32>
    %190 = vector.broadcast %7 : vector<1x32xf32> to vector<5x32xf32>
    %191 = arith.addf %189, %190 : vector<5x32xf32>
    %192 = arith.addf %112, %191 : vector<5x32xf32>
    %193 = arith.mulf %192, %192 : vector<5x32xf32>
    %cst_78 = arith.constant dense<0.000000e+00> : vector<5xf32>
    %194 = vector.multi_reduction <add>, %193, %cst_78 [1] : vector<5x32xf32> to vector<5xf32>
    %195 = vector.shape_cast %194 : vector<5xf32> to vector<5x1xf32>
    %cst_79 = arith.constant 3.200000e+01 : f32
    %196 = vector.broadcast %cst_79 : f32 to vector<5x1xf32>
    %197 = arith.divf %195, %196 : vector<5x1xf32>
    %cst_80 = arith.constant 1.1920929E-7 : f32
    %198 = vector.broadcast %cst_80 : f32 to vector<5x1xf32>
    %199 = arith.addf %197, %198 : vector<5x1xf32>
    %200 = math.rsqrt %199 : vector<5x1xf32>
    %201 = vector.broadcast %200 : vector<5x1xf32> to vector<5x32xf32>
    %202 = arith.mulf %192, %201 : vector<5x32xf32>
    %203 = vector.broadcast %8 : vector<1x32xf32> to vector<5x32xf32>
    %204 = arith.mulf %202, %203 : vector<5x32xf32>
    %c0_81 = arith.constant 0 : index
    %c1_82 = arith.constant 1 : index
    %c0_83 = arith.constant 0 : index
    %c0_84 = arith.constant 0 : index
    %205 = vector.load %arg12[%c0_81, %c1_82, %c0_83, %c0_84] : memref<1x6x5x32xf32, #tpu.memory_space<vmem>>, vector<1x1x5x32xf32>
    %206 = vector.shape_cast %205 : vector<1x1x5x32xf32> to vector<5x32xf32>
    %207 = vector.shape_cast %204 : vector<5x32xf32> to vector<1x1x5x32xf32>
    tpu.vector_store %arg12[%c0_81, %c1_82, %c0_83, %c0_84], %207 {strides = array<i32>} : memref<1x6x5x32xf32, #tpu.memory_space<vmem>>, vector<1x1x5x32xf32>,
    %c0_85 = arith.constant 0 : index
    %c2 = arith.constant 2 : index
    %c0_86 = arith.constant 0 : index
    %c0_87 = arith.constant 0 : index
    %208 = vector.load %arg1[%c0_85, %c2, %c0_86, %c0_87] : memref<1x6x5x32xf32, #tpu.memory_space<vmem>>, vector<1x1x5x32xf32>
    %209 = vector.shape_cast %208 : vector<1x1x5x32xf32> to vector<5x32xf32>
    %cst_88 = arith.constant dense<0.000000e+00> : vector<5x32xf32>
    %210 = tpu.matmul %209, %2, %cst_88 {dimension_numbers = #tpu.dot_dimension_numbers<[1], [0], [0], [1], [0, 0, 1, 1], [], []>} : vector<5x32xf32>, vector<32x32xf32>, vector<5x32xf32> -> vector<5x32xf32>
    %211 = vector.broadcast %3 : vector<1x32xf32> to vector<5x32xf32>
    %212 = arith.addf %210, %211 : vector<5x32xf32>
    %cst_89 = arith.constant dense<0.000000e+00> : vector<5x32xf32>
    %213 = tpu.matmul %209, %4, %cst_89 {dimension_numbers = #tpu.dot_dimension_numbers<[1], [0], [0], [1], [0, 0, 1, 1], [], []>} : vector<5x32xf32>, vector<32x32xf32>, vector<5x32xf32> -> vector<5x32xf32>
    %214 = vector.broadcast %5 : vector<1x32xf32> to vector<5x32xf32>
    %215 = arith.addf %213, %214 : vector<5x32xf32>
    %216 = vector.extract_strided_slice %13 {offsets = [0, 0], sizes = [5, 8], strides = [1, 1]} : vector<5x32xf32> to vector<5x8xf32>
    %217 = vector.extract_strided_slice %212 {offsets = [0, 0], sizes = [5, 8], strides = [1, 1]} : vector<5x32xf32> to vector<5x8xf32>
    %cst_90 = arith.constant dense<0.000000e+00> : vector<5x5xf32>
    %218 = tpu.matmul %216, %217, %cst_90 {dimension_numbers = #tpu.dot_dimension_numbers<[1], [1], [0], [0], [0, 0, 1, 0], [], []>} : vector<5x8xf32>, vector<5x8xf32>, vector<5x5xf32> -> vector<5x5xf32>
    %cst_91 = arith.constant dense<0xFF800000> : vector<5xf32>
    %219 = vector.multi_reduction <maximumf>, %218, %cst_91 [1] : vector<5x5xf32> to vector<5xf32>
    %220 = vector.shape_cast %219 : vector<5xf32> to vector<5x1xf32>
    %221 = vector.broadcast %220 : vector<5x1xf32> to vector<5x5xf32>
    %222 = arith.subf %218, %221 : vector<5x5xf32>
    %223 = math.exp %222 : vector<5x5xf32>
    %cst_92 = arith.constant dense<0.000000e+00> : vector<5xf32>
    %224 = vector.multi_reduction <add>, %223, %cst_92 [1] : vector<5x5xf32> to vector<5xf32>
    %225 = vector.shape_cast %224 : vector<5xf32> to vector<5x1xf32>
    %226 = tpu.reciprocal %225 {approx = true} : vector<5x1xf32> -> vector<5x1xf32>
    %227 = vector.broadcast %226 : vector<5x1xf32> to vector<5x5xf32>
    %228 = arith.mulf %223, %227 : vector<5x5xf32>
    %229 = vector.extract_strided_slice %215 {offsets = [0, 0], sizes = [5, 8], strides = [1, 1]} : vector<5x32xf32> to vector<5x8xf32>
    %cst_93 = arith.constant dense<0.000000e+00> : vector<5x8xf32>
    %230 = tpu.matmul %228, %229, %cst_93 {dimension_numbers = #tpu.dot_dimension_numbers<[1], [0], [0], [1], [0, 0, 1, 1], [], []>} : vector<5x5xf32>, vector<5x8xf32>, vector<5x8xf32> -> vector<5x8xf32>
    %231 = vector.extract_strided_slice %6 {offsets = [0, 0], sizes = [8, 32], strides = [1, 1]} : vector<32x32xf32> to vector<8x32xf32>
    %cst_94 = arith.constant dense<0.000000e+00> : vector<5x32xf32>
    %232 = tpu.matmul %230, %231, %cst_94 {dimension_numbers = #tpu.dot_dimension_numbers<[1], [0], [0], [1], [0, 0, 1, 1], [], []>} : vector<5x8xf32>, vector<8x32xf32>, vector<5x32xf32> -> vector<5x32xf32>
    %233 = vector.extract_strided_slice %13 {offsets = [0, 8], sizes = [5, 8], strides = [1, 1]} : vector<5x32xf32> to vector<5x8xf32>
    %234 = vector.extract_strided_slice %212 {offsets = [0, 8], sizes = [5, 8], strides = [1, 1]} : vector<5x32xf32> to vector<5x8xf32>
    %cst_95 = arith.constant dense<0.000000e+00> : vector<5x5xf32>
    %235 = tpu.matmul %233, %234, %cst_95 {dimension_numbers = #tpu.dot_dimension_numbers<[1], [1], [0], [0], [0, 0, 1, 0], [], []>} : vector<5x8xf32>, vector<5x8xf32>, vector<5x5xf32> -> vector<5x5xf32>
    %cst_96 = arith.constant dense<0xFF800000> : vector<5xf32>
    %236 = vector.multi_reduction <maximumf>, %235, %cst_96 [1] : vector<5x5xf32> to vector<5xf32>
    %237 = vector.shape_cast %236 : vector<5xf32> to vector<5x1xf32>
    %238 = vector.broadcast %237 : vector<5x1xf32> to vector<5x5xf32>
    %239 = arith.subf %235, %238 : vector<5x5xf32>
    %240 = math.exp %239 : vector<5x5xf32>
    %cst_97 = arith.constant dense<0.000000e+00> : vector<5xf32>
    %241 = vector.multi_reduction <add>, %240, %cst_97 [1] : vector<5x5xf32> to vector<5xf32>
    %242 = vector.shape_cast %241 : vector<5xf32> to vector<5x1xf32>
    %243 = tpu.reciprocal %242 {approx = true} : vector<5x1xf32> -> vector<5x1xf32>
    %244 = vector.broadcast %243 : vector<5x1xf32> to vector<5x5xf32>
    %245 = arith.mulf %240, %244 : vector<5x5xf32>
    %246 = vector.extract_strided_slice %215 {offsets = [0, 8], sizes = [5, 8], strides = [1, 1]} : vector<5x32xf32> to vector<5x8xf32>
    %cst_98 = arith.constant dense<0.000000e+00> : vector<5x8xf32>
    %247 = tpu.matmul %245, %246, %cst_98 {dimension_numbers = #tpu.dot_dimension_numbers<[1], [0], [0], [1], [0, 0, 1, 1], [], []>} : vector<5x5xf32>, vector<5x8xf32>, vector<5x8xf32> -> vector<5x8xf32>
    %248 = vector.extract_strided_slice %6 {offsets = [8, 0], sizes = [8, 32], strides = [1, 1]} : vector<32x32xf32> to vector<8x32xf32>
    %cst_99 = arith.constant dense<0.000000e+00> : vector<5x32xf32>
    %249 = tpu.matmul %247, %248, %cst_99 {dimension_numbers = #tpu.dot_dimension_numbers<[1], [0], [0], [1], [0, 0, 1, 1], [], []>} : vector<5x8xf32>, vector<8x32xf32>, vector<5x32xf32> -> vector<5x32xf32>
    %250 = arith.addf %232, %249 : vector<5x32xf32>
    %251 = vector.extract_strided_slice %13 {offsets = [0, 16], sizes = [5, 8], strides = [1, 1]} : vector<5x32xf32> to vector<5x8xf32>
    %252 = vector.extract_strided_slice %212 {offsets = [0, 16], sizes = [5, 8], strides = [1, 1]} : vector<5x32xf32> to vector<5x8xf32>
    %cst_100 = arith.constant dense<0.000000e+00> : vector<5x5xf32>
    %253 = tpu.matmul %251, %252, %cst_100 {dimension_numbers = #tpu.dot_dimension_numbers<[1], [1], [0], [0], [0, 0, 1, 0], [], []>} : vector<5x8xf32>, vector<5x8xf32>, vector<5x5xf32> -> vector<5x5xf32>
    %cst_101 = arith.constant dense<0xFF800000> : vector<5xf32>
    %254 = vector.multi_reduction <maximumf>, %253, %cst_101 [1] : vector<5x5xf32> to vector<5xf32>
    %255 = vector.shape_cast %254 : vector<5xf32> to vector<5x1xf32>
    %256 = vector.broadcast %255 : vector<5x1xf32> to vector<5x5xf32>
    %257 = arith.subf %253, %256 : vector<5x5xf32>
    %258 = math.exp %257 : vector<5x5xf32>
    %cst_102 = arith.constant dense<0.000000e+00> : vector<5xf32>
    %259 = vector.multi_reduction <add>, %258, %cst_102 [1] : vector<5x5xf32> to vector<5xf32>
    %260 = vector.shape_cast %259 : vector<5xf32> to vector<5x1xf32>
    %261 = tpu.reciprocal %260 {approx = true} : vector<5x1xf32> -> vector<5x1xf32>
    %262 = vector.broadcast %261 : vector<5x1xf32> to vector<5x5xf32>
    %263 = arith.mulf %258, %262 : vector<5x5xf32>
    %264 = vector.extract_strided_slice %215 {offsets = [0, 16], sizes = [5, 8], strides = [1, 1]} : vector<5x32xf32> to vector<5x8xf32>
    %cst_103 = arith.constant dense<0.000000e+00> : vector<5x8xf32>
    %265 = tpu.matmul %263, %264, %cst_103 {dimension_numbers = #tpu.dot_dimension_numbers<[1], [0], [0], [1], [0, 0, 1, 1], [], []>} : vector<5x5xf32>, vector<5x8xf32>, vector<5x8xf32> -> vector<5x8xf32>
    %266 = vector.extract_strided_slice %6 {offsets = [16, 0], sizes = [8, 32], strides = [1, 1]} : vector<32x32xf32> to vector<8x32xf32>
    %cst_104 = arith.constant dense<0.000000e+00> : vector<5x32xf32>
    %267 = tpu.matmul %265, %266, %cst_104 {dimension_numbers = #tpu.dot_dimension_numbers<[1], [0], [0], [1], [0, 0, 1, 1], [], []>} : vector<5x8xf32>, vector<8x32xf32>, vector<5x32xf32> -> vector<5x32xf32>
    %268 = arith.addf %250, %267 : vector<5x32xf32>
    %269 = vector.extract_strided_slice %13 {offsets = [0, 24], sizes = [5, 8], strides = [1, 1]} : vector<5x32xf32> to vector<5x8xf32>
    %270 = vector.extract_strided_slice %212 {offsets = [0, 24], sizes = [5, 8], strides = [1, 1]} : vector<5x32xf32> to vector<5x8xf32>
    %cst_105 = arith.constant dense<0.000000e+00> : vector<5x5xf32>
    %271 = tpu.matmul %269, %270, %cst_105 {dimension_numbers = #tpu.dot_dimension_numbers<[1], [1], [0], [0], [0, 0, 1, 0], [], []>} : vector<5x8xf32>, vector<5x8xf32>, vector<5x5xf32> -> vector<5x5xf32>
    %cst_106 = arith.constant dense<0xFF800000> : vector<5xf32>
    %272 = vector.multi_reduction <maximumf>, %271, %cst_106 [1] : vector<5x5xf32> to vector<5xf32>
    %273 = vector.shape_cast %272 : vector<5xf32> to vector<5x1xf32>
    %274 = vector.broadcast %273 : vector<5x1xf32> to vector<5x5xf32>
    %275 = arith.subf %271, %274 : vector<5x5xf32>
    %276 = math.exp %275 : vector<5x5xf32>
    %cst_107 = arith.constant dense<0.000000e+00> : vector<5xf32>
    %277 = vector.multi_reduction <add>, %276, %cst_107 [1] : vector<5x5xf32> to vector<5xf32>
    %278 = vector.shape_cast %277 : vector<5xf32> to vector<5x1xf32>
    %279 = tpu.reciprocal %278 {approx = true} : vector<5x1xf32> -> vector<5x1xf32>
    %280 = vector.broadcast %279 : vector<5x1xf32> to vector<5x5xf32>
    %281 = arith.mulf %276, %280 : vector<5x5xf32>
    %282 = vector.extract_strided_slice %215 {offsets = [0, 24], sizes = [5, 8], strides = [1, 1]} : vector<5x32xf32> to vector<5x8xf32>
    %cst_108 = arith.constant dense<0.000000e+00> : vector<5x8xf32>
    %283 = tpu.matmul %281, %282, %cst_108 {dimension_numbers = #tpu.dot_dimension_numbers<[1], [0], [0], [1], [0, 0, 1, 1], [], []>} : vector<5x5xf32>, vector<5x8xf32>, vector<5x8xf32> -> vector<5x8xf32>
    %284 = vector.extract_strided_slice %6 {offsets = [24, 0], sizes = [8, 32], strides = [1, 1]} : vector<32x32xf32> to vector<8x32xf32>
    %cst_109 = arith.constant dense<0.000000e+00> : vector<5x32xf32>
    %285 = tpu.matmul %283, %284, %cst_109 {dimension_numbers = #tpu.dot_dimension_numbers<[1], [0], [0], [1], [0, 0, 1, 1], [], []>} : vector<5x8xf32>, vector<8x32xf32>, vector<5x32xf32> -> vector<5x32xf32>
    %286 = arith.addf %268, %285 : vector<5x32xf32>
    %287 = vector.broadcast %7 : vector<1x32xf32> to vector<5x32xf32>
    %288 = arith.addf %286, %287 : vector<5x32xf32>
    %289 = arith.addf %209, %288 : vector<5x32xf32>
    %290 = arith.mulf %289, %289 : vector<5x32xf32>
    %cst_110 = arith.constant dense<0.000000e+00> : vector<5xf32>
    %291 = vector.multi_reduction <add>, %290, %cst_110 [1] : vector<5x32xf32> to vector<5xf32>
    %292 = vector.shape_cast %291 : vector<5xf32> to vector<5x1xf32>
    %cst_111 = arith.constant 3.200000e+01 : f32
    %293 = vector.broadcast %cst_111 : f32 to vector<5x1xf32>
    %294 = arith.divf %292, %293 : vector<5x1xf32>
    %cst_112 = arith.constant 1.1920929E-7 : f32
    %295 = vector.broadcast %cst_112 : f32 to vector<5x1xf32>
    %296 = arith.addf %294, %295 : vector<5x1xf32>
    %297 = math.rsqrt %296 : vector<5x1xf32>
    %298 = vector.broadcast %297 : vector<5x1xf32> to vector<5x32xf32>
    %299 = arith.mulf %289, %298 : vector<5x32xf32>
    %300 = vector.broadcast %8 : vector<1x32xf32> to vector<5x32xf32>
    %301 = arith.mulf %299, %300 : vector<5x32xf32>
    %c0_113 = arith.constant 0 : index
    %c2_114 = arith.constant 2 : index
    %c0_115 = arith.constant 0 : index
    %c0_116 = arith.constant 0 : index
    %302 = vector.load %arg12[%c0_113, %c2_114, %c0_115, %c0_116] : memref<1x6x5x32xf32, #tpu.memory_space<vmem>>, vector<1x1x5x32xf32>
    %303 = vector.shape_cast %302 : vector<1x1x5x32xf32> to vector<5x32xf32>
    %304 = vector.shape_cast %301 : vector<5x32xf32> to vector<1x1x5x32xf32>
    tpu.vector_store %arg12[%c0_113, %c2_114, %c0_115, %c0_116], %304 {strides = array<i32>} : memref<1x6x5x32xf32, #tpu.memory_space<vmem>>, vector<1x1x5x32xf32>,
    %c0_117 = arith.constant 0 : index
    %c3 = arith.constant 3 : index
    %c0_118 = arith.constant 0 : index
    %c0_119 = arith.constant 0 : index
    %305 = vector.load %arg1[%c0_117, %c3, %c0_118, %c0_119] : memref<1x6x5x32xf32, #tpu.memory_space<vmem>>, vector<1x1x5x32xf32>
    %306 = vector.shape_cast %305 : vector<1x1x5x32xf32> to vector<5x32xf32>
    %cst_120 = arith.constant dense<0.000000e+00> : vector<5x32xf32>
    %307 = tpu.matmul %306, %2, %cst_120 {dimension_numbers = #tpu.dot_dimension_numbers<[1], [0], [0], [1], [0, 0, 1, 1], [], []>} : vector<5x32xf32>, vector<32x32xf32>, vector<5x32xf32> -> vector<5x32xf32>
    %308 = vector.broadcast %3 : vector<1x32xf32> to vector<5x32xf32>
    %309 = arith.addf %307, %308 : vector<5x32xf32>
    %cst_121 = arith.constant dense<0.000000e+00> : vector<5x32xf32>
    %310 = tpu.matmul %306, %4, %cst_121 {dimension_numbers = #tpu.dot_dimension_numbers<[1], [0], [0], [1], [0, 0, 1, 1], [], []>} : vector<5x32xf32>, vector<32x32xf32>, vector<5x32xf32> -> vector<5x32xf32>
    %311 = vector.broadcast %5 : vector<1x32xf32> to vector<5x32xf32>
    %312 = arith.addf %310, %311 : vector<5x32xf32>
    %313 = vector.extract_strided_slice %13 {offsets = [0, 0], sizes = [5, 8], strides = [1, 1]} : vector<5x32xf32> to vector<5x8xf32>
    %314 = vector.extract_strided_slice %309 {offsets = [0, 0], sizes = [5, 8], strides = [1, 1]} : vector<5x32xf32> to vector<5x8xf32>
    %cst_122 = arith.constant dense<0.000000e+00> : vector<5x5xf32>
    %315 = tpu.matmul %313, %314, %cst_122 {dimension_numbers = #tpu.dot_dimension_numbers<[1], [1], [0], [0], [0, 0, 1, 0], [], []>} : vector<5x8xf32>, vector<5x8xf32>, vector<5x5xf32> -> vector<5x5xf32>
    %cst_123 = arith.constant dense<0xFF800000> : vector<5xf32>
    %316 = vector.multi_reduction <maximumf>, %315, %cst_123 [1] : vector<5x5xf32> to vector<5xf32>
    %317 = vector.shape_cast %316 : vector<5xf32> to vector<5x1xf32>
    %318 = vector.broadcast %317 : vector<5x1xf32> to vector<5x5xf32>
    %319 = arith.subf %315, %318 : vector<5x5xf32>
    %320 = math.exp %319 : vector<5x5xf32>
    %cst_124 = arith.constant dense<0.000000e+00> : vector<5xf32>
    %321 = vector.multi_reduction <add>, %320, %cst_124 [1] : vector<5x5xf32> to vector<5xf32>
    %322 = vector.shape_cast %321 : vector<5xf32> to vector<5x1xf32>
    %323 = tpu.reciprocal %322 {approx = true} : vector<5x1xf32> -> vector<5x1xf32>
    %324 = vector.broadcast %323 : vector<5x1xf32> to vector<5x5xf32>
    %325 = arith.mulf %320, %324 : vector<5x5xf32>
    %326 = vector.extract_strided_slice %312 {offsets = [0, 0], sizes = [5, 8], strides = [1, 1]} : vector<5x32xf32> to vector<5x8xf32>
    %cst_125 = arith.constant dense<0.000000e+00> : vector<5x8xf32>
    %327 = tpu.matmul %325, %326, %cst_125 {dimension_numbers = #tpu.dot_dimension_numbers<[1], [0], [0], [1], [0, 0, 1, 1], [], []>} : vector<5x5xf32>, vector<5x8xf32>, vector<5x8xf32> -> vector<5x8xf32>
    %328 = vector.extract_strided_slice %6 {offsets = [0, 0], sizes = [8, 32], strides = [1, 1]} : vector<32x32xf32> to vector<8x32xf32>
    %cst_126 = arith.constant dense<0.000000e+00> : vector<5x32xf32>
    %329 = tpu.matmul %327, %328, %cst_126 {dimension_numbers = #tpu.dot_dimension_numbers<[1], [0], [0], [1], [0, 0, 1, 1], [], []>} : vector<5x8xf32>, vector<8x32xf32>, vector<5x32xf32> -> vector<5x32xf32>
    %330 = vector.extract_strided_slice %13 {offsets = [0, 8], sizes = [5, 8], strides = [1, 1]} : vector<5x32xf32> to vector<5x8xf32>
    %331 = vector.extract_strided_slice %309 {offsets = [0, 8], sizes = [5, 8], strides = [1, 1]} : vector<5x32xf32> to vector<5x8xf32>
    %cst_127 = arith.constant dense<0.000000e+00> : vector<5x5xf32>
    %332 = tpu.matmul %330, %331, %cst_127 {dimension_numbers = #tpu.dot_dimension_numbers<[1], [1], [0], [0], [0, 0, 1, 0], [], []>} : vector<5x8xf32>, vector<5x8xf32>, vector<5x5xf32> -> vector<5x5xf32>
    %cst_128 = arith.constant dense<0xFF800000> : vector<5xf32>
    %333 = vector.multi_reduction <maximumf>, %332, %cst_128 [1] : vector<5x5xf32> to vector<5xf32>
    %334 = vector.shape_cast %333 : vector<5xf32> to vector<5x1xf32>
    %335 = vector.broadcast %334 : vector<5x1xf32> to vector<5x5xf32>
    %336 = arith.subf %332, %335 : vector<5x5xf32>
    %337 = math.exp %336 : vector<5x5xf32>
    %cst_129 = arith.constant dense<0.000000e+00> : vector<5xf32>
    %338 = vector.multi_reduction <add>, %337, %cst_129 [1] : vector<5x5xf32> to vector<5xf32>
    %339 = vector.shape_cast %338 : vector<5xf32> to vector<5x1xf32>
    %340 = tpu.reciprocal %339 {approx = true} : vector<5x1xf32> -> vector<5x1xf32>
    %341 = vector.broadcast %340 : vector<5x1xf32> to vector<5x5xf32>
    %342 = arith.mulf %337, %341 : vector<5x5xf32>
    %343 = vector.extract_strided_slice %312 {offsets = [0, 8], sizes = [5, 8], strides = [1, 1]} : vector<5x32xf32> to vector<5x8xf32>
    %cst_130 = arith.constant dense<0.000000e+00> : vector<5x8xf32>
    %344 = tpu.matmul %342, %343, %cst_130 {dimension_numbers = #tpu.dot_dimension_numbers<[1], [0], [0], [1], [0, 0, 1, 1], [], []>} : vector<5x5xf32>, vector<5x8xf32>, vector<5x8xf32> -> vector<5x8xf32>
    %345 = vector.extract_strided_slice %6 {offsets = [8, 0], sizes = [8, 32], strides = [1, 1]} : vector<32x32xf32> to vector<8x32xf32>
    %cst_131 = arith.constant dense<0.000000e+00> : vector<5x32xf32>
    %346 = tpu.matmul %344, %345, %cst_131 {dimension_numbers = #tpu.dot_dimension_numbers<[1], [0], [0], [1], [0, 0, 1, 1], [], []>} : vector<5x8xf32>, vector<8x32xf32>, vector<5x32xf32> -> vector<5x32xf32>
    %347 = arith.addf %329, %346 : vector<5x32xf32>
    %348 = vector.extract_strided_slice %13 {offsets = [0, 16], sizes = [5, 8], strides = [1, 1]} : vector<5x32xf32> to vector<5x8xf32>
    %349 = vector.extract_strided_slice %309 {offsets = [0, 16], sizes = [5, 8], strides = [1, 1]} : vector<5x32xf32> to vector<5x8xf32>
    %cst_132 = arith.constant dense<0.000000e+00> : vector<5x5xf32>
    %350 = tpu.matmul %348, %349, %cst_132 {dimension_numbers = #tpu.dot_dimension_numbers<[1], [1], [0], [0], [0, 0, 1, 0], [], []>} : vector<5x8xf32>, vector<5x8xf32>, vector<5x5xf32> -> vector<5x5xf32>
    %cst_133 = arith.constant dense<0xFF800000> : vector<5xf32>
    %351 = vector.multi_reduction <maximumf>, %350, %cst_133 [1] : vector<5x5xf32> to vector<5xf32>
    %352 = vector.shape_cast %351 : vector<5xf32> to vector<5x1xf32>
    %353 = vector.broadcast %352 : vector<5x1xf32> to vector<5x5xf32>
    %354 = arith.subf %350, %353 : vector<5x5xf32>
    %355 = math.exp %354 : vector<5x5xf32>
    %cst_134 = arith.constant dense<0.000000e+00> : vector<5xf32>
    %356 = vector.multi_reduction <add>, %355, %cst_134 [1] : vector<5x5xf32> to vector<5xf32>
    %357 = vector.shape_cast %356 : vector<5xf32> to vector<5x1xf32>
    %358 = tpu.reciprocal %357 {approx = true} : vector<5x1xf32> -> vector<5x1xf32>
    %359 = vector.broadcast %358 : vector<5x1xf32> to vector<5x5xf32>
    %360 = arith.mulf %355, %359 : vector<5x5xf32>
    %361 = vector.extract_strided_slice %312 {offsets = [0, 16], sizes = [5, 8], strides = [1, 1]} : vector<5x32xf32> to vector<5x8xf32>
    %cst_135 = arith.constant dense<0.000000e+00> : vector<5x8xf32>
    %362 = tpu.matmul %360, %361, %cst_135 {dimension_numbers = #tpu.dot_dimension_numbers<[1], [0], [0], [1], [0, 0, 1, 1], [], []>} : vector<5x5xf32>, vector<5x8xf32>, vector<5x8xf32> -> vector<5x8xf32>
    %363 = vector.extract_strided_slice %6 {offsets = [16, 0], sizes = [8, 32], strides = [1, 1]} : vector<32x32xf32> to vector<8x32xf32>
    %cst_136 = arith.constant dense<0.000000e+00> : vector<5x32xf32>
    %364 = tpu.matmul %362, %363, %cst_136 {dimension_numbers = #tpu.dot_dimension_numbers<[1], [0], [0], [1], [0, 0, 1, 1], [], []>} : vector<5x8xf32>, vector<8x32xf32>, vector<5x32xf32> -> vector<5x32xf32>
    %365 = arith.addf %347, %364 : vector<5x32xf32>
    %366 = vector.extract_strided_slice %13 {offsets = [0, 24], sizes = [5, 8], strides = [1, 1]} : vector<5x32xf32> to vector<5x8xf32>
    %367 = vector.extract_strided_slice %309 {offsets = [0, 24], sizes = [5, 8], strides = [1, 1]} : vector<5x32xf32> to vector<5x8xf32>
    %cst_137 = arith.constant dense<0.000000e+00> : vector<5x5xf32>
    %368 = tpu.matmul %366, %367, %cst_137 {dimension_numbers = #tpu.dot_dimension_numbers<[1], [1], [0], [0], [0, 0, 1, 0], [], []>} : vector<5x8xf32>, vector<5x8xf32>, vector<5x5xf32> -> vector<5x5xf32>
    %cst_138 = arith.constant dense<0xFF800000> : vector<5xf32>
    %369 = vector.multi_reduction <maximumf>, %368, %cst_138 [1] : vector<5x5xf32> to vector<5xf32>
    %370 = vector.shape_cast %369 : vector<5xf32> to vector<5x1xf32>
    %371 = vector.broadcast %370 : vector<5x1xf32> to vector<5x5xf32>
    %372 = arith.subf %368, %371 : vector<5x5xf32>
    %373 = math.exp %372 : vector<5x5xf32>
    %cst_139 = arith.constant dense<0.000000e+00> : vector<5xf32>
    %374 = vector.multi_reduction <add>, %373, %cst_139 [1] : vector<5x5xf32> to vector<5xf32>
    %375 = vector.shape_cast %374 : vector<5xf32> to vector<5x1xf32>
    %376 = tpu.reciprocal %375 {approx = true} : vector<5x1xf32> -> vector<5x1xf32>
    %377 = vector.broadcast %376 : vector<5x1xf32> to vector<5x5xf32>
    %378 = arith.mulf %373, %377 : vector<5x5xf32>
    %379 = vector.extract_strided_slice %312 {offsets = [0, 24], sizes = [5, 8], strides = [1, 1]} : vector<5x32xf32> to vector<5x8xf32>
    %cst_140 = arith.constant dense<0.000000e+00> : vector<5x8xf32>
    %380 = tpu.matmul %378, %379, %cst_140 {dimension_numbers = #tpu.dot_dimension_numbers<[1], [0], [0], [1], [0, 0, 1, 1], [], []>} : vector<5x5xf32>, vector<5x8xf32>, vector<5x8xf32> -> vector<5x8xf32>
    %381 = vector.extract_strided_slice %6 {offsets = [24, 0], sizes = [8, 32], strides = [1, 1]} : vector<32x32xf32> to vector<8x32xf32>
    %cst_141 = arith.constant dense<0.000000e+00> : vector<5x32xf32>
    %382 = tpu.matmul %380, %381, %cst_141 {dimension_numbers = #tpu.dot_dimension_numbers<[1], [0], [0], [1], [0, 0, 1, 1], [], []>} : vector<5x8xf32>, vector<8x32xf32>, vector<5x32xf32> -> vector<5x32xf32>
    %383 = arith.addf %365, %382 : vector<5x32xf32>
    %384 = vector.broadcast %7 : vector<1x32xf32> to vector<5x32xf32>
    %385 = arith.addf %383, %384 : vector<5x32xf32>
    %386 = arith.addf %306, %385 : vector<5x32xf32>
    %387 = arith.mulf %386, %386 : vector<5x32xf32>
    %cst_142 = arith.constant dense<0.000000e+00> : vector<5xf32>
    %388 = vector.multi_reduction <add>, %387, %cst_142 [1] : vector<5x32xf32> to vector<5xf32>
    %389 = vector.shape_cast %388 : vector<5xf32> to vector<5x1xf32>
    %cst_143 = arith.constant 3.200000e+01 : f32
    %390 = vector.broadcast %cst_143 : f32 to vector<5x1xf32>
    %391 = arith.divf %389, %390 : vector<5x1xf32>
    %cst_144 = arith.constant 1.1920929E-7 : f32
    %392 = vector.broadcast %cst_144 : f32 to vector<5x1xf32>
    %393 = arith.addf %391, %392 : vector<5x1xf32>
    %394 = math.rsqrt %393 : vector<5x1xf32>
    %395 = vector.broadcast %394 : vector<5x1xf32> to vector<5x32xf32>
    %396 = arith.mulf %386, %395 : vector<5x32xf32>
    %397 = vector.broadcast %8 : vector<1x32xf32> to vector<5x32xf32>
    %398 = arith.mulf %396, %397 : vector<5x32xf32>
    %c0_145 = arith.constant 0 : index
    %c3_146 = arith.constant 3 : index
    %c0_147 = arith.constant 0 : index
    %c0_148 = arith.constant 0 : index
    %399 = vector.load %arg12[%c0_145, %c3_146, %c0_147, %c0_148] : memref<1x6x5x32xf32, #tpu.memory_space<vmem>>, vector<1x1x5x32xf32>
    %400 = vector.shape_cast %399 : vector<1x1x5x32xf32> to vector<5x32xf32>
    %401 = vector.shape_cast %398 : vector<5x32xf32> to vector<1x1x5x32xf32>
    tpu.vector_store %arg12[%c0_145, %c3_146, %c0_147, %c0_148], %401 {strides = array<i32>} : memref<1x6x5x32xf32, #tpu.memory_space<vmem>>, vector<1x1x5x32xf32>,
    %c0_149 = arith.constant 0 : index
    %c4 = arith.constant 4 : index
    %c0_150 = arith.constant 0 : index
    %c0_151 = arith.constant 0 : index
    %402 = vector.load %arg1[%c0_149, %c4, %c0_150, %c0_151] : memref<1x6x5x32xf32, #tpu.memory_space<vmem>>, vector<1x1x5x32xf32>
    %403 = vector.shape_cast %402 : vector<1x1x5x32xf32> to vector<5x32xf32>
    %cst_152 = arith.constant dense<0.000000e+00> : vector<5x32xf32>
    %404 = tpu.matmul %403, %2, %cst_152 {dimension_numbers = #tpu.dot_dimension_numbers<[1], [0], [0], [1], [0, 0, 1, 1], [], []>} : vector<5x32xf32>, vector<32x32xf32>, vector<5x32xf32> -> vector<5x32xf32>
    %405 = vector.broadcast %3 : vector<1x32xf32> to vector<5x32xf32>
    %406 = arith.addf %404, %405 : vector<5x32xf32>
    %cst_153 = arith.constant dense<0.000000e+00> : vector<5x32xf32>
    %407 = tpu.matmul %403, %4, %cst_153 {dimension_numbers = #tpu.dot_dimension_numbers<[1], [0], [0], [1], [0, 0, 1, 1], [], []>} : vector<5x32xf32>, vector<32x32xf32>, vector<5x32xf32> -> vector<5x32xf32>
    %408 = vector.broadcast %5 : vector<1x32xf32> to vector<5x32xf32>
    %409 = arith.addf %407, %408 : vector<5x32xf32>
    %410 = vector.extract_strided_slice %13 {offsets = [0, 0], sizes = [5, 8], strides = [1, 1]} : vector<5x32xf32> to vector<5x8xf32>
    %411 = vector.extract_strided_slice %406 {offsets = [0, 0], sizes = [5, 8], strides = [1, 1]} : vector<5x32xf32> to vector<5x8xf32>
    %cst_154 = arith.constant dense<0.000000e+00> : vector<5x5xf32>
    %412 = tpu.matmul %410, %411, %cst_154 {dimension_numbers = #tpu.dot_dimension_numbers<[1], [1], [0], [0], [0, 0, 1, 0], [], []>} : vector<5x8xf32>, vector<5x8xf32>, vector<5x5xf32> -> vector<5x5xf32>
    %cst_155 = arith.constant dense<0xFF800000> : vector<5xf32>
    %413 = vector.multi_reduction <maximumf>, %412, %cst_155 [1] : vector<5x5xf32> to vector<5xf32>
    %414 = vector.shape_cast %413 : vector<5xf32> to vector<5x1xf32>
    %415 = vector.broadcast %414 : vector<5x1xf32> to vector<5x5xf32>
    %416 = arith.subf %412, %415 : vector<5x5xf32>
    %417 = math.exp %416 : vector<5x5xf32>
    %cst_156 = arith.constant dense<0.000000e+00> : vector<5xf32>
    %418 = vector.multi_reduction <add>, %417, %cst_156 [1] : vector<5x5xf32> to vector<5xf32>
    %419 = vector.shape_cast %418 : vector<5xf32> to vector<5x1xf32>
    %420 = tpu.reciprocal %419 {approx = true} : vector<5x1xf32> -> vector<5x1xf32>
    %421 = vector.broadcast %420 : vector<5x1xf32> to vector<5x5xf32>
    %422 = arith.mulf %417, %421 : vector<5x5xf32>
    %423 = vector.extract_strided_slice %409 {offsets = [0, 0], sizes = [5, 8], strides = [1, 1]} : vector<5x32xf32> to vector<5x8xf32>
    %cst_157 = arith.constant dense<0.000000e+00> : vector<5x8xf32>
    %424 = tpu.matmul %422, %423, %cst_157 {dimension_numbers = #tpu.dot_dimension_numbers<[1], [0], [0], [1], [0, 0, 1, 1], [], []>} : vector<5x5xf32>, vector<5x8xf32>, vector<5x8xf32> -> vector<5x8xf32>
    %425 = vector.extract_strided_slice %6 {offsets = [0, 0], sizes = [8, 32], strides = [1, 1]} : vector<32x32xf32> to vector<8x32xf32>
    %cst_158 = arith.constant dense<0.000000e+00> : vector<5x32xf32>
    %426 = tpu.matmul %424, %425, %cst_158 {dimension_numbers = #tpu.dot_dimension_numbers<[1], [0], [0], [1], [0, 0, 1, 1], [], []>} : vector<5x8xf32>, vector<8x32xf32>, vector<5x32xf32> -> vector<5x32xf32>
    %427 = vector.extract_strided_slice %13 {offsets = [0, 8], sizes = [5, 8], strides = [1, 1]} : vector<5x32xf32> to vector<5x8xf32>
    %428 = vector.extract_strided_slice %406 {offsets = [0, 8], sizes = [5, 8], strides = [1, 1]} : vector<5x32xf32> to vector<5x8xf32>
    %cst_159 = arith.constant dense<0.000000e+00> : vector<5x5xf32>
    %429 = tpu.matmul %427, %428, %cst_159 {dimension_numbers = #tpu.dot_dimension_numbers<[1], [1], [0], [0], [0, 0, 1, 0], [], []>} : vector<5x8xf32>, vector<5x8xf32>, vector<5x5xf32> -> vector<5x5xf32>
    %cst_160 = arith.constant dense<0xFF800000> : vector<5xf32>
    %430 = vector.multi_reduction <maximumf>, %429, %cst_160 [1] : vector<5x5xf32> to vector<5xf32>
    %431 = vector.shape_cast %430 : vector<5xf32> to vector<5x1xf32>
    %432 = vector.broadcast %431 : vector<5x1xf32> to vector<5x5xf32>
    %433 = arith.subf %429, %432 : vector<5x5xf32>
    %434 = math.exp %433 : vector<5x5xf32>
    %cst_161 = arith.constant dense<0.000000e+00> : vector<5xf32>
    %435 = vector.multi_reduction <add>, %434, %cst_161 [1] : vector<5x5xf32> to vector<5xf32>
    %436 = vector.shape_cast %435 : vector<5xf32> to vector<5x1xf32>
    %437 = tpu.reciprocal %436 {approx = true} : vector<5x1xf32> -> vector<5x1xf32>
    %438 = vector.broadcast %437 : vector<5x1xf32> to vector<5x5xf32>
    %439 = arith.mulf %434, %438 : vector<5x5xf32>
    %440 = vector.extract_strided_slice %409 {offsets = [0, 8], sizes = [5, 8], strides = [1, 1]} : vector<5x32xf32> to vector<5x8xf32>
    %cst_162 = arith.constant dense<0.000000e+00> : vector<5x8xf32>
    %441 = tpu.matmul %439, %440, %cst_162 {dimension_numbers = #tpu.dot_dimension_numbers<[1], [0], [0], [1], [0, 0, 1, 1], [], []>} : vector<5x5xf32>, vector<5x8xf32>, vector<5x8xf32> -> vector<5x8xf32>
    %442 = vector.extract_strided_slice %6 {offsets = [8, 0], sizes = [8, 32], strides = [1, 1]} : vector<32x32xf32> to vector<8x32xf32>
    %cst_163 = arith.constant dense<0.000000e+00> : vector<5x32xf32>
    %443 = tpu.matmul %441, %442, %cst_163 {dimension_numbers = #tpu.dot_dimension_numbers<[1], [0], [0], [1], [0, 0, 1, 1], [], []>} : vector<5x8xf32>, vector<8x32xf32>, vector<5x32xf32> -> vector<5x32xf32>
    %444 = arith.addf %426, %443 : vector<5x32xf32>
    %445 = vector.extract_strided_slice %13 {offsets = [0, 16], sizes = [5, 8], strides = [1, 1]} : vector<5x32xf32> to vector<5x8xf32>
    %446 = vector.extract_strided_slice %406 {offsets = [0, 16], sizes = [5, 8], strides = [1, 1]} : vector<5x32xf32> to vector<5x8xf32>
    %cst_164 = arith.constant dense<0.000000e+00> : vector<5x5xf32>
    %447 = tpu.matmul %445, %446, %cst_164 {dimension_numbers = #tpu.dot_dimension_numbers<[1], [1], [0], [0], [0, 0, 1, 0], [], []>} : vector<5x8xf32>, vector<5x8xf32>, vector<5x5xf32> -> vector<5x5xf32>
    %cst_165 = arith.constant dense<0xFF800000> : vector<5xf32>
    %448 = vector.multi_reduction <maximumf>, %447, %cst_165 [1] : vector<5x5xf32> to vector<5xf32>
    %449 = vector.shape_cast %448 : vector<5xf32> to vector<5x1xf32>
    %450 = vector.broadcast %449 : vector<5x1xf32> to vector<5x5xf32>
    %451 = arith.subf %447, %450 : vector<5x5xf32>
    %452 = math.exp %451 : vector<5x5xf32>
    %cst_166 = arith.constant dense<0.000000e+00> : vector<5xf32>
    %453 = vector.multi_reduction <add>, %452, %cst_166 [1] : vector<5x5xf32> to vector<5xf32>
    %454 = vector.shape_cast %453 : vector<5xf32> to vector<5x1xf32>
    %455 = tpu.reciprocal %454 {approx = true} : vector<5x1xf32> -> vector<5x1xf32>
    %456 = vector.broadcast %455 : vector<5x1xf32> to vector<5x5xf32>
    %457 = arith.mulf %452, %456 : vector<5x5xf32>
    %458 = vector.extract_strided_slice %409 {offsets = [0, 16], sizes = [5, 8], strides = [1, 1]} : vector<5x32xf32> to vector<5x8xf32>
    %cst_167 = arith.constant dense<0.000000e+00> : vector<5x8xf32>
    %459 = tpu.matmul %457, %458, %cst_167 {dimension_numbers = #tpu.dot_dimension_numbers<[1], [0], [0], [1], [0, 0, 1, 1], [], []>} : vector<5x5xf32>, vector<5x8xf32>, vector<5x8xf32> -> vector<5x8xf32>
    %460 = vector.extract_strided_slice %6 {offsets = [16, 0], sizes = [8, 32], strides = [1, 1]} : vector<32x32xf32> to vector<8x32xf32>
    %cst_168 = arith.constant dense<0.000000e+00> : vector<5x32xf32>
    %461 = tpu.matmul %459, %460, %cst_168 {dimension_numbers = #tpu.dot_dimension_numbers<[1], [0], [0], [1], [0, 0, 1, 1], [], []>} : vector<5x8xf32>, vector<8x32xf32>, vector<5x32xf32> -> vector<5x32xf32>
    %462 = arith.addf %444, %461 : vector<5x32xf32>
    %463 = vector.extract_strided_slice %13 {offsets = [0, 24], sizes = [5, 8], strides = [1, 1]} : vector<5x32xf32> to vector<5x8xf32>
    %464 = vector.extract_strided_slice %406 {offsets = [0, 24], sizes = [5, 8], strides = [1, 1]} : vector<5x32xf32> to vector<5x8xf32>
    %cst_169 = arith.constant dense<0.000000e+00> : vector<5x5xf32>
    %465 = tpu.matmul %463, %464, %cst_169 {dimension_numbers = #tpu.dot_dimension_numbers<[1], [1], [0], [0], [0, 0, 1, 0], [], []>} : vector<5x8xf32>, vector<5x8xf32>, vector<5x5xf32> -> vector<5x5xf32>
    %cst_170 = arith.constant dense<0xFF800000> : vector<5xf32>
    %466 = vector.multi_reduction <maximumf>, %465, %cst_170 [1] : vector<5x5xf32> to vector<5xf32>
    %467 = vector.shape_cast %466 : vector<5xf32> to vector<5x1xf32>
    %468 = vector.broadcast %467 : vector<5x1xf32> to vector<5x5xf32>
    %469 = arith.subf %465, %468 : vector<5x5xf32>
    %470 = math.exp %469 : vector<5x5xf32>
    %cst_171 = arith.constant dense<0.000000e+00> : vector<5xf32>
    %471 = vector.multi_reduction <add>, %470, %cst_171 [1] : vector<5x5xf32> to vector<5xf32>
    %472 = vector.shape_cast %471 : vector<5xf32> to vector<5x1xf32>
    %473 = tpu.reciprocal %472 {approx = true} : vector<5x1xf32> -> vector<5x1xf32>
    %474 = vector.broadcast %473 : vector<5x1xf32> to vector<5x5xf32>
    %475 = arith.mulf %470, %474 : vector<5x5xf32>
    %476 = vector.extract_strided_slice %409 {offsets = [0, 24], sizes = [5, 8], strides = [1, 1]} : vector<5x32xf32> to vector<5x8xf32>
    %cst_172 = arith.constant dense<0.000000e+00> : vector<5x8xf32>
    %477 = tpu.matmul %475, %476, %cst_172 {dimension_numbers = #tpu.dot_dimension_numbers<[1], [0], [0], [1], [0, 0, 1, 1], [], []>} : vector<5x5xf32>, vector<5x8xf32>, vector<5x8xf32> -> vector<5x8xf32>
    %478 = vector.extract_strided_slice %6 {offsets = [24, 0], sizes = [8, 32], strides = [1, 1]} : vector<32x32xf32> to vector<8x32xf32>
    %cst_173 = arith.constant dense<0.000000e+00> : vector<5x32xf32>
    %479 = tpu.matmul %477, %478, %cst_173 {dimension_numbers = #tpu.dot_dimension_numbers<[1], [0], [0], [1], [0, 0, 1, 1], [], []>} : vector<5x8xf32>, vector<8x32xf32>, vector<5x32xf32> -> vector<5x32xf32>
    %480 = arith.addf %462, %479 : vector<5x32xf32>
    %481 = vector.broadcast %7 : vector<1x32xf32> to vector<5x32xf32>
    %482 = arith.addf %480, %481 : vector<5x32xf32>
    %483 = arith.addf %403, %482 : vector<5x32xf32>
    %484 = arith.mulf %483, %483 : vector<5x32xf32>
    %cst_174 = arith.constant dense<0.000000e+00> : vector<5xf32>
    %485 = vector.multi_reduction <add>, %484, %cst_174 [1] : vector<5x32xf32> to vector<5xf32>
    %486 = vector.shape_cast %485 : vector<5xf32> to vector<5x1xf32>
    %cst_175 = arith.constant 3.200000e+01 : f32
    %487 = vector.broadcast %cst_175 : f32 to vector<5x1xf32>
    %488 = arith.divf %486, %487 : vector<5x1xf32>
    %cst_176 = arith.constant 1.1920929E-7 : f32
    %489 = vector.broadcast %cst_176 : f32 to vector<5x1xf32>
    %490 = arith.addf %488, %489 : vector<5x1xf32>
    %491 = math.rsqrt %490 : vector<5x1xf32>
    %492 = vector.broadcast %491 : vector<5x1xf32> to vector<5x32xf32>
    %493 = arith.mulf %483, %492 : vector<5x32xf32>
    %494 = vector.broadcast %8 : vector<1x32xf32> to vector<5x32xf32>
    %495 = arith.mulf %493, %494 : vector<5x32xf32>
    %c0_177 = arith.constant 0 : index
    %c4_178 = arith.constant 4 : index
    %c0_179 = arith.constant 0 : index
    %c0_180 = arith.constant 0 : index
    %496 = vector.load %arg12[%c0_177, %c4_178, %c0_179, %c0_180] : memref<1x6x5x32xf32, #tpu.memory_space<vmem>>, vector<1x1x5x32xf32>
    %497 = vector.shape_cast %496 : vector<1x1x5x32xf32> to vector<5x32xf32>
    %498 = vector.shape_cast %495 : vector<5x32xf32> to vector<1x1x5x32xf32>
    tpu.vector_store %arg12[%c0_177, %c4_178, %c0_179, %c0_180], %498 {strides = array<i32>} : memref<1x6x5x32xf32, #tpu.memory_space<vmem>>, vector<1x1x5x32xf32>,
    %c0_181 = arith.constant 0 : index
    %c5 = arith.constant 5 : index
    %c0_182 = arith.constant 0 : index
    %c0_183 = arith.constant 0 : index
    %499 = vector.load %arg1[%c0_181, %c5, %c0_182, %c0_183] : memref<1x6x5x32xf32, #tpu.memory_space<vmem>>, vector<1x1x5x32xf32>
    %500 = vector.shape_cast %499 : vector<1x1x5x32xf32> to vector<5x32xf32>
    %cst_184 = arith.constant dense<0.000000e+00> : vector<5x32xf32>
    %501 = tpu.matmul %500, %2, %cst_184 {dimension_numbers = #tpu.dot_dimension_numbers<[1], [0], [0], [1], [0, 0, 1, 1], [], []>} : vector<5x32xf32>, vector<32x32xf32>, vector<5x32xf32> -> vector<5x32xf32>
    %502 = vector.broadcast %3 : vector<1x32xf32> to vector<5x32xf32>
    %503 = arith.addf %501, %502 : vector<5x32xf32>
    %cst_185 = arith.constant dense<0.000000e+00> : vector<5x32xf32>
    %504 = tpu.matmul %500, %4, %cst_185 {dimension_numbers = #tpu.dot_dimension_numbers<[1], [0], [0], [1], [0, 0, 1, 1], [], []>} : vector<5x32xf32>, vector<32x32xf32>, vector<5x32xf32> -> vector<5x32xf32>
    %505 = vector.broadcast %5 : vector<1x32xf32> to vector<5x32xf32>
    %506 = arith.addf %504, %505 : vector<5x32xf32>
    %507 = vector.extract_strided_slice %13 {offsets = [0, 0], sizes = [5, 8], strides = [1, 1]} : vector<5x32xf32> to vector<5x8xf32>
    %508 = vector.extract_strided_slice %503 {offsets = [0, 0], sizes = [5, 8], strides = [1, 1]} : vector<5x32xf32> to vector<5x8xf32>
    %cst_186 = arith.constant dense<0.000000e+00> : vector<5x5xf32>
    %509 = tpu.matmul %507, %508, %cst_186 {dimension_numbers = #tpu.dot_dimension_numbers<[1], [1], [0], [0], [0, 0, 1, 0], [], []>} : vector<5x8xf32>, vector<5x8xf32>, vector<5x5xf32> -> vector<5x5xf32>
    %cst_187 = arith.constant dense<0xFF800000> : vector<5xf32>
    %510 = vector.multi_reduction <maximumf>, %509, %cst_187 [1] : vector<5x5xf32> to vector<5xf32>
    %511 = vector.shape_cast %510 : vector<5xf32> to vector<5x1xf32>
    %512 = vector.broadcast %511 : vector<5x1xf32> to vector<5x5xf32>
    %513 = arith.subf %509, %512 : vector<5x5xf32>
    %514 = math.exp %513 : vector<5x5xf32>
    %cst_188 = arith.constant dense<0.000000e+00> : vector<5xf32>
    %515 = vector.multi_reduction <add>, %514, %cst_188 [1] : vector<5x5xf32> to vector<5xf32>
    %516 = vector.shape_cast %515 : vector<5xf32> to vector<5x1xf32>
    %517 = tpu.reciprocal %516 {approx = true} : vector<5x1xf32> -> vector<5x1xf32>
    %518 = vector.broadcast %517 : vector<5x1xf32> to vector<5x5xf32>
    %519 = arith.mulf %514, %518 : vector<5x5xf32>
    %520 = vector.extract_strided_slice %506 {offsets = [0, 0], sizes = [5, 8], strides = [1, 1]} : vector<5x32xf32> to vector<5x8xf32>
    %cst_189 = arith.constant dense<0.000000e+00> : vector<5x8xf32>
    %521 = tpu.matmul %519, %520, %cst_189 {dimension_numbers = #tpu.dot_dimension_numbers<[1], [0], [0], [1], [0, 0, 1, 1], [], []>} : vector<5x5xf32>, vector<5x8xf32>, vector<5x8xf32> -> vector<5x8xf32>
    %522 = vector.extract_strided_slice %6 {offsets = [0, 0], sizes = [8, 32], strides = [1, 1]} : vector<32x32xf32> to vector<8x32xf32>
    %cst_190 = arith.constant dense<0.000000e+00> : vector<5x32xf32>
    %523 = tpu.matmul %521, %522, %cst_190 {dimension_numbers = #tpu.dot_dimension_numbers<[1], [0], [0], [1], [0, 0, 1, 1], [], []>} : vector<5x8xf32>, vector<8x32xf32>, vector<5x32xf32> -> vector<5x32xf32>
    %524 = vector.extract_strided_slice %13 {offsets = [0, 8], sizes = [5, 8], strides = [1, 1]} : vector<5x32xf32> to vector<5x8xf32>
    %525 = vector.extract_strided_slice %503 {offsets = [0, 8], sizes = [5, 8], strides = [1, 1]} : vector<5x32xf32> to vector<5x8xf32>
    %cst_191 = arith.constant dense<0.000000e+00> : vector<5x5xf32>
    %526 = tpu.matmul %524, %525, %cst_191 {dimension_numbers = #tpu.dot_dimension_numbers<[1], [1], [0], [0], [0, 0, 1, 0], [], []>} : vector<5x8xf32>, vector<5x8xf32>, vector<5x5xf32> -> vector<5x5xf32>
    %cst_192 = arith.constant dense<0xFF800000> : vector<5xf32>
    %527 = vector.multi_reduction <maximumf>, %526, %cst_192 [1] : vector<5x5xf32> to vector<5xf32>
    %528 = vector.shape_cast %527 : vector<5xf32> to vector<5x1xf32>
    %529 = vector.broadcast %528 : vector<5x1xf32> to vector<5x5xf32>
    %530 = arith.subf %526, %529 : vector<5x5xf32>
    %531 = math.exp %530 : vector<5x5xf32>
    %cst_193 = arith.constant dense<0.000000e+00> : vector<5xf32>
    %532 = vector.multi_reduction <add>, %531, %cst_193 [1] : vector<5x5xf32> to vector<5xf32>
    %533 = vector.shape_cast %532 : vector<5xf32> to vector<5x1xf32>
    %534 = tpu.reciprocal %533 {approx = true} : vector<5x1xf32> -> vector<5x1xf32>
    %535 = vector.broadcast %534 : vector<5x1xf32> to vector<5x5xf32>
    %536 = arith.mulf %531, %535 : vector<5x5xf32>
    %537 = vector.extract_strided_slice %506 {offsets = [0, 8], sizes = [5, 8], strides = [1, 1]} : vector<5x32xf32> to vector<5x8xf32>
    %cst_194 = arith.constant dense<0.000000e+00> : vector<5x8xf32>
    %538 = tpu.matmul %536, %537, %cst_194 {dimension_numbers = #tpu.dot_dimension_numbers<[1], [0], [0], [1], [0, 0, 1, 1], [], []>} : vector<5x5xf32>, vector<5x8xf32>, vector<5x8xf32> -> vector<5x8xf32>
    %539 = vector.extract_strided_slice %6 {offsets = [8, 0], sizes = [8, 32], strides = [1, 1]} : vector<32x32xf32> to vector<8x32xf32>
    %cst_195 = arith.constant dense<0.000000e+00> : vector<5x32xf32>
    %540 = tpu.matmul %538, %539, %cst_195 {dimension_numbers = #tpu.dot_dimension_numbers<[1], [0], [0], [1], [0, 0, 1, 1], [], []>} : vector<5x8xf32>, vector<8x32xf32>, vector<5x32xf32> -> vector<5x32xf32>
    %541 = arith.addf %523, %540 : vector<5x32xf32>
    %542 = vector.extract_strided_slice %13 {offsets = [0, 16], sizes = [5, 8], strides = [1, 1]} : vector<5x32xf32> to vector<5x8xf32>
    %543 = vector.extract_strided_slice %503 {offsets = [0, 16], sizes = [5, 8], strides = [1, 1]} : vector<5x32xf32> to vector<5x8xf32>
    %cst_196 = arith.constant dense<0.000000e+00> : vector<5x5xf32>
    %544 = tpu.matmul %542, %543, %cst_196 {dimension_numbers = #tpu.dot_dimension_numbers<[1], [1], [0], [0], [0, 0, 1, 0], [], []>} : vector<5x8xf32>, vector<5x8xf32>, vector<5x5xf32> -> vector<5x5xf32>
    %cst_197 = arith.constant dense<0xFF800000> : vector<5xf32>
    %545 = vector.multi_reduction <maximumf>, %544, %cst_197 [1] : vector<5x5xf32> to vector<5xf32>
    %546 = vector.shape_cast %545 : vector<5xf32> to vector<5x1xf32>
    %547 = vector.broadcast %546 : vector<5x1xf32> to vector<5x5xf32>
    %548 = arith.subf %544, %547 : vector<5x5xf32>
    %549 = math.exp %548 : vector<5x5xf32>
    %cst_198 = arith.constant dense<0.000000e+00> : vector<5xf32>
    %550 = vector.multi_reduction <add>, %549, %cst_198 [1] : vector<5x5xf32> to vector<5xf32>
    %551 = vector.shape_cast %550 : vector<5xf32> to vector<5x1xf32>
    %552 = tpu.reciprocal %551 {approx = true} : vector<5x1xf32> -> vector<5x1xf32>
    %553 = vector.broadcast %552 : vector<5x1xf32> to vector<5x5xf32>
    %554 = arith.mulf %549, %553 : vector<5x5xf32>
    %555 = vector.extract_strided_slice %506 {offsets = [0, 16], sizes = [5, 8], strides = [1, 1]} : vector<5x32xf32> to vector<5x8xf32>
    %cst_199 = arith.constant dense<0.000000e+00> : vector<5x8xf32>
    %556 = tpu.matmul %554, %555, %cst_199 {dimension_numbers = #tpu.dot_dimension_numbers<[1], [0], [0], [1], [0, 0, 1, 1], [], []>} : vector<5x5xf32>, vector<5x8xf32>, vector<5x8xf32> -> vector<5x8xf32>
    %557 = vector.extract_strided_slice %6 {offsets = [16, 0], sizes = [8, 32], strides = [1, 1]} : vector<32x32xf32> to vector<8x32xf32>
    %cst_200 = arith.constant dense<0.000000e+00> : vector<5x32xf32>
    %558 = tpu.matmul %556, %557, %cst_200 {dimension_numbers = #tpu.dot_dimension_numbers<[1], [0], [0], [1], [0, 0, 1, 1], [], []>} : vector<5x8xf32>, vector<8x32xf32>, vector<5x32xf32> -> vector<5x32xf32>
    %559 = arith.addf %541, %558 : vector<5x32xf32>
    %560 = vector.extract_strided_slice %13 {offsets = [0, 24], sizes = [5, 8], strides = [1, 1]} : vector<5x32xf32> to vector<5x8xf32>
    %561 = vector.extract_strided_slice %503 {offsets = [0, 24], sizes = [5, 8], strides = [1, 1]} : vector<5x32xf32> to vector<5x8xf32>
    %cst_201 = arith.constant dense<0.000000e+00> : vector<5x5xf32>
    %562 = tpu.matmul %560, %561, %cst_201 {dimension_numbers = #tpu.dot_dimension_numbers<[1], [1], [0], [0], [0, 0, 1, 0], [], []>} : vector<5x8xf32>, vector<5x8xf32>, vector<5x5xf32> -> vector<5x5xf32>
    %cst_202 = arith.constant dense<0xFF800000> : vector<5xf32>
    %563 = vector.multi_reduction <maximumf>, %562, %cst_202 [1] : vector<5x5xf32> to vector<5xf32>
    %564 = vector.shape_cast %563 : vector<5xf32> to vector<5x1xf32>
    %565 = vector.broadcast %564 : vector<5x1xf32> to vector<5x5xf32>
    %566 = arith.subf %562, %565 : vector<5x5xf32>
    %567 = math.exp %566 : vector<5x5xf32>
    %cst_203 = arith.constant dense<0.000000e+00> : vector<5xf32>
    %568 = vector.multi_reduction <add>, %567, %cst_203 [1] : vector<5x5xf32> to vector<5xf32>
    %569 = vector.shape_cast %568 : vector<5xf32> to vector<5x1xf32>
    %570 = tpu.reciprocal %569 {approx = true} : vector<5x1xf32> -> vector<5x1xf32>
    %571 = vector.broadcast %570 : vector<5x1xf32> to vector<5x5xf32>
    %572 = arith.mulf %567, %571 : vector<5x5xf32>
    %573 = vector.extract_strided_slice %506 {offsets = [0, 24], sizes = [5, 8], strides = [1, 1]} : vector<5x32xf32> to vector<5x8xf32>
    %cst_204 = arith.constant dense<0.000000e+00> : vector<5x8xf32>
    %574 = tpu.matmul %572, %573, %cst_204 {dimension_numbers = #tpu.dot_dimension_numbers<[1], [0], [0], [1], [0, 0, 1, 1], [], []>} : vector<5x5xf32>, vector<5x8xf32>, vector<5x8xf32> -> vector<5x8xf32>
    %575 = vector.extract_strided_slice %6 {offsets = [24, 0], sizes = [8, 32], strides = [1, 1]} : vector<32x32xf32> to vector<8x32xf32>
    %cst_205 = arith.constant dense<0.000000e+00> : vector<5x32xf32>
    %576 = tpu.matmul %574, %575, %cst_205 {dimension_numbers = #tpu.dot_dimension_numbers<[1], [0], [0], [1], [0, 0, 1, 1], [], []>} : vector<5x8xf32>, vector<8x32xf32>, vector<5x32xf32> -> vector<5x32xf32>
    %577 = arith.addf %559, %576 : vector<5x32xf32>
    %578 = vector.broadcast %7 : vector<1x32xf32> to vector<5x32xf32>
    %579 = arith.addf %577, %578 : vector<5x32xf32>
    %580 = arith.addf %500, %579 : vector<5x32xf32>
    %581 = arith.mulf %580, %580 : vector<5x32xf32>
    %cst_206 = arith.constant dense<0.000000e+00> : vector<5xf32>
    %582 = vector.multi_reduction <add>, %581, %cst_206 [1] : vector<5x32xf32> to vector<5xf32>
    %583 = vector.shape_cast %582 : vector<5xf32> to vector<5x1xf32>
    %cst_207 = arith.constant 3.200000e+01 : f32
    %584 = vector.broadcast %cst_207 : f32 to vector<5x1xf32>
    %585 = arith.divf %583, %584 : vector<5x1xf32>
    %cst_208 = arith.constant 1.1920929E-7 : f32
    %586 = vector.broadcast %cst_208 : f32 to vector<5x1xf32>
    %587 = arith.addf %585, %586 : vector<5x1xf32>
    %588 = math.rsqrt %587 : vector<5x1xf32>
    %589 = vector.broadcast %588 : vector<5x1xf32> to vector<5x32xf32>
    %590 = arith.mulf %580, %589 : vector<5x32xf32>
    %591 = vector.broadcast %8 : vector<1x32xf32> to vector<5x32xf32>
    %592 = arith.mulf %590, %591 : vector<5x32xf32>
    %c0_209 = arith.constant 0 : index
    %c5_210 = arith.constant 5 : index
    %c0_211 = arith.constant 0 : index
    %c0_212 = arith.constant 0 : index
    %593 = vector.load %arg12[%c0_209, %c5_210, %c0_211, %c0_212] : memref<1x6x5x32xf32, #tpu.memory_space<vmem>>, vector<1x1x5x32xf32>
    %594 = vector.shape_cast %593 : vector<1x1x5x32xf32> to vector<5x32xf32>
    %595 = vector.shape_cast %592 : vector<5x32xf32> to vector<1x1x5x32xf32>
    tpu.vector_store %arg12[%c0_209, %c5_210, %c0_211, %c0_212], %595 {strides = array<i32>} : memref<1x6x5x32xf32, #tpu.memory_space<vmem>>, vector<1x1x5x32xf32>,
    return
  }
  func.func @transform_0(%arg0: i32) -> (i32, i32, i32, i32) {
    %c0_i32 = arith.constant 0 : i32
    %c0_i32_0 = arith.constant 0 : i32
    %c0_i32_1 = arith.constant 0 : i32
    %c0_i32_2 = arith.constant 0 : i32
    return %arg0, %c0_i32, %c0_i32_0, %c0_i32_1 : i32, i32, i32, i32
  }
  func.func @transform_1(%arg0: i32) -> (i32, i32, i32) {
    %c0_i32 = arith.constant 0 : i32
    %c0_i32_0 = arith.constant 0 : i32
    %c0_i32_1 = arith.constant 0 : i32
    return %arg0, %c0_i32, %c0_i32_0 : i32, i32, i32
  }
  func.func @transform_2(%arg0: i32) -> (i32, i32) {
    %c0_i32 = arith.constant 0 : i32
    %c0_i32_0 = arith.constant 0 : i32
    %c0_i32_1 = arith.constant 0 : i32
    return %c0_i32, %c0_i32_0 : i32, i32
  }
  func.func @transform_3(%arg0: i32) -> (i32, i32) {
    %c0_i32 = arith.constant 0 : i32
    %c0_i32_0 = arith.constant 0 : i32
    %c0_i32_1 = arith.constant 0 : i32
    return %c0_i32, %c0_i32_0 : i32, i32
  }
  func.func @transform_4(%arg0: i32) -> (i32, i32) {
    %c0_i32 = arith.constant 0 : i32
    %c0_i32_0 = arith.constant 0 : i32
    %c0_i32_1 = arith.constant 0 : i32
    return %c0_i32, %c0_i32_0 : i32, i32
  }
  func.func @transform_5(%arg0: i32) -> (i32, i32) {
    %c0_i32 = arith.constant 0 : i32
    %c0_i32_0 = arith.constant 0 : i32
    %c0_i32_1 = arith.constant 0 : i32
    return %c0_i32, %c0_i32_0 : i32, i32
  }
  func.func @transform_6(%arg0: i32) -> (i32, i32) {
    %c0_i32 = arith.constant 0 : i32
    %c0_i32_0 = arith.constant 0 : i32
    %c0_i32_1 = arith.constant 0 : i32
    return %c0_i32, %c0_i32_0 : i32, i32
  }
  func.func @transform_7(%arg0: i32) -> (i32, i32) {
    %c0_i32 = arith.constant 0 : i32
    %c0_i32_0 = arith.constant 0 : i32
    %c0_i32_1 = arith.constant 0 : i32
    return %c0_i32, %c0_i32_0 : i32, i32
  }
  func.func @transform_8(%arg0: i32) -> (i32, i32) {
    %c0_i32 = arith.constant 0 : i32
    %c0_i32_0 = arith.constant 0 : i32
    %c0_i32_1 = arith.constant 0 : i32
    return %c0_i32, %c0_i32_0 : i32, i32
  }
  func.func @transform_9(%arg0: i32) -> (i32, i32) {
    %c0_i32 = arith.constant 0 : i32
    %c0_i32_0 = arith.constant 0 : i32
    %c0_i32_1 = arith.constant 0 : i32
    return %c0_i32, %c0_i32_0 : i32, i32
  }
  func.func @transform_10(%arg0: i32) -> (i32, i32) {
    %c0_i32 = arith.constant 0 : i32
    %c0_i32_0 = arith.constant 0 : i32
    %c0_i32_1 = arith.constant 0 : i32
    return %c0_i32, %c0_i32_0 : i32, i32
  }
  func.func @transform_11(%arg0: i32) -> (i32, i32, i32, i32) {
    %c0_i32 = arith.constant 0 : i32
    %c0_i32_0 = arith.constant 0 : i32
    %c0_i32_1 = arith.constant 0 : i32
    %c0_i32_2 = arith.constant 0 : i32
    return %arg0, %c0_i32, %c0_i32_0, %c0_i32_1 : i32, i32, i32, i32
  }
}

module attributes {stable_mosaic.version = 11 : i64} {
  func.func @_tlayer_kernel(%arg0: i32, %arg1: memref<1x6x32xf32, #tpu.memory_space<vmem>>, %arg2: memref<1x1x6x32xf32, #tpu.memory_space<vmem>>, %arg3: memref<32x32xf32, #tpu.memory_space<vmem>>, %arg4: memref<1x32xf32, #tpu.memory_space<vmem>>, %arg5: memref<32x32xf32, #tpu.memory_space<vmem>>, %arg6: memref<1x32xf32, #tpu.memory_space<vmem>>, %arg7: memref<32x32xf32, #tpu.memory_space<vmem>>, %arg8: memref<1x32xf32, #tpu.memory_space<vmem>>, %arg9: memref<32x32xf32, #tpu.memory_space<vmem>>, %arg10: memref<1x32xf32, #tpu.memory_space<vmem>>, %arg11: memref<1x32xf32, #tpu.memory_space<vmem>>, %arg12: memref<32x64xf32, #tpu.memory_space<vmem>>, %arg13: memref<1x64xf32, #tpu.memory_space<vmem>>, %arg14: memref<32x64xf32, #tpu.memory_space<vmem>>, %arg15: memref<1x64xf32, #tpu.memory_space<vmem>>, %arg16: memref<64x32xf32, #tpu.memory_space<vmem>>, %arg17: memref<1x32xf32, #tpu.memory_space<vmem>>, %arg18: memref<1x32xf32, #tpu.memory_space<vmem>>, %arg19: memref<1x1x6x32xf32, #tpu.memory_space<vmem>>) attributes {dimension_semantics = [#tpu.dimension_semantics<parallel>], iteration_bounds = array<i64: 2>, scalar_prefetch = 0 : i64, scratch_operands = 0 : i64, tpu.core_type = #tpu.core_type<tc>, window_params = [{transform_indices = @transform_0, window_bounds = array<i64: 1, 6, 32>}, {transform_indices = @transform_1, window_bounds = array<i64: 1, 1, 6, 32>}, {pipeline_mode = #tpu.pipeline_mode<synchronous>, transform_indices = @transform_2, window_bounds = array<i64: 32, 32>}, {pipeline_mode = #tpu.pipeline_mode<synchronous>, transform_indices = @transform_3, window_bounds = array<i64: 1, 32>}, {pipeline_mode = #tpu.pipeline_mode<synchronous>, transform_indices = @transform_4, window_bounds = array<i64: 32, 32>}, {pipeline_mode = #tpu.pipeline_mode<synchronous>, transform_indices = @transform_5, window_bounds = array<i64: 1, 32>}, {pipeline_mode = #tpu.pipeline_mode<synchronous>, transform_indices = @transform_6, window_bounds = array<i64: 32, 32>}, {pipeline_mode = #tpu.pipeline_mode<synchronous>, transform_indices = @transform_7, window_bounds = array<i64: 1, 32>}, {pipeline_mode = #tpu.pipeline_mode<synchronous>, transform_indices = @transform_8, window_bounds = array<i64: 32, 32>}, {pipeline_mode = #tpu.pipeline_mode<synchronous>, transform_indices = @transform_9, window_bounds = array<i64: 1, 32>}, {pipeline_mode = #tpu.pipeline_mode<synchronous>, transform_indices = @transform_10, window_bounds = array<i64: 1, 32>}, {pipeline_mode = #tpu.pipeline_mode<synchronous>, transform_indices = @transform_11, window_bounds = array<i64: 32, 64>}, {pipeline_mode = #tpu.pipeline_mode<synchronous>, transform_indices = @transform_12, window_bounds = array<i64: 1, 64>}, {pipeline_mode = #tpu.pipeline_mode<synchronous>, transform_indices = @transform_13, window_bounds = array<i64: 32, 64>}, {pipeline_mode = #tpu.pipeline_mode<synchronous>, transform_indices = @transform_14, window_bounds = array<i64: 1, 64>}, {pipeline_mode = #tpu.pipeline_mode<synchronous>, transform_indices = @transform_15, window_bounds = array<i64: 64, 32>}, {pipeline_mode = #tpu.pipeline_mode<synchronous>, transform_indices = @transform_16, window_bounds = array<i64: 1, 32>}, {pipeline_mode = #tpu.pipeline_mode<synchronous>, transform_indices = @transform_17, window_bounds = array<i64: 1, 32>}, {transform_indices = @transform_18, window_bounds = array<i64: 1, 1, 6, 32>}]} {
    %c0 = arith.constant 0 : index
    %c0_0 = arith.constant 0 : index
    %0 = vector.load %arg3[%c0, %c0_0] : memref<32x32xf32, #tpu.memory_space<vmem>>, vector<32x32xf32>
    %c0_1 = arith.constant 0 : index
    %c0_2 = arith.constant 0 : index
    %1 = vector.load %arg4[%c0_1, %c0_2] : memref<1x32xf32, #tpu.memory_space<vmem>>, vector<1x32xf32>
    %c0_3 = arith.constant 0 : index
    %c0_4 = arith.constant 0 : index
    %2 = vector.load %arg5[%c0_3, %c0_4] : memref<32x32xf32, #tpu.memory_space<vmem>>, vector<32x32xf32>
    %c0_5 = arith.constant 0 : index
    %c0_6 = arith.constant 0 : index
    %3 = vector.load %arg6[%c0_5, %c0_6] : memref<1x32xf32, #tpu.memory_space<vmem>>, vector<1x32xf32>
    %c0_7 = arith.constant 0 : index
    %c0_8 = arith.constant 0 : index
    %4 = vector.load %arg7[%c0_7, %c0_8] : memref<32x32xf32, #tpu.memory_space<vmem>>, vector<32x32xf32>
    %c0_9 = arith.constant 0 : index
    %c0_10 = arith.constant 0 : index
    %5 = vector.load %arg8[%c0_9, %c0_10] : memref<1x32xf32, #tpu.memory_space<vmem>>, vector<1x32xf32>
    %c0_11 = arith.constant 0 : index
    %c0_12 = arith.constant 0 : index
    %6 = vector.load %arg9[%c0_11, %c0_12] : memref<32x32xf32, #tpu.memory_space<vmem>>, vector<32x32xf32>
    %c0_13 = arith.constant 0 : index
    %c0_14 = arith.constant 0 : index
    %7 = vector.load %arg10[%c0_13, %c0_14] : memref<1x32xf32, #tpu.memory_space<vmem>>, vector<1x32xf32>
    %c0_15 = arith.constant 0 : index
    %c0_16 = arith.constant 0 : index
    %8 = vector.load %arg11[%c0_15, %c0_16] : memref<1x32xf32, #tpu.memory_space<vmem>>, vector<1x32xf32>
    %c0_17 = arith.constant 0 : index
    %c0_18 = arith.constant 0 : index
    %9 = vector.load %arg18[%c0_17, %c0_18] : memref<1x32xf32, #tpu.memory_space<vmem>>, vector<1x32xf32>
    %c0_19 = arith.constant 0 : index
    %c0_20 = arith.constant 0 : index
    %10 = vector.load %arg12[%c0_19, %c0_20] : memref<32x64xf32, #tpu.memory_space<vmem>>, vector<32x64xf32>
    %c0_21 = arith.constant 0 : index
    %c0_22 = arith.constant 0 : index
    %11 = vector.load %arg13[%c0_21, %c0_22] : memref<1x64xf32, #tpu.memory_space<vmem>>, vector<1x64xf32>
    %c0_23 = arith.constant 0 : index
    %c0_24 = arith.constant 0 : index
    %12 = vector.load %arg14[%c0_23, %c0_24] : memref<32x64xf32, #tpu.memory_space<vmem>>, vector<32x64xf32>
    %c0_25 = arith.constant 0 : index
    %c0_26 = arith.constant 0 : index
    %13 = vector.load %arg15[%c0_25, %c0_26] : memref<1x64xf32, #tpu.memory_space<vmem>>, vector<1x64xf32>
    %c0_27 = arith.constant 0 : index
    %c0_28 = arith.constant 0 : index
    %14 = vector.load %arg16[%c0_27, %c0_28] : memref<64x32xf32, #tpu.memory_space<vmem>>, vector<64x32xf32>
    %c0_29 = arith.constant 0 : index
    %c0_30 = arith.constant 0 : index
    %15 = vector.load %arg17[%c0_29, %c0_30] : memref<1x32xf32, #tpu.memory_space<vmem>>, vector<1x32xf32>
    %c0_31 = arith.constant 0 : index
    %c0_32 = arith.constant 0 : index
    %c0_33 = arith.constant 0 : index
    %16 = vector.load %arg1[%c0_31, %c0_32, %c0_33] : memref<1x6x32xf32, #tpu.memory_space<vmem>>, vector<1x6x32xf32>
    %17 = vector.shape_cast %16 : vector<1x6x32xf32> to vector<6x32xf32>
    %cst = arith.constant dense<0.000000e+00> : vector<6x32xf32>
    %18 = tpu.matmul %17, %0, %cst {dimension_numbers = #tpu.dot_dimension_numbers<[1], [0], [0], [1], [0, 0, 1, 1], [], []>} : vector<6x32xf32>, vector<32x32xf32>, vector<6x32xf32> -> vector<6x32xf32>
    %19 = vector.broadcast %1 : vector<1x32xf32> to vector<6x32xf32>
    %20 = arith.addf %18, %19 : vector<6x32xf32>
    %c0_34 = arith.constant 0 : index
    %c0_35 = arith.constant 0 : index
    %c0_36 = arith.constant 0 : index
    %c0_37 = arith.constant 0 : index
    %21 = vector.load %arg2[%c0_34, %c0_35, %c0_36, %c0_37] : memref<1x1x6x32xf32, #tpu.memory_space<vmem>>, vector<1x1x6x32xf32>
    %22 = vector.shape_cast %21 : vector<1x1x6x32xf32> to vector<6x32xf32>
    %cst_38 = arith.constant dense<0.000000e+00> : vector<6x32xf32>
    %23 = tpu.matmul %22, %2, %cst_38 {dimension_numbers = #tpu.dot_dimension_numbers<[1], [0], [0], [1], [0, 0, 1, 1], [], []>} : vector<6x32xf32>, vector<32x32xf32>, vector<6x32xf32> -> vector<6x32xf32>
    %24 = vector.broadcast %3 : vector<1x32xf32> to vector<6x32xf32>
    %25 = arith.addf %23, %24 : vector<6x32xf32>
    %cst_39 = arith.constant dense<0.000000e+00> : vector<6x32xf32>
    %26 = tpu.matmul %22, %4, %cst_39 {dimension_numbers = #tpu.dot_dimension_numbers<[1], [0], [0], [1], [0, 0, 1, 1], [], []>} : vector<6x32xf32>, vector<32x32xf32>, vector<6x32xf32> -> vector<6x32xf32>
    %27 = vector.broadcast %5 : vector<1x32xf32> to vector<6x32xf32>
    %28 = arith.addf %26, %27 : vector<6x32xf32>
    %29 = vector.extract_strided_slice %20 {offsets = [0, 0], sizes = [6, 8], strides = [1, 1]} : vector<6x32xf32> to vector<6x8xf32>
    %30 = vector.extract_strided_slice %25 {offsets = [0, 0], sizes = [6, 8], strides = [1, 1]} : vector<6x32xf32> to vector<6x8xf32>
    %cst_40 = arith.constant dense<0.000000e+00> : vector<6x6xf32>
    %31 = tpu.matmul %29, %30, %cst_40 {dimension_numbers = #tpu.dot_dimension_numbers<[1], [1], [0], [0], [0, 0, 1, 0], [], []>} : vector<6x8xf32>, vector<6x8xf32>, vector<6x6xf32> -> vector<6x6xf32>
    %cst_41 = arith.constant dense<0xFF800000> : vector<6xf32>
    %32 = vector.multi_reduction <maximumf>, %31, %cst_41 [1] : vector<6x6xf32> to vector<6xf32>
    %33 = vector.shape_cast %32 : vector<6xf32> to vector<6x1xf32>
    %34 = vector.broadcast %33 : vector<6x1xf32> to vector<6x6xf32>
    %35 = arith.subf %31, %34 : vector<6x6xf32>
    %36 = math.exp %35 : vector<6x6xf32>
    %cst_42 = arith.constant dense<0.000000e+00> : vector<6xf32>
    %37 = vector.multi_reduction <add>, %36, %cst_42 [1] : vector<6x6xf32> to vector<6xf32>
    %38 = vector.shape_cast %37 : vector<6xf32> to vector<6x1xf32>
    %39 = tpu.reciprocal %38 {approx = true} : vector<6x1xf32> -> vector<6x1xf32>
    %40 = vector.broadcast %39 : vector<6x1xf32> to vector<6x6xf32>
    %41 = arith.mulf %36, %40 : vector<6x6xf32>
    %42 = vector.extract_strided_slice %28 {offsets = [0, 0], sizes = [6, 8], strides = [1, 1]} : vector<6x32xf32> to vector<6x8xf32>
    %cst_43 = arith.constant dense<0.000000e+00> : vector<6x8xf32>
    %43 = tpu.matmul %41, %42, %cst_43 {dimension_numbers = #tpu.dot_dimension_numbers<[1], [0], [0], [1], [0, 0, 1, 1], [], []>} : vector<6x6xf32>, vector<6x8xf32>, vector<6x8xf32> -> vector<6x8xf32>
    %44 = vector.extract_strided_slice %6 {offsets = [0, 0], sizes = [8, 32], strides = [1, 1]} : vector<32x32xf32> to vector<8x32xf32>
    %cst_44 = arith.constant dense<0.000000e+00> : vector<6x32xf32>
    %45 = tpu.matmul %43, %44, %cst_44 {dimension_numbers = #tpu.dot_dimension_numbers<[1], [0], [0], [1], [0, 0, 1, 1], [], []>} : vector<6x8xf32>, vector<8x32xf32>, vector<6x32xf32> -> vector<6x32xf32>
    %46 = vector.extract_strided_slice %20 {offsets = [0, 8], sizes = [6, 8], strides = [1, 1]} : vector<6x32xf32> to vector<6x8xf32>
    %47 = vector.extract_strided_slice %25 {offsets = [0, 8], sizes = [6, 8], strides = [1, 1]} : vector<6x32xf32> to vector<6x8xf32>
    %cst_45 = arith.constant dense<0.000000e+00> : vector<6x6xf32>
    %48 = tpu.matmul %46, %47, %cst_45 {dimension_numbers = #tpu.dot_dimension_numbers<[1], [1], [0], [0], [0, 0, 1, 0], [], []>} : vector<6x8xf32>, vector<6x8xf32>, vector<6x6xf32> -> vector<6x6xf32>
    %cst_46 = arith.constant dense<0xFF800000> : vector<6xf32>
    %49 = vector.multi_reduction <maximumf>, %48, %cst_46 [1] : vector<6x6xf32> to vector<6xf32>
    %50 = vector.shape_cast %49 : vector<6xf32> to vector<6x1xf32>
    %51 = vector.broadcast %50 : vector<6x1xf32> to vector<6x6xf32>
    %52 = arith.subf %48, %51 : vector<6x6xf32>
    %53 = math.exp %52 : vector<6x6xf32>
    %cst_47 = arith.constant dense<0.000000e+00> : vector<6xf32>
    %54 = vector.multi_reduction <add>, %53, %cst_47 [1] : vector<6x6xf32> to vector<6xf32>
    %55 = vector.shape_cast %54 : vector<6xf32> to vector<6x1xf32>
    %56 = tpu.reciprocal %55 {approx = true} : vector<6x1xf32> -> vector<6x1xf32>
    %57 = vector.broadcast %56 : vector<6x1xf32> to vector<6x6xf32>
    %58 = arith.mulf %53, %57 : vector<6x6xf32>
    %59 = vector.extract_strided_slice %28 {offsets = [0, 8], sizes = [6, 8], strides = [1, 1]} : vector<6x32xf32> to vector<6x8xf32>
    %cst_48 = arith.constant dense<0.000000e+00> : vector<6x8xf32>
    %60 = tpu.matmul %58, %59, %cst_48 {dimension_numbers = #tpu.dot_dimension_numbers<[1], [0], [0], [1], [0, 0, 1, 1], [], []>} : vector<6x6xf32>, vector<6x8xf32>, vector<6x8xf32> -> vector<6x8xf32>
    %61 = vector.extract_strided_slice %6 {offsets = [8, 0], sizes = [8, 32], strides = [1, 1]} : vector<32x32xf32> to vector<8x32xf32>
    %cst_49 = arith.constant dense<0.000000e+00> : vector<6x32xf32>
    %62 = tpu.matmul %60, %61, %cst_49 {dimension_numbers = #tpu.dot_dimension_numbers<[1], [0], [0], [1], [0, 0, 1, 1], [], []>} : vector<6x8xf32>, vector<8x32xf32>, vector<6x32xf32> -> vector<6x32xf32>
    %63 = arith.addf %45, %62 : vector<6x32xf32>
    %64 = vector.extract_strided_slice %20 {offsets = [0, 16], sizes = [6, 8], strides = [1, 1]} : vector<6x32xf32> to vector<6x8xf32>
    %65 = vector.extract_strided_slice %25 {offsets = [0, 16], sizes = [6, 8], strides = [1, 1]} : vector<6x32xf32> to vector<6x8xf32>
    %cst_50 = arith.constant dense<0.000000e+00> : vector<6x6xf32>
    %66 = tpu.matmul %64, %65, %cst_50 {dimension_numbers = #tpu.dot_dimension_numbers<[1], [1], [0], [0], [0, 0, 1, 0], [], []>} : vector<6x8xf32>, vector<6x8xf32>, vector<6x6xf32> -> vector<6x6xf32>
    %cst_51 = arith.constant dense<0xFF800000> : vector<6xf32>
    %67 = vector.multi_reduction <maximumf>, %66, %cst_51 [1] : vector<6x6xf32> to vector<6xf32>
    %68 = vector.shape_cast %67 : vector<6xf32> to vector<6x1xf32>
    %69 = vector.broadcast %68 : vector<6x1xf32> to vector<6x6xf32>
    %70 = arith.subf %66, %69 : vector<6x6xf32>
    %71 = math.exp %70 : vector<6x6xf32>
    %cst_52 = arith.constant dense<0.000000e+00> : vector<6xf32>
    %72 = vector.multi_reduction <add>, %71, %cst_52 [1] : vector<6x6xf32> to vector<6xf32>
    %73 = vector.shape_cast %72 : vector<6xf32> to vector<6x1xf32>
    %74 = tpu.reciprocal %73 {approx = true} : vector<6x1xf32> -> vector<6x1xf32>
    %75 = vector.broadcast %74 : vector<6x1xf32> to vector<6x6xf32>
    %76 = arith.mulf %71, %75 : vector<6x6xf32>
    %77 = vector.extract_strided_slice %28 {offsets = [0, 16], sizes = [6, 8], strides = [1, 1]} : vector<6x32xf32> to vector<6x8xf32>
    %cst_53 = arith.constant dense<0.000000e+00> : vector<6x8xf32>
    %78 = tpu.matmul %76, %77, %cst_53 {dimension_numbers = #tpu.dot_dimension_numbers<[1], [0], [0], [1], [0, 0, 1, 1], [], []>} : vector<6x6xf32>, vector<6x8xf32>, vector<6x8xf32> -> vector<6x8xf32>
    %79 = vector.extract_strided_slice %6 {offsets = [16, 0], sizes = [8, 32], strides = [1, 1]} : vector<32x32xf32> to vector<8x32xf32>
    %cst_54 = arith.constant dense<0.000000e+00> : vector<6x32xf32>
    %80 = tpu.matmul %78, %79, %cst_54 {dimension_numbers = #tpu.dot_dimension_numbers<[1], [0], [0], [1], [0, 0, 1, 1], [], []>} : vector<6x8xf32>, vector<8x32xf32>, vector<6x32xf32> -> vector<6x32xf32>
    %81 = arith.addf %63, %80 : vector<6x32xf32>
    %82 = vector.extract_strided_slice %20 {offsets = [0, 24], sizes = [6, 8], strides = [1, 1]} : vector<6x32xf32> to vector<6x8xf32>
    %83 = vector.extract_strided_slice %25 {offsets = [0, 24], sizes = [6, 8], strides = [1, 1]} : vector<6x32xf32> to vector<6x8xf32>
    %cst_55 = arith.constant dense<0.000000e+00> : vector<6x6xf32>
    %84 = tpu.matmul %82, %83, %cst_55 {dimension_numbers = #tpu.dot_dimension_numbers<[1], [1], [0], [0], [0, 0, 1, 0], [], []>} : vector<6x8xf32>, vector<6x8xf32>, vector<6x6xf32> -> vector<6x6xf32>
    %cst_56 = arith.constant dense<0xFF800000> : vector<6xf32>
    %85 = vector.multi_reduction <maximumf>, %84, %cst_56 [1] : vector<6x6xf32> to vector<6xf32>
    %86 = vector.shape_cast %85 : vector<6xf32> to vector<6x1xf32>
    %87 = vector.broadcast %86 : vector<6x1xf32> to vector<6x6xf32>
    %88 = arith.subf %84, %87 : vector<6x6xf32>
    %89 = math.exp %88 : vector<6x6xf32>
    %cst_57 = arith.constant dense<0.000000e+00> : vector<6xf32>
    %90 = vector.multi_reduction <add>, %89, %cst_57 [1] : vector<6x6xf32> to vector<6xf32>
    %91 = vector.shape_cast %90 : vector<6xf32> to vector<6x1xf32>
    %92 = tpu.reciprocal %91 {approx = true} : vector<6x1xf32> -> vector<6x1xf32>
    %93 = vector.broadcast %92 : vector<6x1xf32> to vector<6x6xf32>
    %94 = arith.mulf %89, %93 : vector<6x6xf32>
    %95 = vector.extract_strided_slice %28 {offsets = [0, 24], sizes = [6, 8], strides = [1, 1]} : vector<6x32xf32> to vector<6x8xf32>
    %cst_58 = arith.constant dense<0.000000e+00> : vector<6x8xf32>
    %96 = tpu.matmul %94, %95, %cst_58 {dimension_numbers = #tpu.dot_dimension_numbers<[1], [0], [0], [1], [0, 0, 1, 1], [], []>} : vector<6x6xf32>, vector<6x8xf32>, vector<6x8xf32> -> vector<6x8xf32>
    %97 = vector.extract_strided_slice %6 {offsets = [24, 0], sizes = [8, 32], strides = [1, 1]} : vector<32x32xf32> to vector<8x32xf32>
    %cst_59 = arith.constant dense<0.000000e+00> : vector<6x32xf32>
    %98 = tpu.matmul %96, %97, %cst_59 {dimension_numbers = #tpu.dot_dimension_numbers<[1], [0], [0], [1], [0, 0, 1, 1], [], []>} : vector<6x8xf32>, vector<8x32xf32>, vector<6x32xf32> -> vector<6x32xf32>
    %99 = arith.addf %81, %98 : vector<6x32xf32>
    %100 = vector.broadcast %7 : vector<1x32xf32> to vector<6x32xf32>
    %101 = arith.addf %99, %100 : vector<6x32xf32>
    %102 = arith.addf %17, %101 : vector<6x32xf32>
    %103 = arith.mulf %102, %102 : vector<6x32xf32>
    %cst_60 = arith.constant dense<0.000000e+00> : vector<6xf32>
    %104 = vector.multi_reduction <add>, %103, %cst_60 [1] : vector<6x32xf32> to vector<6xf32>
    %105 = vector.shape_cast %104 : vector<6xf32> to vector<6x1xf32>
    %cst_61 = arith.constant 3.200000e+01 : f32
    %106 = vector.broadcast %cst_61 : f32 to vector<6x1xf32>
    %107 = arith.divf %105, %106 : vector<6x1xf32>
    %cst_62 = arith.constant 1.1920929E-7 : f32
    %108 = vector.broadcast %cst_62 : f32 to vector<6x1xf32>
    %109 = arith.addf %107, %108 : vector<6x1xf32>
    %110 = math.rsqrt %109 : vector<6x1xf32>
    %111 = vector.broadcast %110 : vector<6x1xf32> to vector<6x32xf32>
    %112 = arith.mulf %102, %111 : vector<6x32xf32>
    %113 = vector.broadcast %8 : vector<1x32xf32> to vector<6x32xf32>
    %114 = arith.mulf %112, %113 : vector<6x32xf32>
    %cst_63 = arith.constant dense<0.000000e+00> : vector<6x64xf32>
    %115 = tpu.matmul %114, %10, %cst_63 {dimension_numbers = #tpu.dot_dimension_numbers<[1], [0], [0], [1], [0, 0, 1, 1], [], []>} : vector<6x32xf32>, vector<32x64xf32>, vector<6x64xf32> -> vector<6x64xf32>
    %116 = vector.broadcast %11 : vector<1x64xf32> to vector<6x64xf32>
    %117 = arith.addf %115, %116 : vector<6x64xf32>
    %cst_64 = arith.constant dense<0.000000e+00> : vector<6x64xf32>
    %118 = tpu.matmul %114, %12, %cst_64 {dimension_numbers = #tpu.dot_dimension_numbers<[1], [0], [0], [1], [0, 0, 1, 1], [], []>} : vector<6x32xf32>, vector<32x64xf32>, vector<6x64xf32> -> vector<6x64xf32>
    %119 = vector.broadcast %13 : vector<1x64xf32> to vector<6x64xf32>
    %120 = arith.addf %118, %119 : vector<6x64xf32>
    %121 = arith.negf %117 : vector<6x64xf32>
    %122 = math.exp %121 : vector<6x64xf32>
    %cst_65 = arith.constant 1.000000e+00 : f32
    %123 = vector.broadcast %cst_65 : f32 to vector<6x64xf32>
    %124 = arith.addf %123, %122 : vector<6x64xf32>
    %125 = arith.divf %123, %124 : vector<6x64xf32>
    %126 = arith.mulf %117, %125 : vector<6x64xf32>
    %127 = arith.mulf %126, %120 : vector<6x64xf32>
    %cst_66 = arith.constant dense<0.000000e+00> : vector<6x32xf32>
    %128 = tpu.matmul %127, %14, %cst_66 {dimension_numbers = #tpu.dot_dimension_numbers<[1], [0], [0], [1], [0, 0, 1, 1], [], []>} : vector<6x64xf32>, vector<64x32xf32>, vector<6x32xf32> -> vector<6x32xf32>
    %129 = vector.broadcast %15 : vector<1x32xf32> to vector<6x32xf32>
    %130 = arith.addf %128, %129 : vector<6x32xf32>
    %131 = arith.addf %114, %130 : vector<6x32xf32>
    %132 = arith.mulf %131, %131 : vector<6x32xf32>
    %cst_67 = arith.constant dense<0.000000e+00> : vector<6xf32>
    %133 = vector.multi_reduction <add>, %132, %cst_67 [1] : vector<6x32xf32> to vector<6xf32>
    %134 = vector.shape_cast %133 : vector<6xf32> to vector<6x1xf32>
    %cst_68 = arith.constant 3.200000e+01 : f32
    %135 = vector.broadcast %cst_68 : f32 to vector<6x1xf32>
    %136 = arith.divf %134, %135 : vector<6x1xf32>
    %cst_69 = arith.constant 1.1920929E-7 : f32
    %137 = vector.broadcast %cst_69 : f32 to vector<6x1xf32>
    %138 = arith.addf %136, %137 : vector<6x1xf32>
    %139 = math.rsqrt %138 : vector<6x1xf32>
    %140 = vector.broadcast %139 : vector<6x1xf32> to vector<6x32xf32>
    %141 = arith.mulf %131, %140 : vector<6x32xf32>
    %142 = vector.broadcast %9 : vector<1x32xf32> to vector<6x32xf32>
    %143 = arith.mulf %141, %142 : vector<6x32xf32>
    %c0_70 = arith.constant 0 : index
    %c0_71 = arith.constant 0 : index
    %c0_72 = arith.constant 0 : index
    %c0_73 = arith.constant 0 : index
    %144 = vector.load %arg19[%c0_70, %c0_71, %c0_72, %c0_73] : memref<1x1x6x32xf32, #tpu.memory_space<vmem>>, vector<1x1x6x32xf32>
    %145 = vector.shape_cast %144 : vector<1x1x6x32xf32> to vector<6x32xf32>
    %146 = vector.shape_cast %143 : vector<6x32xf32> to vector<1x1x6x32xf32>
    tpu.vector_store %arg19[%c0_70, %c0_71, %c0_72, %c0_73], %146 {strides = array<i32>} : memref<1x1x6x32xf32, #tpu.memory_space<vmem>>, vector<1x1x6x32xf32>,
    return
  }
  func.func @transform_0(%arg0: i32) -> (i32, i32, i32) {
    %c0_i32 = arith.constant 0 : i32
    %c0_i32_0 = arith.constant 0 : i32
    %c0_i32_1 = arith.constant 0 : i32
    return %arg0, %c0_i32, %c0_i32_0 : i32, i32, i32
  }
  func.func @transform_1(%arg0: i32) -> (i32, i32, i32, i32) {
    %c0_i32 = arith.constant 0 : i32
    %c0_i32_0 = arith.constant 0 : i32
    %c0_i32_1 = arith.constant 0 : i32
    %c0_i32_2 = arith.constant 0 : i32
    return %arg0, %c0_i32, %c0_i32_0, %c0_i32_1 : i32, i32, i32, i32
  }
  func.func @transform_2(%arg0: i32) -> (i32, i32) {
    %c0_i32 = arith.constant 0 : i32
    %c0_i32_0 = arith.constant 0 : i32
    %c0_i32_1 = arith.constant 0 : i32
    return %c0_i32, %c0_i32_0 : i32, i32
  }
  func.func @transform_3(%arg0: i32) -> (i32, i32) {
    %c0_i32 = arith.constant 0 : i32
    %c0_i32_0 = arith.constant 0 : i32
    %c0_i32_1 = arith.constant 0 : i32
    return %c0_i32, %c0_i32_0 : i32, i32
  }
  func.func @transform_4(%arg0: i32) -> (i32, i32) {
    %c0_i32 = arith.constant 0 : i32
    %c0_i32_0 = arith.constant 0 : i32
    %c0_i32_1 = arith.constant 0 : i32
    return %c0_i32, %c0_i32_0 : i32, i32
  }
  func.func @transform_5(%arg0: i32) -> (i32, i32) {
    %c0_i32 = arith.constant 0 : i32
    %c0_i32_0 = arith.constant 0 : i32
    %c0_i32_1 = arith.constant 0 : i32
    return %c0_i32, %c0_i32_0 : i32, i32
  }
  func.func @transform_6(%arg0: i32) -> (i32, i32) {
    %c0_i32 = arith.constant 0 : i32
    %c0_i32_0 = arith.constant 0 : i32
    %c0_i32_1 = arith.constant 0 : i32
    return %c0_i32, %c0_i32_0 : i32, i32
  }
  func.func @transform_7(%arg0: i32) -> (i32, i32) {
    %c0_i32 = arith.constant 0 : i32
    %c0_i32_0 = arith.constant 0 : i32
    %c0_i32_1 = arith.constant 0 : i32
    return %c0_i32, %c0_i32_0 : i32, i32
  }
  func.func @transform_8(%arg0: i32) -> (i32, i32) {
    %c0_i32 = arith.constant 0 : i32
    %c0_i32_0 = arith.constant 0 : i32
    %c0_i32_1 = arith.constant 0 : i32
    return %c0_i32, %c0_i32_0 : i32, i32
  }
  func.func @transform_9(%arg0: i32) -> (i32, i32) {
    %c0_i32 = arith.constant 0 : i32
    %c0_i32_0 = arith.constant 0 : i32
    %c0_i32_1 = arith.constant 0 : i32
    return %c0_i32, %c0_i32_0 : i32, i32
  }
  func.func @transform_10(%arg0: i32) -> (i32, i32) {
    %c0_i32 = arith.constant 0 : i32
    %c0_i32_0 = arith.constant 0 : i32
    %c0_i32_1 = arith.constant 0 : i32
    return %c0_i32, %c0_i32_0 : i32, i32
  }
  func.func @transform_11(%arg0: i32) -> (i32, i32) {
    %c0_i32 = arith.constant 0 : i32
    %c0_i32_0 = arith.constant 0 : i32
    %c0_i32_1 = arith.constant 0 : i32
    return %c0_i32, %c0_i32_0 : i32, i32
  }
  func.func @transform_12(%arg0: i32) -> (i32, i32) {
    %c0_i32 = arith.constant 0 : i32
    %c0_i32_0 = arith.constant 0 : i32
    %c0_i32_1 = arith.constant 0 : i32
    return %c0_i32, %c0_i32_0 : i32, i32
  }
  func.func @transform_13(%arg0: i32) -> (i32, i32) {
    %c0_i32 = arith.constant 0 : i32
    %c0_i32_0 = arith.constant 0 : i32
    %c0_i32_1 = arith.constant 0 : i32
    return %c0_i32, %c0_i32_0 : i32, i32
  }
  func.func @transform_14(%arg0: i32) -> (i32, i32) {
    %c0_i32 = arith.constant 0 : i32
    %c0_i32_0 = arith.constant 0 : i32
    %c0_i32_1 = arith.constant 0 : i32
    return %c0_i32, %c0_i32_0 : i32, i32
  }
  func.func @transform_15(%arg0: i32) -> (i32, i32) {
    %c0_i32 = arith.constant 0 : i32
    %c0_i32_0 = arith.constant 0 : i32
    %c0_i32_1 = arith.constant 0 : i32
    return %c0_i32, %c0_i32_0 : i32, i32
  }
  func.func @transform_16(%arg0: i32) -> (i32, i32) {
    %c0_i32 = arith.constant 0 : i32
    %c0_i32_0 = arith.constant 0 : i32
    %c0_i32_1 = arith.constant 0 : i32
    return %c0_i32, %c0_i32_0 : i32, i32
  }
  func.func @transform_17(%arg0: i32) -> (i32, i32) {
    %c0_i32 = arith.constant 0 : i32
    %c0_i32_0 = arith.constant 0 : i32
    %c0_i32_1 = arith.constant 0 : i32
    return %c0_i32, %c0_i32_0 : i32, i32
  }
  func.func @transform_18(%arg0: i32) -> (i32, i32, i32, i32) {
    %c0_i32 = arith.constant 0 : i32
    %c0_i32_0 = arith.constant 0 : i32
    %c0_i32_1 = arith.constant 0 : i32
    %c0_i32_2 = arith.constant 0 : i32
    return %arg0, %c0_i32, %c0_i32_0, %c0_i32_1 : i32, i32, i32, i32
  }
}

</mosaic_0001>

<bundles_post_ra>
// kernel: _lambda_.12
= control target key start
LH: loop header
LB: loop body
LE: loop exit
PB: predicated region body
PF: predicated region fallthrough
CT: control target
= control target key end

     0   :  { %vm40_vm0 = vcmask 130048   ;;  %vm234_vm1 = vcmask 523264   ;;  %vm318_vm2 = vcmask 254976   ;;  %vm316_vm3 = vcmask 261120   ;;  %s519_s1 = inlined_call_operand.vmem [shape: f32[16,64], index: 1, kind: input, shape index: {}]   ;;  %s520_s0 = inlined_call_operand.vmem [shape: f32[10,16], index: 0, kind: input, shape index: {}]   ;;  %s521_s3 = inlined_call_operand.vmem [shape: f32[16,64], index: 3, kind: input, shape index: {}]   ;;  %s522_s5 = inlined_call_operand.vmem [shape: f32[64,32], index: 5, kind: input, shape index: {}]   ;;  %s523_s2 = inlined_call_operand.vmem [shape: f32[1,64], index: 2, kind: input, shape index: {}]   ;;  %s524_s4 = inlined_call_operand.vmem [shape: f32[1,64], index: 4, kind: input, shape index: {}]   ;;  %s525_s6 = inlined_call_operand.vmem [shape: f32[1,32], index: 6, kind: input, shape index: {}]   ;;  %s526_s7 = inlined_call_operand.vmem [shape: f32[10,32], index: 7, kind: output, shape index: {}]  }
   0x1   :  { %v28_v0 = vld [vmem:[%s519_s1] sm:$0xff]  ;;  %v29_v1 = vld [vmem:[%s519_s1 + $0x8] sm:$0xff]  ;;  %v221_v11 = vld [vmem:[%s522_s5 + $0x10] sm:$0xff] }
   0x2   :  { %v26_v2 = vld [vmem:[%s520_s0] sm:$0xff]  ;;  %v386_v3 = vpack.c.bf16 %v29_v1, %v28_v0  ;;  %v32_v5 = vld [vmem:[%s521_s3 + $0x8] sm:$0xff]  ;;  %v222_v12 = vld [vmem:[%s522_s5 + $0x18] sm:$0xff] }
   0x3   :  { %357 = vmatprep.mubr.msk.f32.mxu1 %vm40_vm0, %v26_v2  ;;  %v31_v4 = vld [vmem:[%s521_s3] sm:$0xff]  ;;  %v27_v7 = vld [vmem:[%s520_s0 + $0x8] sm:$0x3]  ;;  %v398_v13 = vpack.c.bf16 %v222_v12, %v221_v11  ;;  %v225_v17 = vld [vmem:[%s522_s5 + $0x30] sm:$0xff] }
   0x4   :  { %v390_v6 = vpack.c.bf16 %v32_v5, %v31_v4  ;;  %387 = vmatprep.subr.bf16.mxu1 %v386_v3  ;;  %v219_v8 = vld [vmem:[%s522_s5] sm:$0xff]  ;;  %v220_v9 = vld [vmem:[%s522_s5 + $0x8] sm:$0xff]  ;;  %v226_v18 = vld [vmem:[%s522_s5 + $0x38] sm:$0xff] }
   0x5   :  { %389 = vmatpush3.bf16.msra.mxu1 %v386_v3  ;;  %v394_v10 = vpack.c.bf16 %v220_v9, %v219_v8  ;;  %v223_v14 = vld [vmem:[%s522_s5 + $0x20] sm:$0xff]  ;;  %v224_v15 = vld [vmem:[%s522_s5 + $0x28] sm:$0xff]  ;;  %v406_v19 = vpack.c.bf16 %v226_v18, %v225_v17 }
   0x6   :  { %391 = vmatprep.subr.bf16.mxu1 %v390_v6  ;;  %v402_v16 = vpack.c.bf16 %v224_v15, %v223_v14  ;;  %v324_v20 = vld [vmem:[%s523_s2] ss:$0 sm:$0xff] }
   0x7   :  { %395 = vmatprep.subr.bf16.mxu0 %v394_v10  ;;  %v327_v33 = vld [vmem:[%s524_s4] ss:$0 sm:$0xff] }
   0x8   :  { %358 = vmatmul.mubr.msk.f32.vlgmr.msra.gmra.mrb[0].mxu1 %vm40_vm0, %v27_v7  ;;  %397 = vmatpush3.bf16.msra.mxu0 %v394_v10  ;;  %v332_v42 = vld [vmem:[%s525_s6] ss:$0 sm:$0xff] }
   0x9   :  { %393 = vmatpush3.bf16.msra.mxu1 %v390_v6  ;;  %364 = vmatprep.mubr.msk.f32.mxu1 %vm40_vm0, %v26_v2 }
   0xa   :  { %399 = vmatprep.subr.bf16.mxu0 %v398_v13 }
   0xc   :  { %365 = vmatmul.mubr.msk.f32.vlgmr.msra.gmra.mrb[2].mxu1 %vm40_vm0, %v27_v7  ;;  %401 = vmatpush3.bf16.msra.mxu0 %v398_v13 }
   0xd   :  { %403 = vmatprep.subr.bf16.mxu0 %v402_v16 }
  0x10   :  { %405 = vmatpush3.bf16.msra.mxu0 %v402_v16 }
  0x11   :  { %407 = vmatprep.subr.bf16.mxu0 %v406_v19 }
  0x14   :  { %409 = vmatpush3.bf16.msra.mxu0 %v406_v19 }
  0xdb   :  { %v359_v21 = vpop.f32.mrb[0].mxu1 }
  0xdc   :  { %v119_v22 = vadd.f32 %v359_v21, %v324_v20  ;;  %v113_v23 = vpop.f32.mrb[1].mxu1 }
  0xdd   :  { %v114_v24 = vadd.f32 %v324_v20, %v113_v23 }
  0xde   :  { %v331_v25 = vmul.f32 -1.442695, %v119_v22 }
  0xdf   :  { %v330_v26 = vmul.f32 -1.442695, %v114_v24  ;;  %v366_v27 = vpop.f32.mrb[2].mxu1 }
  0xe0   :  { %410 = vpow2.f32 %v331_v25  ;;  %v194_v28 = vpop.f32.mrb[3].mxu1  ;;  %v200_v34 = vadd.f32 %v366_v27, %v327_v33 }
  0xe1   :  { %412 = vpow2.f32 %v330_v26  ;;  %v195_v36 = vadd.f32 %v327_v33, %v194_v28 }
  0xea   :  { %v411_v29 = vpop.eup %410 }
  0xeb   :  { %v413_v30 = vpop.eup %412  ;;  %v210_v31 = vadd.f32 1.0, %v411_v29 }
  0xec   :  { %v209_v32 = vadd.f32 1.0, %v413_v30 }
  0xed   :  { %414 = vrcp.f32 %v210_v31 }
  0xee   :  { %416 = vrcp.f32 %v209_v32 }
  0xf7   :  { %v415_v35 = vpop.eup %414 }
  0xf8   :  { %v417_v37 = vpop.eup %416  ;;  %v216_v38 = vmul.f32 %v415_v35, %v119_v22 }
  0xf9   :  { %v215_v39 = vmul.f32 %v417_v37, %v114_v24 }
  0xfa   :  { %v218_v40 = vmul.f32 %v216_v38, %v200_v34 }
  0xfb   :  { %v217_v41 = vmul.f32 %v215_v39, %v195_v36 }
  0xfd   :  { %383 = vmatprep.mubr.msk.f32.mxu0 %vm234_vm1, %v217_v41 }
  0xfe   :  { %384 = vmatmul.mubr.msk.f32.vlgmr.msra.gmra.mrb[0].mxu0 %vm234_vm1, %v218_v40 }
 0x1d1   :  { %v385_v43 = vpop.f32.mrb[0].mxu0 }
 0x1d2   :  { %v313_v44 = vadd.f32 %v385_v43, %v332_v42  ;;  %v307_v45 = vpop.f32.mrb[1].mxu0 }
 0x1d3   :  { %v308_v46 = vadd.f32 %v332_v42, %v307_v45 }
 0x1d4   :  { %319 = vst.msk [vmem:[%s526_s7 + $0x8] sm:$0x3] %vm318_vm2, %v313_v44 }
 0x1d5   :  { %317 = vst.msk [vmem:[%s526_s7] sm:$0xff] %vm316_vm3, %v308_v46 }

// kernel: _lambda_.14
= control target key start
LH: loop header
LB: loop body
LE: loop exit
PB: predicated region body
PF: predicated region fallthrough
CT: control target
= control target key end

     0   :  { %v558_v3 = vmov 0.0   ;;  %vm67_vm0 = vcmask 261120   ;;  %v57_v40 = vlaneseq  ;;  %vm251_vm1 = vcmask 1041408   ;;  %s729_s2 = inlined_call_operand.vmem [shape: f32[32,160], index: 2, kind: input, shape index: {}]   ;;  %s730_s6 = inlined_call_operand.vmem [shape: f32[32,32], index: 6, kind: input, shape index: {}]   ;;  %s731_s4 = inlined_call_operand.vmem [shape: f32[32,160], index: 4, kind: input, shape index: {}]   ;;  %s732_s8 = inlined_call_operand.vmem [shape: f32[32,32], index: 8, kind: input, shape index: {}]   ;;  %s733_s0 = inlined_call_operand.vmem [shape: f32[2,32], index: 0, kind: input, shape index: {}]   ;;  %s734_s1 = inlined_call_operand.vmem [shape: f32[12,32], index: 1, kind: input, shape index: {}]   ;;  %s735_s3 = inlined_call_operand.vmem [shape: f32[1,160], index: 3, kind: input, shape index: {}]   ;;  %s736_s7 = inlined_call_operand.vmem [shape: f32[1,32], index: 7, kind: input, shape index: {}]   ;;  %s737_s5 = inlined_call_operand.vmem [shape: f32[1,160], index: 5, kind: input, shape index: {}]   ;;  %s738_s9 = inlined_call_operand.vmem [shape: f32[1,32], index: 9, kind: input, shape index: {}]   ;;  %s739_s10 = inlined_call_operand.vmem [shape: f32[2,160], index: 10, kind: output, shape index: {0}]   ;;  %s740_s11 = inlined_call_operand.vmem [shape: f32[12,32], index: 11, kind: output, shape index: {1}]  }
   0x1   :  { %v39_v0 = vld [vmem:[%s729_s2 + $0x8] sm:$0xff]  ;;  %v41_v1 = vld [vmem:[%s729_s2 + $0x18] sm:$0xff]  ;;  %v38_v2 = vld [vmem:[%s729_s2] sm:$0xff]  ;;  %135 = vmatprep.mubr.f32.mxu0 %v558_v3  ;;  %217 = vmatprep.mubr.f32.mxu1 %v558_v3  ;;  %vm252_vm2 = vcmask 257026   ;;  %vm452_vm4 = vcmask 257024  }
   0x2   :  { %v508_v4 = vpack.c.bf16 %v41_v1, %v39_v0  ;;  %v40_v5 = vld [vmem:[%s729_s2 + $0x10] sm:$0xff]  ;;  %v43_v6 = vld [vmem:[%s729_s2 + $0x28] sm:$0xff]  ;;  %v45_v7 = vld [vmem:[%s729_s2 + $0x38] sm:$0xff]  ;;  %v58_v41 = vshrl.u32 %v57_v40, 7 }
   0x3   :  { %v510_v8 = vpack.c.bf16 %v40_v5, %v38_v2  ;;  %v512_v9 = vpack.c.bf16 %v45_v7, %v43_v6  ;;  %v42_v10 = vld [vmem:[%s729_s2 + $0x20] sm:$0xff]  ;;  %v44_v11 = vld [vmem:[%s729_s2 + $0x30] sm:$0xff]  ;;  %v258_v13 = vld [vmem:[%s730_s6 + $0x8] sm:$0xff] }
   0x4   :  { %509 = vmatprep.subr.bf16.mxu0 %v508_v4  ;;  %v257_v12 = vld [vmem:[%s730_s6] sm:$0xff]  ;;  %v514_v14 = vpack.c.bf16 %v44_v11, %v42_v10  ;;  %v259_v15 = vld [vmem:[%s730_s6 + $0x10] sm:$0xff]  ;;  %v260_v16 = vld [vmem:[%s730_s6 + $0x18] sm:$0xff]  ;;  %v59_v42 = vsub.s32 0, %v58_v41  ;;  %v63_v44 = vsub.s32 1, %v58_v41 }
   0x5   :  { %511 = vmatpush1.bf16.msra.mxu0 %v510_v8  ;;  %v524_v17 = vpack.c.bf16 %v258_v13, %v257_v12  ;;  %v48_v18 = vld [vmem:[%s731_s4 + $0x8] sm:$0xff]  ;;  %v50_v19 = vld [vmem:[%s731_s4 + $0x18] sm:$0xff]  ;;  %v47_v20 = vld [vmem:[%s731_s4] sm:$0xff]  ;;  %v528_v32 = vpack.c.bf16 %v260_v16, %v259_v15  ;;  %v559_v10 = vmov 1983009808  }
   0x6   :  { %513 = vmatprep.subr.bf16.mxu0 %v512_v9  ;;  %v516_v21 = vpack.c.bf16 %v50_v19, %v48_v18  ;;  %v49_v22 = vld [vmem:[%s731_s4 + $0x10] sm:$0xff]  ;;  %v52_v23 = vld [vmem:[%s731_s4 + $0x28] sm:$0xff]  ;;  %v54_v24 = vld [vmem:[%s731_s4 + $0x38] sm:$0xff]  ;;  %v244_v11 = vunpack.c.l.s4 %v559_v10 }
   0x7   :  { %v518_v25 = vpack.c.bf16 %v49_v22, %v47_v20  ;;  %v520_v26 = vpack.c.bf16 %v54_v24, %v52_v23  ;;  %v51_v27 = vld [vmem:[%s731_s4 + $0x20] sm:$0xff]  ;;  %v53_v28 = vld [vmem:[%s731_s4 + $0x30] sm:$0xff]  ;;  %v263_v31 = vld [vmem:[%s732_s8 + $0x8] sm:$0xff] }
   0x8   :  { %v262_v29 = vld [vmem:[%s732_s8] sm:$0xff]  ;;  %517 = vmatprep.subr.bf16.mxu1 %v516_v21  ;;  %v522_v34 = vpack.c.bf16 %v53_v28, %v51_v27  ;;  %v264_v36 = vld [vmem:[%s732_s8 + $0x10] sm:$0xff]  ;;  %v265_v37 = vld [vmem:[%s732_s8 + $0x18] sm:$0xff]  ;;  %v245_v16 = vunpack.c.0.s8 %v244_v11 }
   0x9   :  { %515 = vmatpush1.bf16.msra.mxu0 %v514_v14  ;;  %v37_v30 = vld [vmem:[%s733_s0] sm:$0x3]  ;;  %519 = vmatpush1.bf16.msra.mxu1 %v518_v25  ;;  %v532_v35 = vpack.c.bf16 %v263_v31, %v262_v29  ;;  %v536_v38 = vpack.c.bf16 %v265_v37, %v264_v36  ;;  %v256_v39 = vld [vmem:[%s734_s1 + $0x8] sm:$0xf]  ;;  %vm253_vm3 = vmor %vm252_vm2, %vm251_vm1 }
   0xa   :  { %525 = vmatprep.subr.bf16.mxu0 %v524_v17  ;;  %v255_v33 = vld [vmem:[%s734_s1] sm:$0xff]  ;;  %521 = vmatprep.subr.bf16.mxu1 %v520_v26  ;;  %v248_v22 = vsub.s32 %v245_v16, %v58_v41 }
   0xb   :  { %v46_v43 = vld [vmem:[%s735_s3] sm:$0x3] }
   0xc   :  { %462 = vmatmul.mubr.msk.f32.vlgmr.msra.gmra.mrb[0].mxu0 %vm67_vm0, %v37_v30  ;;  %v60_v45 = vrot.slane %v46_v43, %v59_v42  ;;  %v64_v46 = vrot.slane %v46_v43, %v63_v44  ;;  %v466_v54 = vld [vmem:[%s736_s7] ss:$0 sm:$0xff] }
   0xd   :  { %527 = vmatpush3.bf16.msra.mxu0 %v524_v17  ;;  %494 = vmatprep.mubr.msk.f32.mxu0 %vm67_vm0, %v255_v33  ;;  %v55_v4 = vld [vmem:[%s737_s5] sm:$0x3] }
   0xe   :  { %529 = vmatprep.subr.bf16.mxu0 %v528_v32  ;;  %523 = vmatpush1.bf16.msra.mxu1 %v522_v34  ;;  %v146_v6 = vrot.slane %v55_v4, %v59_v42  ;;  %v150_v9 = vrot.slane %v55_v4, %v63_v44  ;;  %v469_v23 = vld [vmem:[%s738_s9] ss:$0 sm:$0xff] }
   0xf   :  { %533 = vmatprep.subr.bf16.mxu1 %v532_v35 }
  0x11   :  { %531 = vmatpush3.bf16.msra.mxu0 %v528_v32  ;;  %463 = vmatmul.mubr.msk.f32.vlgmr.msra.gmra.mrb[0].mxu1 %vm67_vm0, %v37_v30 }
  0x12   :  { %535 = vmatpush3.bf16.msra.mxu1 %v532_v35  ;;  %505 = vmatprep.mubr.msk.f32.mxu1 %vm67_vm0, %v255_v33 }
  0x13   :  { %537 = vmatprep.subr.bf16.mxu1 %v536_v38 }
  0x14   :  { %495 = vmatmul.mubr.msk.f32.vlgmr.msra.gmra.mrb[2].mxu0 %vm67_vm0, %v256_v39 }
  0x16   :  { %539 = vmatpush3.bf16.msra.mxu1 %v536_v38 }
  0x19   :  { %506 = vmatmul.mubr.msk.f32.vlgmr.msra.gmra.mrb[2].mxu1 %vm67_vm0, %v256_v39 }
  0xdf   :  { %v137_v47 = vpop.f32.mrb[0].mxu0 }
  0xe0   :  { %v138_v48 = vadd.f32 %v137_v47, %v60_v45  ;;  %v139_v49 = vpop.f32.mrb[1].mxu0 }
  0xe1   :  { %v140_v50 = vadd.f32 %v139_v49, %v64_v46 }
  0xe2   :  { %v464_v51 = vmul.f32 -1.442695, %v138_v48 }
  0xe3   :  { %v465_v52 = vmul.f32 -1.442695, %v140_v50 }
  0xe4   :  { %542 = vpow2.f32 %v464_v51  ;;  %v219_v53 = vpop.f32.mrb[0].mxu1 }
  0xe5   :  { %544 = vpow2.f32 %v465_v52  ;;  %v221_v55 = vpop.f32.mrb[1].mxu1  ;;  %v220_v13 = vadd.f32 %v219_v53, %v146_v6 }
  0xe6   :  { %v222_v15 = vadd.f32 %v221_v55, %v150_v9 }
  0xe7   :  { %v496_v56 = vpop.f32.mrb[2].mxu0 }
  0xe8   :  { %v351_v57 = vadd.f32 %v496_v56, %v466_v54  ;;  %v345_v58 = vpop.f32.mrb[3].mxu0 }
  0xe9   :  { %v346_v59 = vadd.f32 %v466_v54, %v345_v58 }
  0xea   :  { %v473_v60 = vmul.f32 -1.442695, %v351_v57 }
  0xeb   :  { %v472_v61 = vmul.f32 -1.442695, %v346_v59 }
  0xec   :  { %546 = vpow2.f32 %v473_v60  ;;  %v507_v62 = vpop.f32.mrb[2].mxu1 }
  0xed   :  { %548 = vpow2.f32 %v472_v61  ;;  %v426_v63 = vpop.f32.mrb[3].mxu1  ;;  %v432_v25 = vadd.f32 %v507_v62, %v469_v23 }
  0xee   :  { %v543_v0 = vpop.eup %542  ;;  %v427_v28 = vadd.f32 %v469_v23, %v426_v63 }
  0xef   :  { %v545_v1 = vpop.eup %544  ;;  %v230_v2 = vadd.f32 1.0, %v543_v0 }
  0xf0   :  { %v231_v3 = vadd.f32 1.0, %v545_v1 }
  0xf1   :  { %550 = vrcp.f32 %v230_v2 }
  0xf2   :  { %552 = vrcp.f32 %v231_v3 }
  0xf6   :  { %v547_v5 = vpop.eup %546 }
  0xf7   :  { %v549_v7 = vpop.eup %548  ;;  %v442_v8 = vadd.f32 1.0, %v547_v5 }
  0xf8   :  { %v441_v12 = vadd.f32 1.0, %v549_v7 }
  0xf9   :  { %554 = vrcp.f32 %v442_v8 }
  0xfa   :  { %556 = vrcp.f32 %v441_v12 }
  0xfb   :  { %v551_v14 = vpop.eup %550 }
  0xfc   :  { %v553_v17 = vpop.eup %552  ;;  %v236_v18 = vmul.f32 %v551_v14, %v138_v48 }
  0xfd   :  { %v237_v19 = vmul.f32 %v553_v17, %v140_v50 }
  0xfe   :  { %v238_v20 = vmul.f32 %v236_v18, %v220_v13 }
  0xff   :  { %v239_v21 = vmul.f32 %v237_v19, %v222_v15 }
 0x101   :  { %v242_v24 = vcombine.low %v238_v20, %v239_v21 }
 0x103   :  { %v555_v26 = vpop.eup %554  ;;  %v249_v27 = vrot.slane %v242_v24, %v248_v22 }
 0x104   :  { %v557_v29 = vpop.eup %556  ;;  %v448_v30 = vmul.f32 %v555_v26, %v351_v57 }
 0x105   :  { %v447_v31 = vmul.f32 %v557_v29, %v346_v59  ;;  %254 = vst.msk [vmem:[%s739_s10] sm:$0xf] %vm253_vm3, %v249_v27 }
 0x106   :  { %v450_v32 = vmul.f32 %v448_v30, %v432_v25 }
 0x107   :  { %v449_v33 = vmul.f32 %v447_v31, %v427_v28 }
 0x108   :  { %453 = vst.msk [vmem:[%s740_s11 + $0x8] sm:$0xf] %vm452_vm4, %v450_v32 }
 0x109   :  { %451 = vst.msk [vmem:[%s740_s11] sm:$0xff] %vm67_vm0, %v449_v33 }

// kernel: _lambda_.13
= control target key start
LH: loop header
LB: loop body
LE: loop exit
PB: predicated region body
PF: predicated region fallthrough
CT: control target
= control target key end

     0   :  { %vm44_vm0 = vcmask 1043456   ;;  %v191_v0 = vmov 0.0|0.0   ;;  %vm192_vm1 = vmmov 1   ;;  %vm193_vm3 = vmmov 0   ;;  %s264_s1 = inlined_call_operand.vmem [shape: f32[12,32], index: 1, kind: input, shape index: {}]   ;;  %s265_s0 = inlined_call_operand.vmem [shape: f32[40,12], index: 0, kind: input, shape index: {}]   ;;  %s266_s2 = inlined_call_operand.vmem [shape: f32[1,32], index: 2, kind: input, shape index: {}]   ;;  %s267_s3 = inlined_call_operand.vmem [shape: f32[40,32], index: 3, kind: output, shape index: {}]  }
   0x1   :  { %181 = vmatprep.subr.bf16.mxu0 %v191_v0  ;;  %v19_v1 = vld [vmem:[%s264_s1] sm:$0xff]  ;;  %v20_v2 = vld [vmem:[%s264_s1 + $0x8] sm:$0xf]  ;;  %vm183_vm2 = vmpackc.low %vm44_vm0, %vm192_vm1  ;;  %185 = vmatprep.subr.bf16.mxu1 %v191_v0  ;;  %v194_v4 = vmov 0.0   ;;  %vm28_vm4 = vcmask 97280   ;;  %vm138_vm5 = vcmask 261120  }
   0x2   :  { %v182_v3 = vpack.c.bf16 %v20_v2, %v19_v1  ;;  %166 = vmatprep.mubr.msk.f32.mxu0 %vm193_vm3, %v194_v4  ;;  %175 = vmatprep.mubr.msk.f32.mxu1 %vm193_vm3, %v194_v4  ;;  %v14_v5 = vld [vmem:[%s265_s0] sm:$0xff]  ;;  %v17_v6 = vld [vmem:[%s265_s0 + $0x18] sm:$0xff]  ;;  %v15_v7 = vld [vmem:[%s265_s0 + $0x8] sm:$0xff] }
   0x3   :  { %v18_v8 = vld [vmem:[%s265_s0 + $0x20] sm:$0xff]  ;;  %v16_v9 = vld [vmem:[%s265_s0 + $0x10] sm:$0xff] }
   0x4   :  { %184 = vmatpush3.bf16.msk.msra.mxu0 %vm183_vm2, %v182_v3  ;;  %186 = vmatpush3.bf16.msk.msra.mxu1 %vm183_vm2, %v182_v3  ;;  %v148_v10 = vld [vmem:[%s266_s2] ss:$0 sm:$0xff] }
   0x7   :  { %167 = vmatmul.mubr.msk.f32.vlgmr.msra.gmra.mrb[0].mxu0 %vm28_vm4, %v14_v5  ;;  %176 = vmatmul.mubr.msk.f32.vlgmr.msra.gmra.mrb[0].mxu1 %vm28_vm4, %v17_v6 }
   0x8   :  { %169 = vmatprep.mubr.msk.f32.mxu0 %vm193_vm3, %v194_v4  ;;  %178 = vmatprep.mubr.msk.f32.mxu1 %vm193_vm3, %v194_v4 }
   0xb   :  { %170 = vmatmul.mubr.msk.f32.gmra.mrb[2].mxu0 %vm28_vm4, %v15_v7  ;;  %179 = vmatmul.mubr.msk.f32.gmra.mrb[2].mxu1 %vm28_vm4, %v18_v8 }
   0xc   :  { %172 = vmatprep.mubr.msk.f32.mxu0 %vm193_vm3, %v194_v4 }
   0xf   :  { %173 = vmatmul.mubr.msk.f32.gmra.mrb[4].mxu0 %vm28_vm4, %v16_v9 }
  0xda   :  { %v114_v11 = vpop.f32.mrb[0].mxu0  ;;  %v129_v12 = vpop.f32.mrb[0].mxu1 }
  0xdb   :  { %v115_v13 = vadd.f32 %v148_v10, %v114_v11  ;;  %v168_v14 = vpop.f32.mrb[1].mxu0  ;;  %v130_v15 = vadd.f32 %v148_v10, %v129_v12  ;;  %v177_v16 = vpop.f32.mrb[1].mxu1 }
  0xdd   :  { %139 = vst.msk [vmem:[%s267_s3] sm:$0xff] %vm138_vm5, %v115_v13  ;;  %142 = vst.msk [vmem:[%s267_s3 + $0x18] sm:$0xff] %vm138_vm5, %v130_v15 }
  0xde   :  { %v119_v17 = vpop.f32.mrb[2].mxu0  ;;  %v134_v18 = vpop.f32.mrb[2].mxu1 }
  0xdf   :  { %v120_v19 = vadd.f32 %v148_v10, %v119_v17  ;;  %v171_v20 = vpop.f32.mrb[3].mxu0  ;;  %v135_v21 = vadd.f32 %v148_v10, %v134_v18  ;;  %v180_v22 = vpop.f32.mrb[3].mxu1 }
  0xe1   :  { %140 = vst.msk [vmem:[%s267_s3 + $0x8] sm:$0xff] %vm138_vm5, %v120_v19  ;;  %143 = vst.msk [vmem:[%s267_s3 + $0x20] sm:$0xff] %vm138_vm5, %v135_v21 }
  0xe2   :  { %v124_v23 = vpop.f32.mrb[4].mxu0 }
  0xe3   :  { %v125_v24 = vadd.f32 %v148_v10, %v124_v23  ;;  %v174_v25 = vpop.f32.mrb[5].mxu0 }
  0xe5   :  { %141 = vst.msk [vmem:[%s267_s3 + $0x10] sm:$0xff] %vm138_vm5, %v125_v24 }

// kernel: squeeze.14
= control target key start
LH: loop header
LB: loop body
LE: loop exit
PB: predicated region body
PF: predicated region fallthrough
CT: control target
= control target key end

     0   :  { %vm3_vm0 = vcmask 261120   ;;  %s34_s0 = inlined_call_operand.vmem [shape: f32[2,1,6,32], index: 0, kind: input, shape index: {}]   ;;  %s35_s1 = inlined_call_operand.vmem [shape: f32[12,32], index: 1, kind: output, shape index: {}]  }
   0x1   :  { %v2_v0 = vld [vmem:[%s34_s0] sm:$0x3f]   ;;  %v10_v1 = vld [vmem:[%s34_s0 + $0x8] sm:$0x3f]  }
   0x2   :  { %4 = vst.msk [vmem:[%s35_s1] sm:$0x3f] %vm3_vm0, %v2_v0   ;;  %11 = vst.msk [vmem:[%s35_s1 + $0x6] sm:$0x3f] %vm3_vm0, %v10_v1  }

// kernel: _lambda_.17
= control target key start
LH: loop header
LB: loop body
LE: loop exit
PB: predicated region body
PF: predicated region fallthrough
CT: control target
= control target key end

     0   :  { %s2602_s27 = smov 0   ;;  %s2870_s0 = inlined_call_operand.vmem [shape: f32[2,6,32], index: 0, kind: input, shape index: {}, may-alias: {0,1}]   ;;  %s2871_s1 = inlined_call_operand.vmem [shape: f32[2,1,6,32], index: 1, kind: input, shape index: {}, may-alias: {0,1}]   ;;  %s2872_s2 = inlined_call_operand.vmem [shape: f32[32,32], index: 2, kind: input, shape index: {}]   ;;  %s2873_s3 = inlined_call_operand.vmem [shape: f32[1,32], index: 3, kind: input, shape index: {}]   ;;  %s2874_s4 = inlined_call_operand.vmem [shape: f32[32,32], index: 4, kind: input, shape index: {}]   ;;  %s2875_s5 = inlined_call_operand.vmem [shape: f32[1,32], index: 5, kind: input, shape index: {}]   ;;  %s2876_s6 = inlined_call_operand.vmem [shape: f32[32,32], index: 6, kind: input, shape index: {}]   ;;  %s2877_s7 = inlined_call_operand.vmem [shape: f32[1,32], index: 7, kind: input, shape index: {}]   ;;  %s2878_s8 = inlined_call_operand.vmem [shape: f32[32,32], index: 8, kind: input, shape index: {}]   ;;  %s2879_s9 = inlined_call_operand.vmem [shape: f32[1,32], index: 9, kind: input, shape index: {}]   ;;  %s2880_s10 = inlined_call_operand.vmem [shape: f32[1,32], index: 10, kind: input, shape index: {}, may-alias: {10,17}]   ;;  %s2881_s11 = inlined_call_operand.vmem [shape: f32[32,64], index: 11, kind: input, shape index: {}]   ;;  %s2882_s12 = inlined_call_operand.vmem [shape: f32[1,64], index: 12, kind: input, shape index: {}]   ;;  %s2883_s13 = inlined_call_operand.vmem [shape: f32[32,64], index: 13, kind: input, shape index: {}]   ;;  %s2884_s14 = inlined_call_operand.vmem [shape: f32[1,64], index: 14, kind: input, shape index: {}]   ;;  %s2885_s15 = inlined_call_operand.vmem [shape: f32[64,32], index: 15, kind: input, shape index: {}]   ;;  %s2886_s16 = inlined_call_operand.vmem [shape: f32[1,32], index: 16, kind: input, shape index: {}]   ;;  %s2887_s17 = inlined_call_operand.vmem [shape: f32[1,32], index: 17, kind: input, shape index: {}, may-alias: {10,17}]   ;;  %s2888_s18 = inlined_call_operand.vmem [shape: f32[2,1,6,32], index: 18, kind: output, shape index: {}]  }
   0x1   :  { %2890 = sst [smem:[#allocation2_spill]] %s2870_s0 }
   0x2   :  { %2891 = sst [smem:[#allocation3_spill]] %s2871_s1 }
   0x3   :  { %2892 = sst [smem:[#allocation4_spill]] %s2872_s2 }
   0x4 LB: > { %s2175_s28 = sadd.s32 4294967295, %s2499_s27   ;;  %p2179_p0 = scmp.ge.s32.totalorder %s2499_s27, 1  ;;  %s2499_s27 = sphi %s2602_s27, %s28_s27  }
   0x5   : > { %p520_p1 = scmp.lt.s32.totalorder %s2499_s27, 3 }
   0x7   : > { %p521_p2 = pnand %p2179_p0, %p520_p1 }
   0x8   : > { %s2893_s0 = sld [smem:[#allocation4_spill]] (!%p521_p2)  ;;  %v2501_v3 = vmov (!%p521_p2), 0.0|0.0   ;;  %vm2502_vm0 = vmmov (!%p521_p2), 0   ;;  %v2503_v6 = vmov (!%p521_p2), 0.0   ;;  %p576_p3 = scmp.lt.s32.totalorder (!%p521_p2), %s2175_s28, 1  ;;  %v593_v8 = vld [vmem:[%s2874_s4] sm:$0xff] (!%p521_p2) }
   0x9   : > { %524 = sbr.rel (%p521_p2) target bundleno = 3382 (0xd36), region = 92  ;;  %2413 = vmatprep.subr.bf16.mxu1 (!%p521_p2), %v2501_v3  ;;  %2287 = vmatprep.mubr.msk.f32.mxu1 (!%p521_p2), %vm2502_vm0, %v2503_v6  ;;  %v594_v9 = vld [vmem:[%s2874_s4 + $0x8] sm:$0xff] (!%p521_p2)  ;;  %s2894_s1 = sld [smem:[#allocation2_spill]] (!%p521_p2)  ;;  %vm636_vm1 = vcmask (!%p521_p2), 261120   ;;  %v595_v12 = vld [vmem:[%s2874_s4 + $0x10] sm:$0xff] (!%p521_p2)  ;;  %v596_v13 = vld [vmem:[%s2874_s4 + $0x18] sm:$0xff] (!%p521_p2) }
   0xa   : > { %2425 = vmatprep.subr.bf16.mxu0 (!%p521_p2), %v2501_v3  ;;  %2309 = vmatprep.mubr.msk.f32.mxu0 (!%p521_p2), %vm2502_vm0, %v2503_v6  ;;  %v2420_v11 = vpack.c.bf16 (!%p521_p2), %v594_v9, %v593_v8  ;;  %v2423_v14 = vpack.c.bf16 (!%p521_p2), %v596_v13, %v595_v12  ;;  %s2895_s25 = sld [smem:[#allocation3_spill]] (!%p521_p2)  ;;  %v598_v16 = vld [vmem:[%s2876_s6] sm:$0xff] (!%p521_p2)  ;;  %v599_v17 = vld [vmem:[%s2876_s6 + $0x8] sm:$0xff] (!%p521_p2)  ;;  %v600_v18 = vld [vmem:[%s2876_s6 + $0x10] sm:$0xff] (!%p521_p2)  ;;  %vm866_vm2 = vcmask (!%p521_p2), 64512   ;;  %s2504_s30 = smov (!%p521_p2), 120  }
   0xb   : > { %v2426_v19 = vpack.c.bf16 (!%p521_p2), %v599_v17, %v598_v16  ;;  %v601_v20 = vld [vmem:[%s2876_s6 + $0x18] sm:$0xff] (!%p521_p2)  ;;  %v2185_v24 = vld [vmem:[%s2875_s5] ss:$0 sm:$0xff] (!%p521_p2)  ;;  %vm959_vm3 = vcmask (!%p521_p2), 1045504   ;;  %vm943_vm4 = vcmask (!%p521_p2), 46080   ;;  %s2506_s21 = smov (!%p521_p2), 104  }
   0xc   : > { %v2429_v21 = vpack.c.bf16 (!%p521_p2), %v601_v20, %v600_v18  ;;  %v2183_v26 = vld [vmem:[%s2873_s3] ss:$0 sm:$0xff] (!%p521_p2)  ;;  %vm955_vm5 = vcmask (!%p521_p2), 48128   ;;  %v604_v55 = vld [vmem:[%s2878_s8 + $0x8] sm:$0xff] (!%p521_p2)  ;;  %vm1834_vm6 = vcmask (!%p521_p2), 259072   ;;  %vm2019_vm7 = vcmask (!%p521_p2), 523264  }
   0xd   : > { %2427 = vmatpush3.bf16.msra.mxu0 (!%p521_p2), %v2426_v19  ;;  %v2187_v30 = vld [vmem:[%s2877_s7] ss:$0 sm:$0xff] (!%p521_p2) }
   0xe   : > { %v588_v0 = vld [vmem:[%s2893_s0] sm:$0xff] (!%p521_p2)  ;;  %v589_v1 = vld [vmem:[%s2893_s0 + $0x8] sm:$0xff] (!%p521_p2)  ;;  %v590_v2 = vld [vmem:[%s2893_s0 + $0x10] sm:$0xff] (!%p521_p2)  ;;  %2428 = vmatprep.subr.bf16.mxu0 (!%p521_p2), %v2501_v3 }
   0xf   : > { %v2414_v4 = vpack.c.bf16 (!%p521_p2), %v589_v1, %v588_v0  ;;  %v591_v5 = vld [vmem:[%s2893_s0 + $0x18] sm:$0xff] (!%p521_p2)  ;;  %v603_v60 = vld [vmem:[%s2878_s8] sm:$0xff] (!%p521_p2) }
  0x10   : > { %v2417_v7 = vpack.c.bf16 %v591_v5, %v590_v2  ;;  %s2897_s28 = smov (!%p576_p3, %s2175_s28), 1 }
  0x11   : > { %2415 = vmatpush3.bf16.msra.mxu1 %v2414_v4  ;;  %s2635_s29 = sshll.u32 %s2897_s28, 3  ;;  %2430 = vmatpush3.bf16.msra.mxu0 %v2429_v21 }
  0x12   : > { %2416 = vmatprep.subr.bf16.mxu1 %v2501_v3  ;;  %s579_s20 = scalar_lea.vmem %s2894_s1, %s2635_s29  ;;  %s583_s26 = scalar_lea.vmem %s2895_s25, %s2635_s29  ;;  %2322 = vmatprep.subr.mxu0 %v2503_v6 }
  0x13   : > { %v2641_v10 = vld [vmem:[%s579_s20] sm:$0x3f]  ;;  %s2505_s20 = smov 112  }
  0x14   : > { %v710_v15 = vld [vmem:[%s583_s26] sm:$0x3f]  ;;  %s587_s26 = scalar_lea.vmem %s2888_s18, %s2635_s29 }
  0x15   : > { %2418 = vmatpush3.bf16.msra.mxu1 %v2417_v7  ;;  %2310 = vmatmul.mubr.msk.f32.vlgmr.msra.gmra.mrb[0].mxu0 %vm636_vm1, %v710_v15 }
  0x16   : > { %2419 = vmatprep.subr.bf16.mxu1 %v2501_v3  ;;  %2324 = vmatprep.mubr.msk.f32.mxu0 %vm2502_vm0, %v2503_v6 }
  0x18   : > { %2288 = vmatmul.mubr.msk.f32.vlgmr.msra.gmra.mrb[0].mxu1 %vm636_vm1, %v2641_v10 }
  0x19   : > { %2421 = vmatpush3.bf16.msra.mxu1 %v2420_v11  ;;  %2298 = vmatprep.mubr.msk.f32.mxu1 %vm2502_vm0, %v2503_v6 }
  0x1a   : > { %2422 = vmatprep.subr.bf16.mxu1 %v2501_v3 }
  0x1d   : > { %2424 = vmatpush3.bf16.msra.mxu1 %v2423_v14 }
  0x1e   : > { %2312 = vmatprep.subr.mxu1 %v2503_v6 }
  0x20   : > { %2299 = vmatmul.mubr.msk.f32.vlgmr.msra.gmra.mrb[2].mxu1 %vm636_vm1, %v710_v15 }
  0x21   : > { %2314 = vmatprep.mubr.msk.f32.mxu1 %vm2502_vm0, %v2503_v6 }
  0xe8   : > { %v862_v31 = vpop.f32.mrb[0].mxu0 }
  0xe9   : > { %v2700_v32 = vadd.f32 %v2187_v30, %v862_v31  ;;  %v2311_v33 = vpop.f32.mrb[1].mxu0 }
  0xeb   : > { %v706_v22 = vpop.f32.mrb[0].mxu1 }
  0xec   : > { %v2289_v23 = vpop.f32.mrb[1].mxu1  ;;  %v2688_v29 = vadd.f32 %v2183_v26, %v706_v22 }
  0xf3   : > { %v786_v25 = vpop.f32.mrb[2].mxu1 }
  0xf4   : > { %v787_v27 = vadd.f32 %v2185_v24, %v786_v25  ;;  %v2300_v28 = vpop.f32.mrb[3].mxu1  ;;  %v605_v25 = vld [vmem:[%s2878_s8 + $0x10] sm:$0xff] }
  0xf6   : > { %1035 = vrot.lane.b32.xlu0 %v787_v27, %s2504_s30  ;;  %2313 = vmatpush3.xpose.msk.msra.mxu1 %vm866_vm2, %v787_v27 }
  0xf7   : > { %2317 = vmatprep.subr.mxu1 %v2503_v6 }
  0xf9   : > { %2315 = vmatmul.mubr.msk.f32.vlgmr.msra.gmra.mrb[4].mxu1 %vm866_vm2, %v2688_v29 }
  0xfa   : > { %1033 = vrot.lane.b32.xlu0 %v2688_v29, %s2504_s30  ;;  %2319 = vmatprep.mubr.msk.f32.mxu1 %vm2502_vm0, %v2503_v6 }
  0xfb   : > { %2318 = vmatpush3.msk.msra.mxu1 %vm959_vm3, %v2700_v32 }
  0xfc   : > { %2327 = vmatprep.subr.mxu1 %v2503_v6 }
 0x168   : > { %v1036_v34 = vpop.permute.xlu0 %1035 }
 0x169   : > { %2323 = vmatpush3.xpose.msk.msra.mxu0 %vm866_vm2, %v1036_v34 }
 0x16a   : > { %2332 = vmatprep.subr.mxu0 %v2503_v6 }
 0x16c   : > { %v1034_v35 = vpop.permute.xlu0 %1033 }
 0x16d   : > { %2325 = vmatmul.mubr.msk.f32.vlgmr.msra.gmra.mrb[2].mxu0 %vm866_vm2, %v1034_v35 }
 0x16e   : > { %2334 = vmatprep.mubr.msk.f32.mxu0 %vm2502_vm0, %v2503_v6  ;;  %2333 = vmatpush3.msra.mxu0 %v604_v55  ;;  %v611_v55 = vld [vmem:[%s2881_s11 + $0x8] sm:$0xff] }
 0x16f   : > { %2342 = vmatprep.subr.mxu0 %v2503_v6 }
 0x1cc   : > { %v939_v36 = vpop.f32.mrb[4].mxu1 }
 0x1cd   : > { %v2316_v37 = vpop.f32.mrb[5].mxu1  ;;  %v944_v38 = vsel %vm943_vm4, %v939_v36, -inf }
 0x1ce   : > { %945 = vmax.xlane.f32.xlu1 %v944_v38  ;;  %v606_v37 = vld [vmem:[%s2878_s8 + $0x18] sm:$0xff] }
 0x240   : > { %v1107_v39 = vpop.f32.mrb[2].mxu0 }
 0x241   : > { %v2326_v40 = vpop.f32.mrb[3].mxu0  ;;  %v1111_v41 = vsel %vm943_vm4, %v1107_v39, -inf }
 0x242   : > { %1112 = vmax.xlane.f32.xlu1 %v1111_v41 }
 0x25b   : > { %v946_v42 = vpop.xlane.xlu1 %945 }
 0x25c   : > { %v947_v43 = vsub.f32 %v939_v36, %v946_v42 }
 0x25e   : > { %v948_v44 = vmul.f32 1.442695, %v947_v43 }
 0x260   : > { %2469 = vpow2.f32 %v948_v44 }
 0x26a   : > { %v2470_v45 = vpop.eup %2469 }
 0x26b   : > { %v950_v46 = vsel %vm943_vm4, %v2470_v45, 0.0 }
 0x26c   : > { %951 = vadd.xlane.f32.xlu0 %v950_v46  ;;  %v2209_v46 = vld [vmem:[%s2879_s9] ss:$0 sm:$0xff] }
 0x282   : > { %1434 = vrot.lane.b32.xlu0 %v2700_v32, %s2505_s20 }
 0x286   : > { %1587 = vrot.lane.b32.xlu0 %v787_v27, %s2506_s21 }
 0x2cf   : > { %v1113_v47 = vpop.xlane.xlu1 %1112 }
 0x2d0   : > { %v1114_v48 = vsub.f32 %v1107_v39, %v1113_v47 }
 0x2d2   : > { %v1115_v49 = vmul.f32 1.442695, %v1114_v48 }
 0x2d4   : > { %2471 = vpow2.f32 %v1115_v49 }
 0x2de   : > { %v2472_v50 = vpop.eup %2471 }
 0x2df   : > { %v1117_v51 = vsel %vm943_vm4, %v2472_v50, 0.0 }
 0x2e0   : > { %1118 = vadd.xlane.f32.xlu1 %v1117_v51 }
 0x2f1   : > { %1122 = vrot.lane.b32.xlu1 %v2700_v32, %s2504_s30 }
 0x2f5   : > { %1347 = vrot.lane.b32.xlu1 %v787_v27, %s2505_s20 }
 0x2f9   : > { %v952_v52 = vpop.xlane.xlu0 %951  ;;  %1345 = vrot.lane.b32.xlu1 %v2688_v29, %s2505_s20 }
 0x2fa   : > { %2473 = vrcp.f32 %v952_v52 }
 0x2fd   : > { %v1435_v62 = vpop.permute.xlu0 %1434 }
 0x301   : > { %v1588_v20 = vpop.permute.xlu0 %1587 }
 0x304   : > { %v2474_v53 = vpop.eup %2473 }
 0x305   : > { %v954_v54 = vmul.f32 %v2474_v53, %v2470_v45 }
 0x307   : > { %2320 = vmatmul.mubr.msk.f32.vlgmr.msra.gmra.mrb[6].mxu1 %vm955_vm5, %v954_v54  ;;  %v610_v54 = vld [vmem:[%s2881_s11] sm:$0xff] }
 0x308   : > { %2329 = vmatprep.mubr.msk.f32.mxu1 %vm2502_vm0, %v2503_v6 }
 0x36d   : > { %v1119_v56 = vpop.xlane.xlu1 %1118 }
 0x36e   : > { %2475 = vrcp.f32 %v1119_v56  ;;  %v615_v56 = vld [vmem:[%s2883_s13] sm:$0xff] }
 0x371   : > { %v1123_v57 = vpop.permute.xlu1 %1122 }
 0x372   : > { %2328 = vmatpush3.msk.msra.mxu1 %vm959_vm3, %v1123_v57  ;;  %v2432_v57 = vpack.c.bf16 %v611_v55, %v610_v54 }
 0x373   : > { %2337 = vmatprep.subr.mxu1 %v2503_v6 }
 0x375   : > { %v1348_v0 = vpop.permute.xlu1 %1347 }
 0x378   : > { %v2476_v58 = vpop.eup %2475 }
 0x379   : > { %v1121_v59 = vmul.f32 %v2476_v58, %v2472_v50  ;;  %v1346_v4 = vpop.permute.xlu1 %1345 }
 0x37b   : > { %2330 = vmatmul.mubr.msk.f32.vlgmr.msra.gmra.mrb[8].mxu1 %vm955_vm5, %v1121_v59  ;;  %v612_v59 = vld [vmem:[%s2881_s11 + $0x10] sm:$0xff] }
 0x37c   : > { %2338 = vmatpush3.msra.mxu1 %v603_v60  ;;  %2339 = vmatprep.mubr.msk.f32.mxu1 %vm2502_vm0, %v2503_v6  ;;  %v613_v60 = vld [vmem:[%s2881_s11 + $0x18] sm:$0xff] }
 0x37d   : > { %2347 = vmatprep.subr.mxu1 %v2503_v6 }
 0x3da   : > { %v1029_v61 = vpop.f32.mrb[6].mxu1 }
 0x3db   : > { %v2321_v63 = vpop.f32.mrb[7].mxu1  ;;  %2340 = vmatmul.mubr.msk.f32.vlgmr.msra.gmra.mrb[10].mxu1 %vm866_vm2, %v1029_v61  ;;  %v617_v61 = vld [vmem:[%s2883_s13 + $0x10] sm:$0xff] }
 0x3dc   : > { %2348 = vmatpush3.msk.msra.mxu1 %vm959_vm3, %v1435_v62  ;;  %2349 = vmatprep.mubr.msk.f32.mxu1 %vm2502_vm0, %v2503_v6  ;;  %v2435_v62 = vpack.c.bf16 %v613_v60, %v612_v59  ;;  %v618_v63 = vld [vmem:[%s2883_s13 + $0x18] sm:$0xff] }
 0x3dd   : > { %2357 = vmatprep.subr.mxu1 %v2503_v6 }
 0x44e   : > { %v1195_v1 = vpop.f32.mrb[8].mxu1 }
 0x44f   : > { %v2331_v2 = vpop.f32.mrb[9].mxu1  ;;  %2335 = vmatmul.mubr.msk.f32.vlgmr.msra.gmra.mrb[4].mxu0 %vm866_vm2, %v1195_v1 }
 0x450   : > { %2343 = vmatpush3.xpose.msk.msra.mxu0 %vm866_vm2, %v1348_v0  ;;  %2344 = vmatprep.mubr.msk.f32.mxu0 %vm2502_vm0, %v2503_v6  ;;  %v2441_v0 = vpack.c.bf16 %v618_v63, %v617_v61 }
 0x451   : > { %2352 = vmatprep.subr.mxu0 %v2503_v6 }
 0x453   : > { %2345 = vmatmul.mubr.msk.f32.vlgmr.msra.gmra.mrb[6].mxu0 %vm866_vm2, %v1346_v4 }
 0x454   : > { %2354 = vmatprep.mubr.msk.f32.mxu0 %vm2502_vm0, %v2503_v6  ;;  %2353 = vmatpush3.msra.mxu0 %v605_v25 }
 0x455   : > { %2362 = vmatprep.subr.mxu0 %v2503_v6 }
 0x4ae   : > { %v1341_v5 = vpop.f32.mrb[10].mxu1 }
 0x4af   : > { %v2341_v7 = vpop.f32.mrb[11].mxu1 }
 0x4b0   : > { %v2210_v7 = vld [vmem:[%s2880_s10] ss:$0 sm:$0xff] }
 0x522   : > { %v1268_v8 = vpop.f32.mrb[4].mxu0 }
 0x523   : > { %v1342_v9 = vadd.f32 %v1341_v5, %v1268_v8  ;;  %v2336_v11 = vpop.f32.mrb[5].mxu0 }
 0x524   : > { %v620_v11 = vld [vmem:[%s2885_s15] sm:$0xff] }
 0x526   : > { %v1419_v12 = vpop.f32.mrb[6].mxu0 }
 0x527   : > { %v2346_v13 = vpop.f32.mrb[7].mxu0  ;;  %v1423_v14 = vsel %vm943_vm4, %v1419_v12, -inf }
 0x528   : > { %1424 = vmax.xlane.f32.xlu1 %v1423_v14  ;;  %v622_v14 = vld [vmem:[%s2885_s15 + $0x10] sm:$0xff] }
 0x5b5   : > { %v1425_v15 = vpop.xlane.xlu1 %1424 }
 0x5b6   : > { %v1426_v16 = vsub.f32 %v1419_v12, %v1425_v15  ;;  %v621_v12 = vld [vmem:[%s2885_s15 + $0x8] sm:$0xff] }
 0x5b7   : > { %v2444_v13 = vpack.c.bf16 %v621_v12, %v620_v11 }
 0x5b8   : > { %v1427_v17 = vmul.f32 1.442695, %v1426_v16  ;;  %v624_v16 = vld [vmem:[%s2885_s15 + $0x20] sm:$0xff] }
 0x5ba   : > { %2477 = vpow2.f32 %v1427_v17  ;;  %v625_v17 = vld [vmem:[%s2885_s15 + $0x28] sm:$0xff] }
 0x5c4   : > { %v2478_v18 = vpop.eup %2477 }
 0x5c5   : > { %v1429_v19 = vsel %vm943_vm4, %v2478_v18, 0.0 }
 0x5c6   : > { %1430 = vadd.xlane.f32.xlu0 %v1429_v19  ;;  %v626_v19 = vld [vmem:[%s2885_s15 + $0x30] sm:$0xff] }
 0x5dc   : > { %1585 = vrot.lane.b32.xlu0 %v2688_v29, %s2506_s21 }
 0x653   : > { %v1431_v21 = vpop.xlane.xlu0 %1430 }
 0x654   : > { %2479 = vrcp.f32 %v1431_v21 }
 0x657   : > { %v1586_v24 = vpop.permute.xlu0 %1585 }
 0x65e   : > { %v2480_v22 = vpop.eup %2479 }
 0x65f   : > { %v1433_v23 = vmul.f32 %v2480_v22, %v2478_v18  ;;  %v2450_v18 = vpack.c.bf16 %v625_v17, %v624_v16  ;;  %v2211_v22 = vld [vmem:[%s2882_s12] ss:$0 sm:$0xff] }
 0x661   : > { %2350 = vmatmul.mubr.msk.f32.vlgmr.msra.gmra.mrb[12].mxu1 %vm955_vm5, %v1433_v23 }
 0x662   : > { %2358 = vmatpush3.xpose.msk.msra.mxu1 %vm866_vm2, %v1588_v20  ;;  %2359 = vmatprep.mubr.msk.f32.mxu1 %vm2502_vm0, %v2503_v6  ;;  %v627_v20 = vld [vmem:[%s2885_s15 + $0x38] sm:$0xff] }
 0x663   : > { %2367 = vmatprep.subr.mxu1 %v2503_v6  ;;  %v2453_v21 = vpack.c.bf16 %v627_v20, %v626_v19 }
 0x665   : > { %2360 = vmatmul.mubr.msk.f32.vlgmr.msra.gmra.mrb[14].mxu1 %vm866_vm2, %v1586_v24 }
 0x666   : > { %2369 = vmatprep.mubr.msk.f32.mxu1 %vm2502_vm0, %v2503_v6  ;;  %2368 = vmatpush3.msra.mxu1 %v606_v37 }
 0x667   : > { %2437 = vmatprep.subr.bf16.mxu1 %v2501_v3 }
 0x734   : > { %v1507_v26 = vpop.f32.mrb[12].mxu1 }
 0x735   : > { %v2351_v27 = vpop.f32.mrb[13].mxu1  ;;  %2355 = vmatmul.mubr.msk.f32.vlgmr.msra.gmra.mrb[8].mxu0 %vm866_vm2, %v1507_v26 }
 0x736   : > { %2364 = vmatprep.mubr.msk.f32.mxu0 %vm2502_vm0, %v2503_v6 }
 0x738   : > { %v1659_v28 = vpop.f32.mrb[14].mxu1 }
 0x739   : > { %v2361_v29 = vpop.f32.mrb[15].mxu1  ;;  %v1663_v30 = vsel %vm943_vm4, %v1659_v28, -inf }
 0x73a   : > { %1664 = vmax.xlane.f32.xlu0 %v1663_v30  ;;  %v2213_v30 = vld [vmem:[%s2884_s14] ss:$0 sm:$0xff] }
 0x7c7   : > { %v1665_v31 = vpop.xlane.xlu0 %1664 }
 0x7c8   : > { %v1666_v33 = vsub.f32 %v1659_v28, %v1665_v31 }
 0x7ca   : > { %v1667_v34 = vmul.f32 1.442695, %v1666_v33 }
 0x7cc   : > { %2481 = vpow2.f32 %v1667_v34 }
 0x7d6   : > { %v2482_v35 = vpop.eup %2481 }
 0x7d7   : > { %v1669_v36 = vsel %vm943_vm4, %v2482_v35, 0.0 }
 0x7d8   : > { %1670 = vadd.xlane.f32.xlu1 %v1669_v36  ;;  %v2216_v36 = vld [vmem:[%s2886_s16] ss:$0 sm:$0xff] }
 0x7e9   : > { %1674 = vrot.lane.b32.xlu1 %v2700_v32, %s2506_s21 }
 0x808   : > { %v1580_v38 = vpop.f32.mrb[8].mxu0 }
 0x809   : > { %v1584_v39 = vadd.f32 %v1580_v38, %v1342_v9  ;;  %v2356_v40 = vpop.f32.mrb[9].mxu0 }
 0x865   : > { %v1671_v41 = vpop.xlane.xlu1 %1670 }
 0x866   : > { %2483 = vrcp.f32 %v1671_v41 }
 0x869   : > { %v1675_v42 = vpop.permute.xlu1 %1674 }
 0x86a   : > { %2363 = vmatpush3.msk.msra.mxu0 %vm959_vm3, %v1675_v42 }
 0x86b   : > { %2431 = vmatprep.subr.bf16.mxu0 %v2501_v3 }
 0x870   : > { %v2484_v43 = vpop.eup %2483 }
 0x871   : > { %v1673_v44 = vmul.f32 %v2484_v43, %v2482_v35 }
 0x873   : > { %2365 = vmatmul.mubr.msk.f32.vlgmr.msra.gmra.mrb[10].mxu0 %vm955_vm5, %v1673_v44 }
 0x874   : > { %2380 = vmatprep.mubr.msk.f32.mxu0 %vm2502_vm0, %v2503_v6  ;;  %2433 = vmatpush3.bf16.msra.mxu0 %v2432_v57 }
 0x875   : > { %2434 = vmatprep.subr.bf16.mxu0 %v2501_v3 }
 0x878   : > { %2436 = vmatpush3.bf16.msra.mxu0 %v2435_v62 }
 0x879   : > { %2443 = vmatprep.subr.bf16.mxu0 %v2501_v3 }
 0x946   : > { %v1747_v32 = vpop.f32.mrb[10].mxu0 }
 0x947   : > { %v2366_v45 = vpop.f32.mrb[11].mxu0  ;;  %2370 = vmatmul.mubr.msk.f32.vlgmr.msra.gmra.mrb[16].mxu1 %vm866_vm2, %v1747_v32 }
 0x948   : > { %2391 = vmatprep.mubr.msk.f32.mxu1 %vm2502_vm0, %v2503_v6 }
 0xa1a   : > { %v1820_v47 = vpop.f32.mrb[16].mxu1 }
 0xa1b   : > { %v1824_v48 = vadd.f32 %v1820_v47, %v1584_v39  ;;  %v2371_v49 = vpop.f32.mrb[17].mxu1 }
 0xa1d   : > { %v1831_v50 = vadd.f32 %v2209_v46, %v1824_v48  ;;  %v2218_v46 = vld [vmem:[%s2887_s17] ss:$0 sm:$0xff] }
 0xa1f   : > { %v1832_v51 = vadd.f32 %v1831_v50, %v2641_v10  ;;  %v616_v10 = vld [vmem:[%s2883_s13 + $0x8] sm:$0xff] }
 0xa20   : > { %v2438_v58 = vpack.c.bf16 %v616_v10, %v615_v56 }
 0xa21   : > { %v1833_v52 = vmul.f32 %v1832_v51, %v1832_v51 }
 0xa22   : > { %2439 = vmatpush3.bf16.msra.mxu1 %v2438_v58 }
 0xa23   : > { %v1835_v53 = vsel %vm1834_vm6, %v1833_v52, 0.0  ;;  %2440 = vmatprep.subr.bf16.mxu1 %v2501_v3 }
 0xa24   : > { %1836 = vadd.xlane.f32.xlu1 %v1835_v53 }
 0xa26   : > { %2442 = vmatpush3.bf16.msra.mxu1 %v2441_v0 }
 0xab1   : > { %v1837_v1 = vpop.xlane.xlu1 %1836 }
 0xab2   : > { %v1839_v2 = vmul.f32 0.03125, %v1837_v1 }
 0xab4   : > { %v1840_v4 = vadd.f32 1.1920929e-07, %v1839_v2 }
 0xab6   : > { %2485 = vrsqrt.f32 %v1840_v4 }
 0xac0   : > { %v2486_v5 = vpop.eup %2485 }
 0xac1   : > { %v1842_v8 = vmul.f32 %v2486_v5, %v1832_v51 }
 0xac3   : > { %v1849_v9 = vmul.f32 %v2210_v7, %v1842_v8 }
 0xac5   : > { %2381 = vmatmul.mubr.msk.f32.vlgmr.msra.gmra.mrb[12].mxu0 %vm636_vm1, %v1849_v9  ;;  %2392 = vmatmul.mubr.msk.f32.vlgmr.msra.gmra.mrb[18].mxu1 %vm636_vm1, %v1849_v9 }
 0xac6   : > { %2410 = vmatprep.mubr.msk.f32.mxu0 %vm2502_vm0, %v2503_v6  ;;  %2445 = vmatpush3.bf16.msra.mxu0 %v2444_v13  ;;  %v623_v6 = vld [vmem:[%s2885_s15 + $0x18] sm:$0xff] }
 0xac7   : > { %2446 = vmatprep.subr.bf16.mxu0 %v2501_v3  ;;  %v2447_v15 = vpack.c.bf16 %v623_v6, %v622_v14 }
 0xaca   : > { %2448 = vmatpush3.bf16.msra.mxu0 %v2447_v15 }
 0xacb   : > { %2449 = vmatprep.subr.bf16.mxu0 %v2501_v3 }
 0xace   : > { %2451 = vmatpush3.bf16.msra.mxu0 %v2450_v18 }
 0xacf   : > { %2452 = vmatprep.subr.bf16.mxu0 %v2501_v3 }
 0xad2   : > { %2454 = vmatpush3.bf16.msra.mxu0 %v2453_v21 }
 0xb98   : > { %v1925_v23 = vpop.f32.mrb[12].mxu0  ;;  %v2001_v24 = vpop.f32.mrb[18].mxu1 }
 0xb99   : > { %v1926_v25 = vadd.f32 %v2211_v22, %v1925_v23  ;;  %v2382_v26 = vpop.f32.mrb[13].mxu0  ;;  %v2393_v27 = vpop.f32.mrb[19].mxu1  ;;  %v2002_v34 = vadd.f32 %v2213_v30, %v2001_v24 }
 0xb9b   : > { %v2215_v3 = vmul.f32 -1.442695, %v1926_v25 }
 0xb9d   : > { %2487 = vpow2.f32 %v2215_v3 }
 0xba7   : > { %v2488_v28 = vpop.eup %2487 }
 0xba8   : > { %v2008_v29 = vadd.f32 1.0, %v2488_v28 }
 0xbaa   : > { %2489 = vrcp.f32 %v2008_v29 }
 0xbb4   : > { %v2490_v31 = vpop.eup %2489 }
 0xbb5   : > { %v2011_v33 = vmul.f32 %v2490_v31, %v1926_v25 }
 0xbb7   : > { %v2012_v35 = vmul.f32 %v2011_v33, %v2002_v34 }
 0xbb9   : > { %2411 = vmatmul.mubr.msk.f32.vlgmr.msra.gmra.mrb[14].mxu0 %vm2019_vm7, %v2012_v35 }
 0xc8c   : > { %v2089_v37 = vpop.f32.mrb[14].mxu0 }
 0xc8d   : > { %v2090_v38 = vadd.f32 %v2216_v36, %v2089_v37  ;;  %v2412_v39 = vpop.f32.mrb[15].mxu0 }
 0xc8f   : > { %v2093_v40 = vadd.f32 %v2090_v38, %v1849_v9 }
 0xc91   : > { %v2094_v41 = vmul.f32 %v2093_v40, %v2093_v40 }
 0xc93   : > { %v2095_v42 = vsel %vm1834_vm6, %v2094_v41, 0.0 }
 0xc94   : > { %2096 = vadd.xlane.f32.xlu0 %v2095_v42 }
 0xd21   : > { %v2097_v43 = vpop.xlane.xlu0 %2096 }
 0xd22   : > { %v2098_v44 = vmul.f32 0.03125, %v2097_v43 }
 0xd24   : > { %v2099_v32 = vadd.f32 1.1920929e-07, %v2098_v44 }
 0xd26   : > { %2491 = vrsqrt.f32 %v2099_v32 }
 0xd30   : > { %v2492_v45 = vpop.eup %2491 }
 0xd31   : > { %v2101_v47 = vmul.f32 %v2492_v45, %v2093_v40 }
 0xd33   : > { %v2108_v48 = vmul.f32 %v2218_v46, %v2101_v47 }
 0xd35   : > { %2109 = vst.msk [vmem:[%s587_s26] sm:$0x3f] %vm1834_vm6, %v2108_v48 }
 0xd36 PF: > { %s28_s27 = sadd.s32 1, %s2499_s27  }
 0xd37   : > { %p25_p4 = scmp.ge.s32.totalorder %s28_s27, 4  }
 0xd39   :  { %27 = sbr.rel (!%p25_p4) target bundleno = 4 (0x4), region = 125 }

// kernel: _lambda_.15
= control target key start
LH: loop header
LB: loop body
LE: loop exit
PB: predicated region body
PF: predicated region fallthrough
CT: control target
= control target key end

     0   :  { %s8358_s17 = smov 0   ;;  %s9220_s0 = inlined_call_operand.vmem [shape: f32[2,6,5,32], index: 0, kind: input, shape index: {}]   ;;  %s9221_s1 = inlined_call_operand.vmem [shape: f32[2,5,32], index: 1, kind: input, shape index: {}]   ;;  %s9222_s2 = inlined_call_operand.vmem [shape: f32[32,32], index: 2, kind: input, shape index: {}]   ;;  %s9223_s3 = inlined_call_operand.vmem [shape: f32[1,32], index: 3, kind: input, shape index: {}]   ;;  %s9224_s4 = inlined_call_operand.vmem [shape: f32[32,32], index: 4, kind: input, shape index: {}]   ;;  %s9225_s5 = inlined_call_operand.vmem [shape: f32[1,32], index: 5, kind: input, shape index: {}]   ;;  %s9226_s6 = inlined_call_operand.vmem [shape: f32[32,32], index: 6, kind: input, shape index: {}]   ;;  %s9227_s7 = inlined_call_operand.vmem [shape: f32[1,32], index: 7, kind: input, shape index: {}]   ;;  %s9228_s8 = inlined_call_operand.vmem [shape: f32[32,32], index: 8, kind: input, shape index: {}]   ;;  %s9229_s9 = inlined_call_operand.vmem [shape: f32[1,32], index: 9, kind: input, shape index: {}]   ;;  %s9230_s10 = inlined_call_operand.vmem [shape: f32[1,32], index: 10, kind: input, shape index: {}]   ;;  %s9231_s11 = inlined_call_operand.vmem [shape: f32[2,6,5,32], index: 11, kind: output, shape index: {}]  }
   0x1 LB: > { %s7204_s18 = sadd.s32 4294967295, %s8290_s17   ;;  %p7208_p0 = scmp.ge.s32.totalorder %s8290_s17, 1  ;;  %s8290_s17 = sphi %s8358_s17, %s21_s17  }
   0x2   : > { %p346_p1 = scmp.lt.s32.totalorder %s8290_s17, 3 }
   0x4   : > { %p347_p2 = pnand %p7208_p0, %p346_p1 }
   0x5   : > { %v409_v0 = vld [vmem:[%s9224_s4] sm:$0xff] (!%p347_p2)  ;;  %v410_v1 = vld [vmem:[%s9224_s4 + $0x8] sm:$0xff] (!%p347_p2)  ;;  %v8292_v3 = vmov (!%p347_p2), 0.0|0.0   ;;  %v411_v6 = vld [vmem:[%s9224_s4 + $0x10] sm:$0xff] (!%p347_p2)  ;;  %p390_p3 = scmp.lt.s32.totalorder (!%p347_p2), %s7204_s18, 1  ;;  %vm8293_vm0 = vmmov (!%p347_p2), 0  }
   0x6   : > { %350 = sbr.rel (%p347_p2) target bundleno = 13434 (0x347a), region = 64  ;;  %v404_v2 = vld [vmem:[%s9222_s2] sm:$0xff] (!%p347_p2)  ;;  %8080 = vmatprep.subr.bf16.mxu1 (!%p347_p2), %v8292_v3  ;;  %v8376_v4 = vpack.c.bf16 (!%p347_p2), %v410_v1, %v409_v0  ;;  %8074 = vmatprep.subr.bf16.mxu0 (!%p347_p2), %v8292_v3  ;;  %v405_v5 = vld [vmem:[%s9222_s2 + $0x8] sm:$0xff] (!%p347_p2)  ;;  %v412_v7 = vld [vmem:[%s9224_s4 + $0x18] sm:$0xff] (!%p347_p2)  ;;  %v8294_v9 = vmov (!%p347_p2), 0.0   ;;  %vm432_vm1 = vcmask (!%p347_p2), 261120  }
   0x7   : > { %v8075_v8 = vpack.c.bf16 (!%p347_p2), %v405_v5, %v404_v2  ;;  %7590 = vmatprep.mubr.msk.f32.mxu1 (!%p347_p2), %vm8293_vm0, %v8294_v9  ;;  %v406_v10 = vld [vmem:[%s9222_s2 + $0x10] sm:$0xff] (!%p347_p2)  ;;  %v407_v11 = vld [vmem:[%s9222_s2 + $0x18] sm:$0xff] (!%p347_p2)  ;;  %7579 = vmatprep.mubr.msk.f32.mxu0 (!%p347_p2), %vm8293_vm0, %v8294_v9  ;;  %v8399_v12 = vpack.c.bf16 (!%p347_p2), %v412_v7, %v411_v6  ;;  %v414_v16 = vld [vmem:[%s9226_s6] sm:$0xff] (!%p347_p2)  ;;  %vm662_vm2 = vcmask (!%p347_p2), 64512   ;;  %vm755_vm3 = vcmask (!%p347_p2), 1044480   ;;  %s8296_s26 = smov (!%p347_p2), 112  }
   0x8   : > { %8082 = vmatpush3.bf16.msra.mxu1 (!%p347_p2), %v8376_v4  ;;  %v8078_v13 = vpack.c.bf16 (!%p347_p2), %v407_v11, %v406_v10  ;;  %v415_v17 = vld [vmem:[%s9226_s6 + $0x8] sm:$0xff] (!%p347_p2)  ;;  %v416_v18 = vld [vmem:[%s9226_s6 + $0x10] sm:$0xff] (!%p347_p2)  ;;  %v417_v20 = vld [vmem:[%s9226_s6 + $0x18] sm:$0xff] (!%p347_p2)  ;;  %vm739_vm4 = vcmask (!%p347_p2), 36864   ;;  %s8297_s27 = smov (!%p347_p2), 104   ;;  %vm751_vm5 = vcmask (!%p347_p2), 39936  }
   0x9   : > { %8076 = vmatpush3.bf16.msra.mxu0 (!%p347_p2), %v8075_v8  ;;  %8083 = vmatprep.subr.bf16.mxu1 (!%p347_p2), %v8292_v3  ;;  %v8436_v19 = vpack.c.bf16 (!%p347_p2), %v415_v17, %v414_v16  ;;  %v8442_v21 = vpack.c.bf16 (!%p347_p2), %v417_v20, %v416_v18  ;;  %v8453_v22 = vld [vmem:[%s9225_s5] ss:$0 sm:$0xff] (!%p347_p2)  ;;  %v8507_v55 = vld [vmem:[%s9228_s8 + $0x8] sm:$0xff] (!%p347_p2)  ;;  %vm1630_vm6 = vcmask (!%p347_p2), 258048  }
   0xa   : > { %8077 = vmatprep.subr.bf16.mxu0 (!%p347_p2), %v8292_v3  ;;  %v7212_v23 = vld [vmem:[%s9223_s3] ss:$0 sm:$0xff] (!%p347_p2) }
   0xb   : > { %v8473_v30 = vld [vmem:[%s9227_s7] ss:$0 sm:$0xff] (!%p347_p2) }
   0xc   : > { %8085 = vmatpush3.bf16.msra.mxu1 (!%p347_p2), %v8399_v12  ;;  %v8516_v60 = vld [vmem:[%s9228_s8] sm:$0xff] (!%p347_p2) }
   0xd   : > { %s9233_s18 = smov (!%p390_p3, %s7204_s18), 1  ;;  %8079 = vmatpush3.bf16.msra.mxu0 %v8078_v13  ;;  %7604 = vmatprep.subr.mxu1 %v8294_v9 }
   0xe   : > { %s8152_s16 = smul.u32 48, %s9233_s18  ;;  %s7210_s19 = sshll.u32 %s9233_s18, 3  ;;  %8086 = vmatprep.subr.bf16.mxu0 %v8292_v3 }
   0xf   : > { %s398_s22 = scalar_lea.vmem %s9221_s1, %s7210_s19 }
  0x10   : > { %s8416_s25 = scalar_lea.vmem %s9220_s0, %s8152_s16  ;;  %v425_v15 = vld [vmem:[%s398_s22] sm:$0x1f]  ;;  %s8295_s22 = smov 120  }
  0x11   : > { %v506_v14 = vld [vmem:[%s8416_s25] sm:$0x1f]  ;;  %7580 = vmatmul.mubr.msk.f32.vlgmr.msra.gmra.mrb[0].mxu0 %vm432_vm1, %v425_v15  ;;  %s9194_s24 = scalar_lea.vmem %s9231_s11, %s8152_s16 }
  0x12   : > { %7591 = vmatmul.mubr.msk.f32.vlgmr.msra.gmra.mrb[0].mxu1 %vm432_vm1, %v506_v14  ;;  %7601 = vmatprep.mubr.msk.f32.mxu0 %vm8293_vm0, %v8294_v9 }
  0x13   : > { %7606 = vmatprep.mubr.msk.f32.mxu1 %vm8293_vm0, %v8294_v9  ;;  %8088 = vmatpush3.bf16.msra.mxu0 %v8436_v19 }
  0x14   : > { %8089 = vmatprep.subr.bf16.mxu0 %v8292_v3 }
  0x17   : > { %8091 = vmatpush3.bf16.msra.mxu0 %v8442_v21 }
  0x18   : > { %7614 = vmatprep.subr.mxu0 %v8294_v9 }
  0x1a   : > { %7602 = vmatmul.mubr.msk.f32.vlgmr.msra.gmra.mrb[2].mxu0 %vm432_vm1, %v506_v14 }
  0x1b   : > { %7616 = vmatprep.mubr.msk.f32.mxu0 %vm8293_vm0, %v8294_v9 }
  0xe4   : > { %v502_v27 = vpop.f32.mrb[0].mxu0 }
  0xe5   : > { %v582_v24 = vpop.f32.mrb[0].mxu1  ;;  %v8459_v28 = vadd.f32 %v7212_v23, %v502_v27  ;;  %v7581_v29 = vpop.f32.mrb[1].mxu0 }
  0xe6   : > { %v583_v25 = vadd.f32 %v8453_v22, %v582_v24  ;;  %v7592_v26 = vpop.f32.mrb[1].mxu1 }
  0xe8   : > { %831 = vrot.lane.b32.xlu0 %v583_v25, %s8295_s22  ;;  %7605 = vmatpush3.xpose.msk.msra.mxu1 %vm662_vm2, %v583_v25 }
  0xe9   : > { %7609 = vmatprep.subr.mxu1 %v8294_v9 }
  0xeb   : > { %7607 = vmatmul.mubr.msk.f32.vlgmr.msra.gmra.mrb[2].mxu1 %vm662_vm2, %v8459_v28 }
  0xec   : > { %829 = vrot.lane.b32.xlu0 %v8459_v28, %s8295_s22  ;;  %7611 = vmatprep.mubr.msk.f32.mxu1 %vm8293_vm0, %v8294_v9 }
  0xed   : > { %v658_v31 = vpop.f32.mrb[2].mxu0 }
  0xee   : > { %v8476_v32 = vadd.f32 %v8473_v30, %v658_v31  ;;  %v7603_v33 = vpop.f32.mrb[3].mxu0  ;;  %v8557_v31 = vld [vmem:[%s9228_s8 + $0x10] sm:$0xff] }
  0xf0   : > { %7610 = vmatpush3.msk.msra.mxu1 %vm755_vm3, %v8476_v32 }
  0xf1   : > { %7619 = vmatprep.subr.mxu1 %v8294_v9 }
 0x15a   : > { %v832_v34 = vpop.permute.xlu0 %831 }
 0x15b   : > { %7615 = vmatpush3.xpose.msk.msra.mxu0 %vm662_vm2, %v832_v34 }
 0x15c   : > { %7624 = vmatprep.subr.mxu0 %v8294_v9 }
 0x15e   : > { %v8483_v35 = vpop.permute.xlu0 %829 }
 0x15f   : > { %7617 = vmatmul.mubr.msk.f32.vlgmr.msra.gmra.mrb[4].mxu0 %vm662_vm2, %v8483_v35 }
 0x160   : > { %7626 = vmatprep.mubr.msk.f32.mxu0 %vm8293_vm0, %v8294_v9  ;;  %7625 = vmatpush3.msra.mxu0 %v8507_v55 }
 0x161   : > { %7634 = vmatprep.subr.mxu0 %v8294_v9 }
 0x1be   : > { %v735_v36 = vpop.f32.mrb[2].mxu1 }
 0x1bf   : > { %v7608_v37 = vpop.f32.mrb[3].mxu1  ;;  %v740_v38 = vsel %vm739_vm4, %v735_v36, -inf }
 0x1c0   : > { %741 = vmax.xlane.f32.xlu1 %v740_v38 }
 0x232   : > { %v903_v39 = vpop.f32.mrb[4].mxu0 }
 0x233   : > { %v7618_v40 = vpop.f32.mrb[5].mxu0  ;;  %v907_v41 = vsel %vm739_vm4, %v903_v39, -inf }
 0x234   : > { %908 = vmax.xlane.f32.xlu1 %v907_v41 }
 0x24d   : > { %v742_v42 = vpop.xlane.xlu1 %741 }
 0x24e   : > { %v743_v43 = vsub.f32 %v735_v36, %v742_v42 }
 0x250   : > { %v744_v44 = vmul.f32 1.442695, %v743_v43 }
 0x252   : > { %8167 = vpow2.f32 %v744_v44 }
 0x25c   : > { %v8168_v45 = vpop.eup %8167 }
 0x25d   : > { %v746_v46 = vsel %vm739_vm4, %v8168_v45, 0.0 }
 0x25e   : > { %747 = vadd.xlane.f32.xlu0 %v746_v46 }
 0x274   : > { %1230 = vrot.lane.b32.xlu0 %v8476_v32, %s8296_s26 }
 0x278   : > { %1383 = vrot.lane.b32.xlu0 %v583_v25, %s8297_s27 }
 0x2c1   : > { %v909_v47 = vpop.xlane.xlu1 %908 }
 0x2c2   : > { %v910_v48 = vsub.f32 %v903_v39, %v909_v47 }
 0x2c4   : > { %v911_v49 = vmul.f32 1.442695, %v910_v48 }
 0x2c6   : > { %8169 = vpow2.f32 %v911_v49 }
 0x2d0   : > { %v8170_v50 = vpop.eup %8169 }
 0x2d1   : > { %v913_v51 = vsel %vm739_vm4, %v8170_v50, 0.0 }
 0x2d2   : > { %914 = vadd.xlane.f32.xlu1 %v913_v51  ;;  %v8584_v51 = vld [vmem:[%s9228_s8 + $0x18] sm:$0xff] }
 0x2e3   : > { %918 = vrot.lane.b32.xlu1 %v8476_v32, %s8295_s22 }
 0x2e7   : > { %1143 = vrot.lane.b32.xlu1 %v583_v25, %s8296_s26 }
 0x2eb   : > { %v748_v52 = vpop.xlane.xlu0 %747  ;;  %1141 = vrot.lane.b32.xlu1 %v8459_v28, %s8296_s26 }
 0x2ec   : > { %8171 = vrcp.f32 %v748_v52 }
 0x2ef   : > { %v1231_v62 = vpop.permute.xlu0 %1230 }
 0x2f3   : > { %v1384_v24 = vpop.permute.xlu0 %1383 }
 0x2f6   : > { %v8172_v53 = vpop.eup %8171 }
 0x2f7   : > { %v750_v54 = vmul.f32 %v8172_v53, %v8168_v45 }
 0x2f9   : > { %7612 = vmatmul.mubr.msk.f32.vlgmr.msra.gmra.mrb[4].mxu1 %vm751_vm5, %v750_v54 }
 0x2fa   : > { %7621 = vmatprep.mubr.msk.f32.mxu1 %vm8293_vm0, %v8294_v9 }
 0x35f   : > { %v915_v56 = vpop.xlane.xlu1 %914 }
 0x360   : > { %8173 = vrcp.f32 %v915_v56 }
 0x363   : > { %v919_v57 = vpop.permute.xlu1 %918 }
 0x364   : > { %7620 = vmatpush3.msk.msra.mxu1 %vm755_vm3, %v919_v57 }
 0x365   : > { %7629 = vmatprep.subr.mxu1 %v8294_v9 }
 0x367   : > { %v1144_v0 = vpop.permute.xlu1 %1143 }
 0x36a   : > { %v8174_v58 = vpop.eup %8173 }
 0x36b   : > { %v917_v59 = vmul.f32 %v8174_v58, %v8170_v50  ;;  %v8533_v5 = vpop.permute.xlu1 %1141 }
 0x36d   : > { %7622 = vmatmul.mubr.msk.f32.vlgmr.msra.gmra.mrb[6].mxu1 %vm751_vm5, %v917_v59 }
 0x36e   : > { %7630 = vmatpush3.msra.mxu1 %v8516_v60  ;;  %7631 = vmatprep.mubr.msk.f32.mxu1 %vm8293_vm0, %v8294_v9 }
 0x36f   : > { %7639 = vmatprep.subr.mxu1 %v8294_v9 }
 0x3cc   : > { %v825_v61 = vpop.f32.mrb[4].mxu1 }
 0x3cd   : > { %v7613_v63 = vpop.f32.mrb[5].mxu1  ;;  %7632 = vmatmul.mubr.msk.f32.vlgmr.msra.gmra.mrb[8].mxu1 %vm662_vm2, %v825_v61 }
 0x3ce   : > { %7640 = vmatpush3.msk.msra.mxu1 %vm755_vm3, %v1231_v62  ;;  %7641 = vmatprep.mubr.msk.f32.mxu1 %vm8293_vm0, %v8294_v9 }
 0x3cf   : > { %7649 = vmatprep.subr.mxu1 %v8294_v9 }
 0x440   : > { %v991_v1 = vpop.f32.mrb[6].mxu1 }
 0x441   : > { %v7623_v2 = vpop.f32.mrb[7].mxu1  ;;  %7627 = vmatmul.mubr.msk.f32.vlgmr.msra.gmra.mrb[6].mxu0 %vm662_vm2, %v991_v1 }
 0x442   : > { %7635 = vmatpush3.xpose.msk.msra.mxu0 %vm662_vm2, %v1144_v0  ;;  %7636 = vmatprep.mubr.msk.f32.mxu0 %vm8293_vm0, %v8294_v9 }
 0x443   : > { %7644 = vmatprep.subr.mxu0 %v8294_v9 }
 0x445   : > { %7637 = vmatmul.mubr.msk.f32.vlgmr.msra.gmra.mrb[8].mxu0 %vm662_vm2, %v8533_v5 }
 0x446   : > { %7646 = vmatprep.mubr.msk.f32.mxu0 %vm8293_vm0, %v8294_v9  ;;  %7645 = vmatpush3.msra.mxu0 %v8557_v31 }
 0x447   : > { %7654 = vmatprep.subr.mxu0 %v8294_v9 }
 0x4a0   : > { %v1137_v6 = vpop.f32.mrb[8].mxu1 }
 0x4a1   : > { %v7633_v7 = vpop.f32.mrb[9].mxu1 }
 0x514   : > { %v1064_v8 = vpop.f32.mrb[6].mxu0 }
 0x515   : > { %v1138_v10 = vadd.f32 %v1137_v6, %v1064_v8  ;;  %v7628_v11 = vpop.f32.mrb[7].mxu0 }
 0x518   : > { %v1215_v13 = vpop.f32.mrb[8].mxu0 }
 0x519   : > { %v7638_v14 = vpop.f32.mrb[9].mxu0  ;;  %v1219_v15 = vsel %vm739_vm4, %v1215_v13, -inf }
 0x51a   : > { %1220 = vmax.xlane.f32.xlu1 %v1219_v15 }
 0x5a7   : > { %v1221_v16 = vpop.xlane.xlu1 %1220 }
 0x5a8   : > { %v1222_v17 = vsub.f32 %v1215_v13, %v1221_v16 }
 0x5aa   : > { %v1223_v18 = vmul.f32 1.442695, %v1222_v17 }
 0x5ac   : > { %8175 = vpow2.f32 %v1223_v18 }
 0x5b6   : > { %v8176_v20 = vpop.eup %8175 }
 0x5b7   : > { %v1225_v23 = vsel %vm739_vm4, %v8176_v20, 0.0 }
 0x5b8   : > { %1226 = vadd.xlane.f32.xlu0 %v1225_v23 }
 0x5ce   : > { %1381 = vrot.lane.b32.xlu0 %v8459_v28, %s8297_s27 }
 0x645   : > { %v1227_v25 = vpop.xlane.xlu0 %1226 }
 0x646   : > { %8177 = vrcp.f32 %v1227_v25 }
 0x649   : > { %v8548_v29 = vpop.permute.xlu0 %1381 }
 0x650   : > { %v8178_v26 = vpop.eup %8177 }
 0x651   : > { %v1229_v27 = vmul.f32 %v8178_v26, %v8176_v20 }
 0x653   : > { %7642 = vmatmul.mubr.msk.f32.vlgmr.msra.gmra.mrb[10].mxu1 %vm751_vm5, %v1229_v27 }
 0x654   : > { %7650 = vmatpush3.xpose.msk.msra.mxu1 %vm662_vm2, %v1384_v24  ;;  %7651 = vmatprep.mubr.msk.f32.mxu1 %vm8293_vm0, %v8294_v9 }
 0x655   : > { %7659 = vmatprep.subr.mxu1 %v8294_v9 }
 0x657   : > { %7652 = vmatmul.mubr.msk.f32.vlgmr.msra.gmra.mrb[12].mxu1 %vm662_vm2, %v8548_v29 }
 0x658   : > { %7661 = vmatprep.mubr.msk.f32.mxu1 %vm8293_vm0, %v8294_v9  ;;  %7660 = vmatpush3.msra.mxu1 %v8584_v51 }
 0x659   : > { %8098 = vmatprep.subr.bf16.mxu1 %v8292_v3 }
 0x726   : > { %v1303_v33 = vpop.f32.mrb[10].mxu1 }
 0x727   : > { %v7643_v34 = vpop.f32.mrb[11].mxu1  ;;  %7647 = vmatmul.mubr.msk.f32.vlgmr.msra.gmra.mrb[10].mxu0 %vm662_vm2, %v1303_v33 }
 0x728   : > { %7656 = vmatprep.mubr.msk.f32.mxu0 %vm8293_vm0, %v8294_v9 }
 0x72a   : > { %v1455_v36 = vpop.f32.mrb[12].mxu1 }
 0x72b   : > { %v7653_v37 = vpop.f32.mrb[13].mxu1  ;;  %v1459_v38 = vsel %vm739_vm4, %v1455_v36, -inf }
 0x72c   : > { %1460 = vmax.xlane.f32.xlu0 %v1459_v38 }
 0x7b9   : > { %v1461_v39 = vpop.xlane.xlu0 %1460 }
 0x7ba   : > { %v1462_v40 = vsub.f32 %v1455_v36, %v1461_v39 }
 0x7bc   : > { %v1463_v41 = vmul.f32 1.442695, %v1462_v40 }
 0x7be   : > { %8179 = vpow2.f32 %v1463_v41 }
 0x7c8   : > { %v8180_v42 = vpop.eup %8179 }
 0x7c9   : > { %v1465_v43 = vsel %vm739_vm4, %v8180_v42, 0.0 }
 0x7ca   : > { %1466 = vadd.xlane.f32.xlu1 %v1465_v43 }
 0x7db   : > { %1470 = vrot.lane.b32.xlu1 %v8476_v32, %s8297_s27  ;;  %v7240_v32 = vld [vmem:[%s8416_s25 + $0x8] sm:$0x1f] }
 0x7fa   : > { %v1376_v44 = vpop.f32.mrb[10].mxu0 }
 0x7fb   : > { %v1380_v45 = vadd.f32 %v1376_v44, %v1138_v10  ;;  %v7648_v46 = vpop.f32.mrb[11].mxu0 }
 0x857   : > { %v1467_v47 = vpop.xlane.xlu1 %1466 }
 0x858   : > { %8181 = vrcp.f32 %v1467_v47 }
 0x85b   : > { %v1471_v48 = vpop.permute.xlu1 %1470 }
 0x85c   : > { %7655 = vmatpush3.msk.msra.mxu0 %vm755_vm3, %v1471_v48 }
 0x85d   : > { %8092 = vmatprep.subr.bf16.mxu0 %v8292_v3 }
 0x862   : > { %v8182_v49 = vpop.eup %8181 }
 0x863   : > { %v1469_v50 = vmul.f32 %v8182_v49, %v8180_v42 }
 0x865   : > { %7657 = vmatmul.mubr.msk.f32.vlgmr.msra.gmra.mrb[12].mxu0 %vm751_vm5, %v1469_v50 }
 0x866   : > { %8094 = vmatpush3.bf16.msra.mxu0 %v8376_v4  ;;  %7672 = vmatprep.mubr.msk.f32.mxu0 %vm8293_vm0, %v8294_v9 }
 0x867   : > { %8095 = vmatprep.subr.bf16.mxu0 %v8292_v3 }
 0x86a   : > { %8097 = vmatpush3.bf16.msra.mxu0 %v8399_v12 }
 0x86b   : > { %7686 = vmatprep.subr.mxu0 %v8294_v9 }
 0x86d   : > { %7673 = vmatmul.mubr.msk.f32.vlgmr.msra.gmra.mrb[14].mxu0 %vm432_vm1, %v7240_v32 }
 0x86e   : > { %7688 = vmatprep.mubr.msk.f32.mxu0 %vm8293_vm0, %v8294_v9 }
 0x938   : > { %v1543_v52 = vpop.f32.mrb[12].mxu0 }
 0x939   : > { %v7658_v53 = vpop.f32.mrb[13].mxu0  ;;  %7662 = vmatmul.mubr.msk.f32.vlgmr.msra.gmra.mrb[14].mxu1 %vm662_vm2, %v1543_v52 }
 0x93a   : > { %8100 = vmatpush3.bf16.msra.mxu1 %v8436_v19  ;;  %7683 = vmatprep.mubr.msk.f32.mxu1 %vm8293_vm0, %v8294_v9 }
 0x93b   : > { %8101 = vmatprep.subr.bf16.mxu1 %v8292_v3 }
 0x93e   : > { %8103 = vmatpush3.bf16.msra.mxu1 %v8442_v21 }
 0x93f   : > { %7691 = vmatprep.subr.mxu1 %v8294_v9 }
 0x940   : > { %v1718_v54 = vpop.f32.mrb[14].mxu0 }
 0x941   : > { %v8596_v56 = vadd.f32 %v8453_v22, %v1718_v54  ;;  %v7674_v57 = vpop.f32.mrb[15].mxu0  ;;  %7684 = vmatmul.mubr.msk.f32.vlgmr.msra.gmra.mrb[16].mxu1 %vm432_vm1, %v7240_v32 }
 0x942   : > { %7693 = vmatprep.mubr.msk.f32.mxu1 %vm8293_vm0, %v8294_v9 }
 0x943   : > { %1952 = vrot.lane.b32.xlu1 %v8596_v56, %s8295_s22  ;;  %7687 = vmatpush3.xpose.msk.msra.mxu0 %vm662_vm2, %v8596_v56 }
 0x944   : > { %7696 = vmatprep.subr.mxu0 %v8294_v9 }
 0x946   : > { %7689 = vmatmul.mubr.msk.f32.vlgmr.msra.gmra.mrb[16].mxu0 %vm662_vm2, %v8459_v28 }
 0x947   : > { %7698 = vmatprep.mubr.msk.f32.mxu0 %vm8293_vm0, %v8294_v9 }
 0x9b5   : > { %v1953_v58 = vpop.permute.xlu1 %1952 }
 0x9b6   : > { %7697 = vmatpush3.xpose.msk.msra.mxu0 %vm662_vm2, %v1953_v58 }
 0x9b7   : > { %7706 = vmatprep.subr.mxu0 %v8294_v9 }
 0x9b9   : > { %7699 = vmatmul.mubr.msk.f32.vlgmr.msra.gmra.mrb[18].mxu0 %vm662_vm2, %v8483_v35 }
 0x9ba   : > { %7707 = vmatpush3.msra.mxu0 %v8507_v55  ;;  %7708 = vmatprep.mubr.msk.f32.mxu0 %vm8293_vm0, %v8294_v9 }
 0x9bb   : > { %7716 = vmatprep.subr.mxu0 %v8294_v9 }
 0xa0c   : > { %v1616_v59 = vpop.f32.mrb[14].mxu1 }
 0xa0d   : > { %v8618_v61 = vadd.f32 %v1616_v59, %v1380_v45  ;;  %v7663_v62 = vpop.f32.mrb[15].mxu1 }
 0xa14   : > { %v1788_v15 = vpop.f32.mrb[16].mxu1 }
 0xa15   : > { %v7685_v16 = vpop.f32.mrb[17].mxu1  ;;  %v8626_v17 = vadd.f32 %v8473_v30, %v1788_v15 }
 0xa17   : > { %7692 = vmatpush3.msk.msra.mxu1 %vm755_vm3, %v8626_v17 }
 0xa18   : > { %7701 = vmatprep.subr.mxu1 %v8294_v9 }
 0xa19   : > { %v1861_v63 = vpop.f32.mrb[16].mxu0 }
 0xa1a   : > { %v7690_v0 = vpop.f32.mrb[17].mxu0  ;;  %v1865_v1 = vsel %vm739_vm4, %v1861_v63, -inf }
 0xa1b   : > { %1866 = vmax.xlane.f32.xlu1 %v1865_v1 }
 0xa2c   : > { %2260 = vrot.lane.b32.xlu1 %v8596_v56, %s8296_s26 }
 0xa8c   : > { %v2022_v2 = vpop.f32.mrb[18].mxu0 }
 0xa8d   : > { %v7700_v6 = vpop.f32.mrb[19].mxu0  ;;  %v2026_v7 = vsel %vm739_vm4, %v2022_v2, -inf }
 0xa8e   : > { %2027 = vmax.xlane.f32.xlu0 %v2026_v7 }
 0xaa8   : > { %v1867_v8 = vpop.xlane.xlu1 %1866 }
 0xaa9   : > { %v1868_v10 = vsub.f32 %v1861_v63, %v1867_v8 }
 0xaab   : > { %v1869_v11 = vmul.f32 1.442695, %v1868_v10 }
 0xaac   : > { %v2261_v42 = vpop.permute.xlu1 %2260 }
 0xaad   : > { %8183 = vpow2.f32 %v1869_v11 }
 0xab7   : > { %v8184_v13 = vpop.eup %8183 }
 0xab8   : > { %v1871_v14 = vsel %vm739_vm4, %v8184_v13, 0.0 }
 0xab9   : > { %1872 = vadd.xlane.f32.xlu0 %v1871_v14 }
 0xb1b   : > { %v2028_v18 = vpop.xlane.xlu0 %2027 }
 0xb1c   : > { %v2029_v20 = vsub.f32 %v2022_v2, %v2028_v18 }
 0xb1e   : > { %v2030_v23 = vmul.f32 1.442695, %v2029_v20 }
 0xb20   : > { %8185 = vpow2.f32 %v2030_v23 }
 0xb2a   : > { %v8186_v24 = vpop.eup %8185 }
 0xb2b   : > { %v2032_v25 = vsel %vm739_vm4, %v8186_v24, 0.0 }
 0xb2c   : > { %2033 = vadd.xlane.f32.xlu0 %v2032_v25 }
 0xb42   : > { %2037 = vrot.lane.b32.xlu0 %v8626_v17, %s8295_s22 }
 0xb46   : > { %v1873_v26 = vpop.xlane.xlu0 %1872 }
 0xb47   : > { %8187 = vrcp.f32 %v1873_v26  ;;  %v7264_v26 = vld [vmem:[%s8416_s25 + $0x10] sm:$0x1f] }
 0xb51   : > { %v8188_v27 = vpop.eup %8187 }
 0xb52   : > { %v1875_v33 = vmul.f32 %v8188_v27, %v8184_v13 }
 0xb54   : > { %7694 = vmatmul.mubr.msk.f32.vlgmr.msra.gmra.mrb[18].mxu1 %vm751_vm5, %v1875_v33 }
 0xb55   : > { %7703 = vmatprep.mubr.msk.f32.mxu1 %vm8293_vm0, %v8294_v9 }
 0xbb9   : > { %v2034_v34 = vpop.xlane.xlu0 %2033 }
 0xbba   : > { %8189 = vrcp.f32 %v2034_v34 }
 0xbbd   : > { %v2038_v36 = vpop.permute.xlu0 %2037 }
 0xbbe   : > { %7702 = vmatpush3.msk.msra.mxu1 %vm755_vm3, %v2038_v36 }
 0xbbf   : > { %7711 = vmatprep.subr.mxu1 %v8294_v9 }
 0xbc4   : > { %v8190_v37 = vpop.eup %8189 }
 0xbc5   : > { %v2036_v38 = vmul.f32 %v8190_v37, %v8186_v24 }
 0xbc7   : > { %7704 = vmatmul.mubr.msk.f32.vlgmr.msra.gmra.mrb[20].mxu1 %vm751_vm5, %v2036_v38 }
 0xbc8   : > { %7712 = vmatpush3.msra.mxu1 %v8516_v60  ;;  %7713 = vmatprep.mubr.msk.f32.mxu1 %vm8293_vm0, %v8294_v9 }
 0xbc9   : > { %7721 = vmatprep.subr.mxu1 %v8294_v9 }
 0xc27   : > { %v1948_v39 = vpop.f32.mrb[18].mxu1 }
 0xc28   : > { %v7695_v40 = vpop.f32.mrb[19].mxu1  ;;  %7714 = vmatmul.mubr.msk.f32.vlgmr.msra.gmra.mrb[22].mxu1 %vm662_vm2, %v1948_v39 }
 0xc29   : > { %7723 = vmatprep.mubr.msk.f32.mxu1 %vm8293_vm0, %v8294_v9 }
 0xc9a   : > { %v2110_v41 = vpop.f32.mrb[20].mxu1 }
 0xc9b   : > { %v7705_v43 = vpop.f32.mrb[21].mxu1  ;;  %7709 = vmatmul.mubr.msk.f32.vlgmr.msra.gmra.mrb[20].mxu0 %vm662_vm2, %v2110_v41 }
 0xc9c   : > { %7717 = vmatpush3.xpose.msk.msra.mxu0 %vm662_vm2, %v2261_v42  ;;  %7718 = vmatprep.mubr.msk.f32.mxu0 %vm8293_vm0, %v8294_v9 }
 0xc9d   : > { %7726 = vmatprep.subr.mxu0 %v8294_v9 }
 0xc9f   : > { %7719 = vmatmul.mubr.msk.f32.vlgmr.msra.gmra.mrb[22].mxu0 %vm662_vm2, %v8533_v5 }
 0xca0   : > { %7727 = vmatpush3.msra.mxu0 %v8557_v31  ;;  %7728 = vmatprep.mubr.msk.f32.mxu0 %vm8293_vm0, %v8294_v9 }
 0xca1   : > { %7736 = vmatprep.subr.mxu0 %v8294_v9 }
 0xcfb   : > { %v2256_v44 = vpop.f32.mrb[22].mxu1 }
 0xcfc   : > { %v7715_v45 = vpop.f32.mrb[23].mxu1 }
 0xd6e   : > { %v2183_v46 = vpop.f32.mrb[20].mxu0 }
 0xd6f   : > { %v2257_v47 = vadd.f32 %v2256_v44, %v2183_v46  ;;  %v7710_v48 = vpop.f32.mrb[21].mxu0 }
 0xd72   : > { %v2330_v49 = vpop.f32.mrb[22].mxu0 }
 0xd73   : > { %v7720_v50 = vpop.f32.mrb[23].mxu0  ;;  %v2334_v32 = vsel %vm739_vm4, %v2330_v49, -inf }
 0xd74   : > { %2335 = vmax.xlane.f32.xlu0 %v2334_v32 }
 0xd8a   : > { %2345 = vrot.lane.b32.xlu0 %v8626_v17, %s8296_s26 }
 0xe01   : > { %v2336_v52 = vpop.xlane.xlu0 %2335 }
 0xe02   : > { %v2337_v53 = vsub.f32 %v2330_v49, %v2336_v52 }
 0xe04   : > { %v2338_v54 = vmul.f32 1.442695, %v2337_v53 }
 0xe05   : > { %v2346_v57 = vpop.permute.xlu0 %2345 }
 0xe06   : > { %8191 = vpow2.f32 %v2338_v54  ;;  %7722 = vmatpush3.msk.msra.mxu1 %vm755_vm3, %v2346_v57 }
 0xe07   : > { %7731 = vmatprep.subr.mxu1 %v8294_v9 }
 0xe10   : > { %v8192_v58 = vpop.eup %8191 }
 0xe11   : > { %v2340_v59 = vsel %vm739_vm4, %v8192_v58, 0.0 }
 0xe12   : > { %2341 = vadd.xlane.f32.xlu1 %v2340_v59 }
 0xe23   : > { %2496 = vrot.lane.b32.xlu1 %v8596_v56, %s8297_s27 }
 0xe9f   : > { %v2342_v62 = vpop.xlane.xlu1 %2341 }
 0xea0   : > { %8193 = vrcp.f32 %v2342_v62 }
 0xea3   : > { %v2497_v1 = vpop.permute.xlu1 %2496 }
 0xeaa   : > { %v8194_v63 = vpop.eup %8193 }
 0xeab   : > { %v2344_v0 = vmul.f32 %v8194_v63, %v8192_v58 }
 0xead   : > { %7724 = vmatmul.mubr.msk.f32.vlgmr.msra.gmra.mrb[24].mxu1 %vm751_vm5, %v2344_v0 }
 0xeae   : > { %7732 = vmatpush3.xpose.msk.msra.mxu1 %vm662_vm2, %v2497_v1  ;;  %7733 = vmatprep.mubr.msk.f32.mxu1 %vm8293_vm0, %v8294_v9 }
 0xeaf   : > { %7741 = vmatprep.subr.mxu1 %v8294_v9 }
 0xeb1   : > { %7734 = vmatmul.mubr.msk.f32.vlgmr.msra.gmra.mrb[26].mxu1 %vm662_vm2, %v8548_v29 }
 0xeb2   : > { %7742 = vmatpush3.msra.mxu1 %v8584_v51  ;;  %7743 = vmatprep.mubr.msk.f32.mxu1 %vm8293_vm0, %v8294_v9 }
 0xeb3   : > { %8110 = vmatprep.subr.bf16.mxu1 %v8292_v3 }
 0xf80   : > { %v2418_v56 = vpop.f32.mrb[24].mxu1 }
 0xf81   : > { %v7725_v2 = vpop.f32.mrb[25].mxu1  ;;  %7729 = vmatmul.mubr.msk.f32.vlgmr.msra.gmra.mrb[24].mxu0 %vm662_vm2, %v2418_v56 }
 0xf82   : > { %7738 = vmatprep.mubr.msk.f32.mxu0 %vm8293_vm0, %v8294_v9 }
 0xf84   : > { %v2566_v6 = vpop.f32.mrb[26].mxu1 }
 0xf85   : > { %v7735_v7 = vpop.f32.mrb[27].mxu1  ;;  %v2570_v8 = vsel %vm739_vm4, %v2566_v6, -inf }
 0xf86   : > { %2571 = vmax.xlane.f32.xlu0 %v2570_v8 }
 0xf9c   : > { %2581 = vrot.lane.b32.xlu0 %v8626_v17, %s8297_s27 }
0x1013   : > { %v2572_v10 = vpop.xlane.xlu0 %2571 }
0x1014   : > { %v2573_v11 = vsub.f32 %v2566_v6, %v2572_v10 }
0x1016   : > { %v2574_v13 = vmul.f32 1.442695, %v2573_v11 }
0x1017   : > { %v2582_v14 = vpop.permute.xlu0 %2581 }
0x1018   : > { %8195 = vpow2.f32 %v2574_v13  ;;  %7737 = vmatpush3.msk.msra.mxu0 %vm755_vm3, %v2582_v14 }
0x1019   : > { %8104 = vmatprep.subr.bf16.mxu0 %v8292_v3 }
0x1022   : > { %v8196_v15 = vpop.eup %8195 }
0x1023   : > { %v2576_v16 = vsel %vm739_vm4, %v8196_v15, 0.0 }
0x1024   : > { %2577 = vadd.xlane.f32.xlu1 %v2576_v16 }
0x1054   : > { %v2491_v18 = vpop.f32.mrb[24].mxu0 }
0x1055   : > { %v2495_v20 = vadd.f32 %v2491_v18, %v2257_v47  ;;  %v7730_v23 = vpop.f32.mrb[25].mxu0 }
0x10b1   : > { %v2578_v24 = vpop.xlane.xlu1 %2577 }
0x10b2   : > { %8197 = vrcp.f32 %v2578_v24 }
0x10bc   : > { %v8198_v17 = vpop.eup %8197 }
0x10bd   : > { %v2580_v25 = vmul.f32 %v8198_v17, %v8196_v15 }
0x10bf   : > { %7739 = vmatmul.mubr.msk.f32.vlgmr.msra.gmra.mrb[26].mxu0 %vm751_vm5, %v2580_v25 }
0x10c0   : > { %8106 = vmatpush3.bf16.msra.mxu0 %v8376_v4  ;;  %7754 = vmatprep.mubr.msk.f32.mxu0 %vm8293_vm0, %v8294_v9 }
0x10c1   : > { %8107 = vmatprep.subr.bf16.mxu0 %v8292_v3 }
0x10c4   : > { %8109 = vmatpush3.bf16.msra.mxu0 %v8399_v12 }
0x10c5   : > { %7768 = vmatprep.subr.mxu0 %v8294_v9 }
0x10c7   : > { %7755 = vmatmul.mubr.msk.f32.vlgmr.msra.gmra.mrb[28].mxu0 %vm432_vm1, %v7264_v26 }
0x10c8   : > { %7770 = vmatprep.mubr.msk.f32.mxu0 %vm8293_vm0, %v8294_v9 }
0x1192   : > { %v2654_v27 = vpop.f32.mrb[26].mxu0 }
0x1193   : > { %v7740_v33 = vpop.f32.mrb[27].mxu0  ;;  %7744 = vmatmul.mubr.msk.f32.vlgmr.msra.gmra.mrb[28].mxu1 %vm662_vm2, %v2654_v27 }
0x1194   : > { %8112 = vmatpush3.bf16.msra.mxu1 %v8436_v19  ;;  %7765 = vmatprep.mubr.msk.f32.mxu1 %vm8293_vm0, %v8294_v9 }
0x1195   : > { %8113 = vmatprep.subr.bf16.mxu1 %v8292_v3 }
0x1198   : > { %8115 = vmatpush3.bf16.msra.mxu1 %v8442_v21 }
0x1199   : > { %7773 = vmatprep.subr.mxu1 %v8294_v9 }
0x119a   : > { %v2816_v34 = vpop.f32.mrb[28].mxu0 }
0x119b   : > { %v8705_v36 = vadd.f32 %v8453_v22, %v2816_v34  ;;  %v7756_v37 = vpop.f32.mrb[29].mxu0  ;;  %7766 = vmatmul.mubr.msk.f32.vlgmr.msra.gmra.mrb[30].mxu1 %vm432_vm1, %v7264_v26 }
0x119c   : > { %7775 = vmatprep.mubr.msk.f32.mxu1 %vm8293_vm0, %v8294_v9 }
0x119d   : > { %3050 = vrot.lane.b32.xlu1 %v8705_v36, %s8295_s22  ;;  %7769 = vmatpush3.xpose.msk.msra.mxu0 %vm662_vm2, %v8705_v36 }
0x119e   : > { %7778 = vmatprep.subr.mxu0 %v8294_v9 }
0x11a0   : > { %7771 = vmatmul.mubr.msk.f32.vlgmr.msra.gmra.mrb[30].mxu0 %vm662_vm2, %v8459_v28 }
0x11a1   : > { %7780 = vmatprep.mubr.msk.f32.mxu0 %vm8293_vm0, %v8294_v9 }
0x120f   : > { %v3051_v38 = vpop.permute.xlu1 %3050 }
0x1210   : > { %7779 = vmatpush3.xpose.msk.msra.mxu0 %vm662_vm2, %v3051_v38 }
0x1211   : > { %7788 = vmatprep.subr.mxu0 %v8294_v9 }
0x1213   : > { %7781 = vmatmul.mubr.msk.f32.vlgmr.msra.gmra.mrb[32].mxu0 %vm662_vm2, %v8483_v35 }
0x1214   : > { %7789 = vmatpush3.msra.mxu0 %v8507_v55  ;;  %7790 = vmatprep.mubr.msk.f32.mxu0 %vm8293_vm0, %v8294_v9 }
0x1215   : > { %7798 = vmatprep.subr.mxu0 %v8294_v9 }
0x1266   : > { %v2727_v39 = vpop.f32.mrb[28].mxu1 }
0x1267   : > { %v8727_v40 = vadd.f32 %v2727_v39, %v2495_v20  ;;  %v7745_v41 = vpop.f32.mrb[29].mxu1 }
0x126e   : > { %v2886_v53 = vpop.f32.mrb[30].mxu1 }
0x126f   : > { %v7767_v54 = vpop.f32.mrb[31].mxu1  ;;  %v8735_v57 = vadd.f32 %v8473_v30, %v2886_v53 }
0x1271   : > { %7774 = vmatpush3.msk.msra.mxu1 %vm755_vm3, %v8735_v57 }
0x1272   : > { %7783 = vmatprep.subr.mxu1 %v8294_v9 }
0x1273   : > { %v2959_v42 = vpop.f32.mrb[30].mxu0 }
0x1274   : > { %v7772_v43 = vpop.f32.mrb[31].mxu0  ;;  %v2963_v44 = vsel %vm739_vm4, %v2959_v42, -inf }
0x1275   : > { %2964 = vmax.xlane.f32.xlu0 %v2963_v44 }
0x12e6   : > { %v3120_v45 = vpop.f32.mrb[32].mxu0 }
0x12e7   : > { %v7782_v46 = vpop.f32.mrb[33].mxu0  ;;  %v3124_v47 = vsel %vm739_vm4, %v3120_v45, -inf }
0x12e8   : > { %3125 = vmax.xlane.f32.xlu1 %v3124_v47 }
0x12f9   : > { %3358 = vrot.lane.b32.xlu1 %v8705_v36, %s8296_s26 }
0x1302   : > { %v2965_v48 = vpop.xlane.xlu0 %2964 }
0x1303   : > { %v2966_v49 = vsub.f32 %v2959_v42, %v2965_v48 }
0x1305   : > { %v2967_v50 = vmul.f32 1.442695, %v2966_v49 }
0x1307   : > { %8199 = vpow2.f32 %v2967_v50 }
0x1311   : > { %v8200_v32 = vpop.eup %8199 }
0x1312   : > { %v2969_v52 = vsel %vm739_vm4, %v8200_v32, 0.0 }
0x1313   : > { %2970 = vadd.xlane.f32.xlu0 %v2969_v52 }
0x1375   : > { %v3126_v58 = vpop.xlane.xlu1 %3125 }
0x1376   : > { %v3127_v59 = vsub.f32 %v3120_v45, %v3126_v58 }
0x1378   : > { %v3128_v62 = vmul.f32 1.442695, %v3127_v59 }
0x1379   : > { %v3359_v14 = vpop.permute.xlu1 %3358 }
0x137a   : > { %8201 = vpow2.f32 %v3128_v62 }
0x1384   : > { %v8202_v63 = vpop.eup %8201 }
0x1385   : > { %v3130_v0 = vsel %vm739_vm4, %v8202_v63, 0.0 }
0x1386   : > { %3131 = vadd.xlane.f32.xlu0 %v3130_v0 }
0x139c   : > { %3135 = vrot.lane.b32.xlu0 %v8735_v57, %s8295_s22 }
0x13a0   : > { %v2971_v1 = vpop.xlane.xlu0 %2970 }
0x13a1   : > { %8203 = vrcp.f32 %v2971_v1  ;;  %v8802_v1 = vld [vmem:[%s8416_s25 + $0x18] sm:$0x1f] }
0x13ab   : > { %v8204_v30 = vpop.eup %8203 }
0x13ac   : > { %v2973_v56 = vmul.f32 %v8204_v30, %v8200_v32 }
0x13ae   : > { %7776 = vmatmul.mubr.msk.f32.vlgmr.msra.gmra.mrb[32].mxu1 %vm751_vm5, %v2973_v56 }
0x13af   : > { %7785 = vmatprep.mubr.msk.f32.mxu1 %vm8293_vm0, %v8294_v9 }
0x1413   : > { %v3132_v2 = vpop.xlane.xlu0 %3131 }
0x1414   : > { %8205 = vrcp.f32 %v3132_v2 }
0x1417   : > { %v3136_v6 = vpop.permute.xlu0 %3135 }
0x1418   : > { %7784 = vmatpush3.msk.msra.mxu1 %vm755_vm3, %v3136_v6 }
0x1419   : > { %7793 = vmatprep.subr.mxu1 %v8294_v9 }
0x141e   : > { %v8206_v7 = vpop.eup %8205 }
0x141f   : > { %v3134_v8 = vmul.f32 %v8206_v7, %v8202_v63 }
0x1421   : > { %7786 = vmatmul.mubr.msk.f32.vlgmr.msra.gmra.mrb[34].mxu1 %vm751_vm5, %v3134_v8 }
0x1422   : > { %7794 = vmatpush3.msra.mxu1 %v8516_v60  ;;  %7795 = vmatprep.mubr.msk.f32.mxu1 %vm8293_vm0, %v8294_v9 }
0x1423   : > { %7803 = vmatprep.subr.mxu1 %v8294_v9 }
0x1481   : > { %v3046_v10 = vpop.f32.mrb[32].mxu1 }
0x1482   : > { %v7777_v11 = vpop.f32.mrb[33].mxu1  ;;  %7796 = vmatmul.mubr.msk.f32.vlgmr.msra.gmra.mrb[36].mxu1 %vm662_vm2, %v3046_v10 }
0x1483   : > { %7805 = vmatprep.mubr.msk.f32.mxu1 %vm8293_vm0, %v8294_v9 }
0x14f4   : > { %v3208_v13 = vpop.f32.mrb[34].mxu1 }
0x14f5   : > { %v7787_v15 = vpop.f32.mrb[35].mxu1  ;;  %7791 = vmatmul.mubr.msk.f32.vlgmr.msra.gmra.mrb[34].mxu0 %vm662_vm2, %v3208_v13 }
0x14f6   : > { %7799 = vmatpush3.xpose.msk.msra.mxu0 %vm662_vm2, %v3359_v14  ;;  %7800 = vmatprep.mubr.msk.f32.mxu0 %vm8293_vm0, %v8294_v9 }
0x14f7   : > { %7808 = vmatprep.subr.mxu0 %v8294_v9 }
0x14f9   : > { %7801 = vmatmul.mubr.msk.f32.vlgmr.msra.gmra.mrb[36].mxu0 %vm662_vm2, %v8533_v5 }
0x14fa   : > { %7809 = vmatpush3.msra.mxu0 %v8557_v31  ;;  %7810 = vmatprep.mubr.msk.f32.mxu0 %vm8293_vm0, %v8294_v9 }
0x14fb   : > { %7818 = vmatprep.subr.mxu0 %v8294_v9 }
0x1555   : > { %v3354_v16 = vpop.f32.mrb[36].mxu1 }
0x1556   : > { %v7797_v18 = vpop.f32.mrb[37].mxu1 }
0x15c8   : > { %v3281_v20 = vpop.f32.mrb[34].mxu0 }
0x15c9   : > { %v3355_v23 = vadd.f32 %v3354_v16, %v3281_v20  ;;  %v7792_v24 = vpop.f32.mrb[35].mxu0 }
0x15cc   : > { %v3428_v17 = vpop.f32.mrb[36].mxu0 }
0x15cd   : > { %v7802_v25 = vpop.f32.mrb[37].mxu0  ;;  %v3432_v26 = vsel %vm739_vm4, %v3428_v17, -inf }
0x15ce   : > { %3433 = vmax.xlane.f32.xlu0 %v3432_v26 }
0x15e4   : > { %3443 = vrot.lane.b32.xlu0 %v8735_v57, %s8296_s26 }
0x165b   : > { %v3434_v27 = vpop.xlane.xlu0 %3433 }
0x165c   : > { %v3435_v33 = vsub.f32 %v3428_v17, %v3434_v27 }
0x165e   : > { %v3436_v34 = vmul.f32 1.442695, %v3435_v33  ;;  %v8850_v33 = vld [vmem:[%s9227_s7] ss:$0 sm:$0xff] }
0x165f   : > { %v3444_v37 = vpop.permute.xlu0 %3443 }
0x1660   : > { %8207 = vpow2.f32 %v3436_v34  ;;  %7804 = vmatpush3.msk.msra.mxu1 %vm755_vm3, %v3444_v37 }
0x1661   : > { %7813 = vmatprep.subr.mxu1 %v8294_v9 }
0x166a   : > { %v8208_v38 = vpop.eup %8207 }
0x166b   : > { %v3438_v39 = vsel %vm739_vm4, %v8208_v38, 0.0 }
0x166c   : > { %3439 = vadd.xlane.f32.xlu1 %v3438_v39 }
0x167d   : > { %3594 = vrot.lane.b32.xlu1 %v8705_v36, %s8297_s27 }
0x16f9   : > { %v3440_v41 = vpop.xlane.xlu1 %3439 }
0x16fa   : > { %8209 = vrcp.f32 %v3440_v41 }
0x16fd   : > { %v3595_v44 = vpop.permute.xlu1 %3594 }
0x1704   : > { %v8210_v42 = vpop.eup %8209 }
0x1705   : > { %v3442_v43 = vmul.f32 %v8210_v42, %v8208_v38 }
0x1707   : > { %7806 = vmatmul.mubr.msk.f32.vlgmr.msra.gmra.mrb[38].mxu1 %vm751_vm5, %v3442_v43 }
0x1708   : > { %7814 = vmatpush3.xpose.msk.msra.mxu1 %vm662_vm2, %v3595_v44  ;;  %7815 = vmatprep.mubr.msk.f32.mxu1 %vm8293_vm0, %v8294_v9 }
0x1709   : > { %7823 = vmatprep.subr.mxu1 %v8294_v9 }
0x170b   : > { %7816 = vmatmul.mubr.msk.f32.vlgmr.msra.gmra.mrb[40].mxu1 %vm662_vm2, %v8548_v29 }
0x170c   : > { %7824 = vmatpush3.msra.mxu1 %v8584_v51  ;;  %7825 = vmatprep.mubr.msk.f32.mxu1 %vm8293_vm0, %v8294_v9 }
0x170d   : > { %8122 = vmatprep.subr.bf16.mxu1 %v8292_v3 }
0x17da   : > { %v3516_v36 = vpop.f32.mrb[38].mxu1 }
0x17db   : > { %v7807_v45 = vpop.f32.mrb[39].mxu1  ;;  %7811 = vmatmul.mubr.msk.f32.vlgmr.msra.gmra.mrb[38].mxu0 %vm662_vm2, %v3516_v36 }
0x17dc   : > { %7820 = vmatprep.mubr.msk.f32.mxu0 %vm8293_vm0, %v8294_v9 }
0x17de   : > { %v3664_v46 = vpop.f32.mrb[40].mxu1 }
0x17df   : > { %v7817_v47 = vpop.f32.mrb[41].mxu1  ;;  %v3668_v48 = vsel %vm739_vm4, %v3664_v46, -inf }
0x17e0   : > { %3669 = vmax.xlane.f32.xlu0 %v3668_v48 }
0x17f6   : > { %3679 = vrot.lane.b32.xlu0 %v8735_v57, %s8297_s27 }
0x186d   : > { %v3670_v49 = vpop.xlane.xlu0 %3669 }
0x186e   : > { %v3671_v50 = vsub.f32 %v3664_v46, %v3670_v49 }
0x1870   : > { %v3672_v32 = vmul.f32 1.442695, %v3671_v50 }
0x1871   : > { %v3680_v52 = vpop.permute.xlu0 %3679 }
0x1872   : > { %8211 = vpow2.f32 %v3672_v32  ;;  %7819 = vmatpush3.msk.msra.mxu0 %vm755_vm3, %v3680_v52 }
0x1873   : > { %8116 = vmatprep.subr.bf16.mxu0 %v8292_v3 }
0x187c   : > { %v8212_v53 = vpop.eup %8211 }
0x187d   : > { %v3674_v54 = vsel %vm739_vm4, %v8212_v53, 0.0 }
0x187e   : > { %3675 = vadd.xlane.f32.xlu1 %v3674_v54 }
0x18ae   : > { %v3589_v58 = vpop.f32.mrb[38].mxu0 }
0x18af   : > { %v3593_v59 = vadd.f32 %v3589_v58, %v3355_v23  ;;  %v7812_v62 = vpop.f32.mrb[39].mxu0 }
0x190b   : > { %v3676_v63 = vpop.xlane.xlu1 %3675 }
0x190c   : > { %8213 = vrcp.f32 %v3676_v63 }
0x1916   : > { %v8214_v57 = vpop.eup %8213 }
0x1917   : > { %v3678_v0 = vmul.f32 %v8214_v57, %v8212_v53 }
0x1919   : > { %7821 = vmatmul.mubr.msk.f32.vlgmr.msra.gmra.mrb[40].mxu0 %vm751_vm5, %v3678_v0 }
0x191a   : > { %8118 = vmatpush3.bf16.msra.mxu0 %v8376_v4  ;;  %7836 = vmatprep.mubr.msk.f32.mxu0 %vm8293_vm0, %v8294_v9 }
0x191b   : > { %8119 = vmatprep.subr.bf16.mxu0 %v8292_v3 }
0x191e   : > { %8121 = vmatpush3.bf16.msra.mxu0 %v8399_v12 }
0x191f   : > { %7850 = vmatprep.subr.mxu0 %v8294_v9 }
0x1921   : > { %7837 = vmatmul.mubr.msk.f32.vlgmr.msra.gmra.mrb[42].mxu0 %vm432_vm1, %v8802_v1 }
0x1922   : > { %7852 = vmatprep.mubr.msk.f32.mxu0 %vm8293_vm0, %v8294_v9 }
0x19ec   : > { %v3752_v30 = vpop.f32.mrb[40].mxu0 }
0x19ed   : > { %v7822_v56 = vpop.f32.mrb[41].mxu0  ;;  %7826 = vmatmul.mubr.msk.f32.vlgmr.msra.gmra.mrb[42].mxu1 %vm662_vm2, %v3752_v30 }
0x19ee   : > { %8124 = vmatpush3.bf16.msra.mxu1 %v8436_v19  ;;  %7847 = vmatprep.mubr.msk.f32.mxu1 %vm8293_vm0, %v8294_v9 }
0x19ef   : > { %8125 = vmatprep.subr.bf16.mxu1 %v8292_v3 }
0x19f2   : > { %8127 = vmatpush3.bf16.msra.mxu1 %v8442_v21 }
0x19f3   : > { %7855 = vmatprep.subr.mxu1 %v8294_v9 }
0x19f4   : > { %v3914_v2 = vpop.f32.mrb[42].mxu0 }
0x19f5   : > { %v8817_v6 = vadd.f32 %v8453_v22, %v3914_v2  ;;  %v7838_v7 = vpop.f32.mrb[43].mxu0  ;;  %7848 = vmatmul.mubr.msk.f32.vlgmr.msra.gmra.mrb[44].mxu1 %vm432_vm1, %v8802_v1 }
0x19f6   : > { %7857 = vmatprep.mubr.msk.f32.mxu1 %vm8293_vm0, %v8294_v9 }
0x19f7   : > { %4148 = vrot.lane.b32.xlu1 %v8817_v6, %s8295_s22  ;;  %7851 = vmatpush3.xpose.msk.msra.mxu0 %vm662_vm2, %v8817_v6 }
0x19f8   : > { %7860 = vmatprep.subr.mxu0 %v8294_v9 }
0x19fa   : > { %7853 = vmatmul.mubr.msk.f32.vlgmr.msra.gmra.mrb[44].mxu0 %vm662_vm2, %v8459_v28 }
0x19fb   : > { %7862 = vmatprep.mubr.msk.f32.mxu0 %vm8293_vm0, %v8294_v9 }
0x1a69   : > { %v4149_v22 = vpop.permute.xlu1 %4148 }
0x1a6a   : > { %7861 = vmatpush3.xpose.msk.msra.mxu0 %vm662_vm2, %v4149_v22 }
0x1a6b   : > { %7870 = vmatprep.subr.mxu0 %v8294_v9 }
0x1a6d   : > { %7863 = vmatmul.mubr.msk.f32.vlgmr.msra.gmra.mrb[46].mxu0 %vm662_vm2, %v8483_v35 }
0x1a6e   : > { %7871 = vmatpush3.msra.mxu0 %v8507_v55  ;;  %7872 = vmatprep.mubr.msk.f32.mxu0 %vm8293_vm0, %v8294_v9 }
0x1a6f   : > { %7880 = vmatprep.subr.mxu0 %v8294_v9 }
0x1ac0   : > { %v3825_v8 = vpop.f32.mrb[42].mxu1 }
0x1ac1   : > { %v8840_v10 = vadd.f32 %v3825_v8, %v3593_v59  ;;  %v7827_v11 = vpop.f32.mrb[43].mxu1 }
0x1ac8   : > { %v3984_v26 = vpop.f32.mrb[44].mxu1 }
0x1ac9   : > { %v7849_v27 = vpop.f32.mrb[45].mxu1  ;;  %v8853_v34 = vadd.f32 %v8850_v33, %v3984_v26 }
0x1acb   : > { %7856 = vmatpush3.msk.msra.mxu1 %vm755_vm3, %v8853_v34 }
0x1acc   : > { %7865 = vmatprep.subr.mxu1 %v8294_v9 }
0x1acd   : > { %v4057_v13 = vpop.f32.mrb[44].mxu0 }
0x1ace   : > { %v7854_v14 = vpop.f32.mrb[45].mxu0  ;;  %v4061_v15 = vsel %vm739_vm4, %v4057_v13, -inf }
0x1acf   : > { %4062 = vmax.xlane.f32.xlu0 %v4061_v15 }
0x1b40   : > { %v4218_v16 = vpop.f32.mrb[46].mxu0 }
0x1b41   : > { %v7864_v18 = vpop.f32.mrb[47].mxu0  ;;  %v4222_v20 = vsel %vm739_vm4, %v4218_v16, -inf }
0x1b42   : > { %4223 = vmax.xlane.f32.xlu1 %v4222_v20 }
0x1b53   : > { %4456 = vrot.lane.b32.xlu1 %v8817_v6, %s8296_s26 }
0x1b5c   : > { %v4063_v55 = vpop.xlane.xlu0 %4062 }
0x1b5d   : > { %v4064_v23 = vsub.f32 %v4057_v13, %v4063_v55 }
0x1b5f   : > { %v4065_v24 = vmul.f32 1.442695, %v4064_v23 }
0x1b61   : > { %8215 = vpow2.f32 %v4065_v24 }
0x1b6b   : > { %v8216_v17 = vpop.eup %8215 }
0x1b6c   : > { %v4067_v25 = vsel %vm739_vm4, %v8216_v17, 0.0 }
0x1b6d   : > { %4068 = vadd.xlane.f32.xlu0 %v4067_v25 }
0x1bcf   : > { %v4224_v37 = vpop.xlane.xlu1 %4223 }
0x1bd0   : > { %v4225_v38 = vsub.f32 %v4218_v16, %v4224_v37 }
0x1bd2   : > { %v4226_v39 = vmul.f32 1.442695, %v4225_v38 }
0x1bd3   : > { %v4457_v52 = vpop.permute.xlu1 %4456 }
0x1bd4   : > { %8217 = vpow2.f32 %v4226_v39 }
0x1bde   : > { %v8218_v41 = vpop.eup %8217 }
0x1bdf   : > { %v4228_v42 = vsel %vm739_vm4, %v8218_v41, 0.0 }
0x1be0   : > { %4229 = vadd.xlane.f32.xlu0 %v4228_v42 }
0x1bf6   : > { %4233 = vrot.lane.b32.xlu0 %v8853_v34, %s8295_s22 }
0x1bfa   : > { %v4069_v43 = vpop.xlane.xlu0 %4068 }
0x1bfb   : > { %8219 = vrcp.f32 %v4069_v43 }
0x1c05   : > { %v8220_v44 = vpop.eup %8219 }
0x1c06   : > { %v4071_v36 = vmul.f32 %v8220_v44, %v8216_v17 }
0x1c08   : > { %7858 = vmatmul.mubr.msk.f32.vlgmr.msra.gmra.mrb[46].mxu1 %vm751_vm5, %v4071_v36  ;;  %v8937_v36 = vld [vmem:[%s9225_s5] ss:$0 sm:$0xff] }
0x1c09   : > { %7867 = vmatprep.mubr.msk.f32.mxu1 %vm8293_vm0, %v8294_v9 }
0x1c6d   : > { %v4230_v45 = vpop.xlane.xlu0 %4229 }
0x1c6e   : > { %8221 = vrcp.f32 %v4230_v45 }
0x1c71   : > { %v4234_v46 = vpop.permute.xlu0 %4233 }
0x1c72   : > { %7866 = vmatpush3.msk.msra.mxu1 %vm755_vm3, %v4234_v46 }
0x1c73   : > { %7875 = vmatprep.subr.mxu1 %v8294_v9 }
0x1c78   : > { %v8222_v47 = vpop.eup %8221 }
0x1c79   : > { %v4232_v48 = vmul.f32 %v8222_v47, %v8218_v41 }
0x1c7b   : > { %7868 = vmatmul.mubr.msk.f32.vlgmr.msra.gmra.mrb[48].mxu1 %vm751_vm5, %v4232_v48  ;;  %v8962_v48 = vld [vmem:[%s9228_s8 + $0x8] sm:$0xff] }
0x1c7c   : > { %7876 = vmatpush3.msra.mxu1 %v8516_v60  ;;  %7877 = vmatprep.mubr.msk.f32.mxu1 %vm8293_vm0, %v8294_v9 }
0x1c7d   : > { %7885 = vmatprep.subr.mxu1 %v8294_v9 }
0x1cdb   : > { %v4144_v49 = vpop.f32.mrb[46].mxu1 }
0x1cdc   : > { %v7859_v50 = vpop.f32.mrb[47].mxu1  ;;  %7878 = vmatmul.mubr.msk.f32.vlgmr.msra.gmra.mrb[50].mxu1 %vm662_vm2, %v4144_v49 }
0x1cdd   : > { %7887 = vmatprep.mubr.msk.f32.mxu1 %vm8293_vm0, %v8294_v9 }
0x1d4e   : > { %v4306_v32 = vpop.f32.mrb[48].mxu1 }
0x1d4f   : > { %v7869_v53 = vpop.f32.mrb[49].mxu1  ;;  %7873 = vmatmul.mubr.msk.f32.vlgmr.msra.gmra.mrb[48].mxu0 %vm662_vm2, %v4306_v32 }
0x1d50   : > { %7881 = vmatpush3.xpose.msk.msra.mxu0 %vm662_vm2, %v4457_v52  ;;  %7882 = vmatprep.mubr.msk.f32.mxu0 %vm8293_vm0, %v8294_v9 }
0x1d51   : > { %7890 = vmatprep.subr.mxu0 %v8294_v9 }
0x1d53   : > { %7883 = vmatmul.mubr.msk.f32.vlgmr.msra.gmra.mrb[50].mxu0 %vm662_vm2, %v8533_v5 }
0x1d54   : > { %7891 = vmatpush3.msra.mxu0 %v8557_v31  ;;  %7892 = vmatprep.mubr.msk.f32.mxu0 %vm8293_vm0, %v8294_v9 }
0x1d55   : > { %7900 = vmatprep.subr.mxu0 %v8294_v9 }
0x1daf   : > { %v4452_v60 = vpop.f32.mrb[50].mxu1 }
0x1db0   : > { %v7879_v54 = vpop.f32.mrb[51].mxu1 }
0x1e22   : > { %v4379_v58 = vpop.f32.mrb[48].mxu0 }
0x1e23   : > { %v4453_v59 = vadd.f32 %v4452_v60, %v4379_v58  ;;  %v7874_v62 = vpop.f32.mrb[49].mxu0 }
0x1e26   : > { %v4526_v63 = vpop.f32.mrb[50].mxu0 }
0x1e27   : > { %v7884_v57 = vpop.f32.mrb[51].mxu0  ;;  %v4530_v0 = vsel %vm739_vm4, %v4526_v63, -inf }
0x1e28   : > { %4531 = vmax.xlane.f32.xlu1 %v4530_v0 }
0x1e39   : > { %4692 = vrot.lane.b32.xlu1 %v8817_v6, %s8297_s27 }
0x1eb5   : > { %v4532_v30 = vpop.xlane.xlu1 %4531 }
0x1eb6   : > { %v4533_v31 = vsub.f32 %v4526_v63, %v4532_v30 }
0x1eb8   : > { %v4534_v56 = vmul.f32 1.442695, %v4533_v31 }
0x1eb9   : > { %v4693_v13 = vpop.permute.xlu1 %4692 }
0x1eba   : > { %8223 = vpow2.f32 %v4534_v56 }
0x1ec4   : > { %v8224_v2 = vpop.eup %8223 }
0x1ec5   : > { %v4536_v7 = vsel %vm739_vm4, %v8224_v2, 0.0 }
0x1ec6   : > { %4537 = vadd.xlane.f32.xlu0 %v4536_v7 }
0x1edc   : > { %4541 = vrot.lane.b32.xlu0 %v8853_v34, %s8296_s26 }
0x1f53   : > { %v4538_v22 = vpop.xlane.xlu0 %4537 }
0x1f54   : > { %8225 = vrcp.f32 %v4538_v22 }
0x1f57   : > { %v4542_v8 = vpop.permute.xlu0 %4541 }
0x1f58   : > { %7886 = vmatpush3.msk.msra.mxu1 %vm755_vm3, %v4542_v8 }
0x1f59   : > { %7895 = vmatprep.subr.mxu1 %v8294_v9 }
0x1f5e   : > { %v8226_v11 = vpop.eup %8225 }
0x1f5f   : > { %v4540_v6 = vmul.f32 %v8226_v11, %v8224_v2 }
0x1f61   : > { %7888 = vmatmul.mubr.msk.f32.vlgmr.msra.gmra.mrb[52].mxu1 %vm751_vm5, %v4540_v6 }
0x1f62   : > { %7896 = vmatpush3.xpose.msk.msra.mxu1 %vm662_vm2, %v4693_v13  ;;  %7897 = vmatprep.mubr.msk.f32.mxu1 %vm8293_vm0, %v8294_v9 }
0x1f63   : > { %7905 = vmatprep.subr.mxu1 %v8294_v9 }
0x1f65   : > { %7898 = vmatmul.mubr.msk.f32.vlgmr.msra.gmra.mrb[54].mxu1 %vm662_vm2, %v8548_v29 }
0x1f66   : > { %7906 = vmatpush3.msra.mxu1 %v8584_v51  ;;  %7907 = vmatprep.mubr.msk.f32.mxu1 %vm8293_vm0, %v8294_v9 }
0x1f67   : > { %8134 = vmatprep.subr.bf16.mxu1 %v8292_v3 }
0x2034   : > { %v4614_v14 = vpop.f32.mrb[52].mxu1 }
0x2035   : > { %v7889_v15 = vpop.f32.mrb[53].mxu1  ;;  %7893 = vmatmul.mubr.msk.f32.vlgmr.msra.gmra.mrb[52].mxu0 %vm662_vm2, %v4614_v14 }
0x2036   : > { %7902 = vmatprep.mubr.msk.f32.mxu0 %vm8293_vm0, %v8294_v9 }
0x2038   : > { %v4762_v16 = vpop.f32.mrb[54].mxu1 }
0x2039   : > { %v7899_v18 = vpop.f32.mrb[55].mxu1  ;;  %v4766_v20 = vsel %vm739_vm4, %v4762_v16, -inf }
0x203a   : > { %4767 = vmax.xlane.f32.xlu1 %v4766_v20 }
0x20c7   : > { %v4768_v55 = vpop.xlane.xlu1 %4767 }
0x20c8   : > { %v4769_v23 = vsub.f32 %v4762_v16, %v4768_v55 }
0x20ca   : > { %v4770_v51 = vmul.f32 1.442695, %v4769_v23  ;;  %v8993_v23 = vld [vmem:[%s9228_s8] sm:$0xff] }
0x20cc   : > { %8227 = vpow2.f32 %v4770_v51 }
0x20d6   : > { %v8228_v24 = vpop.eup %8227 }
0x20d7   : > { %v4772_v17 = vsel %vm739_vm4, %v8228_v24, 0.0 }
0x20d8   : > { %4773 = vadd.xlane.f32.xlu0 %v4772_v17 }
0x20ee   : > { %4777 = vrot.lane.b32.xlu0 %v8853_v34, %s8297_s27  ;;  %v8920_v34 = vld [vmem:[%s8416_s25 + $0x20] sm:$0x1f] }
0x2108   : > { %v4687_v25 = vpop.f32.mrb[52].mxu0 }
0x2109   : > { %v4691_v26 = vadd.f32 %v4687_v25, %v4453_v59  ;;  %v7894_v27 = vpop.f32.mrb[53].mxu0 }
0x210a   : > { %v9012_v27 = vld [vmem:[%s9228_s8 + $0x10] sm:$0xff] }
0x2165   : > { %v4774_v37 = vpop.xlane.xlu0 %4773 }
0x2166   : > { %8229 = vrcp.f32 %v4774_v37 }
0x2169   : > { %v4778_v38 = vpop.permute.xlu0 %4777 }
0x216a   : > { %7901 = vmatpush3.msk.msra.mxu0 %vm755_vm3, %v4778_v38 }
0x216b   : > { %8128 = vmatprep.subr.bf16.mxu0 %v8292_v3 }
0x2170   : > { %v8230_v39 = vpop.eup %8229 }
0x2171   : > { %v4776_v41 = vmul.f32 %v8230_v39, %v8228_v24 }
0x2173   : > { %7903 = vmatmul.mubr.msk.f32.vlgmr.msra.gmra.mrb[54].mxu0 %vm751_vm5, %v4776_v41 }
0x2174   : > { %8130 = vmatpush3.bf16.msra.mxu0 %v8376_v4  ;;  %7918 = vmatprep.mubr.msk.f32.mxu0 %vm8293_vm0, %v8294_v9 }
0x2175   : > { %8131 = vmatprep.subr.bf16.mxu0 %v8292_v3 }
0x2178   : > { %8133 = vmatpush3.bf16.msra.mxu0 %v8399_v12 }
0x2179   : > { %7932 = vmatprep.subr.mxu0 %v8294_v9 }
0x217b   : > { %7919 = vmatmul.mubr.msk.f32.vlgmr.msra.gmra.mrb[56].mxu0 %vm432_vm1, %v8920_v34 }
0x217c   : > { %7934 = vmatprep.mubr.msk.f32.mxu0 %vm8293_vm0, %v8294_v9 }
0x2246   : > { %v4850_v42 = vpop.f32.mrb[54].mxu0 }
0x2247   : > { %v7904_v43 = vpop.f32.mrb[55].mxu0  ;;  %7908 = vmatmul.mubr.msk.f32.vlgmr.msra.gmra.mrb[56].mxu1 %vm662_vm2, %v4850_v42 }
0x2248   : > { %8136 = vmatpush3.bf16.msra.mxu1 %v8436_v19  ;;  %7929 = vmatprep.mubr.msk.f32.mxu1 %vm8293_vm0, %v8294_v9 }
0x2249   : > { %8137 = vmatprep.subr.bf16.mxu1 %v8292_v3 }
0x224c   : > { %8139 = vmatpush3.bf16.msra.mxu1 %v8442_v21 }
0x224d   : > { %7937 = vmatprep.subr.mxu1 %v8294_v9 }
0x224e   : > { %v5012_v44 = vpop.f32.mrb[56].mxu0 }
0x224f   : > { %v8940_v45 = vadd.f32 %v8937_v36, %v5012_v44  ;;  %v7920_v46 = vpop.f32.mrb[57].mxu0  ;;  %7930 = vmatmul.mubr.msk.f32.vlgmr.msra.gmra.mrb[58].mxu1 %vm432_vm1, %v8920_v34 }
0x2250   : > { %7939 = vmatprep.mubr.msk.f32.mxu1 %vm8293_vm0, %v8294_v9 }
0x2251   : > { %5246 = vrot.lane.b32.xlu1 %v8940_v45, %s8295_s22  ;;  %7933 = vmatpush3.xpose.msk.msra.mxu0 %vm662_vm2, %v8940_v45 }
0x2252   : > { %7942 = vmatprep.subr.mxu0 %v8294_v9 }
0x2254   : > { %7935 = vmatmul.mubr.msk.f32.vlgmr.msra.gmra.mrb[58].mxu0 %vm662_vm2, %v8459_v28 }
0x2255   : > { %7944 = vmatprep.mubr.msk.f32.mxu0 %vm8293_vm0, %v8294_v9 }
0x22c3   : > { %v5247_v47 = vpop.permute.xlu1 %5246 }
0x22c4   : > { %7943 = vmatpush3.xpose.msk.msra.mxu0 %vm662_vm2, %v5247_v47 }
0x22c5   : > { %7952 = vmatprep.subr.mxu0 %v8294_v9 }
0x22c7   : > { %7945 = vmatmul.mubr.msk.f32.vlgmr.msra.gmra.mrb[60].mxu0 %vm662_vm2, %v8483_v35 }
0x22c8   : > { %7953 = vmatpush3.msra.mxu0 %v8962_v48  ;;  %7954 = vmatprep.mubr.msk.f32.mxu0 %vm8293_vm0, %v8294_v9 }
0x22c9   : > { %7962 = vmatprep.subr.mxu0 %v8294_v9 }
0x231a   : > { %v4923_v49 = vpop.f32.mrb[56].mxu1 }
0x231b   : > { %v8968_v50 = vadd.f32 %v4923_v49, %v4691_v26  ;;  %v7909_v32 = vpop.f32.mrb[57].mxu1 }
0x2322   : > { %v5082_v31 = vpop.f32.mrb[58].mxu1 }
0x2323   : > { %v7931_v56 = vpop.f32.mrb[59].mxu1  ;;  %v8974_v2 = vadd.f32 %v8850_v33, %v5082_v31 }
0x2325   : > { %7938 = vmatpush3.msk.msra.mxu1 %vm755_vm3, %v8974_v2 }
0x2326   : > { %7947 = vmatprep.subr.mxu1 %v8294_v9 }
0x2327   : > { %v5155_v52 = vpop.f32.mrb[58].mxu0 }
0x2328   : > { %v7936_v53 = vpop.f32.mrb[59].mxu0  ;;  %v5159_v60 = vsel %vm739_vm4, %v5155_v52, -inf }
0x2329   : > { %5160 = vmax.xlane.f32.xlu1 %v5159_v60 }
0x239a   : > { %v5316_v54 = vpop.f32.mrb[60].mxu0 }
0x239b   : > { %v7946_v58 = vpop.f32.mrb[61].mxu0  ;;  %v5320_v59 = vsel %vm739_vm4, %v5316_v54, -inf }
0x239c   : > { %5321 = vmax.xlane.f32.xlu0 %v5320_v59 }
0x23b6   : > { %v5161_v62 = vpop.xlane.xlu1 %5160 }
0x23b7   : > { %v5162_v63 = vsub.f32 %v5155_v52, %v5161_v62  ;;  %v9036_v62 = vld [vmem:[%s9228_s8 + $0x18] sm:$0xff] }
0x23b9   : > { %v5163_v57 = vmul.f32 1.442695, %v5162_v63 }
0x23bb   : > { %8231 = vpow2.f32 %v5163_v57 }
0x23c5   : > { %v8232_v0 = vpop.eup %8231 }
0x23c6   : > { %v5165_v30 = vsel %vm739_vm4, %v8232_v0, 0.0 }
0x23c7   : > { %5166 = vadd.xlane.f32.xlu0 %v5165_v30 }
0x23dd   : > { %5331 = vrot.lane.b32.xlu0 %v8974_v2, %s8295_s22 }
0x2429   : > { %v5322_v7 = vpop.xlane.xlu0 %5321 }
0x242a   : > { %v5323_v22 = vsub.f32 %v5316_v54, %v5322_v7 }
0x242c   : > { %v5324_v8 = vmul.f32 1.442695, %v5323_v22 }
0x242e   : > { %8233 = vpow2.f32 %v5324_v8 }
0x2438   : > { %v8234_v11 = vpop.eup %8233 }
0x2439   : > { %v5326_v6 = vsel %vm739_vm4, %v8234_v11, 0.0 }
0x243a   : > { %5327 = vadd.xlane.f32.xlu1 %v5326_v6 }
0x244b   : > { %5554 = vrot.lane.b32.xlu1 %v8940_v45, %s8296_s26 }
0x2454   : > { %v5167_v13 = vpop.xlane.xlu0 %5166 }
0x2455   : > { %8235 = vrcp.f32 %v5167_v13 }
0x2458   : > { %v5332_v16 = vpop.permute.xlu0 %5331 }
0x245f   : > { %v8236_v14 = vpop.eup %8235 }
0x2460   : > { %v5169_v15 = vmul.f32 %v8236_v14, %v8232_v0 }
0x2462   : > { %7940 = vmatmul.mubr.msk.f32.vlgmr.msra.gmra.mrb[60].mxu1 %vm751_vm5, %v5169_v15 }
0x2463   : > { %7948 = vmatpush3.msk.msra.mxu1 %vm755_vm3, %v5332_v16  ;;  %7949 = vmatprep.mubr.msk.f32.mxu1 %vm8293_vm0, %v8294_v9 }
0x2464   : > { %7957 = vmatprep.subr.mxu1 %v8294_v9 }
0x24c7   : > { %v5328_v18 = vpop.xlane.xlu1 %5327 }
0x24c8   : > { %8237 = vrcp.f32 %v5328_v18 }
0x24cb   : > { %v5555_v25 = vpop.permute.xlu1 %5554 }
0x24d2   : > { %v8238_v20 = vpop.eup %8237 }
0x24d3   : > { %v5330_v55 = vmul.f32 %v8238_v20, %v8234_v11 }
0x24d5   : > { %7950 = vmatmul.mubr.msk.f32.vlgmr.msra.gmra.mrb[62].mxu1 %vm751_vm5, %v5330_v55 }
0x24d6   : > { %7958 = vmatpush3.msra.mxu1 %v8993_v23  ;;  %7959 = vmatprep.mubr.msk.f32.mxu1 %vm8293_vm0, %v8294_v9 }
0x24d7   : > { %7967 = vmatprep.subr.mxu1 %v8294_v9 }
0x2535   : > { %v5242_v51 = vpop.f32.mrb[60].mxu1 }
0x2536   : > { %v7941_v24 = vpop.f32.mrb[61].mxu1  ;;  %7960 = vmatmul.mubr.msk.f32.vlgmr.msra.gmra.mrb[64].mxu1 %vm662_vm2, %v5242_v51 }
0x2537   : > { %7969 = vmatprep.mubr.msk.f32.mxu1 %vm8293_vm0, %v8294_v9 }
0x25a8   : > { %v5404_v17 = vpop.f32.mrb[62].mxu1 }
0x25a9   : > { %v7951_v26 = vpop.f32.mrb[63].mxu1  ;;  %7955 = vmatmul.mubr.msk.f32.vlgmr.msra.gmra.mrb[62].mxu0 %vm662_vm2, %v5404_v17 }
0x25aa   : > { %7963 = vmatpush3.xpose.msk.msra.mxu0 %vm662_vm2, %v5555_v25  ;;  %7964 = vmatprep.mubr.msk.f32.mxu0 %vm8293_vm0, %v8294_v9 }
0x25ab   : > { %7972 = vmatprep.subr.mxu0 %v8294_v9 }
0x25ad   : > { %7965 = vmatmul.mubr.msk.f32.vlgmr.msra.gmra.mrb[64].mxu0 %vm662_vm2, %v8533_v5 }
0x25ae   : > { %7973 = vmatpush3.msra.mxu0 %v9012_v27  ;;  %7974 = vmatprep.mubr.msk.f32.mxu0 %vm8293_vm0, %v8294_v9 }
0x25af   : > { %7982 = vmatprep.subr.mxu0 %v8294_v9 }
0x2609   : > { %v5550_v37 = vpop.f32.mrb[64].mxu1 }
0x260a   : > { %v7961_v38 = vpop.f32.mrb[65].mxu1 }
0x267c   : > { %v5477_v39 = vpop.f32.mrb[62].mxu0 }
0x267d   : > { %v5551_v41 = vadd.f32 %v5550_v37, %v5477_v39  ;;  %v7956_v42 = vpop.f32.mrb[63].mxu0 }
0x2680   : > { %v5624_v43 = vpop.f32.mrb[64].mxu0 }
0x2681   : > { %v7966_v44 = vpop.f32.mrb[65].mxu0  ;;  %v5628_v46 = vsel %vm739_vm4, %v5624_v43, -inf }
0x2682   : > { %5629 = vmax.xlane.f32.xlu1 %v5628_v46 }
0x2693   : > { %5790 = vrot.lane.b32.xlu1 %v8940_v45, %s8297_s27 }
0x270f   : > { %v5630_v47 = vpop.xlane.xlu1 %5629 }
0x2710   : > { %v5631_v49 = vsub.f32 %v5624_v43, %v5630_v47 }
0x2712   : > { %v5632_v32 = vmul.f32 1.442695, %v5631_v49 }
0x2713   : > { %v5791_v59 = vpop.permute.xlu1 %5790 }
0x2714   : > { %8239 = vpow2.f32 %v5632_v32 }
0x271e   : > { %v8240_v52 = vpop.eup %8239 }
0x271f   : > { %v5634_v53 = vsel %vm739_vm4, %v8240_v52, 0.0 }
0x2720   : > { %5635 = vadd.xlane.f32.xlu0 %v5634_v53 }
0x2736   : > { %5639 = vrot.lane.b32.xlu0 %v8974_v2, %s8296_s26 }
0x27ad   : > { %v5636_v60 = vpop.xlane.xlu0 %5635 }
0x27ae   : > { %8241 = vrcp.f32 %v5636_v60 }
0x27b1   : > { %v5640_v54 = vpop.permute.xlu0 %5639 }
0x27b2   : > { %7968 = vmatpush3.msk.msra.mxu1 %vm755_vm3, %v5640_v54 }
0x27b3   : > { %7977 = vmatprep.subr.mxu1 %v8294_v9 }
0x27b8   : > { %v8242_v58 = vpop.eup %8241 }
0x27b9   : > { %v5638_v45 = vmul.f32 %v8242_v58, %v8240_v52 }
0x27bb   : > { %7970 = vmatmul.mubr.msk.f32.vlgmr.msra.gmra.mrb[66].mxu1 %vm751_vm5, %v5638_v45 }
0x27bc   : > { %7978 = vmatpush3.xpose.msk.msra.mxu1 %vm662_vm2, %v5791_v59  ;;  %7979 = vmatprep.mubr.msk.f32.mxu1 %vm8293_vm0, %v8294_v9 }
0x27bd   : > { %7987 = vmatprep.subr.mxu1 %v8294_v9 }
0x27bf   : > { %7980 = vmatmul.mubr.msk.f32.vlgmr.msra.gmra.mrb[68].mxu1 %vm662_vm2, %v8548_v29 }
0x27c0   : > { %7988 = vmatpush3.msra.mxu1 %v9036_v62  ;;  %7989 = vmatprep.mubr.msk.f32.mxu1 %vm8293_vm0, %v8294_v9 }
0x27c1   : > { %8146 = vmatprep.subr.bf16.mxu1 %v8292_v3 }
0x288e   : > { %v5712_v63 = vpop.f32.mrb[66].mxu1 }
0x288f   : > { %v7971_v57 = vpop.f32.mrb[67].mxu1  ;;  %7975 = vmatmul.mubr.msk.f32.vlgmr.msra.gmra.mrb[66].mxu0 %vm662_vm2, %v5712_v63 }
0x2890   : > { %7984 = vmatprep.mubr.msk.f32.mxu0 %vm8293_vm0, %v8294_v9 }
0x2892   : > { %v5860_v0 = vpop.f32.mrb[68].mxu1 }
0x2893   : > { %v7981_v30 = vpop.f32.mrb[69].mxu1  ;;  %v5864_v31 = vsel %vm739_vm4, %v5860_v0, -inf }
0x2894   : > { %5865 = vmax.xlane.f32.xlu1 %v5864_v31 }
0x2921   : > { %v5866_v56 = vpop.xlane.xlu1 %5865 }
0x2922   : > { %v5867_v7 = vsub.f32 %v5860_v0, %v5866_v56 }
0x2924   : > { %v5868_v22 = vmul.f32 1.442695, %v5867_v7 }
0x2926   : > { %8243 = vpow2.f32 %v5868_v22 }
0x2930   : > { %v8244_v8 = vpop.eup %8243 }
0x2931   : > { %v5870_v11 = vsel %vm739_vm4, %v8244_v8, 0.0 }
0x2932   : > { %5871 = vadd.xlane.f32.xlu0 %v5870_v11 }
0x2948   : > { %5875 = vrot.lane.b32.xlu0 %v8974_v2, %s8297_s27  ;;  %v9058_v2 = vld [vmem:[%s8416_s25 + $0x28] sm:$0x1f] }
0x2962   : > { %v5785_v6 = vpop.f32.mrb[66].mxu0 }
0x2963   : > { %v5789_v13 = vadd.f32 %v5785_v6, %v5551_v41  ;;  %v7976_v14 = vpop.f32.mrb[67].mxu0 }
0x29bf   : > { %v5872_v15 = vpop.xlane.xlu0 %5871 }
0x29c0   : > { %8245 = vrcp.f32 %v5872_v15 }
0x29c3   : > { %v5876_v16 = vpop.permute.xlu0 %5875 }
0x29c4   : > { %7983 = vmatpush3.msk.msra.mxu0 %vm755_vm3, %v5876_v16 }
0x29c5   : > { %8140 = vmatprep.subr.bf16.mxu0 %v8292_v3 }
0x29ca   : > { %v8246_v18 = vpop.eup %8245 }
0x29cb   : > { %v5874_v20 = vmul.f32 %v8246_v18, %v8244_v8 }
0x29cd   : > { %7985 = vmatmul.mubr.msk.f32.vlgmr.msra.gmra.mrb[68].mxu0 %vm751_vm5, %v5874_v20 }
0x29ce   : > { %8142 = vmatpush3.bf16.msra.mxu0 %v8376_v4  ;;  %8000 = vmatprep.mubr.msk.f32.mxu0 %vm8293_vm0, %v8294_v9 }
0x29cf   : > { %8143 = vmatprep.subr.bf16.mxu0 %v8292_v3 }
0x29d2   : > { %8145 = vmatpush3.bf16.msra.mxu0 %v8399_v12 }
0x29d3   : > { %8014 = vmatprep.subr.mxu0 %v8294_v9 }
0x29d5   : > { %8001 = vmatmul.mubr.msk.f32.vlgmr.msra.gmra.mrb[70].mxu0 %vm432_vm1, %v9058_v2 }
0x29d6   : > { %8016 = vmatprep.mubr.msk.f32.mxu0 %vm8293_vm0, %v8294_v9 }
0x2aa0   : > { %v5948_v55 = vpop.f32.mrb[68].mxu0 }
0x2aa1   : > { %v7986_v51 = vpop.f32.mrb[69].mxu0  ;;  %7990 = vmatmul.mubr.msk.f32.vlgmr.msra.gmra.mrb[70].mxu1 %vm662_vm2, %v5948_v55 }
0x2aa2   : > { %8148 = vmatpush3.bf16.msra.mxu1 %v8436_v19  ;;  %8011 = vmatprep.mubr.msk.f32.mxu1 %vm8293_vm0, %v8294_v9 }
0x2aa3   : > { %8149 = vmatprep.subr.bf16.mxu1 %v8292_v3 }
0x2aa6   : > { %8151 = vmatpush3.bf16.msra.mxu1 %v8442_v21 }
0x2aa7   : > { %8019 = vmatprep.subr.mxu1 %v8294_v9 }
0x2aa8   : > { %v6110_v4 = vpop.f32.mrb[70].mxu0 }
0x2aa9   : > { %v9073_v12 = vadd.f32 %v8937_v36, %v6110_v4  ;;  %v8002_v24 = vpop.f32.mrb[71].mxu0  ;;  %8012 = vmatmul.mubr.msk.f32.vlgmr.msra.gmra.mrb[72].mxu1 %vm432_vm1, %v9058_v2 }
0x2aaa   : > { %8021 = vmatprep.mubr.msk.f32.mxu1 %vm8293_vm0, %v8294_v9  ;;  %v9159_v24 = vld [vmem:[%s9229_s9] ss:$0 sm:$0xff] }
0x2aab   : > { %6344 = vrot.lane.b32.xlu1 %v9073_v12, %s8295_s22  ;;  %8015 = vmatpush3.xpose.msk.msra.mxu0 %vm662_vm2, %v9073_v12 }
0x2aac   : > { %8024 = vmatprep.subr.mxu0 %v8294_v9 }
0x2aae   : > { %8017 = vmatmul.mubr.msk.f32.vlgmr.msra.gmra.mrb[72].mxu0 %vm662_vm2, %v8459_v28 }
0x2aaf   : > { %8026 = vmatprep.mubr.msk.f32.mxu0 %vm8293_vm0, %v8294_v9 }
0x2b1d   : > { %v6345_v3 = vpop.permute.xlu1 %6344 }
0x2b1e   : > { %8025 = vmatpush3.xpose.msk.msra.mxu0 %vm662_vm2, %v6345_v3  ;;  %v1627_v3 = vadd.f32 %v9159_v24, %v8618_v61 }
0x2b1f   : > { %8034 = vmatprep.subr.mxu0 %v8294_v9 }
0x2b21   : > { %8027 = vmatmul.mubr.msk.f32.vlgmr.msra.gmra.mrb[74].mxu0 %vm662_vm2, %v8483_v35 }
0x2b22   : > { %8035 = vmatpush3.msra.mxu0 %v8962_v48  ;;  %8036 = vmatprep.mubr.msk.f32.mxu0 %vm8293_vm0, %v8294_v9 }
0x2b23   : > { %8044 = vmatprep.subr.mxu0 %v8294_v9 }
0x2b74   : > { %v6021_v19 = vpop.f32.mrb[70].mxu1 }
0x2b75   : > { %v9096_v21 = vadd.f32 %v6021_v19, %v5789_v13  ;;  %v7991_v28 = vpop.f32.mrb[71].mxu1 }
0x2b76   : > { %v2732_v28 = vadd.f32 %v9159_v24, %v8727_v40  ;;  %v4928_v40 = vadd.f32 %v9159_v24, %v8968_v50 }
0x2b7c   : > { %v6180_v43 = vpop.f32.mrb[72].mxu1 }
0x2b7d   : > { %v8013_v44 = vpop.f32.mrb[73].mxu1  ;;  %v9102_v46 = vadd.f32 %v8850_v33, %v6180_v43 }
0x2b7e   : > { %v4929_v44 = vadd.f32 %v8802_v1, %v4928_v40 }
0x2b7f   : > { %8020 = vmatpush3.msk.msra.mxu1 %vm755_vm3, %v9102_v46 }
0x2b80   : > { %8029 = vmatprep.subr.mxu1 %v8294_v9 }
0x2b81   : > { %v6253_v36 = vpop.f32.mrb[72].mxu0 }
0x2b82   : > { %v8018_v17 = vpop.f32.mrb[73].mxu0  ;;  %v6257_v25 = vsel %vm739_vm4, %v6253_v36, -inf }
0x2b83   : > { %6258 = vmax.xlane.f32.xlu1 %v6257_v25  ;;  %v3830_v25 = vadd.f32 %v9159_v24, %v8840_v10  ;;  %v6026_v10 = vadd.f32 %v9159_v24, %v9096_v21 }
0x2b85   : > { %v6027_v50 = vadd.f32 %v8920_v34, %v6026_v10 }
0x2bf4   : > { %v6414_v26 = vpop.f32.mrb[74].mxu0 }
0x2bf5   : > { %v8028_v37 = vpop.f32.mrb[75].mxu0  ;;  %v6418_v35 = vsel %vm739_vm4, %v6414_v26, -inf }
0x2bf6   : > { %6419 = vmax.xlane.f32.xlu0 %v6418_v35  ;;  %v8282_v35 = vld [vmem:[%s8416_s25 + $0x8] sm:$0x1f] }
0x2c10   : > { %v6259_v48 = vpop.xlane.xlu1 %6258 }
0x2c11   : > { %v6260_v38 = vsub.f32 %v6253_v36, %v6259_v48  ;;  %v2733_v48 = vadd.f32 %v8282_v35, %v2732_v28 }
0x2c13   : > { %v6261_v39 = vmul.f32 1.442695, %v6260_v38 }
0x2c15   : > { %8247 = vpow2.f32 %v6261_v39  ;;  %v2734_v39 = vmul.f32 %v2733_v48, %v2733_v48 }
0x2c1f   : > { %v8248_v41 = vpop.eup %8247 }
0x2c20   : > { %v6263_v42 = vsel %vm739_vm4, %v8248_v41, 0.0 }
0x2c21   : > { %6264 = vadd.xlane.f32.xlu0 %v6263_v42  ;;  %v2735_v42 = vsel %vm1630_vm6, %v2734_v39, 0.0 }
0x2c37   : > { %6429 = vrot.lane.b32.xlu0 %v9102_v46, %s8295_s22 }
0x2c83   : > { %v6420_v47 = vpop.xlane.xlu0 %6419 }
0x2c84   : > { %v6421_v49 = vsub.f32 %v6414_v26, %v6420_v47 }
0x2c86   : > { %v6422_v32 = vmul.f32 1.442695, %v6421_v49  ;;  %v4930_v49 = vmul.f32 %v4929_v44, %v4929_v44 }
0x2c88   : > { %8249 = vpow2.f32 %v6422_v32  ;;  %v4931_v32 = vsel %vm1630_vm6, %v4930_v49, 0.0 }
0x2c92   : > { %v8250_v52 = vpop.eup %8249 }
0x2c93   : > { %v6424_v53 = vsel %vm739_vm4, %v8250_v52, 0.0 }
0x2c94   : > { %6425 = vadd.xlane.f32.xlu1 %v6424_v53 }
0x2ca5   : > { %6652 = vrot.lane.b32.xlu1 %v9073_v12, %s8296_s26 }
0x2cae   : > { %v6265_v33 = vpop.xlane.xlu0 %6264 }
0x2caf   : > { %8251 = vrcp.f32 %v6265_v33 }
0x2cb2   : > { %v6430_v58 = vpop.permute.xlu0 %6429 }
0x2cb9   : > { %v8252_v60 = vpop.eup %8251 }
0x2cba   : > { %v6267_v54 = vmul.f32 %v8252_v60, %v8248_v41  ;;  %v8283_v41 = vld [vmem:[%s8416_s25 + $0x10] sm:$0x1f] }
0x2cbc   : > { %8022 = vmatmul.mubr.msk.f32.vlgmr.msra.gmra.mrb[74].mxu1 %vm751_vm5, %v6267_v54 }
0x2cbd   : > { %8030 = vmatpush3.msk.msra.mxu1 %vm755_vm3, %v6430_v58  ;;  %8031 = vmatprep.mubr.msk.f32.mxu1 %vm8293_vm0, %v8294_v9 }
0x2cbe   : > { %8039 = vmatprep.subr.mxu1 %v8294_v9 }
0x2d21   : > { %v6426_v45 = vpop.xlane.xlu1 %6425 }
0x2d22   : > { %8253 = vrcp.f32 %v6426_v45 }
0x2d25   : > { %v6653_v31 = vpop.permute.xlu1 %6652 }
0x2d2c   : > { %v8254_v59 = vpop.eup %8253 }
0x2d2d   : > { %v6428_v63 = vmul.f32 %v8254_v59, %v8250_v52  ;;  %v6028_v52 = vmul.f32 %v6027_v50, %v6027_v50 }
0x2d2f   : > { %8032 = vmatmul.mubr.msk.f32.vlgmr.msra.gmra.mrb[76].mxu1 %vm751_vm5, %v6428_v63  ;;  %v6029_v53 = vsel %vm1630_vm6, %v6028_v52, 0.0 }
0x2d30   : > { %8040 = vmatpush3.msra.mxu1 %v8993_v23  ;;  %8041 = vmatprep.mubr.msk.f32.mxu1 %vm8293_vm0, %v8294_v9 }
0x2d31   : > { %8049 = vmatprep.subr.mxu1 %v8294_v9 }
0x2d8f   : > { %v6340_v57 = vpop.f32.mrb[74].mxu1 }
0x2d90   : > { %v8023_v0 = vpop.f32.mrb[75].mxu1  ;;  %8042 = vmatmul.mubr.msk.f32.vlgmr.msra.gmra.mrb[78].mxu1 %vm662_vm2, %v6340_v57 }
0x2d91   : > { %8051 = vmatprep.mubr.msk.f32.mxu1 %vm8293_vm0, %v8294_v9 }
0x2e02   : > { %v6502_v30 = vpop.f32.mrb[76].mxu1 }
0x2e03   : > { %v8033_v56 = vpop.f32.mrb[77].mxu1  ;;  %8037 = vmatmul.mubr.msk.f32.vlgmr.msra.gmra.mrb[76].mxu0 %vm662_vm2, %v6502_v30 }
0x2e04   : > { %8045 = vmatpush3.xpose.msk.msra.mxu0 %vm662_vm2, %v6653_v31  ;;  %8046 = vmatprep.mubr.msk.f32.mxu0 %vm8293_vm0, %v8294_v9 }
0x2e05   : > { %8054 = vmatprep.subr.mxu0 %v8294_v9 }
0x2e07   : > { %8047 = vmatmul.mubr.msk.f32.vlgmr.msra.gmra.mrb[78].mxu0 %vm662_vm2, %v8533_v5 }
0x2e08   : > { %8055 = vmatpush3.msra.mxu0 %v9012_v27  ;;  %8056 = vmatprep.mubr.msk.f32.mxu0 %vm8293_vm0, %v8294_v9 }
0x2e09   : > { %8064 = vmatprep.subr.mxu0 %v8294_v9 }
0x2e63   : > { %v6648_v23 = vpop.f32.mrb[78].mxu1 }
0x2e64   : > { %v8043_v7 = vpop.f32.mrb[79].mxu1 }
0x2ed6   : > { %v6575_v22 = vpop.f32.mrb[76].mxu0 }
0x2ed7   : > { %v9136_v8 = vadd.f32 %v6648_v23, %v6575_v22  ;;  %v8038_v11 = vpop.f32.mrb[77].mxu0  ;;  %v7239_v22 = vld [vmem:[%s9230_s10] ss:$0 sm:$0xff] }
0x2eda   : > { %v6722_v6 = vpop.f32.mrb[78].mxu0 }
0x2edb   : > { %v8048_v13 = vpop.f32.mrb[79].mxu0  ;;  %v6726_v14 = vsel %vm739_vm4, %v6722_v6, -inf }
0x2edc   : > { %6727 = vmax.xlane.f32.xlu1 %v6726_v14 }
0x2eed   : > { %6888 = vrot.lane.b32.xlu1 %v9073_v12, %s8297_s27 }
0x2f69   : > { %v6728_v5 = vpop.xlane.xlu1 %6727 }
0x2f6a   : > { %v6729_v27 = vsub.f32 %v6722_v6, %v6728_v5 }
0x2f6c   : > { %v6730_v15 = vmul.f32 1.442695, %v6729_v27 }
0x2f6d   : > { %v6889_v12 = vpop.permute.xlu1 %6888 }
0x2f6e   : > { %8255 = vpow2.f32 %v6730_v15 }
0x2f78   : > { %v8256_v16 = vpop.eup %8255 }
0x2f79   : > { %v6732_v18 = vsel %vm739_vm4, %v8256_v16, 0.0 }
0x2f7a   : > { %6733 = vadd.xlane.f32.xlu0 %v6732_v18 }
0x2f90   : > { %6737 = vrot.lane.b32.xlu0 %v9102_v46, %s8296_s26 }
0x3007   : > { %v6734_v20 = vpop.xlane.xlu0 %6733 }
0x3008   : > { %8257 = vrcp.f32 %v6734_v20 }
0x300b   : > { %v6738_v55 = vpop.permute.xlu0 %6737 }
0x300c   : > { %8050 = vmatpush3.msk.msra.mxu1 %vm755_vm3, %v6738_v55 }
0x300d   : > { %8059 = vmatprep.subr.mxu1 %v8294_v9 }
0x3012   : > { %v8258_v51 = vpop.eup %8257 }
0x3013   : > { %v6736_v4 = vmul.f32 %v8258_v51, %v8256_v16 }
0x3015   : > { %8052 = vmatmul.mubr.msk.f32.vlgmr.msra.gmra.mrb[80].mxu1 %vm751_vm5, %v6736_v4 }
0x3016   : > { %8060 = vmatpush3.xpose.msk.msra.mxu1 %vm662_vm2, %v6889_v12  ;;  %8061 = vmatprep.mubr.msk.f32.mxu1 %vm8293_vm0, %v8294_v9 }
0x3017   : > { %8069 = vmatprep.subr.mxu1 %v8294_v9 }
0x3019   : > { %8062 = vmatmul.mubr.msk.f32.vlgmr.msra.gmra.mrb[82].mxu1 %vm662_vm2, %v8548_v29  ;;  %v8281_v29 = vld [vmem:[%s8416_s25] sm:$0x1f] }
0x301a   : > { %8070 = vmatpush3.msra.mxu1 %v9036_v62  ;;  %8071 = vmatprep.mubr.msk.f32.mxu1 %vm8293_vm0, %v8294_v9  ;;  %v1628_v62 = vadd.f32 %v8281_v29, %v1627_v3 }
0x301c   : > { %v1629_v37 = vmul.f32 %v1628_v62, %v1628_v62 }
0x301e   : > { %v1631_v38 = vsel %vm1630_vm6, %v1629_v37, 0.0 }
0x30e8   : > { %v6810_v19 = vpop.f32.mrb[80].mxu1 }
0x30e9   : > { %v8053_v36 = vpop.f32.mrb[81].mxu1  ;;  %8057 = vmatmul.mubr.msk.f32.vlgmr.msra.gmra.mrb[80].mxu0 %vm662_vm2, %v6810_v19 }
0x30ea   : > { %8066 = vmatprep.mubr.msk.f32.mxu0 %vm8293_vm0, %v8294_v9  ;;  %v3831_v9 = vadd.f32 %v8283_v41, %v3830_v25 }
0x30ec   : > { %v6958_v17 = vpop.f32.mrb[82].mxu1  ;;  %v3832_v43 = vmul.f32 %v3831_v9, %v3831_v9 }
0x30ed   : > { %v8063_v26 = vpop.f32.mrb[83].mxu1  ;;  %v6962_v61 = vsel %vm739_vm4, %v6958_v17, -inf }
0x30ee   : > { %6963 = vmax.xlane.f32.xlu1 %v6962_v61  ;;  %v3833_v47 = vsel %vm1630_vm6, %v3832_v43, 0.0 }
0x30f2   : > { %1632 = vadd.xlane.f32.xlu1 %v1631_v38 }
0x30f6   : > { %2736 = vadd.xlane.f32.xlu1 %v2735_v42 }
0x30fa   : > { %3834 = vadd.xlane.f32.xlu1 %v3833_v47 }
0x30fe   : > { %4932 = vadd.xlane.f32.xlu1 %v4931_v32 }
0x3102   : > { %6030 = vadd.xlane.f32.xlu1 %v6029_v53 }
0x317b   : > { %v6964_v21 = vpop.xlane.xlu1 %6963 }
0x317c   : > { %v6965_v33 = vsub.f32 %v6958_v17, %v6964_v21 }
0x317e   : > { %v6966_v60 = vmul.f32 1.442695, %v6965_v33 }
0x317f   : > { %v1633_v54 = vpop.xlane.xlu1 %1632 }
0x3180   : > { %8259 = vpow2.f32 %v6966_v60  ;;  %v1635_v1 = vmul.f32 0.03125, %v1633_v54 }
0x3182   : > { %v1636_v58 = vadd.f32 1.1920929e-07, %v1635_v1 }
0x3183   : > { %v2737_v45 = vpop.xlane.xlu1 %2736 }
0x3184   : > { %8261 = vrsqrt.f32 %v1636_v58  ;;  %v2738_v59 = vmul.f32 0.03125, %v2737_v45 }
0x3186   : > { %v2739_v63 = vadd.f32 1.1920929e-07, %v2738_v59 }
0x3187   : > { %v3835_v34 = vpop.xlane.xlu1 %3834 }
0x3188   : > { %8263 = vrsqrt.f32 %v2739_v63  ;;  %v3836_v57 = vmul.f32 0.03125, %v3835_v34 }
0x318a   : > { %v8260_v0 = vpop.eup %8259  ;;  %v3837_v30 = vadd.f32 1.1920929e-07, %v3836_v57 }
0x318b   : > { %v4933_v31 = vpop.xlane.xlu1 %4932  ;;  %v6968_v56 = vsel %vm739_vm4, %v8260_v0, 0.0 }
0x318c   : > { %8265 = vrsqrt.f32 %v3837_v30  ;;  %v4934_v23 = vmul.f32 0.03125, %v4933_v31  ;;  %6969 = vadd.xlane.f32.xlu0 %v6968_v56 }
0x318e   : > { %v8262_v7 = vpop.eup %8261  ;;  %v4935_v11 = vadd.f32 1.1920929e-07, %v4934_v23 }
0x318f   : > { %v1638_v6 = vmul.f32 %v8262_v7, %v1628_v62  ;;  %v6031_v13 = vpop.xlane.xlu1 %6030 }
0x3190   : > { %8267 = vrsqrt.f32 %v4935_v11  ;;  %v6032_v14 = vmul.f32 0.03125, %v6031_v13 }
0x3191   : > { %v1645_v5 = vmul.f32 %v7239_v22, %v1638_v6 }
0x3192   : > { %v8264_v27 = vpop.eup %8263  ;;  %v6033_v15 = vadd.f32 1.1920929e-07, %v6032_v14 }
0x3193   : > { %1646 = vst.msk [vmem:[%s9194_s24] sm:$0x1f] %vm1630_vm6, %v1645_v5  ;;  %v2741_v16 = vmul.f32 %v8264_v27, %v2733_v48 }
0x3194   : > { %8269 = vrsqrt.f32 %v6033_v15 }
0x3195   : > { %v2742_v18 = vmul.f32 %v7239_v22, %v2741_v16 }
0x3196   : > { %v8266_v20 = vpop.eup %8265 }
0x3197   : > { %7263 = vst.msk [vmem:[%s9194_s24 + $0x8] sm:$0x1f] %vm1630_vm6, %v2742_v18  ;;  %v3839_v55 = vmul.f32 %v8266_v20, %v3831_v9 }
0x3199   : > { %v3840_v51 = vmul.f32 %v7239_v22, %v3839_v55 }
0x319a   : > { %v8268_v4 = vpop.eup %8267 }
0x319b   : > { %7287 = vst.msk [vmem:[%s9194_s24 + $0x10] sm:$0x1f] %vm1630_vm6, %v3840_v51  ;;  %v4937_v12 = vmul.f32 %v8268_v4, %v4929_v44 }
0x319d   : > { %v4938_v3 = vmul.f32 %v7239_v22, %v4937_v12 }
0x319e   : > { %v8270_v19 = vpop.eup %8269 }
0x319f   : > { %7311 = vst.msk [vmem:[%s9194_s24 + $0x18] sm:$0x1f] %vm1630_vm6, %v4938_v3  ;;  %v6035_v28 = vmul.f32 %v8270_v19, %v6027_v50 }
0x31a1   : > { %v6036_v36 = vmul.f32 %v7239_v22, %v6035_v28 }
0x31a2   : > { %6973 = vrot.lane.b32.xlu0 %v9102_v46, %s8297_s27 }
0x31a3   : > { %7335 = vst.msk [vmem:[%s9194_s24 + $0x20] sm:$0x1f] %vm1630_vm6, %v6036_v36 }
0x31bc   : > { %v6883_v29 = vpop.f32.mrb[80].mxu0 }
0x31bd   : > { %v6887_v62 = vadd.f32 %v6883_v29, %v9136_v8  ;;  %v8058_v17 = vpop.f32.mrb[81].mxu0 }
0x3219   : > { %v6970_v25 = vpop.xlane.xlu0 %6969 }
0x321a   : > { %8271 = vrcp.f32 %v6970_v25 }
0x321d   : > { %v6974_v26 = vpop.permute.xlu0 %6973 }
0x321e   : > { %8065 = vmatpush3.msk.msra.mxu0 %vm755_vm3, %v6974_v26 }
0x3224   : > { %v8272_v61 = vpop.eup %8271 }
0x3225   : > { %v6972_v37 = vmul.f32 %v8272_v61, %v8260_v0 }
0x3227   : > { %8067 = vmatmul.mubr.msk.f32.vlgmr.msra.gmra.mrb[82].mxu0 %vm751_vm5, %v6972_v37 }
0x32fa   : > { %v7046_v35 = vpop.f32.mrb[82].mxu0 }
0x32fb   : > { %v8068_v48 = vpop.f32.mrb[83].mxu0  ;;  %8072 = vmatmul.mubr.msk.f32.vlgmr.msra.gmra.mrb[84].mxu1 %vm662_vm2, %v7046_v35 }
0x33ce   : > { %v7119_v46 = vpop.f32.mrb[84].mxu1 }
0x33cf   : > { %v7123_v40 = vadd.f32 %v7119_v46, %v6887_v62  ;;  %v8073_v38 = vpop.f32.mrb[85].mxu1 }
0x33d1   : > { %v7124_v8 = vadd.f32 %v9159_v24, %v7123_v40 }
0x33d3   : > { %v7125_v39 = vadd.f32 %v9058_v2, %v7124_v8 }
0x33d5   : > { %v7126_v41 = vmul.f32 %v7125_v39, %v7125_v39 }
0x33d7   : > { %v7127_v9 = vsel %vm1630_vm6, %v7126_v41, 0.0 }
0x33d8   : > { %7128 = vadd.xlane.f32.xlu0 %v7127_v9 }
0x3465   : > { %v7129_v10 = vpop.xlane.xlu0 %7128 }
0x3466   : > { %v7130_v42 = vmul.f32 0.03125, %v7129_v10 }
0x3468   : > { %v7131_v43 = vadd.f32 1.1920929e-07, %v7130_v42 }
0x346a   : > { %8273 = vrsqrt.f32 %v7131_v43 }
0x3474   : > { %v8274_v44 = vpop.eup %8273 }
0x3475   : > { %v7133_v47 = vmul.f32 %v8274_v44, %v7125_v39 }
0x3477   : > { %v7134_v49 = vmul.f32 %v7239_v22, %v7133_v47 }
0x3479   : > { %7359 = vst.msk [vmem:[%s9194_s24 + $0x28] sm:$0x1f] %vm1630_vm6, %v7134_v49 }
0x347a PF: > { %s21_s17 = sadd.s32 1, %s8290_s17  }
0x347b   : > { %p18_p4 = scmp.ge.s32.totalorder %s21_s17, 4  }
0x347d   :  { %20 = sbr.rel (!%p18_p4) target bundleno = 1 (0x1), region = 107 }

// kernel: _lambda_.16
= control target key start
LH: loop header
LB: loop body
LE: loop exit
PB: predicated region body
PF: predicated region fallthrough
CT: control target
= control target key end

     0   :  { %s9005_s27 = smov 0   ;;  %s10027_s0 = inlined_call_operand.vmem [shape: f32[2,6,32], index: 0, kind: input, shape index: {}]   ;;  %s10028_s1 = inlined_call_operand.vmem [shape: f32[2,5,6,32], index: 1, kind: input, shape index: {}]   ;;  %s10029_s2 = inlined_call_operand.vmem [shape: f32[32,32], index: 2, kind: input, shape index: {}]   ;;  %s10030_s3 = inlined_call_operand.vmem [shape: f32[1,32], index: 3, kind: input, shape index: {}]   ;;  %s10031_s4 = inlined_call_operand.vmem [shape: f32[32,32], index: 4, kind: input, shape index: {}]   ;;  %s10032_s5 = inlined_call_operand.vmem [shape: f32[1,32], index: 5, kind: input, shape index: {}]   ;;  %s10033_s6 = inlined_call_operand.vmem [shape: f32[32,32], index: 6, kind: input, shape index: {}]   ;;  %s10034_s7 = inlined_call_operand.vmem [shape: f32[1,32], index: 7, kind: input, shape index: {}]   ;;  %s10035_s8 = inlined_call_operand.vmem [shape: f32[32,32], index: 8, kind: input, shape index: {}]   ;;  %s10036_s9 = inlined_call_operand.vmem [shape: f32[1,32], index: 9, kind: input, shape index: {}]   ;;  %s10037_s10 = inlined_call_operand.vmem [shape: f32[1,32], index: 10, kind: input, shape index: {}, may-alias: {10,17}]   ;;  %s10038_s11 = inlined_call_operand.vmem [shape: f32[32,64], index: 11, kind: input, shape index: {}]   ;;  %s10039_s12 = inlined_call_operand.vmem [shape: f32[1,64], index: 12, kind: input, shape index: {}]   ;;  %s10040_s13 = inlined_call_operand.vmem [shape: f32[32,64], index: 13, kind: input, shape index: {}]   ;;  %s10041_s14 = inlined_call_operand.vmem [shape: f32[1,64], index: 14, kind: input, shape index: {}]   ;;  %s10042_s15 = inlined_call_operand.vmem [shape: f32[64,32], index: 15, kind: input, shape index: {}]   ;;  %s10043_s16 = inlined_call_operand.vmem [shape: f32[1,32], index: 16, kind: input, shape index: {}]   ;;  %s10044_s17 = inlined_call_operand.vmem [shape: f32[1,32], index: 17, kind: input, shape index: {}, may-alias: {10,17}]   ;;  %s10045_s18 = inlined_call_operand.vmem [shape: f32[2,5,6,32], index: 18, kind: output, shape index: {}]  }
   0x1   :  { %10050 = sst [smem:[#allocation2_spill]] %s10027_s0 }
   0x2   :  { %10051 = sst [smem:[#allocation3_spill]] %s10028_s1 }
   0x3   :  { %10052 = sst [smem:[#allocation4_spill]] %s10029_s2 }
   0x4 LB: > { %s7510_s28 = sadd.s32 4294967295, %s8902_s27   ;;  %p7514_p0 = scmp.ge.s32.totalorder %s8902_s27, 1  ;;  %s8902_s27 = sphi %s9005_s27, %s28_s27  }
   0x5   : > { %p521_p1 = scmp.lt.s32.totalorder %s8902_s27, 3 }
   0x7   : > { %p522_p2 = pnand %p7514_p0, %p521_p1 }
   0x8   : > { %s10053_s0 = sld [smem:[#allocation4_spill]] (!%p522_p2)  ;;  %v8904_v3 = vmov (!%p522_p2), 0.0|0.0   ;;  %vm8905_vm0 = vmmov (!%p522_p2), 0   ;;  %v8906_v6 = vmov (!%p522_p2), 0.0   ;;  %p579_p3 = scmp.lt.s32.totalorder (!%p522_p2), %s7510_s28, 1  ;;  %v598_v8 = vld [vmem:[%s10031_s4] sm:$0xff] (!%p522_p2) }
   0x9   : > { %525 = sbr.rel (%p522_p2) target bundleno = 14310 (0x37e6), region = 92  ;;  %8564 = vmatprep.subr.bf16.mxu1 (!%p522_p2), %v8904_v3  ;;  %7946 = vmatprep.mubr.msk.f32.mxu1 (!%p522_p2), %vm8905_vm0, %v8906_v6  ;;  %v599_v9 = vld [vmem:[%s10031_s4 + $0x8] sm:$0xff] (!%p522_p2)  ;;  %s10054_s1 = sld [smem:[#allocation2_spill]] (!%p522_p2)  ;;  %vm641_vm1 = vcmask (!%p522_p2), 261120   ;;  %v600_v12 = vld [vmem:[%s10031_s4 + $0x10] sm:$0xff] (!%p522_p2)  ;;  %v601_v13 = vld [vmem:[%s10031_s4 + $0x18] sm:$0xff] (!%p522_p2) }
   0xa   : > { %8576 = vmatprep.subr.bf16.mxu0 (!%p522_p2), %v8904_v3  ;;  %7968 = vmatprep.mubr.msk.f32.mxu0 (!%p522_p2), %vm8905_vm0, %v8906_v6  ;;  %v9049_v11 = vpack.c.bf16 (!%p522_p2), %v599_v9, %v598_v8  ;;  %v9062_v14 = vpack.c.bf16 (!%p522_p2), %v601_v13, %v600_v12  ;;  %v603_v16 = vld [vmem:[%s10033_s6] sm:$0xff] (!%p522_p2)  ;;  %v604_v17 = vld [vmem:[%s10033_s6 + $0x8] sm:$0xff] (!%p522_p2)  ;;  %v605_v18 = vld [vmem:[%s10033_s6 + $0x10] sm:$0xff] (!%p522_p2)  ;;  %vm871_vm2 = vcmask (!%p522_p2), 64512   ;;  %s8907_s2 = smov (!%p522_p2), 120   ;;  %vm964_vm3 = vcmask (!%p522_p2), 1045504  }
   0xb   : > { %v9089_v19 = vpack.c.bf16 (!%p522_p2), %v604_v17, %v603_v16  ;;  %v606_v20 = vld [vmem:[%s10033_s6 + $0x18] sm:$0xff] (!%p522_p2)  ;;  %v9106_v24 = vld [vmem:[%s10032_s5] ss:$0 sm:$0xff] (!%p522_p2)  ;;  %vm948_vm4 = vcmask (!%p522_p2), 46080   ;;  %s8908_s25 = smov (!%p522_p2), 112   ;;  %s10048_s26 = smov (!%p522_p2), 104  }
   0xc   : > { %v9095_v21 = vpack.c.bf16 (!%p522_p2), %v606_v20, %v605_v18  ;;  %v7518_v26 = vld [vmem:[%s10030_s3] ss:$0 sm:$0xff] (!%p522_p2)  ;;  %vm960_vm5 = vcmask (!%p522_p2), 48128   ;;  %v9160_v55 = vld [vmem:[%s10035_s8 + $0x8] sm:$0xff] (!%p522_p2)  ;;  %vm1839_vm6 = vcmask (!%p522_p2), 259072   ;;  %vm2024_vm7 = vcmask (!%p522_p2), 523264  }
   0xd   : > { %8578 = vmatpush3.bf16.msra.mxu0 (!%p522_p2), %v9089_v19  ;;  %v9126_v30 = vld [vmem:[%s10034_s7] ss:$0 sm:$0xff] (!%p522_p2) }
   0xe   : > { %v593_v0 = vld [vmem:[%s10053_s0] sm:$0xff] (!%p522_p2)  ;;  %v594_v1 = vld [vmem:[%s10053_s0 + $0x8] sm:$0xff] (!%p522_p2)  ;;  %v595_v2 = vld [vmem:[%s10053_s0 + $0x10] sm:$0xff] (!%p522_p2)  ;;  %8579 = vmatprep.subr.bf16.mxu0 (!%p522_p2), %v8904_v3 }
   0xf   : > { %v8565_v4 = vpack.c.bf16 (!%p522_p2), %v594_v1, %v593_v0  ;;  %v596_v5 = vld [vmem:[%s10053_s0 + $0x18] sm:$0xff] (!%p522_p2)  ;;  %v9169_v60 = vld [vmem:[%s10035_s8] sm:$0xff] (!%p522_p2) }
  0x10   : > { %v8568_v7 = vpack.c.bf16 %v596_v5, %v595_v2  ;;  %s10059_s28 = smov (!%p579_p3, %s7510_s28), 1 }
  0x11   : > { %8566 = vmatpush3.bf16.msra.mxu1 %v8565_v4  ;;  %s7515_s29 = sshll.u32 %s10059_s28, 3  ;;  %s10047_s21 = smul.u32 40, %s10059_s28  ;;  %8581 = vmatpush3.bf16.msra.mxu0 %v9095_v21 }
  0x12   : > { %8567 = vmatprep.subr.bf16.mxu1 %v8904_v3  ;;  %s9044_s20 = scalar_lea.vmem %s10054_s1, %s7515_s29  ;;  %s10055_s29 = sld [smem:[#allocation3_spill]]  ;;  %7981 = vmatprep.subr.mxu0 %v8906_v6 }
  0x13   : > { %v9047_v10 = vld [vmem:[%s9044_s20] sm:$0x3f]  ;;  %s10056_s1 = smov 104  }
  0x15   : > { %8569 = vmatpush3.bf16.msra.mxu1 %v8568_v7 }
  0x16   : > { %8570 = vmatprep.subr.bf16.mxu1 %v8904_v3 }
  0x18   : > { %7947 = vmatmul.mubr.msk.f32.vlgmr.msra.gmra.mrb[0].mxu1 %vm641_vm1, %v9047_v10  ;;  %s9072_s30 = scalar_lea.vmem %s10055_s29, %s10047_s21  ;;  %s10057_s29 = smul.u32 40, %s10059_s28 }
  0x19   : > { %8572 = vmatpush3.bf16.msra.mxu1 %v9049_v11  ;;  %7957 = vmatprep.mubr.msk.f32.mxu1 %vm8905_vm0, %v8906_v6  ;;  %v715_v15 = vld [vmem:[%s9072_s30] sm:$0x3f] }
  0x1a   : > { %8573 = vmatprep.subr.bf16.mxu1 %v8904_v3  ;;  %7969 = vmatmul.mubr.msk.f32.vlgmr.msra.gmra.mrb[0].mxu0 %vm641_vm1, %v715_v15 }
  0x1b   : > { %7983 = vmatprep.mubr.msk.f32.mxu0 %vm8905_vm0, %v8906_v6 }
  0x1d   : > { %8575 = vmatpush3.bf16.msra.mxu1 %v9062_v14 }
  0x1e   : > { %7971 = vmatprep.subr.mxu1 %v8906_v6 }
  0x20   : > { %7958 = vmatmul.mubr.msk.f32.vlgmr.msra.gmra.mrb[2].mxu1 %vm641_vm1, %v715_v15 }
  0x21   : > { %7973 = vmatprep.mubr.msk.f32.mxu1 %vm8905_vm0, %v8906_v6 }
  0xeb   : > { %v711_v22 = vpop.f32.mrb[0].mxu1 }
  0xec   : > { %v7948_v23 = vpop.f32.mrb[1].mxu1  ;;  %v9114_v29 = vadd.f32 %v7518_v26, %v711_v22 }
  0xed   : > { %v867_v31 = vpop.f32.mrb[0].mxu0 }
  0xee   : > { %v9129_v32 = vadd.f32 %v9126_v30, %v867_v31  ;;  %v7970_v33 = vpop.f32.mrb[1].mxu0 }
  0xef   : > { %v9210_v33 = vld [vmem:[%s10035_s8 + $0x10] sm:$0xff] }
  0xf3   : > { %v791_v25 = vpop.f32.mrb[2].mxu1 }
  0xf4   : > { %v792_v27 = vadd.f32 %v9106_v24, %v791_v25  ;;  %v7959_v28 = vpop.f32.mrb[3].mxu1 }
  0xf6   : > { %1040 = vrot.lane.b32.xlu0 %v792_v27, %s8907_s2  ;;  %7972 = vmatpush3.xpose.msk.msra.mxu1 %vm871_vm2, %v792_v27 }
  0xf7   : > { %7976 = vmatprep.subr.mxu1 %v8906_v6 }
  0xf9   : > { %7974 = vmatmul.mubr.msk.f32.vlgmr.msra.gmra.mrb[4].mxu1 %vm871_vm2, %v9114_v29 }
  0xfa   : > { %1038 = vrot.lane.b32.xlu0 %v9114_v29, %s8907_s2  ;;  %7978 = vmatprep.mubr.msk.f32.mxu1 %vm8905_vm0, %v8906_v6 }
  0xfb   : > { %7977 = vmatpush3.msk.msra.mxu1 %vm964_vm3, %v9129_v32 }
  0xfc   : > { %7986 = vmatprep.subr.mxu1 %v8906_v6 }
 0x168   : > { %v1041_v34 = vpop.permute.xlu0 %1040 }
 0x169   : > { %7982 = vmatpush3.xpose.msk.msra.mxu0 %vm871_vm2, %v1041_v34 }
 0x16a   : > { %7991 = vmatprep.subr.mxu0 %v8906_v6 }
 0x16c   : > { %v9136_v35 = vpop.permute.xlu0 %1038 }
 0x16d   : > { %7984 = vmatmul.mubr.msk.f32.vlgmr.msra.gmra.mrb[2].mxu0 %vm871_vm2, %v9136_v35 }
 0x16e   : > { %7993 = vmatprep.mubr.msk.f32.mxu0 %vm8905_vm0, %v8906_v6  ;;  %7992 = vmatpush3.msra.mxu0 %v9160_v55 }
 0x16f   : > { %8001 = vmatprep.subr.mxu0 %v8906_v6 }
 0x1cc   : > { %v944_v36 = vpop.f32.mrb[4].mxu1 }
 0x1cd   : > { %v7975_v37 = vpop.f32.mrb[5].mxu1  ;;  %v949_v38 = vsel %vm948_vm4, %v944_v36, -inf }
 0x1ce   : > { %950 = vmax.xlane.f32.xlu1 %v949_v38 }
 0x240   : > { %v1112_v39 = vpop.f32.mrb[2].mxu0 }
 0x241   : > { %v7985_v40 = vpop.f32.mrb[3].mxu0  ;;  %v1116_v41 = vsel %vm948_vm4, %v1112_v39, -inf }
 0x242   : > { %1117 = vmax.xlane.f32.xlu1 %v1116_v41 }
 0x25b   : > { %v951_v42 = vpop.xlane.xlu1 %950 }
 0x25c   : > { %v952_v43 = vsub.f32 %v944_v36, %v951_v42 }
 0x25e   : > { %v953_v44 = vmul.f32 1.442695, %v952_v43 }
 0x260   : > { %8765 = vpow2.f32 %v953_v44 }
 0x26a   : > { %v8766_v45 = vpop.eup %8765 }
 0x26b   : > { %v955_v46 = vsel %vm948_vm4, %v8766_v45, 0.0 }
 0x26c   : > { %956 = vadd.xlane.f32.xlu0 %v955_v46 }
 0x282   : > { %1439 = vrot.lane.b32.xlu0 %v9129_v32, %s8908_s25 }
 0x286   : > { %1592 = vrot.lane.b32.xlu0 %v792_v27, %s10048_s26 }
 0x2cf   : > { %v1118_v47 = vpop.xlane.xlu1 %1117 }
 0x2d0   : > { %v1119_v48 = vsub.f32 %v1112_v39, %v1118_v47 }
 0x2d2   : > { %v1120_v49 = vmul.f32 1.442695, %v1119_v48 }
 0x2d4   : > { %8767 = vpow2.f32 %v1120_v49 }
 0x2de   : > { %v8768_v50 = vpop.eup %8767 }
 0x2df   : > { %v1122_v51 = vsel %vm948_vm4, %v8768_v50, 0.0 }
 0x2e0   : > { %1123 = vadd.xlane.f32.xlu1 %v1122_v51 }
 0x2f1   : > { %1127 = vrot.lane.b32.xlu1 %v9129_v32, %s8907_s2 }
 0x2f5   : > { %1352 = vrot.lane.b32.xlu1 %v792_v27, %s8908_s25 }
 0x2f9   : > { %v957_v52 = vpop.xlane.xlu0 %956  ;;  %1350 = vrot.lane.b32.xlu1 %v9114_v29, %s8908_s25 }
 0x2fa   : > { %8769 = vrcp.f32 %v957_v52 }
 0x2fd   : > { %v1440_v62 = vpop.permute.xlu0 %1439 }
 0x301   : > { %v1593_v25 = vpop.permute.xlu0 %1592 }
 0x304   : > { %v8770_v53 = vpop.eup %8769 }
 0x305   : > { %v959_v54 = vmul.f32 %v8770_v53, %v8766_v45  ;;  %v9224_v45 = vld [vmem:[%s10035_s8 + $0x18] sm:$0xff] }
 0x307   : > { %7979 = vmatmul.mubr.msk.f32.vlgmr.msra.gmra.mrb[6].mxu1 %vm960_vm5, %v959_v54  ;;  %v9239_v54 = vld [vmem:[%s10036_s9] ss:$0 sm:$0xff] }
 0x308   : > { %7988 = vmatprep.mubr.msk.f32.mxu1 %vm8905_vm0, %v8906_v6 }
 0x36d   : > { %v1124_v56 = vpop.xlane.xlu1 %1123 }
 0x36e   : > { %8771 = vrcp.f32 %v1124_v56 }
 0x371   : > { %v1128_v57 = vpop.permute.xlu1 %1127 }
 0x372   : > { %7987 = vmatpush3.msk.msra.mxu1 %vm964_vm3, %v1128_v57 }
 0x373   : > { %7996 = vmatprep.subr.mxu1 %v8906_v6 }
 0x375   : > { %v1353_v0 = vpop.permute.xlu1 %1352 }
 0x378   : > { %v8772_v58 = vpop.eup %8771 }
 0x379   : > { %v1126_v59 = vmul.f32 %v8772_v58, %v8768_v50  ;;  %v9186_v4 = vpop.permute.xlu1 %1350 }
 0x37b   : > { %7989 = vmatmul.mubr.msk.f32.vlgmr.msra.gmra.mrb[8].mxu1 %vm960_vm5, %v1126_v59 }
 0x37c   : > { %7997 = vmatpush3.msra.mxu1 %v9169_v60  ;;  %7998 = vmatprep.mubr.msk.f32.mxu1 %vm8905_vm0, %v8906_v6 }
 0x37d   : > { %8006 = vmatprep.subr.mxu1 %v8906_v6 }
 0x3da   : > { %v1034_v61 = vpop.f32.mrb[6].mxu1 }
 0x3db   : > { %v7980_v63 = vpop.f32.mrb[7].mxu1  ;;  %7999 = vmatmul.mubr.msk.f32.vlgmr.msra.gmra.mrb[10].mxu1 %vm871_vm2, %v1034_v61 }
 0x3dc   : > { %8007 = vmatpush3.msk.msra.mxu1 %vm964_vm3, %v1440_v62  ;;  %8008 = vmatprep.mubr.msk.f32.mxu1 %vm8905_vm0, %v8906_v6 }
 0x3dd   : > { %8016 = vmatprep.subr.mxu1 %v8906_v6 }
 0x44e   : > { %v1200_v1 = vpop.f32.mrb[8].mxu1 }
 0x44f   : > { %v7990_v2 = vpop.f32.mrb[9].mxu1  ;;  %7994 = vmatmul.mubr.msk.f32.vlgmr.msra.gmra.mrb[4].mxu0 %vm871_vm2, %v1200_v1  ;;  %v621_v1 = vld [vmem:[%s10040_s13 + $0x8] sm:$0xff] }
 0x450   : > { %8002 = vmatpush3.xpose.msk.msra.mxu0 %vm871_vm2, %v1353_v0  ;;  %8003 = vmatprep.mubr.msk.f32.mxu0 %vm8905_vm0, %v8906_v6  ;;  %v620_v0 = vld [vmem:[%s10040_s13] sm:$0xff] }
 0x451   : > { %8011 = vmatprep.subr.mxu0 %v8906_v6  ;;  %v9250_v2 = vpack.c.bf16 %v621_v1, %v620_v0 }
 0x453   : > { %8004 = vmatmul.mubr.msk.f32.vlgmr.msra.gmra.mrb[6].mxu0 %vm871_vm2, %v9186_v4 }
 0x454   : > { %8013 = vmatprep.mubr.msk.f32.mxu0 %vm8905_vm0, %v8906_v6  ;;  %8012 = vmatpush3.msra.mxu0 %v9210_v33 }
 0x455   : > { %8021 = vmatprep.subr.mxu0 %v8906_v6 }
 0x4ae   : > { %v1346_v5 = vpop.f32.mrb[10].mxu1 }
 0x4af   : > { %v8000_v7 = vpop.f32.mrb[11].mxu1 }
 0x4b0   : > { %v616_v7 = vld [vmem:[%s10038_s11 + $0x8] sm:$0xff] }
 0x522   : > { %v1273_v8 = vpop.f32.mrb[4].mxu0 }
 0x523   : > { %v1347_v9 = vadd.f32 %v1346_v5, %v1273_v8  ;;  %v7995_v12 = vpop.f32.mrb[5].mxu0  ;;  %v615_v5 = vld [vmem:[%s10038_s11] sm:$0xff] }
 0x524   : > { %v9258_v8 = vpack.c.bf16 %v616_v7, %v615_v5  ;;  %v623_v12 = vld [vmem:[%s10040_s13 + $0x18] sm:$0xff] }
 0x526   : > { %v1424_v13 = vpop.f32.mrb[6].mxu0 }
 0x527   : > { %v8005_v15 = vpop.f32.mrb[7].mxu0  ;;  %v1428_v16 = vsel %vm948_vm4, %v1424_v13, -inf }
 0x528   : > { %1429 = vmax.xlane.f32.xlu1 %v1428_v16  ;;  %v617_v15 = vld [vmem:[%s10038_s11 + $0x10] sm:$0xff]  ;;  %v618_v16 = vld [vmem:[%s10038_s11 + $0x18] sm:$0xff] }
 0x5b5   : > { %v1430_v17 = vpop.xlane.xlu1 %1429 }
 0x5b6   : > { %v1431_v18 = vsub.f32 %v1424_v13, %v1430_v17  ;;  %v9278_v17 = vpack.c.bf16 %v618_v16, %v617_v15 }
 0x5b8   : > { %v1432_v20 = vmul.f32 1.442695, %v1431_v18 }
 0x5ba   : > { %8773 = vpow2.f32 %v1432_v20 }
 0x5c4   : > { %v8774_v22 = vpop.eup %8773 }
 0x5c5   : > { %v1434_v23 = vsel %vm948_vm4, %v8774_v22, 0.0 }
 0x5c6   : > { %1435 = vadd.xlane.f32.xlu0 %v1434_v23 }
 0x5dc   : > { %1590 = vrot.lane.b32.xlu0 %v9114_v29, %s10048_s26 }
 0x653   : > { %v1436_v26 = vpop.xlane.xlu0 %1435 }
 0x654   : > { %8775 = vrcp.f32 %v1436_v26 }
 0x657   : > { %v9201_v31 = vpop.permute.xlu0 %1590 }
 0x65e   : > { %v8776_v27 = vpop.eup %8775 }
 0x65f   : > { %v1438_v28 = vmul.f32 %v8776_v27, %v8774_v22 }
 0x661   : > { %8009 = vmatmul.mubr.msk.f32.vlgmr.msra.gmra.mrb[12].mxu1 %vm960_vm5, %v1438_v28  ;;  %v7554_v28 = vld [vmem:[%s9072_s30 + $0x8] sm:$0x3f] }
 0x662   : > { %8017 = vmatpush3.xpose.msk.msra.mxu1 %vm871_vm2, %v1593_v25  ;;  %8018 = vmatprep.mubr.msk.f32.mxu1 %vm8905_vm0, %v8906_v6  ;;  %v9287_v25 = vld [vmem:[%s10037_s10] ss:$0 sm:$0xff] }
 0x663   : > { %8026 = vmatprep.subr.mxu1 %v8906_v6 }
 0x665   : > { %8019 = vmatmul.mubr.msk.f32.vlgmr.msra.gmra.mrb[14].mxu1 %vm871_vm2, %v9201_v31 }
 0x666   : > { %8028 = vmatprep.mubr.msk.f32.mxu1 %vm8905_vm0, %v8906_v6  ;;  %8027 = vmatpush3.msra.mxu1 %v9224_v45 }
 0x667   : > { %8588 = vmatprep.subr.bf16.mxu1 %v8904_v3 }
 0x734   : > { %v1512_v34 = vpop.f32.mrb[12].mxu1 }
 0x735   : > { %v8010_v36 = vpop.f32.mrb[13].mxu1  ;;  %8014 = vmatmul.mubr.msk.f32.vlgmr.msra.gmra.mrb[8].mxu0 %vm871_vm2, %v1512_v34  ;;  %v625_v34 = vld [vmem:[%s10042_s15] sm:$0xff] }
 0x736   : > { %8023 = vmatprep.mubr.msk.f32.mxu0 %vm8905_vm0, %v8906_v6  ;;  %v626_v36 = vld [vmem:[%s10042_s15 + $0x8] sm:$0xff] }
 0x738   : > { %v1664_v37 = vpop.f32.mrb[14].mxu1 }
 0x739   : > { %v8020_v38 = vpop.f32.mrb[15].mxu1  ;;  %v1668_v39 = vsel %vm948_vm4, %v1664_v37, -inf }
 0x73a   : > { %1669 = vmax.xlane.f32.xlu0 %v1668_v39  ;;  %v627_v38 = vld [vmem:[%s10042_s15 + $0x10] sm:$0xff]  ;;  %v628_v39 = vld [vmem:[%s10042_s15 + $0x18] sm:$0xff] }
 0x7c7   : > { %v1670_v40 = vpop.xlane.xlu0 %1669 }
 0x7c8   : > { %v1671_v41 = vsub.f32 %v1664_v37, %v1670_v40  ;;  %v9321_v37 = vpack.c.bf16 %v626_v36, %v625_v34  ;;  %v9331_v40 = vpack.c.bf16 %v628_v39, %v627_v38 }
 0x7ca   : > { %v1672_v42 = vmul.f32 1.442695, %v1671_v41  ;;  %v629_v41 = vld [vmem:[%s10042_s15 + $0x20] sm:$0xff] }
 0x7cc   : > { %8777 = vpow2.f32 %v1672_v42  ;;  %v630_v42 = vld [vmem:[%s10042_s15 + $0x28] sm:$0xff] }
 0x7d6   : > { %v8778_v43 = vpop.eup %8777 }
 0x7d7   : > { %v1674_v44 = vsel %vm948_vm4, %v8778_v43, 0.0 }
 0x7d8   : > { %1675 = vadd.xlane.f32.xlu1 %v1674_v44  ;;  %v631_v44 = vld [vmem:[%s10042_s15 + $0x30] sm:$0xff] }
 0x7e9   : > { %1679 = vrot.lane.b32.xlu1 %v9129_v32, %s10048_s26  ;;  %s9962_s26 = scalar_lea.vmem %s10045_s18, %s10057_s29 }
 0x808   : > { %v1585_v46 = vpop.f32.mrb[8].mxu0 }
 0x809   : > { %v1589_v47 = vadd.f32 %v1585_v46, %v1347_v9  ;;  %v8015_v48 = vpop.f32.mrb[9].mxu0  ;;  %v622_v9 = vld [vmem:[%s10040_s13 + $0x10] sm:$0xff]  ;;  %v632_v46 = vld [vmem:[%s10042_s15 + $0x38] sm:$0xff] }
 0x80a   : > { %v9270_v13 = vpack.c.bf16 %v623_v12, %v622_v9  ;;  %v9358_v48 = vld [vmem:[%s10039_s12] ss:$0 sm:$0xff] }
 0x865   : > { %v1676_v49 = vpop.xlane.xlu1 %1675 }
 0x866   : > { %8779 = vrcp.f32 %v1676_v49 }
 0x869   : > { %v1680_v50 = vpop.permute.xlu1 %1679 }
 0x86a   : > { %8022 = vmatpush3.msk.msra.mxu0 %vm964_vm3, %v1680_v50 }
 0x86b   : > { %8582 = vmatprep.subr.bf16.mxu0 %v8904_v3 }
 0x870   : > { %v8780_v32 = vpop.eup %8779 }
 0x871   : > { %v1678_v51 = vmul.f32 %v8780_v32, %v8778_v43  ;;  %v9341_v43 = vpack.c.bf16 %v630_v42, %v629_v41 }
 0x873   : > { %8024 = vmatmul.mubr.msk.f32.vlgmr.msra.gmra.mrb[10].mxu0 %vm960_vm5, %v1678_v51 }
 0x874   : > { %8039 = vmatprep.mubr.msk.f32.mxu0 %vm8905_vm0, %v8906_v6  ;;  %8584 = vmatpush3.bf16.msra.mxu0 %v9258_v8 }
 0x875   : > { %8585 = vmatprep.subr.bf16.mxu0 %v8904_v3 }
 0x878   : > { %8587 = vmatpush3.bf16.msra.mxu0 %v9278_v17 }
 0x879   : > { %8594 = vmatprep.subr.bf16.mxu0 %v8904_v3 }
 0x946   : > { %v1752_v52 = vpop.f32.mrb[10].mxu0 }
 0x947   : > { %v8025_v53 = vpop.f32.mrb[11].mxu0  ;;  %8029 = vmatmul.mubr.msk.f32.vlgmr.msra.gmra.mrb[16].mxu1 %vm871_vm2, %v1752_v52 }
 0x948   : > { %8050 = vmatprep.mubr.msk.f32.mxu1 %vm8905_vm0, %v8906_v6  ;;  %8590 = vmatpush3.bf16.msra.mxu1 %v9250_v2 }
 0x949   : > { %8591 = vmatprep.subr.bf16.mxu1 %v8904_v3 }
 0x94c   : > { %8593 = vmatpush3.bf16.msra.mxu1 %v9270_v13 }
 0x94d   : > { %8606 = vmatprep.subr.bf16.mxu1 %v8904_v3 }
 0xa1a   : > { %v1825_v56 = vpop.f32.mrb[16].mxu1 }
 0xa1b   : > { %v1829_v57 = vadd.f32 %v1825_v56, %v1589_v47  ;;  %v8030_v58 = vpop.f32.mrb[17].mxu1  ;;  %v9351_v47 = vpack.c.bf16 %v632_v46, %v631_v44 }
 0xa1d   : > { %v1836_v59 = vadd.f32 %v9239_v54, %v1829_v57 }
 0xa1f   : > { %v1837_v61 = vadd.f32 %v1836_v59, %v9047_v10 }
 0xa21   : > { %v1838_v62 = vmul.f32 %v1837_v61, %v1837_v61 }
 0xa23   : > { %v1840_v63 = vsel %vm1839_vm6, %v1838_v62, 0.0  ;;  %v9369_v62 = vld [vmem:[%s10041_s14] ss:$0 sm:$0xff] }
 0xa24   : > { %1841 = vadd.xlane.f32.xlu1 %v1840_v63 }
 0xab1   : > { %v1842_v18 = vpop.xlane.xlu1 %1841 }
 0xab2   : > { %v1844_v20 = vmul.f32 0.03125, %v1842_v18 }
 0xab4   : > { %v1845_v22 = vadd.f32 1.1920929e-07, %v1844_v20 }
 0xab6   : > { %8781 = vrsqrt.f32 %v1845_v22 }
 0xac0   : > { %v8782_v23 = vpop.eup %8781 }
 0xac1   : > { %v1847_v26 = vmul.f32 %v8782_v23, %v1837_v61 }
 0xac3   : > { %v9290_v27 = vmul.f32 %v9287_v25, %v1847_v26 }
 0xac5   : > { %8040 = vmatmul.mubr.msk.f32.vlgmr.msra.gmra.mrb[12].mxu0 %vm641_vm1, %v9290_v27  ;;  %8051 = vmatmul.mubr.msk.f32.vlgmr.msra.gmra.mrb[18].mxu1 %vm641_vm1, %v9290_v27 }
 0xac6   : > { %8608 = vmatpush3.bf16.msra.mxu1 %v9049_v11  ;;  %8080 = vmatprep.mubr.msk.f32.mxu1 %vm8905_vm0, %v8906_v6 }
 0xac7   : > { %8609 = vmatprep.subr.bf16.mxu1 %v8904_v3  ;;  %8069 = vmatprep.mubr.msk.f32.mxu0 %vm8905_vm0, %v8906_v6 }
 0xac8   : > { %8596 = vmatpush3.bf16.msra.mxu0 %v9321_v37 }
 0xac9   : > { %8597 = vmatprep.subr.bf16.mxu0 %v8904_v3 }
 0xaca   : > { %8611 = vmatpush3.bf16.msra.mxu1 %v9062_v14 }
 0xacb   : > { %8612 = vmatprep.subr.bf16.mxu1 %v8904_v3 }
 0xacc   : > { %8599 = vmatpush3.bf16.msra.mxu0 %v9331_v40 }
 0xacd   : > { %8081 = vmatmul.mubr.msk.f32.vlgmr.msra.gmra.mrb[20].mxu1 %vm641_vm1, %v7554_v28  ;;  %8600 = vmatprep.subr.bf16.mxu0 %v8904_v3 }
 0xace   : > { %8614 = vmatpush3.bf16.msra.mxu1 %v9089_v19  ;;  %8091 = vmatprep.mubr.msk.f32.mxu1 %vm8905_vm0, %v8906_v6 }
 0xacf   : > { %8615 = vmatprep.subr.bf16.mxu1 %v8904_v3 }
 0xad0   : > { %8602 = vmatpush3.bf16.msra.mxu0 %v9341_v43 }
 0xad1   : > { %8603 = vmatprep.subr.bf16.mxu0 %v8904_v3 }
 0xad2   : > { %8617 = vmatpush3.bf16.msra.mxu1 %v9095_v21 }
 0xad3   : > { %8099 = vmatprep.subr.mxu1 %v8906_v6 }
 0xad4   : > { %8605 = vmatpush3.bf16.msra.mxu0 %v9351_v47 }
 0xad5   : > { %8092 = vmatmul.mubr.msk.f32.vlgmr.msra.gmra.mrb[22].mxu1 %vm641_vm1, %v7554_v28  ;;  %8094 = vmatprep.subr.mxu0 %v8906_v6 }
 0xad6   : > { %8101 = vmatprep.mubr.msk.f32.mxu1 %vm8905_vm0, %v8906_v6 }
 0xb98   : > { %v1930_v49 = vpop.f32.mrb[12].mxu0  ;;  %v2006_v50 = vpop.f32.mrb[18].mxu1 }
 0xb99   : > { %v1931_v32 = vadd.f32 %v9358_v48, %v1930_v49  ;;  %v8041_v51 = vpop.f32.mrb[13].mxu0  ;;  %v8052_v52 = vpop.f32.mrb[19].mxu1  ;;  %v2007_v1 = vadd.f32 %v9369_v62, %v2006_v50 }
 0xb9b   : > { %v7550_v53 = vmul.f32 -1.442695, %v1931_v32 }
 0xb9d   : > { %8783 = vpow2.f32 %v7550_v53 }
 0xba0   : > { %v2186_v56 = vpop.f32.mrb[20].mxu1 }
 0xba1   : > { %v9362_v57 = vadd.f32 %v9106_v24, %v2186_v56  ;;  %v8082_v58 = vpop.f32.mrb[21].mxu1 }
 0xba3   : > { %2420 = vrot.lane.b32.xlu0 %v9362_v57, %s8907_s2 }
 0xba7   : > { %v8784_v59 = vpop.eup %8783 }
 0xba8   : > { %v2013_v61 = vadd.f32 1.0, %v8784_v59  ;;  %v2256_v26 = vpop.f32.mrb[22].mxu1 }
 0xba9   : > { %v9397_v28 = vadd.f32 %v9126_v30, %v2256_v26  ;;  %v8093_v34 = vpop.f32.mrb[23].mxu1 }
 0xbaa   : > { %8785 = vrcp.f32 %v2013_v61 }
 0xbab   : > { %8100 = vmatpush3.msk.msra.mxu1 %vm964_vm3, %v9397_v28 }
 0xbac   : > { %8109 = vmatprep.subr.mxu1 %v8906_v6 }
 0xbb4   : > { %v8786_v63 = vpop.eup %8785 }
 0xbb5   : > { %v2016_v0 = vmul.f32 %v8786_v63, %v1931_v32 }
 0xbb7   : > { %v2017_v5 = vmul.f32 %v2016_v0, %v2007_v1 }
 0xbb9   : > { %8070 = vmatmul.mubr.msk.f32.vlgmr.msra.gmra.mrb[14].mxu0 %vm2024_vm7, %v2017_v5 }
 0xbba   : > { %8095 = vmatpush3.xpose.msk.msra.mxu0 %vm871_vm2, %v9362_v57  ;;  %8096 = vmatprep.mubr.msk.f32.mxu0 %vm8905_vm0, %v8906_v6 }
 0xbbb   : > { %8104 = vmatprep.subr.mxu0 %v8906_v6 }
 0xbbd   : > { %8097 = vmatmul.mubr.msk.f32.vlgmr.msra.gmra.mrb[16].mxu0 %vm871_vm2, %v9114_v29 }
 0xbbe   : > { %8106 = vmatprep.mubr.msk.f32.mxu0 %vm8905_vm0, %v8906_v6 }
 0xc15   : > { %v2421_v7 = vpop.permute.xlu0 %2420 }
 0xc16   : > { %8105 = vmatpush3.xpose.msk.msra.mxu0 %vm871_vm2, %v2421_v7 }
 0xc17   : > { %8114 = vmatprep.subr.mxu0 %v8906_v6 }
 0xc19   : > { %8107 = vmatmul.mubr.msk.f32.vlgmr.msra.gmra.mrb[18].mxu0 %vm871_vm2, %v9136_v35 }
 0xc1a   : > { %8115 = vmatpush3.msra.mxu0 %v9160_v55  ;;  %8116 = vmatprep.mubr.msk.f32.mxu0 %vm8905_vm0, %v8906_v6 }
 0xc1b   : > { %8124 = vmatprep.subr.mxu0 %v8906_v6 }
 0xc8c   : > { %v9390_v9 = vpop.f32.mrb[14].mxu0 }
 0xc8d   : > { %v8071_v12 = vpop.f32.mrb[15].mxu0 }
 0xc90   : > { %v2329_v15 = vpop.f32.mrb[16].mxu0 }
 0xc91   : > { %v8098_v16 = vpop.f32.mrb[17].mxu0  ;;  %v2333_v18 = vsel %vm948_vm4, %v2329_v15, -inf }
 0xc92   : > { %2334 = vmax.xlane.f32.xlu0 %v2333_v18 }
 0xca8   : > { %2728 = vrot.lane.b32.xlu0 %v9362_v57, %s8908_s25 }
 0xcec   : > { %v2490_v20 = vpop.f32.mrb[18].mxu0 }
 0xced   : > { %v8108_v22 = vpop.f32.mrb[19].mxu0  ;;  %v2494_v23 = vsel %vm948_vm4, %v2490_v20, -inf }
 0xcee   : > { %2495 = vmax.xlane.f32.xlu1 %v2494_v23 }
 0xd1f   : > { %v2335_v36 = vpop.xlane.xlu0 %2334 }
 0xd20   : > { %v2336_v38 = vsub.f32 %v2329_v15, %v2335_v36 }
 0xd22   : > { %v2337_v39 = vmul.f32 1.442695, %v2336_v38 }
 0xd23   : > { %v2729_v5 = vpop.permute.xlu0 %2728 }
 0xd24   : > { %8787 = vpow2.f32 %v2337_v39 }
 0xd2e   : > { %v8788_v41 = vpop.eup %8787 }
 0xd2f   : > { %v2339_v42 = vsel %vm948_vm4, %v8788_v41, 0.0 }
 0xd30   : > { %2340 = vadd.xlane.f32.xlu1 %v2339_v42 }
 0xd7b   : > { %v2496_v44 = vpop.xlane.xlu1 %2495 }
 0xd7c   : > { %v2497_v46 = vsub.f32 %v2490_v20, %v2496_v44 }
 0xd7e   : > { %v2498_v49 = vmul.f32 1.442695, %v2497_v46 }
 0xd80   : > { %8789 = vpow2.f32 %v2498_v49 }
 0xd8a   : > { %v8790_v50 = vpop.eup %8789 }
 0xd8b   : > { %v2500_v32 = vsel %vm948_vm4, %v8790_v50, 0.0 }
 0xd8c   : > { %2501 = vadd.xlane.f32.xlu1 %v2500_v32 }
 0xd9d   : > { %2505 = vrot.lane.b32.xlu1 %v9397_v28, %s8907_s2 }
 0xdbd   : > { %v2341_v51 = vpop.xlane.xlu1 %2340 }
 0xdbe   : > { %8791 = vrcp.f32 %v2341_v51 }
 0xdc8   : > { %v8792_v52 = vpop.eup %8791 }
 0xdc9   : > { %v2343_v53 = vmul.f32 %v8792_v52, %v8788_v41 }
 0xdcb   : > { %8102 = vmatmul.mubr.msk.f32.vlgmr.msra.gmra.mrb[24].mxu1 %vm960_vm5, %v2343_v53 }
 0xdcc   : > { %8111 = vmatprep.mubr.msk.f32.mxu1 %vm8905_vm0, %v8906_v6 }
 0xe19   : > { %v2502_v56 = vpop.xlane.xlu1 %2501 }
 0xe1a   : > { %8793 = vrcp.f32 %v2502_v56 }
 0xe1d   : > { %v2506_v58 = vpop.permute.xlu1 %2505 }
 0xe1e   : > { %8110 = vmatpush3.msk.msra.mxu1 %vm964_vm3, %v2506_v58 }
 0xe1f   : > { %8119 = vmatprep.subr.mxu1 %v8906_v6 }
 0xe24   : > { %v8794_v59 = vpop.eup %8793 }
 0xe25   : > { %v2504_v61 = vmul.f32 %v8794_v59, %v8790_v50 }
 0xe27   : > { %8112 = vmatmul.mubr.msk.f32.vlgmr.msra.gmra.mrb[26].mxu1 %vm960_vm5, %v2504_v61 }
 0xe28   : > { %8120 = vmatpush3.msra.mxu1 %v9169_v60  ;;  %8121 = vmatprep.mubr.msk.f32.mxu1 %vm8905_vm0, %v8906_v6 }
 0xe29   : > { %8129 = vmatprep.subr.mxu1 %v8906_v6 }
 0xe9e   : > { %v2416_v63 = vpop.f32.mrb[24].mxu1 }
 0xe9f   : > { %v8103_v0 = vpop.f32.mrb[25].mxu1  ;;  %8122 = vmatmul.mubr.msk.f32.vlgmr.msra.gmra.mrb[28].mxu1 %vm871_vm2, %v2416_v63 }
 0xea0   : > { %8131 = vmatprep.mubr.msk.f32.mxu1 %vm8905_vm0, %v8906_v6 }
 0xefa   : > { %v2578_v1 = vpop.f32.mrb[26].mxu1 }
 0xefb   : > { %v8113_v7 = vpop.f32.mrb[27].mxu1  ;;  %8117 = vmatmul.mubr.msk.f32.vlgmr.msra.gmra.mrb[20].mxu0 %vm871_vm2, %v2578_v1 }
 0xefc   : > { %8125 = vmatpush3.xpose.msk.msra.mxu0 %vm871_vm2, %v2729_v5  ;;  %8126 = vmatprep.mubr.msk.f32.mxu0 %vm8905_vm0, %v8906_v6 }
 0xefd   : > { %8134 = vmatprep.subr.mxu0 %v8906_v6 }
 0xeff   : > { %8127 = vmatmul.mubr.msk.f32.vlgmr.msra.gmra.mrb[22].mxu0 %vm871_vm2, %v9186_v4 }
 0xf00   : > { %8135 = vmatpush3.msra.mxu0 %v9210_v33  ;;  %8136 = vmatprep.mubr.msk.f32.mxu0 %vm8905_vm0, %v8906_v6 }
 0xf01   : > { %8144 = vmatprep.subr.mxu0 %v8906_v6 }
 0xf72   : > { %v2724_v12 = vpop.f32.mrb[28].mxu1 }
 0xf73   : > { %v8123_v15 = vpop.f32.mrb[29].mxu1 }
 0xfce   : > { %v2651_v16 = vpop.f32.mrb[20].mxu0 }
 0xfcf   : > { %v2725_v18 = vadd.f32 %v2724_v12, %v2651_v16  ;;  %v8118_v20 = vpop.f32.mrb[21].mxu0 }
 0xfd2   : > { %v2798_v22 = vpop.f32.mrb[22].mxu0 }
 0xfd3   : > { %v8128_v23 = vpop.f32.mrb[23].mxu0  ;;  %v2802_v26 = vsel %vm948_vm4, %v2798_v22, -inf }
 0xfd4   : > { %2803 = vmax.xlane.f32.xlu1 %v2802_v26 }
 0xfe5   : > { %2813 = vrot.lane.b32.xlu1 %v9397_v28, %s8908_s25 }
0x1061   : > { %v2804_v34 = vpop.xlane.xlu1 %2803 }
0x1062   : > { %v2805_v36 = vsub.f32 %v2798_v22, %v2804_v34 }
0x1064   : > { %v2806_v38 = vmul.f32 1.442695, %v2805_v36 }
0x1065   : > { %v2814_v39 = vpop.permute.xlu1 %2813 }
0x1066   : > { %8795 = vpow2.f32 %v2806_v38  ;;  %8130 = vmatpush3.msk.msra.mxu1 %vm964_vm3, %v2814_v39 }
0x1067   : > { %8139 = vmatprep.subr.mxu1 %v8906_v6 }
0x1070   : > { %v8796_v41 = vpop.eup %8795 }
0x1071   : > { %v2808_v42 = vsel %vm948_vm4, %v8796_v41, 0.0 }
0x1072   : > { %2809 = vadd.xlane.f32.xlu0 %v2808_v42 }
0x1088   : > { %2964 = vrot.lane.b32.xlu0 %v9362_v57, %s10056_s1 }
0x10ff   : > { %v2810_v44 = vpop.xlane.xlu0 %2809 }
0x1100   : > { %8797 = vrcp.f32 %v2810_v44 }
0x1103   : > { %v2965_v50 = vpop.permute.xlu0 %2964 }
0x110a   : > { %v8798_v46 = vpop.eup %8797 }
0x110b   : > { %v2812_v49 = vmul.f32 %v8798_v46, %v8796_v41 }
0x110d   : > { %8132 = vmatmul.mubr.msk.f32.vlgmr.msra.gmra.mrb[30].mxu1 %vm960_vm5, %v2812_v49 }
0x110e   : > { %8140 = vmatpush3.xpose.msk.msra.mxu1 %vm871_vm2, %v2965_v50  ;;  %8141 = vmatprep.mubr.msk.f32.mxu1 %vm8905_vm0, %v8906_v6 }
0x110f   : > { %8149 = vmatprep.subr.mxu1 %v8906_v6 }
0x1111   : > { %8142 = vmatmul.mubr.msk.f32.vlgmr.msra.gmra.mrb[32].mxu1 %vm871_vm2, %v9201_v31 }
0x1112   : > { %8150 = vmatpush3.msra.mxu1 %v9224_v45  ;;  %8151 = vmatprep.mubr.msk.f32.mxu1 %vm8905_vm0, %v8906_v6 }
0x1113   : > { %8624 = vmatprep.subr.bf16.mxu1 %v8904_v3 }
0x11e0   : > { %v2886_v57 = vpop.f32.mrb[30].mxu1 }
0x11e1   : > { %v8133_v32 = vpop.f32.mrb[31].mxu1  ;;  %8137 = vmatmul.mubr.msk.f32.vlgmr.msra.gmra.mrb[24].mxu0 %vm871_vm2, %v2886_v57 }
0x11e2   : > { %8146 = vmatprep.mubr.msk.f32.mxu0 %vm8905_vm0, %v8906_v6 }
0x11e4   : > { %v3034_v51 = vpop.f32.mrb[32].mxu1 }
0x11e5   : > { %v8143_v52 = vpop.f32.mrb[33].mxu1  ;;  %v3038_v53 = vsel %vm948_vm4, %v3034_v51, -inf }
0x11e6   : > { %3039 = vmax.xlane.f32.xlu1 %v3038_v53 }
0x11f7   : > { %3049 = vrot.lane.b32.xlu1 %v9397_v28, %s10056_s1 }
0x1273   : > { %v3040_v56 = vpop.xlane.xlu1 %3039 }
0x1274   : > { %v3041_v58 = vsub.f32 %v3034_v51, %v3040_v56 }
0x1276   : > { %v3042_v59 = vmul.f32 1.442695, %v3041_v58 }
0x1277   : > { %v3050_v61 = vpop.permute.xlu1 %3049 }
0x1278   : > { %8799 = vpow2.f32 %v3042_v59  ;;  %8145 = vmatpush3.msk.msra.mxu0 %vm964_vm3, %v3050_v61 }
0x1279   : > { %8618 = vmatprep.subr.bf16.mxu0 %v8904_v3 }
0x1282   : > { %v8800_v63 = vpop.eup %8799 }
0x1283   : > { %v3044_v0 = vsel %vm948_vm4, %v8800_v63, 0.0 }
0x1284   : > { %3045 = vadd.xlane.f32.xlu0 %v3044_v0 }
0x12b4   : > { %v2959_v1 = vpop.f32.mrb[24].mxu0 }
0x12b5   : > { %v2963_v5 = vadd.f32 %v2959_v1, %v2725_v18  ;;  %v8138_v7 = vpop.f32.mrb[25].mxu0 }
0x1311   : > { %v3046_v12 = vpop.xlane.xlu0 %3045 }
0x1312   : > { %8801 = vrcp.f32 %v3046_v12 }
0x131c   : > { %v8802_v15 = vpop.eup %8801 }
0x131d   : > { %v3048_v28 = vmul.f32 %v8802_v15, %v8800_v63 }
0x131f   : > { %8147 = vmatmul.mubr.msk.f32.vlgmr.msra.gmra.mrb[26].mxu0 %vm960_vm5, %v3048_v28 }
0x1320   : > { %8620 = vmatpush3.bf16.msra.mxu0 %v9258_v8  ;;  %8162 = vmatprep.mubr.msk.f32.mxu0 %vm8905_vm0, %v8906_v6 }
0x1321   : > { %8621 = vmatprep.subr.bf16.mxu0 %v8904_v3 }
0x1324   : > { %8623 = vmatpush3.bf16.msra.mxu0 %v9278_v17 }
0x1325   : > { %8630 = vmatprep.subr.bf16.mxu0 %v8904_v3 }
0x13f2   : > { %v3122_v16 = vpop.f32.mrb[26].mxu0 }
0x13f3   : > { %v8148_v18 = vpop.f32.mrb[27].mxu0  ;;  %8152 = vmatmul.mubr.msk.f32.vlgmr.msra.gmra.mrb[34].mxu1 %vm871_vm2, %v3122_v16 }
0x13f4   : > { %8626 = vmatpush3.bf16.msra.mxu1 %v9250_v2  ;;  %8173 = vmatprep.mubr.msk.f32.mxu1 %vm8905_vm0, %v8906_v6 }
0x13f5   : > { %8627 = vmatprep.subr.bf16.mxu1 %v8904_v3 }
0x13f8   : > { %8629 = vmatpush3.bf16.msra.mxu1 %v9270_v13 }
0x13f9   : > { %8642 = vmatprep.subr.bf16.mxu1 %v8904_v3 }
0x14c6   : > { %v3195_v20 = vpop.f32.mrb[34].mxu1 }
0x14c7   : > { %v3199_v22 = vadd.f32 %v3195_v20, %v2963_v5  ;;  %v8153_v23 = vpop.f32.mrb[35].mxu1 }
0x14c9   : > { %v3200_v26 = vadd.f32 %v9239_v54, %v3199_v22 }
0x14cb   : > { %v3201_v34 = vadd.f32 %v3200_v26, %v9047_v10  ;;  %v7582_v10 = vld [vmem:[%s9072_s30 + $0x10] sm:$0x3f] }
0x14cd   : > { %v3202_v36 = vmul.f32 %v3201_v34, %v3201_v34 }
0x14cf   : > { %v3203_v38 = vsel %vm1839_vm6, %v3202_v36, 0.0 }
0x14d0   : > { %3204 = vadd.xlane.f32.xlu0 %v3203_v38 }
0x155d   : > { %v3205_v39 = vpop.xlane.xlu0 %3204 }
0x155e   : > { %v3206_v41 = vmul.f32 0.03125, %v3205_v39 }
0x1560   : > { %v3207_v42 = vadd.f32 1.1920929e-07, %v3206_v41 }
0x1562   : > { %8803 = vrsqrt.f32 %v3207_v42 }
0x156c   : > { %v8804_v44 = vpop.eup %8803 }
0x156d   : > { %v3209_v46 = vmul.f32 %v8804_v44, %v3201_v34 }
0x156f   : > { %v9476_v49 = vmul.f32 %v9287_v25, %v3209_v46 }
0x1571   : > { %8163 = vmatmul.mubr.msk.f32.vlgmr.msra.gmra.mrb[28].mxu0 %vm641_vm1, %v9476_v49  ;;  %8174 = vmatmul.mubr.msk.f32.vlgmr.msra.gmra.mrb[36].mxu1 %vm641_vm1, %v9476_v49 }
0x1572   : > { %8644 = vmatpush3.bf16.msra.mxu1 %v9049_v11  ;;  %8203 = vmatprep.mubr.msk.f32.mxu1 %vm8905_vm0, %v8906_v6 }
0x1573   : > { %8645 = vmatprep.subr.bf16.mxu1 %v8904_v3  ;;  %8632 = vmatpush3.bf16.msra.mxu0 %v9321_v37 }
0x1574   : > { %8633 = vmatprep.subr.bf16.mxu0 %v8904_v3  ;;  %8192 = vmatprep.mubr.msk.f32.mxu0 %vm8905_vm0, %v8906_v6 }
0x1576   : > { %8647 = vmatpush3.bf16.msra.mxu1 %v9062_v14 }
0x1577   : > { %8635 = vmatpush3.bf16.msra.mxu0 %v9331_v40  ;;  %8648 = vmatprep.subr.bf16.mxu1 %v8904_v3 }
0x1578   : > { %8636 = vmatprep.subr.bf16.mxu0 %v8904_v3 }
0x1579   : > { %8204 = vmatmul.mubr.msk.f32.vlgmr.msra.gmra.mrb[38].mxu1 %vm641_vm1, %v7582_v10 }
0x157a   : > { %8650 = vmatpush3.bf16.msra.mxu1 %v9089_v19  ;;  %8214 = vmatprep.mubr.msk.f32.mxu1 %vm8905_vm0, %v8906_v6 }
0x157b   : > { %8638 = vmatpush3.bf16.msra.mxu0 %v9341_v43  ;;  %8651 = vmatprep.subr.bf16.mxu1 %v8904_v3 }
0x157c   : > { %8639 = vmatprep.subr.bf16.mxu0 %v8904_v3 }
0x157e   : > { %8653 = vmatpush3.bf16.msra.mxu1 %v9095_v21 }
0x157f   : > { %8641 = vmatpush3.bf16.msra.mxu0 %v9351_v47  ;;  %8222 = vmatprep.subr.mxu1 %v8906_v6 }
0x1580   : > { %8217 = vmatprep.subr.mxu0 %v8906_v6 }
0x1581   : > { %8215 = vmatmul.mubr.msk.f32.vlgmr.msra.gmra.mrb[40].mxu1 %vm641_vm1, %v7582_v10 }
0x1582   : > { %8224 = vmatprep.mubr.msk.f32.mxu1 %vm8905_vm0, %v8906_v6 }
0x1644   : > { %v3280_v50 = vpop.f32.mrb[28].mxu0  ;;  %v3350_v57 = vpop.f32.mrb[36].mxu1 }
0x1645   : > { %v3281_v32 = vadd.f32 %v9358_v48, %v3280_v50  ;;  %v8164_v51 = vpop.f32.mrb[29].mxu0  ;;  %v8175_v52 = vpop.f32.mrb[37].mxu1  ;;  %v3351_v5 = vadd.f32 %v9369_v62, %v3350_v57 }
0x1647   : > { %v7579_v53 = vmul.f32 -1.442695, %v3281_v32 }
0x1649   : > { %8805 = vpow2.f32 %v7579_v53 }
0x164c   : > { %v3518_v56 = vpop.f32.mrb[38].mxu1 }
0x164d   : > { %v9511_v58 = vadd.f32 %v9106_v24, %v3518_v56  ;;  %v8205_v59 = vpop.f32.mrb[39].mxu1 }
0x164f   : > { %3752 = vrot.lane.b32.xlu1 %v9511_v58, %s8907_s2 }
0x1653   : > { %v8806_v61 = vpop.eup %8805 }
0x1654   : > { %v3357_v63 = vadd.f32 1.0, %v8806_v61  ;;  %v3588_v26 = vpop.f32.mrb[40].mxu1 }
0x1655   : > { %v8216_v34 = vpop.f32.mrb[41].mxu1 }
0x1656   : > { %8807 = vrcp.f32 %v3357_v63 }
0x1660   : > { %v8808_v0 = vpop.eup %8807 }
0x1661   : > { %v3360_v1 = vmul.f32 %v8808_v0, %v3281_v32 }
0x1663   : > { %v3361_v7 = vmul.f32 %v3360_v1, %v3351_v5 }
0x1665   : > { %8193 = vmatmul.mubr.msk.f32.vlgmr.msra.gmra.mrb[30].mxu0 %vm2024_vm7, %v3361_v7 }
0x1666   : > { %8218 = vmatpush3.xpose.msk.msra.mxu0 %vm871_vm2, %v9511_v58  ;;  %8219 = vmatprep.mubr.msk.f32.mxu0 %vm8905_vm0, %v8906_v6 }
0x1667   : > { %8227 = vmatprep.subr.mxu0 %v8906_v6 }
0x1669   : > { %8220 = vmatmul.mubr.msk.f32.vlgmr.msra.gmra.mrb[32].mxu0 %vm871_vm2, %v9114_v29 }
0x166a   : > { %8229 = vmatprep.mubr.msk.f32.mxu0 %vm8905_vm0, %v8906_v6 }
0x16c1   : > { %v3753_v24 = vpop.permute.xlu1 %3752 }
0x16c2   : > { %8228 = vmatpush3.xpose.msk.msra.mxu0 %vm871_vm2, %v3753_v24 }
0x16c3   : > { %8237 = vmatprep.subr.mxu0 %v8906_v6 }
0x16c5   : > { %8230 = vmatmul.mubr.msk.f32.vlgmr.msra.gmra.mrb[34].mxu0 %vm871_vm2, %v9136_v35 }
0x16c6   : > { %8238 = vmatpush3.msra.mxu0 %v9160_v55  ;;  %8239 = vmatprep.mubr.msk.f32.mxu0 %vm8905_vm0, %v8906_v6  ;;  %v9539_v55 = vadd.f32 %v9126_v30, %v3588_v26 }
0x16c7   : > { %8247 = vmatprep.subr.mxu0 %v8906_v6 }
0x16c8   : > { %8223 = vmatpush3.msk.msra.mxu1 %vm964_vm3, %v9539_v55 }
0x16c9   : > { %8232 = vmatprep.subr.mxu1 %v8906_v6 }
0x1738   : > { %v9534_v12 = vpop.f32.mrb[30].mxu0 }
0x1739   : > { %v8194_v15 = vpop.f32.mrb[31].mxu0 }
0x173c   : > { %v3661_v28 = vpop.f32.mrb[32].mxu0 }
0x173d   : > { %v8221_v16 = vpop.f32.mrb[33].mxu0  ;;  %v3665_v18 = vsel %vm948_vm4, %v3661_v28, -inf }
0x173e   : > { %3666 = vmax.xlane.f32.xlu0 %v3665_v18 }
0x1798   : > { %v3822_v20 = vpop.f32.mrb[34].mxu0 }
0x1799   : > { %v8231_v22 = vpop.f32.mrb[35].mxu0  ;;  %v3826_v23 = vsel %vm948_vm4, %v3822_v20, -inf }
0x179a   : > { %3827 = vmax.xlane.f32.xlu1 %v3826_v23 }
0x17ab   : > { %4145 = vrot.lane.b32.xlu1 %v9539_v55, %s8908_s25 }
0x17cb   : > { %v3667_v36 = vpop.xlane.xlu0 %3666 }
0x17cc   : > { %v3668_v38 = vsub.f32 %v3661_v28, %v3667_v36 }
0x17ce   : > { %v3669_v39 = vmul.f32 1.442695, %v3668_v38 }
0x17d0   : > { %8809 = vpow2.f32 %v3669_v39 }
0x17da   : > { %v8810_v41 = vpop.eup %8809 }
0x17db   : > { %v3671_v42 = vsel %vm948_vm4, %v8810_v41, 0.0 }
0x17dc   : > { %3672 = vadd.xlane.f32.xlu0 %v3671_v42 }
0x1827   : > { %v3828_v44 = vpop.xlane.xlu1 %3827 }
0x1828   : > { %v3829_v30 = vsub.f32 %v3822_v20, %v3828_v44 }
0x182a   : > { %v3830_v46 = vmul.f32 1.442695, %v3829_v30 }
0x182b   : > { %v4146_v63 = vpop.permute.xlu1 %4145 }
0x182c   : > { %8811 = vpow2.f32 %v3830_v46 }
0x1836   : > { %v8812_v10 = vpop.eup %8811 }
0x1837   : > { %v3832_v50 = vsel %vm948_vm4, %v8812_v10, 0.0 }
0x1838   : > { %3833 = vadd.xlane.f32.xlu0 %v3832_v50 }
0x184e   : > { %3837 = vrot.lane.b32.xlu0 %v9539_v55, %s8907_s2 }
0x1852   : > { %4060 = vrot.lane.b32.xlu0 %v9511_v58, %s8908_s25 }
0x1869   : > { %v3673_v57 = vpop.xlane.xlu0 %3672 }
0x186a   : > { %8813 = vrcp.f32 %v3673_v57 }
0x1874   : > { %v8814_v32 = vpop.eup %8813 }
0x1875   : > { %v3675_v51 = vmul.f32 %v8814_v32, %v8810_v41 }
0x1877   : > { %8225 = vmatmul.mubr.msk.f32.vlgmr.msra.gmra.mrb[42].mxu1 %vm960_vm5, %v3675_v51 }
0x1878   : > { %8234 = vmatprep.mubr.msk.f32.mxu1 %vm8905_vm0, %v8906_v6 }
0x18c5   : > { %v3834_v52 = vpop.xlane.xlu0 %3833 }
0x18c6   : > { %8815 = vrcp.f32 %v3834_v52 }
0x18c9   : > { %v3838_v53 = vpop.permute.xlu0 %3837 }
0x18ca   : > { %8233 = vmatpush3.msk.msra.mxu1 %vm964_vm3, %v3838_v53 }
0x18cb   : > { %8242 = vmatprep.subr.mxu1 %v8906_v6 }
0x18cd   : > { %v4061_v5 = vpop.permute.xlu0 %4060 }
0x18d0   : > { %v8816_v56 = vpop.eup %8815 }
0x18d1   : > { %v3836_v59 = vmul.f32 %v8816_v56, %v8812_v10 }
0x18d3   : > { %8235 = vmatmul.mubr.msk.f32.vlgmr.msra.gmra.mrb[44].mxu1 %vm960_vm5, %v3836_v59 }
0x18d4   : > { %8243 = vmatpush3.msra.mxu1 %v9169_v60  ;;  %8244 = vmatprep.mubr.msk.f32.mxu1 %vm8905_vm0, %v8906_v6 }
0x18d5   : > { %8252 = vmatprep.subr.mxu1 %v8906_v6 }
0x194a   : > { %v3748_v61 = vpop.f32.mrb[42].mxu1 }
0x194b   : > { %v8226_v0 = vpop.f32.mrb[43].mxu1  ;;  %8245 = vmatmul.mubr.msk.f32.vlgmr.msra.gmra.mrb[46].mxu1 %vm871_vm2, %v3748_v61 }
0x194c   : > { %8253 = vmatpush3.msk.msra.mxu1 %vm964_vm3, %v4146_v63  ;;  %8254 = vmatprep.mubr.msk.f32.mxu1 %vm8905_vm0, %v8906_v6 }
0x194d   : > { %8262 = vmatprep.subr.mxu1 %v8906_v6 }
0x19a6   : > { %v3910_v1 = vpop.f32.mrb[44].mxu1 }
0x19a7   : > { %v8236_v60 = vpop.f32.mrb[45].mxu1  ;;  %8240 = vmatmul.mubr.msk.f32.vlgmr.msra.gmra.mrb[36].mxu0 %vm871_vm2, %v3910_v1 }
0x19a8   : > { %8248 = vmatpush3.xpose.msk.msra.mxu0 %vm871_vm2, %v4061_v5  ;;  %8249 = vmatprep.mubr.msk.f32.mxu0 %vm8905_vm0, %v8906_v6 }
0x19a9   : > { %8257 = vmatprep.subr.mxu0 %v8906_v6 }
0x19ab   : > { %8250 = vmatmul.mubr.msk.f32.vlgmr.msra.gmra.mrb[38].mxu0 %vm871_vm2, %v9186_v4 }
0x19ac   : > { %8258 = vmatpush3.msra.mxu0 %v9210_v33  ;;  %8259 = vmatprep.mubr.msk.f32.mxu0 %vm8905_vm0, %v8906_v6 }
0x19ad   : > { %8267 = vmatprep.subr.mxu0 %v8906_v6 }
0x1a1e   : > { %v4056_v7 = vpop.f32.mrb[46].mxu1 }
0x1a1f   : > { %v8246_v24 = vpop.f32.mrb[47].mxu1 }
0x1a7a   : > { %v3983_v15 = vpop.f32.mrb[36].mxu0 }
0x1a7b   : > { %v4057_v28 = vadd.f32 %v4056_v7, %v3983_v15  ;;  %v8241_v16 = vpop.f32.mrb[37].mxu0  ;;  %v9618_v15 = vld [vmem:[%s9044_s20] sm:$0x3f] }
0x1a7e   : > { %v4130_v18 = vpop.f32.mrb[38].mxu0 }
0x1a7f   : > { %v8251_v20 = vpop.f32.mrb[39].mxu0  ;;  %v4134_v22 = vsel %vm948_vm4, %v4130_v18, -inf }
0x1a80   : > { %4135 = vmax.xlane.f32.xlu0 %v4134_v22 }
0x1b0d   : > { %v4136_v23 = vpop.xlane.xlu0 %4135 }
0x1b0e   : > { %v4137_v26 = vsub.f32 %v4130_v18, %v4136_v23 }
0x1b10   : > { %v4138_v34 = vmul.f32 1.442695, %v4137_v26 }
0x1b12   : > { %8817 = vpow2.f32 %v4138_v34 }
0x1b1c   : > { %v8818_v33 = vpop.eup %8817 }
0x1b1d   : > { %v4140_v36 = vsel %vm948_vm4, %v8818_v33, 0.0 }
0x1b1e   : > { %4141 = vadd.xlane.f32.xlu1 %v4140_v36 }
0x1b2f   : > { %4296 = vrot.lane.b32.xlu1 %v9511_v58, %s10056_s1 }
0x1bab   : > { %v4142_v38 = vpop.xlane.xlu1 %4141 }
0x1bac   : > { %8819 = vrcp.f32 %v4142_v38 }
0x1baf   : > { %v4297_v42 = vpop.permute.xlu1 %4296 }
0x1bb6   : > { %v8820_v39 = vpop.eup %8819 }
0x1bb7   : > { %v4144_v41 = vmul.f32 %v8820_v39, %v8818_v33 }
0x1bb9   : > { %8255 = vmatmul.mubr.msk.f32.vlgmr.msra.gmra.mrb[48].mxu1 %vm960_vm5, %v4144_v41 }
0x1bba   : > { %8263 = vmatpush3.xpose.msk.msra.mxu1 %vm871_vm2, %v4297_v42  ;;  %8264 = vmatprep.mubr.msk.f32.mxu1 %vm8905_vm0, %v8906_v6 }
0x1bbb   : > { %8272 = vmatprep.subr.mxu1 %v8906_v6 }
0x1bbd   : > { %8265 = vmatmul.mubr.msk.f32.vlgmr.msra.gmra.mrb[50].mxu1 %vm871_vm2, %v9201_v31 }
0x1bbe   : > { %8273 = vmatpush3.msra.mxu1 %v9224_v45  ;;  %8274 = vmatprep.mubr.msk.f32.mxu1 %vm8905_vm0, %v8906_v6 }
0x1bbf   : > { %8660 = vmatprep.subr.bf16.mxu1 %v8904_v3 }
0x1c8c   : > { %v4218_v58 = vpop.f32.mrb[48].mxu1 }
0x1c8d   : > { %v8256_v44 = vpop.f32.mrb[49].mxu1  ;;  %8260 = vmatmul.mubr.msk.f32.vlgmr.msra.gmra.mrb[40].mxu0 %vm871_vm2, %v4218_v58 }
0x1c8e   : > { %8269 = vmatprep.mubr.msk.f32.mxu0 %vm8905_vm0, %v8906_v6  ;;  %v9660_v44 = vld [vmem:[%s10032_s5] ss:$0 sm:$0xff] }
0x1c90   : > { %v4366_v30 = vpop.f32.mrb[50].mxu1 }
0x1c91   : > { %v8266_v46 = vpop.f32.mrb[51].mxu1  ;;  %v4370_v10 = vsel %vm948_vm4, %v4366_v30, -inf }
0x1c92   : > { %4371 = vmax.xlane.f32.xlu1 %v4370_v10 }
0x1d1f   : > { %v4372_v50 = vpop.xlane.xlu1 %4371 }
0x1d20   : > { %v4373_v57 = vsub.f32 %v4366_v30, %v4372_v50 }
0x1d22   : > { %v4374_v45 = vmul.f32 1.442695, %v4373_v57 }
0x1d24   : > { %8821 = vpow2.f32 %v4374_v45 }
0x1d2e   : > { %v8822_v32 = vpop.eup %8821 }
0x1d2f   : > { %v4376_v51 = vsel %vm948_vm4, %v8822_v32, 0.0 }
0x1d30   : > { %4377 = vadd.xlane.f32.xlu0 %v4376_v51 }
0x1d46   : > { %4381 = vrot.lane.b32.xlu0 %v9539_v55, %s10056_s1 }
0x1d60   : > { %v4291_v52 = vpop.f32.mrb[40].mxu0 }
0x1d61   : > { %v4295_v53 = vadd.f32 %v4291_v52, %v4057_v28  ;;  %v8261_v56 = vpop.f32.mrb[41].mxu0 }
0x1dbd   : > { %v4378_v59 = vpop.xlane.xlu0 %4377 }
0x1dbe   : > { %8823 = vrcp.f32 %v4378_v59 }
0x1dc1   : > { %v4382_v61 = vpop.permute.xlu0 %4381 }
0x1dc2   : > { %8268 = vmatpush3.msk.msra.mxu0 %vm964_vm3, %v4382_v61 }
0x1dc3   : > { %8654 = vmatprep.subr.bf16.mxu0 %v8904_v3 }
0x1dc8   : > { %v8824_v63 = vpop.eup %8823 }
0x1dc9   : > { %v4380_v0 = vmul.f32 %v8824_v63, %v8822_v32 }
0x1dcb   : > { %8270 = vmatmul.mubr.msk.f32.vlgmr.msra.gmra.mrb[42].mxu0 %vm960_vm5, %v4380_v0 }
0x1dcc   : > { %8656 = vmatpush3.bf16.msra.mxu0 %v9258_v8  ;;  %8285 = vmatprep.mubr.msk.f32.mxu0 %vm8905_vm0, %v8906_v6 }
0x1dcd   : > { %8657 = vmatprep.subr.bf16.mxu0 %v8904_v3 }
0x1dd0   : > { %8659 = vmatpush3.bf16.msra.mxu0 %v9278_v17 }
0x1dd1   : > { %8666 = vmatprep.subr.bf16.mxu0 %v8904_v3 }
0x1e9e   : > { %v4454_v55 = vpop.f32.mrb[42].mxu0 }
0x1e9f   : > { %v8271_v1 = vpop.f32.mrb[43].mxu0  ;;  %8275 = vmatmul.mubr.msk.f32.vlgmr.msra.gmra.mrb[52].mxu1 %vm871_vm2, %v4454_v55 }
0x1ea0   : > { %8662 = vmatpush3.bf16.msra.mxu1 %v9250_v2  ;;  %8296 = vmatprep.mubr.msk.f32.mxu1 %vm8905_vm0, %v8906_v6 }
0x1ea1   : > { %8663 = vmatprep.subr.bf16.mxu1 %v8904_v3 }
0x1ea4   : > { %8665 = vmatpush3.bf16.msra.mxu1 %v9270_v13 }
0x1ea5   : > { %8678 = vmatprep.subr.bf16.mxu1 %v8904_v3 }
0x1f72   : > { %v4527_v5 = vpop.f32.mrb[52].mxu1 }
0x1f73   : > { %v4531_v60 = vadd.f32 %v4527_v5, %v4295_v53  ;;  %v8276_v7 = vpop.f32.mrb[53].mxu1  ;;  %v9700_v5 = vld [vmem:[%s10034_s7] ss:$0 sm:$0xff] }
0x1f75   : > { %v4532_v24 = vadd.f32 %v9239_v54, %v4531_v60  ;;  %v7610_v54 = vld [vmem:[%s9072_s30 + $0x18] sm:$0x3f] }
0x1f77   : > { %v4533_v28 = vadd.f32 %v9618_v15, %v4532_v24 }
0x1f79   : > { %v4534_v16 = vmul.f32 %v4533_v28, %v4533_v28 }
0x1f7b   : > { %v4535_v18 = vsel %vm1839_vm6, %v4534_v16, 0.0 }
0x1f7c   : > { %4536 = vadd.xlane.f32.xlu0 %v4535_v18 }
0x2009   : > { %v4537_v20 = vpop.xlane.xlu0 %4536 }
0x200a   : > { %v4538_v22 = vmul.f32 0.03125, %v4537_v20 }
0x200c   : > { %v4539_v23 = vadd.f32 1.1920929e-07, %v4538_v22 }
0x200e   : > { %8825 = vrsqrt.f32 %v4539_v23 }
0x2018   : > { %v8826_v26 = vpop.eup %8825 }
0x2019   : > { %v4541_v34 = vmul.f32 %v8826_v26, %v4533_v28 }
0x201b   : > { %v9623_v33 = vmul.f32 %v9287_v25, %v4541_v34 }
0x201d   : > { %8286 = vmatmul.mubr.msk.f32.vlgmr.msra.gmra.mrb[44].mxu0 %vm641_vm1, %v9623_v33  ;;  %8297 = vmatmul.mubr.msk.f32.vlgmr.msra.gmra.mrb[54].mxu1 %vm641_vm1, %v9623_v33 }
0x201e   : > { %8680 = vmatpush3.bf16.msra.mxu1 %v9049_v11  ;;  %8326 = vmatprep.mubr.msk.f32.mxu1 %vm8905_vm0, %v8906_v6 }
0x201f   : > { %8681 = vmatprep.subr.bf16.mxu1 %v8904_v3  ;;  %8668 = vmatpush3.bf16.msra.mxu0 %v9321_v37 }
0x2020   : > { %8669 = vmatprep.subr.bf16.mxu0 %v8904_v3  ;;  %8315 = vmatprep.mubr.msk.f32.mxu0 %vm8905_vm0, %v8906_v6 }
0x2022   : > { %8683 = vmatpush3.bf16.msra.mxu1 %v9062_v14 }
0x2023   : > { %8671 = vmatpush3.bf16.msra.mxu0 %v9331_v40  ;;  %8684 = vmatprep.subr.bf16.mxu1 %v8904_v3 }
0x2024   : > { %8672 = vmatprep.subr.bf16.mxu0 %v8904_v3 }
0x2025   : > { %8327 = vmatmul.mubr.msk.f32.vlgmr.msra.gmra.mrb[56].mxu1 %vm641_vm1, %v7610_v54 }
0x2026   : > { %8686 = vmatpush3.bf16.msra.mxu1 %v9089_v19  ;;  %8337 = vmatprep.mubr.msk.f32.mxu1 %vm8905_vm0, %v8906_v6 }
0x2027   : > { %8674 = vmatpush3.bf16.msra.mxu0 %v9341_v43  ;;  %8687 = vmatprep.subr.bf16.mxu1 %v8904_v3 }
0x2028   : > { %8675 = vmatprep.subr.bf16.mxu0 %v8904_v3 }
0x202a   : > { %8689 = vmatpush3.bf16.msra.mxu1 %v9095_v21 }
0x202b   : > { %8677 = vmatpush3.bf16.msra.mxu0 %v9351_v47  ;;  %8345 = vmatprep.subr.mxu1 %v8906_v6 }
0x202c   : > { %8340 = vmatprep.subr.mxu0 %v8906_v6 }
0x202d   : > { %8338 = vmatmul.mubr.msk.f32.vlgmr.msra.gmra.mrb[58].mxu1 %vm641_vm1, %v7610_v54 }
0x202e   : > { %8347 = vmatprep.mubr.msk.f32.mxu1 %vm8905_vm0, %v8906_v6 }
0x20f0   : > { %v4612_v25 = vpop.f32.mrb[44].mxu0  ;;  %v4682_v36 = vpop.f32.mrb[54].mxu1 }
0x20f1   : > { %v4613_v38 = vadd.f32 %v9358_v48, %v4612_v25  ;;  %v8287_v39 = vpop.f32.mrb[45].mxu0  ;;  %v8298_v41 = vpop.f32.mrb[55].mxu1  ;;  %v4683_v45 = vadd.f32 %v9369_v62, %v4682_v36  ;;  %v9685_v62 = vld [vmem:[%s10035_s8 + $0x8] sm:$0xff] }
0x20f3   : > { %v7607_v42 = vmul.f32 -1.442695, %v4613_v38 }
0x20f5   : > { %8827 = vpow2.f32 %v7607_v42 }
0x20f8   : > { %v4850_v58 = vpop.f32.mrb[56].mxu1 }
0x20f9   : > { %v9663_v30 = vadd.f32 %v9660_v44, %v4850_v58  ;;  %v8328_v46 = vpop.f32.mrb[57].mxu1 }
0x20fa   : > { %v9721_v46 = vld [vmem:[%s10035_s8] sm:$0xff] }
0x20fb   : > { %5084 = vrot.lane.b32.xlu1 %v9663_v30, %s8907_s2 }
0x20ff   : > { %v8828_v10 = vpop.eup %8827 }
0x2100   : > { %v4689_v50 = vadd.f32 1.0, %v8828_v10  ;;  %v4920_v1 = vpop.f32.mrb[58].mxu1 }
0x2101   : > { %v9703_v60 = vadd.f32 %v9700_v5, %v4920_v1  ;;  %v8339_v7 = vpop.f32.mrb[59].mxu1 }
0x2102   : > { %8829 = vrcp.f32 %v4689_v50 }
0x2103   : > { %8346 = vmatpush3.msk.msra.mxu1 %vm964_vm3, %v9703_v60 }
0x2104   : > { %8355 = vmatprep.subr.mxu1 %v8906_v6 }
0x210c   : > { %v8830_v48 = vpop.eup %8829 }
0x210d   : > { %v4692_v57 = vmul.f32 %v8830_v48, %v4613_v38 }
0x210f   : > { %v4693_v32 = vmul.f32 %v4692_v57, %v4683_v45 }
0x2111   : > { %8316 = vmatmul.mubr.msk.f32.vlgmr.msra.gmra.mrb[46].mxu0 %vm2024_vm7, %v4693_v32  ;;  %v9740_v32 = vld [vmem:[%s10035_s8 + $0x10] sm:$0xff] }
0x2112   : > { %8341 = vmatpush3.xpose.msk.msra.mxu0 %vm871_vm2, %v9663_v30  ;;  %8342 = vmatprep.mubr.msk.f32.mxu0 %vm8905_vm0, %v8906_v6 }
0x2113   : > { %8350 = vmatprep.subr.mxu0 %v8906_v6 }
0x2115   : > { %8343 = vmatmul.mubr.msk.f32.vlgmr.msra.gmra.mrb[48].mxu0 %vm871_vm2, %v9114_v29 }
0x2116   : > { %8352 = vmatprep.mubr.msk.f32.mxu0 %vm8905_vm0, %v8906_v6 }
0x216d   : > { %v5085_v51 = vpop.permute.xlu1 %5084 }
0x216e   : > { %8351 = vmatpush3.xpose.msk.msra.mxu0 %vm871_vm2, %v5085_v51 }
0x216f   : > { %8360 = vmatprep.subr.mxu0 %v8906_v6 }
0x2171   : > { %8353 = vmatmul.mubr.msk.f32.vlgmr.msra.gmra.mrb[50].mxu0 %vm871_vm2, %v9136_v35 }
0x2172   : > { %8361 = vmatpush3.msra.mxu0 %v9685_v62  ;;  %8362 = vmatprep.mubr.msk.f32.mxu0 %vm8905_vm0, %v8906_v6 }
0x2173   : > { %8370 = vmatprep.subr.mxu0 %v8906_v6 }
0x21e4   : > { %v9691_v52 = vpop.f32.mrb[46].mxu0 }
0x21e5   : > { %v8317_v53 = vpop.f32.mrb[47].mxu0 }
0x21e8   : > { %v4993_v56 = vpop.f32.mrb[48].mxu0 }
0x21e9   : > { %v8344_v59 = vpop.f32.mrb[49].mxu0  ;;  %v4997_v61 = vsel %vm948_vm4, %v4993_v56, -inf }
0x21ea   : > { %4998 = vmax.xlane.f32.xlu1 %v4997_v61 }
0x21fb   : > { %5392 = vrot.lane.b32.xlu1 %v9663_v30, %s8908_s25 }
0x2244   : > { %v5154_v63 = vpop.f32.mrb[50].mxu0 }
0x2245   : > { %v8354_v0 = vpop.f32.mrb[51].mxu0  ;;  %v5158_v55 = vsel %vm948_vm4, %v5154_v63, -inf }
0x2246   : > { %5159 = vmax.xlane.f32.xlu0 %v5158_v55 }
0x2277   : > { %v4999_v24 = vpop.xlane.xlu1 %4998 }
0x2278   : > { %v5000_v28 = vsub.f32 %v4993_v56, %v4999_v24 }
0x227a   : > { %v5001_v16 = vmul.f32 1.442695, %v5000_v28 }
0x227b   : > { %v5393_v57 = vpop.permute.xlu1 %5392 }
0x227c   : > { %8831 = vpow2.f32 %v5001_v16 }
0x2286   : > { %v8832_v18 = vpop.eup %8831 }
0x2287   : > { %v5003_v20 = vsel %vm948_vm4, %v8832_v18, 0.0 }
0x2288   : > { %5004 = vadd.xlane.f32.xlu0 %v5003_v20 }
0x22d3   : > { %v5160_v22 = vpop.xlane.xlu0 %5159 }
0x22d4   : > { %v5161_v23 = vsub.f32 %v5154_v63, %v5160_v22 }
0x22d6   : > { %v5162_v26 = vmul.f32 1.442695, %v5161_v23 }
0x22d8   : > { %8833 = vpow2.f32 %v5162_v26 }
0x22e2   : > { %v8834_v34 = vpop.eup %8833 }
0x22e3   : > { %v5164_v54 = vsel %vm948_vm4, %v8834_v34, 0.0 }
0x22e4   : > { %5165 = vadd.xlane.f32.xlu0 %v5164_v54 }
0x22fa   : > { %5169 = vrot.lane.b32.xlu0 %v9703_v60, %s8907_s2 }
0x2315   : > { %v5005_v25 = vpop.xlane.xlu0 %5004 }
0x2316   : > { %8835 = vrcp.f32 %v5005_v25 }
0x2320   : > { %v8836_v36 = vpop.eup %8835 }
0x2321   : > { %v5007_v38 = vmul.f32 %v8836_v36, %v8832_v18 }
0x2323   : > { %8348 = vmatmul.mubr.msk.f32.vlgmr.msra.gmra.mrb[60].mxu1 %vm960_vm5, %v5007_v38 }
0x2324   : > { %8357 = vmatprep.mubr.msk.f32.mxu1 %vm8905_vm0, %v8906_v6 }
0x2371   : > { %v5166_v39 = vpop.xlane.xlu0 %5165 }
0x2372   : > { %8837 = vrcp.f32 %v5166_v39 }
0x2375   : > { %v5170_v41 = vpop.permute.xlu0 %5169 }
0x2376   : > { %8356 = vmatpush3.msk.msra.mxu1 %vm964_vm3, %v5170_v41 }
0x2377   : > { %8365 = vmatprep.subr.mxu1 %v8906_v6 }
0x237c   : > { %v8838_v42 = vpop.eup %8837 }
0x237d   : > { %v5168_v58 = vmul.f32 %v8838_v42, %v8834_v34 }
0x237f   : > { %8358 = vmatmul.mubr.msk.f32.vlgmr.msra.gmra.mrb[62].mxu1 %vm960_vm5, %v5168_v58 }
0x2380   : > { %8366 = vmatpush3.msra.mxu1 %v9721_v46  ;;  %8367 = vmatprep.mubr.msk.f32.mxu1 %vm8905_vm0, %v8906_v6 }
0x2381   : > { %8375 = vmatprep.subr.mxu1 %v8906_v6 }
0x23f6   : > { %v5080_v10 = vpop.f32.mrb[60].mxu1 }
0x23f7   : > { %v8349_v50 = vpop.f32.mrb[61].mxu1  ;;  %8368 = vmatmul.mubr.msk.f32.vlgmr.msra.gmra.mrb[64].mxu1 %vm871_vm2, %v5080_v10 }
0x23f8   : > { %8377 = vmatprep.mubr.msk.f32.mxu1 %vm8905_vm0, %v8906_v6 }
0x2452   : > { %v5242_v48 = vpop.f32.mrb[62].mxu1 }
0x2453   : > { %v8359_v45 = vpop.f32.mrb[63].mxu1  ;;  %8363 = vmatmul.mubr.msk.f32.vlgmr.msra.gmra.mrb[52].mxu0 %vm871_vm2, %v5242_v48 }
0x2454   : > { %8371 = vmatpush3.xpose.msk.msra.mxu0 %vm871_vm2, %v5393_v57  ;;  %8372 = vmatprep.mubr.msk.f32.mxu0 %vm8905_vm0, %v8906_v6 }
0x2455   : > { %8380 = vmatprep.subr.mxu0 %v8906_v6 }
0x2457   : > { %8373 = vmatmul.mubr.msk.f32.vlgmr.msra.gmra.mrb[54].mxu0 %vm871_vm2, %v9186_v4 }
0x2458   : > { %8381 = vmatpush3.msra.mxu0 %v9740_v32  ;;  %8382 = vmatprep.mubr.msk.f32.mxu0 %vm8905_vm0, %v8906_v6 }
0x2459   : > { %8390 = vmatprep.subr.mxu0 %v8906_v6 }
0x24ca   : > { %v5388_v51 = vpop.f32.mrb[64].mxu1 }
0x24cb   : > { %v8369_v53 = vpop.f32.mrb[65].mxu1 }
0x2526   : > { %v5315_v56 = vpop.f32.mrb[52].mxu0 }
0x2527   : > { %v5389_v59 = vadd.f32 %v5388_v51, %v5315_v56  ;;  %v8364_v61 = vpop.f32.mrb[53].mxu0 }
0x252a   : > { %v5462_v63 = vpop.f32.mrb[54].mxu0 }
0x252b   : > { %v8374_v0 = vpop.f32.mrb[55].mxu0  ;;  %v5466_v55 = vsel %vm948_vm4, %v5462_v63, -inf }
0x252c   : > { %5467 = vmax.xlane.f32.xlu0 %v5466_v55  ;;  %v9796_v55 = vld [vmem:[%s10036_s9] ss:$0 sm:$0xff] }
0x2542   : > { %5477 = vrot.lane.b32.xlu0 %v9703_v60, %s8908_s25 }
0x25b9   : > { %v5468_v1 = vpop.xlane.xlu0 %5467 }
0x25ba   : > { %v5469_v7 = vsub.f32 %v5462_v63, %v5468_v1 }
0x25bc   : > { %v5470_v24 = vmul.f32 1.442695, %v5469_v7 }
0x25bd   : > { %v5478_v28 = vpop.permute.xlu0 %5477 }
0x25be   : > { %8839 = vpow2.f32 %v5470_v24  ;;  %8376 = vmatpush3.msk.msra.mxu1 %vm964_vm3, %v5478_v28 }
0x25bf   : > { %8385 = vmatprep.subr.mxu1 %v8906_v6 }
0x25c8   : > { %v8840_v16 = vpop.eup %8839 }
0x25c9   : > { %v5472_v18 = vsel %vm948_vm4, %v8840_v16, 0.0 }
0x25ca   : > { %5473 = vadd.xlane.f32.xlu1 %v5472_v18 }
0x25db   : > { %5628 = vrot.lane.b32.xlu1 %v9663_v30, %s10056_s1  ;;  %v9764_v30 = vld [vmem:[%s10035_s8 + $0x18] sm:$0xff] }
0x2657   : > { %v5474_v20 = vpop.xlane.xlu1 %5473 }
0x2658   : > { %8841 = vrcp.f32 %v5474_v20 }
0x265b   : > { %v5629_v26 = vpop.permute.xlu1 %5628 }
0x2662   : > { %v8842_v22 = vpop.eup %8841 }
0x2663   : > { %v5476_v23 = vmul.f32 %v8842_v22, %v8840_v16 }
0x2665   : > { %8378 = vmatmul.mubr.msk.f32.vlgmr.msra.gmra.mrb[66].mxu1 %vm960_vm5, %v5476_v23 }
0x2666   : > { %8386 = vmatpush3.xpose.msk.msra.mxu1 %vm871_vm2, %v5629_v26  ;;  %8387 = vmatprep.mubr.msk.f32.mxu1 %vm8905_vm0, %v8906_v6  ;;  %v9804_v26 = vld [vmem:[%s10037_s10] ss:$0 sm:$0xff] }
0x2667   : > { %8395 = vmatprep.subr.mxu1 %v8906_v6 }
0x2669   : > { %8388 = vmatmul.mubr.msk.f32.vlgmr.msra.gmra.mrb[68].mxu1 %vm871_vm2, %v9201_v31 }
0x266a   : > { %8396 = vmatpush3.msra.mxu1 %v9764_v30  ;;  %8397 = vmatprep.mubr.msk.f32.mxu1 %vm8905_vm0, %v8906_v6 }
0x266b   : > { %8696 = vmatprep.subr.bf16.mxu1 %v8904_v3 }
0x2738   : > { %v5550_v34 = vpop.f32.mrb[66].mxu1 }
0x2739   : > { %v8379_v54 = vpop.f32.mrb[67].mxu1  ;;  %8383 = vmatmul.mubr.msk.f32.vlgmr.msra.gmra.mrb[56].mxu0 %vm871_vm2, %v5550_v34 }
0x273a   : > { %8392 = vmatprep.mubr.msk.f32.mxu0 %vm8905_vm0, %v8906_v6  ;;  %v7638_v54 = vld [vmem:[%s9072_s30 + $0x20] sm:$0x3f] }
0x273c   : > { %v5698_v25 = vpop.f32.mrb[68].mxu1 }
0x273d   : > { %v8389_v36 = vpop.f32.mrb[69].mxu1  ;;  %v5702_v38 = vsel %vm948_vm4, %v5698_v25, -inf }
0x273e   : > { %5703 = vmax.xlane.f32.xlu0 %v5702_v38 }
0x2754   : > { %5713 = vrot.lane.b32.xlu0 %v9703_v60, %s10056_s1 }
0x27cb   : > { %v5704_v39 = vpop.xlane.xlu0 %5703 }
0x27cc   : > { %v5705_v41 = vsub.f32 %v5698_v25, %v5704_v39 }
0x27ce   : > { %v5706_v42 = vmul.f32 1.442695, %v5705_v41 }
0x27cf   : > { %v5714_v58 = vpop.permute.xlu0 %5713 }
0x27d0   : > { %8843 = vpow2.f32 %v5706_v42  ;;  %8391 = vmatpush3.msk.msra.mxu0 %vm964_vm3, %v5714_v58 }
0x27d1   : > { %8690 = vmatprep.subr.bf16.mxu0 %v8904_v3 }
0x27da   : > { %v8844_v10 = vpop.eup %8843 }
0x27db   : > { %v5708_v50 = vsel %vm948_vm4, %v8844_v10, 0.0 }
0x27dc   : > { %5709 = vadd.xlane.f32.xlu1 %v5708_v50 }
0x280c   : > { %v5623_v48 = vpop.f32.mrb[56].mxu0 }
0x280d   : > { %v5627_v57 = vadd.f32 %v5623_v48, %v5389_v59  ;;  %v8384_v45 = vpop.f32.mrb[57].mxu0 }
0x2869   : > { %v5710_v51 = vpop.xlane.xlu1 %5709 }
0x286a   : > { %8845 = vrcp.f32 %v5710_v51 }
0x2874   : > { %v8846_v53 = vpop.eup %8845 }
0x2875   : > { %v5712_v60 = vmul.f32 %v8846_v53, %v8844_v10 }
0x2877   : > { %8393 = vmatmul.mubr.msk.f32.vlgmr.msra.gmra.mrb[58].mxu0 %vm960_vm5, %v5712_v60 }
0x2878   : > { %8692 = vmatpush3.bf16.msra.mxu0 %v9258_v8  ;;  %8408 = vmatprep.mubr.msk.f32.mxu0 %vm8905_vm0, %v8906_v6 }
0x2879   : > { %8693 = vmatprep.subr.bf16.mxu0 %v8904_v3 }
0x287c   : > { %8695 = vmatpush3.bf16.msra.mxu0 %v9278_v17 }
0x287d   : > { %8702 = vmatprep.subr.bf16.mxu0 %v8904_v3 }
0x294a   : > { %v5786_v56 = vpop.f32.mrb[58].mxu0 }
0x294b   : > { %v8394_v59 = vpop.f32.mrb[59].mxu0  ;;  %8398 = vmatmul.mubr.msk.f32.vlgmr.msra.gmra.mrb[70].mxu1 %vm871_vm2, %v5786_v56 }
0x294c   : > { %8698 = vmatpush3.bf16.msra.mxu1 %v9250_v2  ;;  %8419 = vmatprep.mubr.msk.f32.mxu1 %vm8905_vm0, %v8906_v6 }
0x294d   : > { %8699 = vmatprep.subr.bf16.mxu1 %v8904_v3 }
0x2950   : > { %8701 = vmatpush3.bf16.msra.mxu1 %v9270_v13 }
0x2951   : > { %8714 = vmatprep.subr.bf16.mxu1 %v8904_v3 }
0x2a1e   : > { %v5859_v61 = vpop.f32.mrb[70].mxu1 }
0x2a1f   : > { %v5863_v63 = vadd.f32 %v5859_v61, %v5627_v57  ;;  %v8399_v0 = vpop.f32.mrb[71].mxu1  ;;  %v9854_v57 = vld [vmem:[%s10041_s14] ss:$0 sm:$0xff] }
0x2a21   : > { %v5864_v1 = vadd.f32 %v9796_v55, %v5863_v63 }
0x2a23   : > { %v5865_v7 = vadd.f32 %v9618_v15, %v5864_v1 }
0x2a25   : > { %v5866_v24 = vmul.f32 %v5865_v7, %v5865_v7 }
0x2a27   : > { %v5867_v28 = vsel %vm1839_vm6, %v5866_v24, 0.0 }
0x2a28   : > { %5868 = vadd.xlane.f32.xlu1 %v5867_v28 }
0x2ab5   : > { %v5869_v16 = vpop.xlane.xlu1 %5868 }
0x2ab6   : > { %v5870_v18 = vmul.f32 0.03125, %v5869_v16 }
0x2ab8   : > { %v5871_v20 = vadd.f32 1.1920929e-07, %v5870_v18 }
0x2aba   : > { %8847 = vrsqrt.f32 %v5871_v20 }
0x2ac4   : > { %v8848_v22 = vpop.eup %8847 }
0x2ac5   : > { %v5873_v23 = vmul.f32 %v8848_v22, %v5865_v7 }
0x2ac7   : > { %v9807_v34 = vmul.f32 %v9804_v26, %v5873_v23 }
0x2ac9   : > { %8409 = vmatmul.mubr.msk.f32.vlgmr.msra.gmra.mrb[60].mxu0 %vm641_vm1, %v9807_v34  ;;  %8420 = vmatmul.mubr.msk.f32.vlgmr.msra.gmra.mrb[72].mxu1 %vm641_vm1, %v9807_v34 }
0x2aca   : > { %8716 = vmatpush3.bf16.msra.mxu1 %v9049_v11  ;;  %8449 = vmatprep.mubr.msk.f32.mxu1 %vm8905_vm0, %v8906_v6 }
0x2acb   : > { %8717 = vmatprep.subr.bf16.mxu1 %v8904_v3  ;;  %8704 = vmatpush3.bf16.msra.mxu0 %v9321_v37 }
0x2acc   : > { %8705 = vmatprep.subr.bf16.mxu0 %v8904_v3  ;;  %8438 = vmatprep.mubr.msk.f32.mxu0 %vm8905_vm0, %v8906_v6 }
0x2ace   : > { %8719 = vmatpush3.bf16.msra.mxu1 %v9062_v14 }
0x2acf   : > { %8707 = vmatpush3.bf16.msra.mxu0 %v9331_v40  ;;  %8720 = vmatprep.subr.bf16.mxu1 %v8904_v3 }
0x2ad0   : > { %8708 = vmatprep.subr.bf16.mxu0 %v8904_v3 }
0x2ad1   : > { %8450 = vmatmul.mubr.msk.f32.vlgmr.msra.gmra.mrb[74].mxu1 %vm641_vm1, %v7638_v54 }
0x2ad2   : > { %8722 = vmatpush3.bf16.msra.mxu1 %v9089_v19  ;;  %8460 = vmatprep.mubr.msk.f32.mxu1 %vm8905_vm0, %v8906_v6  ;;  %v9843_v19 = vld [vmem:[%s10039_s12] ss:$0 sm:$0xff] }
0x2ad3   : > { %8710 = vmatpush3.bf16.msra.mxu0 %v9341_v43  ;;  %8723 = vmatprep.subr.bf16.mxu1 %v8904_v3 }
0x2ad4   : > { %8711 = vmatprep.subr.bf16.mxu0 %v8904_v3 }
0x2ad6   : > { %8725 = vmatpush3.bf16.msra.mxu1 %v9095_v21 }
0x2ad7   : > { %8713 = vmatpush3.bf16.msra.mxu0 %v9351_v47  ;;  %8468 = vmatprep.subr.mxu1 %v8906_v6 }
0x2ad8   : > { %8463 = vmatprep.subr.mxu0 %v8906_v6 }
0x2ad9   : > { %8461 = vmatmul.mubr.msk.f32.vlgmr.msra.gmra.mrb[76].mxu1 %vm641_vm1, %v7638_v54 }
0x2ada   : > { %8470 = vmatprep.mubr.msk.f32.mxu1 %vm8905_vm0, %v8906_v6 }
0x2b9c   : > { %v5944_v11 = vpop.f32.mrb[60].mxu0  ;;  %v6014_v14 = vpop.f32.mrb[72].mxu1 }
0x2b9d   : > { %v5945_v21 = vadd.f32 %v9843_v19, %v5944_v11  ;;  %v8410_v25 = vpop.f32.mrb[61].mxu0  ;;  %v8421_v36 = vpop.f32.mrb[73].mxu1  ;;  %v6015_v45 = vadd.f32 %v9854_v57, %v6014_v14 }
0x2b9f   : > { %v7635_v38 = vmul.f32 -1.442695, %v5945_v21 }
0x2ba1   : > { %8849 = vpow2.f32 %v7635_v38 }
0x2ba4   : > { %v6182_v39 = vpop.f32.mrb[74].mxu1 }
0x2ba5   : > { %v9847_v41 = vadd.f32 %v9660_v44, %v6182_v39  ;;  %v8451_v42 = vpop.f32.mrb[75].mxu1 }
0x2ba7   : > { %6416 = vrot.lane.b32.xlu1 %v9847_v41, %s8907_s2 }
0x2bab   : > { %v8850_v58 = vpop.eup %8849 }
0x2bac   : > { %v6021_v10 = vadd.f32 1.0, %v8850_v58 }
0x2bae   : > { %8851 = vrcp.f32 %v6021_v10 }
0x2bb8   : > { %v8852_v50 = vpop.eup %8851 }
0x2bb9   : > { %v6024_v48 = vmul.f32 %v8852_v50, %v5945_v21 }
0x2bbb   : > { %v6025_v51 = vmul.f32 %v6024_v48, %v6015_v45 }
0x2bbd   : > { %8439 = vmatmul.mubr.msk.f32.vlgmr.msra.gmra.mrb[62].mxu0 %vm2024_vm7, %v6025_v51 }
0x2bbe   : > { %8464 = vmatpush3.xpose.msk.msra.mxu0 %vm871_vm2, %v9847_v41  ;;  %8465 = vmatprep.mubr.msk.f32.mxu0 %vm8905_vm0, %v8906_v6 }
0x2bbf   : > { %8473 = vmatprep.subr.mxu0 %v8906_v6 }
0x2bc1   : > { %8466 = vmatmul.mubr.msk.f32.vlgmr.msra.gmra.mrb[64].mxu0 %vm871_vm2, %v9114_v29 }
0x2bc2   : > { %8475 = vmatprep.mubr.msk.f32.mxu0 %vm8905_vm0, %v8906_v6 }
0x2c19   : > { %v6417_v44 = vpop.permute.xlu1 %6416 }
0x2c1a   : > { %8474 = vmatpush3.xpose.msk.msra.mxu0 %vm871_vm2, %v6417_v44 }
0x2c1b   : > { %8483 = vmatprep.subr.mxu0 %v8906_v6 }
0x2c1d   : > { %8476 = vmatmul.mubr.msk.f32.vlgmr.msra.gmra.mrb[66].mxu0 %vm871_vm2, %v9136_v35  ;;  %v6252_v35 = vpop.f32.mrb[76].mxu1 }
0x2c1e   : > { %8484 = vmatpush3.msra.mxu0 %v9685_v62  ;;  %8485 = vmatprep.mubr.msk.f32.mxu0 %vm8905_vm0, %v8906_v6  ;;  %v9882_v62 = vadd.f32 %v9700_v5, %v6252_v35  ;;  %v8462_v1 = vpop.f32.mrb[77].mxu1 }
0x2c1f   : > { %8493 = vmatprep.subr.mxu0 %v8906_v6 }
0x2c20   : > { %8469 = vmatpush3.msk.msra.mxu1 %vm964_vm3, %v9882_v62 }
0x2c21   : > { %8478 = vmatprep.subr.mxu1 %v8906_v6 }
0x2c90   : > { %v9875_v53 = vpop.f32.mrb[62].mxu0 }
0x2c91   : > { %v8440_v29 = vpop.f32.mrb[63].mxu0 }
0x2c94   : > { %v6325_v60 = vpop.f32.mrb[64].mxu0 }
0x2c95   : > { %v8467_v56 = vpop.f32.mrb[65].mxu0  ;;  %v6329_v59 = vsel %vm948_vm4, %v6325_v60, -inf }
0x2c96   : > { %6330 = vmax.xlane.f32.xlu0 %v6329_v59 }
0x2cf0   : > { %v6486_v61 = vpop.f32.mrb[66].mxu0 }
0x2cf1   : > { %v8477_v63 = vpop.f32.mrb[67].mxu0  ;;  %v6490_v0 = vsel %vm948_vm4, %v6486_v61, -inf }
0x2cf2   : > { %6491 = vmax.xlane.f32.xlu1 %v6490_v0 }
0x2d03   : > { %6724 = vrot.lane.b32.xlu1 %v9847_v41, %s8908_s25 }
0x2d23   : > { %v6331_v7 = vpop.xlane.xlu0 %6330 }
0x2d24   : > { %v6332_v24 = vsub.f32 %v6325_v60, %v6331_v7 }
0x2d26   : > { %v6333_v28 = vmul.f32 1.442695, %v6332_v24 }
0x2d28   : > { %8853 = vpow2.f32 %v6333_v28 }
0x2d32   : > { %v8854_v16 = vpop.eup %8853 }
0x2d33   : > { %v6335_v18 = vsel %vm948_vm4, %v8854_v16, 0.0 }
0x2d34   : > { %6336 = vadd.xlane.f32.xlu0 %v6335_v18 }
0x2d7f   : > { %v6492_v20 = vpop.xlane.xlu1 %6491 }
0x2d80   : > { %v6493_v22 = vsub.f32 %v6486_v61, %v6492_v20 }
0x2d82   : > { %v6494_v23 = vmul.f32 1.442695, %v6493_v22 }
0x2d83   : > { %v6725_v50 = vpop.permute.xlu1 %6724 }
0x2d84   : > { %8855 = vpow2.f32 %v6494_v23 }
0x2d8e   : > { %v8856_v5 = vpop.eup %8855 }
0x2d8f   : > { %v6496_v54 = vsel %vm948_vm4, %v8856_v5, 0.0 }
0x2d90   : > { %6497 = vadd.xlane.f32.xlu0 %v6496_v54 }
0x2da6   : > { %6501 = vrot.lane.b32.xlu0 %v9882_v62, %s8907_s2 }
0x2dc1   : > { %v6337_v11 = vpop.xlane.xlu0 %6336 }
0x2dc2   : > { %8857 = vrcp.f32 %v6337_v11 }
0x2dcc   : > { %v8858_v14 = vpop.eup %8857 }
0x2dcd   : > { %v6339_v21 = vmul.f32 %v8858_v14, %v8854_v16 }
0x2dcf   : > { %8471 = vmatmul.mubr.msk.f32.vlgmr.msra.gmra.mrb[78].mxu1 %vm960_vm5, %v6339_v21 }
0x2dd0   : > { %8480 = vmatprep.mubr.msk.f32.mxu1 %vm8905_vm0, %v8906_v6 }
0x2e1d   : > { %v6498_v25 = vpop.xlane.xlu0 %6497 }
0x2e1e   : > { %8859 = vrcp.f32 %v6498_v25 }
0x2e21   : > { %v6502_v36 = vpop.permute.xlu0 %6501 }
0x2e22   : > { %8479 = vmatpush3.msk.msra.mxu1 %vm964_vm3, %v6502_v36 }
0x2e23   : > { %8488 = vmatprep.subr.mxu1 %v8906_v6 }
0x2e28   : > { %v8860_v38 = vpop.eup %8859 }
0x2e29   : > { %v6500_v39 = vmul.f32 %v8860_v38, %v8856_v5 }
0x2e2b   : > { %8481 = vmatmul.mubr.msk.f32.vlgmr.msra.gmra.mrb[80].mxu1 %vm960_vm5, %v6500_v39 }
0x2e2c   : > { %8489 = vmatpush3.msra.mxu1 %v9721_v46  ;;  %8490 = vmatprep.mubr.msk.f32.mxu1 %vm8905_vm0, %v8906_v6 }
0x2e2d   : > { %8498 = vmatprep.subr.mxu1 %v8906_v6 }
0x2ea2   : > { %v6412_v42 = vpop.f32.mrb[78].mxu1 }
0x2ea3   : > { %v8472_v58 = vpop.f32.mrb[79].mxu1  ;;  %8491 = vmatmul.mubr.msk.f32.vlgmr.msra.gmra.mrb[82].mxu1 %vm871_vm2, %v6412_v42 }
0x2ea4   : > { %8500 = vmatprep.mubr.msk.f32.mxu1 %vm8905_vm0, %v8906_v6 }
0x2efe   : > { %v6574_v10 = vpop.f32.mrb[80].mxu1 }
0x2eff   : > { %v8482_v48 = vpop.f32.mrb[81].mxu1  ;;  %8486 = vmatmul.mubr.msk.f32.vlgmr.msra.gmra.mrb[68].mxu0 %vm871_vm2, %v6574_v10 }
0x2f00   : > { %8494 = vmatpush3.xpose.msk.msra.mxu0 %vm871_vm2, %v6725_v50  ;;  %8495 = vmatprep.mubr.msk.f32.mxu0 %vm8905_vm0, %v8906_v6  ;;  %v9955_v50 = vld [vmem:[%s10044_s17] ss:$0 sm:$0xff] }
0x2f01   : > { %8503 = vmatprep.subr.mxu0 %v8906_v6 }
0x2f03   : > { %8496 = vmatmul.mubr.msk.f32.vlgmr.msra.gmra.mrb[70].mxu0 %vm871_vm2, %v9186_v4 }
0x2f04   : > { %8504 = vmatpush3.msra.mxu0 %v9740_v32  ;;  %8505 = vmatprep.mubr.msk.f32.mxu0 %vm8905_vm0, %v8906_v6 }
0x2f05   : > { %8513 = vmatprep.subr.mxu0 %v8906_v6 }
0x2f76   : > { %v6720_v46 = vpop.f32.mrb[82].mxu1 }
0x2f77   : > { %v8492_v45 = vpop.f32.mrb[83].mxu1 }
0x2fd2   : > { %v6647_v51 = vpop.f32.mrb[68].mxu0 }
0x2fd3   : > { %v6721_v44 = vadd.f32 %v6720_v46, %v6647_v51  ;;  %v8487_v29 = vpop.f32.mrb[69].mxu0 }
0x2fd6   : > { %v6794_v60 = vpop.f32.mrb[70].mxu0 }
0x2fd7   : > { %v8497_v56 = vpop.f32.mrb[71].mxu0  ;;  %v6798_v59 = vsel %vm948_vm4, %v6794_v60, -inf }
0x2fd8   : > { %6799 = vmax.xlane.f32.xlu0 %v6798_v59 }
0x2fee   : > { %6809 = vrot.lane.b32.xlu0 %v9882_v62, %s8908_s25 }
0x3065   : > { %v6800_v4 = vpop.xlane.xlu0 %6799 }
0x3066   : > { %v6801_v32 = vsub.f32 %v6794_v60, %v6800_v4 }
0x3068   : > { %v6802_v61 = vmul.f32 1.442695, %v6801_v32 }
0x3069   : > { %v6810_v63 = vpop.permute.xlu0 %6809 }
0x306a   : > { %8861 = vpow2.f32 %v6802_v61  ;;  %8499 = vmatpush3.msk.msra.mxu1 %vm964_vm3, %v6810_v63 }
0x306b   : > { %8508 = vmatprep.subr.mxu1 %v8906_v6 }
0x3074   : > { %v8862_v0 = vpop.eup %8861 }
0x3075   : > { %v6804_v35 = vsel %vm948_vm4, %v8862_v0, 0.0 }
0x3076   : > { %6805 = vadd.xlane.f32.xlu1 %v6804_v35 }
0x3087   : > { %6960 = vrot.lane.b32.xlu1 %v9847_v41, %s10056_s1 }
0x3103   : > { %v6806_v1 = vpop.xlane.xlu1 %6805 }
0x3104   : > { %8863 = vrcp.f32 %v6806_v1 }
0x3107   : > { %v6961_v28 = vpop.permute.xlu1 %6960 }
0x310e   : > { %v8864_v7 = vpop.eup %8863 }
0x310f   : > { %v6808_v24 = vmul.f32 %v8864_v7, %v8862_v0 }
0x3111   : > { %8501 = vmatmul.mubr.msk.f32.vlgmr.msra.gmra.mrb[84].mxu1 %vm960_vm5, %v6808_v24 }
0x3112   : > { %8509 = vmatpush3.xpose.msk.msra.mxu1 %vm871_vm2, %v6961_v28  ;;  %8510 = vmatprep.mubr.msk.f32.mxu1 %vm8905_vm0, %v8906_v6 }
0x3113   : > { %8518 = vmatprep.subr.mxu1 %v8906_v6 }
0x3115   : > { %8511 = vmatmul.mubr.msk.f32.vlgmr.msra.gmra.mrb[86].mxu1 %vm871_vm2, %v9201_v31  ;;  %v9943_v31 = vld [vmem:[%s10043_s16] ss:$0 sm:$0xff] }
0x3116   : > { %8519 = vmatpush3.msra.mxu1 %v9764_v30  ;;  %8520 = vmatprep.mubr.msk.f32.mxu1 %vm8905_vm0, %v8906_v6  ;;  %v4764_v30 = vadd.f32 %v9943_v31, %v9691_v52  ;;  %v2095_v56 = vadd.f32 %v9943_v31, %v9390_v9 }
0x3117   : > { %8732 = vmatprep.subr.bf16.mxu1 %v8904_v3 }
0x3118   : > { %v4767_v23 = vadd.f32 %v4764_v30, %v9623_v33  ;;  %v2098_v32 = vadd.f32 %v2095_v56, %v9290_v27 }
0x311a   : > { %v4768_v5 = vmul.f32 %v4767_v23, %v4767_v23  ;;  %v2099_v9 = vmul.f32 %v2098_v32, %v2098_v32 }
0x311c   : > { %v4769_v54 = vsel %vm1839_vm6, %v4768_v5, 0.0 }
0x31e4   : > { %v6882_v41 = vpop.f32.mrb[84].mxu1 }
0x31e5   : > { %v8502_v16 = vpop.f32.mrb[85].mxu1  ;;  %8506 = vmatmul.mubr.msk.f32.vlgmr.msra.gmra.mrb[72].mxu0 %vm871_vm2, %v6882_v41 }
0x31e6   : > { %8515 = vmatprep.mubr.msk.f32.mxu0 %vm8905_vm0, %v8906_v6 }
0x31e8   : > { %v7030_v18 = vpop.f32.mrb[86].mxu1 }
0x31e9   : > { %v8512_v20 = vpop.f32.mrb[87].mxu1  ;;  %v7034_v22 = vsel %vm948_vm4, %v7030_v18, -inf }
0x31ea   : > { %7035 = vmax.xlane.f32.xlu0 %v7034_v22 }
0x3200   : > { %7045 = vrot.lane.b32.xlu0 %v9882_v62, %s10056_s1 }
0x321f   : > { %4770 = vadd.xlane.f32.xlu0 %v4769_v54 }
0x3277   : > { %v7036_v11 = vpop.xlane.xlu0 %7035 }
0x3278   : > { %v7037_v14 = vsub.f32 %v7030_v18, %v7036_v11 }
0x327a   : > { %v7038_v21 = vmul.f32 1.442695, %v7037_v14 }
0x327b   : > { %v7046_v25 = vpop.permute.xlu0 %7045 }
0x327c   : > { %8865 = vpow2.f32 %v7038_v21  ;;  %8514 = vmatpush3.msk.msra.mxu0 %vm964_vm3, %v7046_v25 }
0x327d   : > { %8726 = vmatprep.subr.bf16.mxu0 %v8904_v3 }
0x3286   : > { %v8866_v62 = vpop.eup %8865 }
0x3287   : > { %v7040_v36 = vsel %vm948_vm4, %v8866_v62, 0.0 }
0x3288   : > { %7041 = vadd.xlane.f32.xlu1 %v7040_v36 }
0x32ac   : > { %v4771_v52 = vpop.xlane.xlu0 %4770 }
0x32ad   : > { %v4772_v33 = vmul.f32 0.03125, %v4771_v52 }
0x32af   : > { %v4773_v38 = vadd.f32 1.1920929e-07, %v4772_v33 }
0x32b1   : > { %8867 = vrsqrt.f32 %v4773_v38 }
0x32b8   : > { %v6955_v39 = vpop.f32.mrb[72].mxu0 }
0x32b9   : > { %v6959_v42 = vadd.f32 %v6955_v39, %v6721_v44  ;;  %v8507_v58 = vpop.f32.mrb[73].mxu0 }
0x32bb   : > { %v8868_v10 = vpop.eup %8867 }
0x32bc   : > { %v4775_v48 = vmul.f32 %v8868_v10, %v4767_v23 }
0x32be   : > { %v4776_v46 = vmul.f32 %v9955_v50, %v4775_v48 }
0x32c0   : > { %7609 = vst.msk [vmem:[%s9962_s26 + $0x10] sm:$0x3f] %vm1839_vm6, %v4776_v46 }
0x3315   : > { %v7042_v45 = vpop.xlane.xlu1 %7041 }
0x3316   : > { %8869 = vrcp.f32 %v7042_v45 }
0x3320   : > { %v8870_v51 = vpop.eup %8869 }
0x3321   : > { %v7044_v44 = vmul.f32 %v8870_v51, %v8866_v62 }
0x3323   : > { %8516 = vmatmul.mubr.msk.f32.vlgmr.msra.gmra.mrb[74].mxu0 %vm960_vm5, %v7044_v44 }
0x3324   : > { %8728 = vmatpush3.bf16.msra.mxu0 %v9258_v8  ;;  %8531 = vmatprep.mubr.msk.f32.mxu0 %vm8905_vm0, %v8906_v6 }
0x3325   : > { %8729 = vmatprep.subr.bf16.mxu0 %v8904_v3 }
0x3328   : > { %8731 = vmatpush3.bf16.msra.mxu0 %v9278_v17 }
0x3329   : > { %8738 = vmatprep.subr.bf16.mxu0 %v8904_v3 }
0x33f6   : > { %v7118_v29 = vpop.f32.mrb[74].mxu0 }
0x33f7   : > { %v8517_v60 = vpop.f32.mrb[75].mxu0  ;;  %8521 = vmatmul.mubr.msk.f32.vlgmr.msra.gmra.mrb[88].mxu1 %vm871_vm2, %v7118_v29 }
0x33f8   : > { %8734 = vmatpush3.bf16.msra.mxu1 %v9250_v2  ;;  %8542 = vmatprep.mubr.msk.f32.mxu1 %vm8905_vm0, %v8906_v6  ;;  %v3432_v2 = vadd.f32 %v9943_v31, %v9534_v12 }
0x33f9   : > { %8735 = vmatprep.subr.bf16.mxu1 %v8904_v3 }
0x33fa   : > { %v3435_v0 = vadd.f32 %v3432_v2, %v9476_v49 }
0x33fc   : > { %8737 = vmatpush3.bf16.msra.mxu1 %v9270_v13  ;;  %v6096_v13 = vadd.f32 %v9943_v31, %v9875_v53  ;;  %v3436_v27 = vmul.f32 %v3435_v0, %v3435_v0 }
0x33fe   : > { %v6099_v1 = vadd.f32 %v6096_v13, %v9807_v34  ;;  %v3437_v12 = vsel %vm1839_vm6, %v3436_v27, 0.0 }
0x3400   : > { %v6100_v7 = vmul.f32 %v6099_v1, %v6099_v1 }
0x34ca   : > { %v7191_v8 = vpop.f32.mrb[88].mxu1 }
0x34cb   : > { %v7195_v17 = vadd.f32 %v7191_v8, %v6959_v42  ;;  %v8522_v59 = vpop.f32.mrb[89].mxu1 }
0x34cd   : > { %v7196_v4 = vadd.f32 %v9796_v55, %v7195_v17  ;;  %v2100_v55 = vsel %vm1839_vm6, %v2099_v9, 0.0 }
0x34cf   : > { %v7197_v61 = vadd.f32 %v9618_v15, %v7196_v4  ;;  %v6101_v15 = vsel %vm1839_vm6, %v6100_v7, 0.0 }
0x34d1   : > { %v7198_v63 = vmul.f32 %v7197_v61, %v7197_v61 }
0x34d3   : > { %v7199_v35 = vsel %vm1839_vm6, %v7198_v63, 0.0 }
0x34d4   : > { %7200 = vadd.xlane.f32.xlu1 %v7199_v35 }
0x34d8   : > { %2101 = vadd.xlane.f32.xlu1 %v2100_v55 }
0x34dc   : > { %3438 = vadd.xlane.f32.xlu1 %v3437_v12 }
0x34e0   : > { %6102 = vadd.xlane.f32.xlu1 %v6101_v15 }
0x3561   : > { %v7201_v49 = vpop.xlane.xlu1 %7200 }
0x3562   : > { %v7202_v24 = vmul.f32 0.03125, %v7201_v49 }
0x3564   : > { %v7203_v53 = vadd.f32 1.1920929e-07, %v7202_v24 }
0x3565   : > { %v2102_v28 = vpop.xlane.xlu1 %2101 }
0x3566   : > { %8871 = vrsqrt.f32 %v7203_v53  ;;  %v2103_v41 = vmul.f32 0.03125, %v2102_v28 }
0x3568   : > { %v2104_v16 = vadd.f32 1.1920929e-07, %v2103_v41 }
0x3569   : > { %v3439_v18 = vpop.xlane.xlu1 %3438 }
0x356a   : > { %8873 = vrsqrt.f32 %v2104_v16  ;;  %v3440_v34 = vmul.f32 0.03125, %v3439_v18 }
0x356c   : > { %v3441_v20 = vadd.f32 1.1920929e-07, %v3440_v34 }
0x356d   : > { %v6103_v22 = vpop.xlane.xlu1 %6102 }
0x356e   : > { %8875 = vrsqrt.f32 %v3441_v20  ;;  %v6104_v30 = vmul.f32 0.03125, %v6103_v22 }
0x3570   : > { %v8872_v23 = vpop.eup %8871  ;;  %v6105_v5 = vadd.f32 1.1920929e-07, %v6104_v30 }
0x3571   : > { %v7205_v54 = vmul.f32 %v8872_v23, %v7197_v61 }
0x3572   : > { %8877 = vrsqrt.f32 %v6105_v5 }
0x3573   : > { %v7206_v11 = vmul.f32 %v9804_v26, %v7205_v54 }
0x3574   : > { %v8874_v14 = vpop.eup %8873 }
0x3575   : > { %v2106_v21 = vmul.f32 %v8874_v14, %v2098_v32  ;;  %8532 = vmatmul.mubr.msk.f32.vlgmr.msra.gmra.mrb[76].mxu0 %vm641_vm1, %v7206_v11  ;;  %8543 = vmatmul.mubr.msk.f32.vlgmr.msra.gmra.mrb[90].mxu1 %vm641_vm1, %v7206_v11 }
0x3576   : > { %8740 = vmatpush3.bf16.msra.mxu0 %v9321_v37  ;;  %8561 = vmatprep.mubr.msk.f32.mxu0 %vm8905_vm0, %v8906_v6 }
0x3577   : > { %v2113_v25 = vmul.f32 %v9955_v50, %v2106_v21  ;;  %8741 = vmatprep.subr.bf16.mxu0 %v8904_v3 }
0x3578   : > { %v8876_v62 = vpop.eup %8875 }
0x3579   : > { %2114 = vst.msk [vmem:[%s9962_s26] sm:$0x3f] %vm1839_vm6, %v2113_v25  ;;  %v3443_v26 = vmul.f32 %v8876_v62, %v3435_v0 }
0x357a   : > { %8743 = vmatpush3.bf16.msra.mxu0 %v9331_v40 }
0x357b   : > { %v3444_v36 = vmul.f32 %v9955_v50, %v3443_v26  ;;  %8744 = vmatprep.subr.bf16.mxu0 %v8904_v3 }
0x357c   : > { %v8878_v52 = vpop.eup %8877 }
0x357d   : > { %7581 = vst.msk [vmem:[%s9962_s26 + $0x8] sm:$0x3f] %vm1839_vm6, %v3444_v36  ;;  %v6107_v37 = vmul.f32 %v8878_v52, %v6099_v1 }
0x357e   : > { %8746 = vmatpush3.bf16.msra.mxu0 %v9341_v43 }
0x357f   : > { %v6108_v6 = vmul.f32 %v9955_v50, %v6107_v37  ;;  %8747 = vmatprep.subr.bf16.mxu0 %v8904_v3 }
0x3581   : > { %7637 = vst.msk [vmem:[%s9962_s26 + $0x18] sm:$0x3f] %vm1839_vm6, %v6108_v6 }
0x3582   : > { %8749 = vmatpush3.bf16.msra.mxu0 %v9351_v47 }
0x3648   : > { %v7276_v33 = vpop.f32.mrb[76].mxu0  ;;  %v7346_v40 = vpop.f32.mrb[90].mxu1 }
0x3649   : > { %v7277_v38 = vadd.f32 %v9843_v19, %v7276_v33  ;;  %v8533_v39 = vpop.f32.mrb[77].mxu0  ;;  %v8544_v42 = vpop.f32.mrb[91].mxu1  ;;  %v7347_v45 = vadd.f32 %v9854_v57, %v7346_v40 }
0x364b   : > { %v7663_v58 = vmul.f32 -1.442695, %v7277_v38 }
0x364d   : > { %8879 = vpow2.f32 %v7663_v58 }
0x3657   : > { %v8880_v10 = vpop.eup %8879 }
0x3658   : > { %v7353_v48 = vadd.f32 1.0, %v8880_v10 }
0x365a   : > { %8881 = vrcp.f32 %v7353_v48 }
0x3664   : > { %v8882_v43 = vpop.eup %8881 }
0x3665   : > { %v7356_v46 = vmul.f32 %v8882_v43, %v7277_v38 }
0x3667   : > { %v7357_v3 = vmul.f32 %v7356_v46, %v7347_v45 }
0x3669   : > { %8562 = vmatmul.mubr.msk.f32.vlgmr.msra.gmra.mrb[78].mxu0 %vm2024_vm7, %v7357_v3 }
0x373c   : > { %v7427_v47 = vpop.f32.mrb[78].mxu0 }
0x373d   : > { %v7428_v51 = vadd.f32 %v9943_v31, %v7427_v47  ;;  %v8563_v44 = vpop.f32.mrb[79].mxu0 }
0x373f   : > { %v7431_v19 = vadd.f32 %v7428_v51, %v7206_v11 }
0x3741   : > { %v7432_v29 = vmul.f32 %v7431_v19, %v7431_v19 }
0x3743   : > { %v7433_v60 = vsel %vm1839_vm6, %v7432_v29, 0.0 }
0x3744   : > { %7434 = vadd.xlane.f32.xlu1 %v7433_v60 }
0x37d1   : > { %v7435_v8 = vpop.xlane.xlu1 %7434 }
0x37d2   : > { %v7436_v56 = vmul.f32 0.03125, %v7435_v8 }
0x37d4   : > { %v7437_v17 = vadd.f32 1.1920929e-07, %v7436_v56 }
0x37d6   : > { %8883 = vrsqrt.f32 %v7437_v17 }
0x37e0   : > { %v8884_v59 = vpop.eup %8883 }
0x37e1   : > { %v7439_v4 = vmul.f32 %v8884_v59, %v7431_v19 }
0x37e3   : > { %v7440_v57 = vmul.f32 %v9955_v50, %v7439_v4 }
0x37e5   : > { %7665 = vst.msk [vmem:[%s9962_s26 + $0x20] sm:$0x3f] %vm1839_vm6, %v7440_v57 }
0x37e6 PF: > { %s28_s27 = sadd.s32 1, %s8902_s27  }
0x37e7   : > { %p25_p4 = scmp.ge.s32.totalorder %s28_s27, 4  }
0x37e9   :  { %27 = sbr.rel (!%p25_p4) target bundleno = 4 (0x4), region = 133 }

</bundles_post_ra>
